<compile_context>
chip_gen: v6e
topology: v6e:2x2x1
jax: 0.10.0
libtpu: 0.0.40
codegen_flags: <defaults>
</compile_context>

<pallas_src>
import functools

import jax
import jax.numpy as jnp
from jax.experimental import pallas as pl
from jax.experimental.pallas import tpu as pltpu

NEG_SLOPE = 0.2
IN_EPS = 1e-5
GEMM_DTYPE = jnp.bfloat16   # MXU-native operand dtype; accumulation is f32.


# ----------------------------------------------------------------------------
# Fused (style | class) Linear + LeakyReLU kernel (single launch, block-diag W)
# ----------------------------------------------------------------------------
def _fused_linear_lrelu_kernel(x_ref, w_ref, b_ref, o_ref):
    # x_ref: (B, Din_s+Din_c), w_ref: (Din_s+Din_c, 1024) block-diagonal,
    # b_ref: (1, 1024), o_ref: (B, 1024)
    y = jnp.dot(x_ref[...], w_ref[...], preferred_element_type=jnp.float32)
    y = y + b_ref[...]
    o_ref[...] = jnp.where(y >= 0.0, y, NEG_SLOPE * y)


def fused_linear_lrelu(x, w, b):
    B, Din = x.shape
    Dout = w.shape[1]
    return pl.pallas_call(
        _fused_linear_lrelu_kernel,
        out_shape=jax.ShapeDtypeStruct((B, Dout), jnp.float32),
        grid=(1,),
        in_specs=[
            pl.BlockSpec((B, Din), lambda i: (0, 0)),
            pl.BlockSpec((Din, Dout), lambda i: (0, 0)),
            pl.BlockSpec((1, Dout), lambda i: (0, 0)),
        ],
        out_specs=pl.BlockSpec((B, Dout), lambda i: (0, 0)),
    )(x, w, b)


# ----------------------------------------------------------------------------
# ConvTranspose2d (+ optional InstanceNorm + LeakyReLU) kernel: one big-K GEMM
# ----------------------------------------------------------------------------
def _deconv_gemm_kernel(x_ref, w_ref, b_ref, o_ref, *, apply_norm):
    # x_ref: (1, K, P) bf16 im2col columns of one image, K = KH*KW*Cin
    # w_ref: (Cout, K) bf16   (flipped conv-transpose weight, taps folded into K)
    # b_ref: (Cout, 1) f32
    # o_ref: (1, Cout, P) f32
    acc = jnp.dot(w_ref[...], x_ref[0],
                  preferred_element_type=jnp.float32)   # single big-K MXU GEMM
    acc = acc + b_ref[...]                              # broadcast (Cout,1) over P

    if apply_norm:
        # InstanceNorm2d (affine=False): training-mode instance statistics,
        # computed in one pass (E[x], E[x^2]) in f32 over the logical P lanes.
        # TODO(synk): running-stats buffer update (track_running_stats=True) is
        # a stateful side effect and is not reproduced; eval mode would use it.
        inv_p = 1.0 / acc.shape[1]
        mean = jnp.sum(acc, axis=1, keepdims=True) * inv_p
        msq = jnp.sum(acc * acc, axis=1, keepdims=True) * inv_p
        var = jnp.maximum(msq - mean * mean, 0.0)
        acc = (acc - mean) * jax.lax.rsqrt(var + IN_EPS)
        acc = jnp.where(acc >= 0.0, acc, NEG_SLOPE * acc)

    o_ref[0] = acc


def conv_transpose2d(x_nchw, w2d, b_col, *, ksize, stride, padding, apply_norm):
    """Transposed conv, PyTorch semantics, as a single GEMM per image.

    x_nchw: (N, Cin, H, W) f32 activation
    w2d:    (Cout, KH*KW*Cin) bf16   (pre-flipped / pre-flattened in prepare_params)
    b_col:  (Cout, 1) f32
    """
    N, Cin, H, W = x_nchw.shape
    Cout, K = w2d.shape
    KH = KW = ksize
    Hout = (H - 1) * stride - 2 * padding + KH
    Wout = (W - 1) * stride - 2 * padding + KW
    P = Hout * Wout

    # --- glue (fused into the surrounding jit): zero-dilate + pad in bf16,
    #     im2col with the tap axis folded into the contraction axis K ----------
    x = x_nchw.astype(GEMM_DTYPE)
    Hd, Wd = (H - 1) * stride + 1, (W - 1) * stride + 1
    xd = jnp.zeros((N, Cin, Hd, Wd), GEMM_DTYPE)
    xd = xd.at[:, :, ::stride, ::stride].set(x)
    ph, pw = KH - 1 - padding, KW - 1 - padding
    xp = jnp.pad(xd, ((0, 0), (0, 0), (ph, ph), (pw, pw)))

    patches = [
        xp[:, :, kh:kh + Hout, kw:kw + Wout].reshape(N, Cin, P)
        for kh in range(KH) for kw in range(KW)
    ]
    xcol = jnp.stack(patches, axis=1).reshape(N, K, P)   # (N, KH*KW*Cin, P)

    kernel = functools.partial(_deconv_gemm_kernel, apply_norm=apply_norm)
    out = pl.pallas_call(
        kernel,
        out_shape=jax.ShapeDtypeStruct((N, Cout, P), jnp.float32),
        grid=(N,),
        in_specs=[
            pl.BlockSpec((1, K, P), lambda n: (n, 0, 0)),
            pl.BlockSpec((Cout, K), lambda n: (0, 0)),
            pl.BlockSpec((Cout, 1), lambda n: (0, 0)),
        ],
        out_specs=pl.BlockSpec((1, Cout, P), lambda n: (n, 0, 0)),
        compiler_params=pltpu.CompilerParams(
            dimension_semantics=("parallel",)),   # v7x: one image per TensorCore
    )(xcol, w2d, b_col)

    return out.reshape(N, Cout, Hout, Wout)


# ----------------------------------------------------------------------------
# Parameter init (deterministic, PyTorch-style uniform bounds)
# ----------------------------------------------------------------------------
def init_params(key, style_dim, class_dim):
    keys = jax.random.split(key, 6)

    def linear(k, din, dout):
        kw, kb = jax.random.split(k)
        bound = 1.0 / jnp.sqrt(din)
        w = jax.random.uniform(kw, (din, dout), jnp.float32, -bound, bound)
        b = jax.random.uniform(kb, (dout,), jnp.float32, -bound, bound)
        return w, b

    def deconv(k, cin, cout, ksize):
        kw, kb = jax.random.split(k)
        bound = 1.0 / jnp.sqrt(cin * ksize * ksize)
        w = jax.random.uniform(kw, (cin, cout, ksize, ksize), jnp.float32,
                               -bound, bound)
        b = jax.random.uniform(kb, (cout,), jnp.float32, -bound, bound)
        return w, b

    return {
        "style": linear(keys[0], style_dim, 512),
        "class": linear(keys[1], class_dim, 512),
        "deconv1": deconv(keys[2], 256, 64, 4),
        "deconv2": deconv(keys[3], 64, 32, 4),
        "deconv3": deconv(keys[4], 32, 16, 4),
        "deconv4": deconv(keys[5], 16, 3, 4),
    }


# ----------------------------------------------------------------------------
# One-time parameter re-layout (hoisted out of the forward pass)
# ----------------------------------------------------------------------------
def prepare_params(params):
    sw, sb = params["style"]   # (style_dim, 512), (512,)
    cw, cb = params["class"]   # (class_dim, 512), (512,)
    sdim, cdim = sw.shape[0], cw.shape[0]

    # Block-diagonal weight: concat([s @ Ws + bs, c @ Wc + bc]) == [s|c] @ Wblk + bcat
    w_blk = jnp.zeros((sdim + cdim, 1024), jnp.float32)
    w_blk = w_blk.at[:sdim, :512].set(sw)
    w_blk = w_blk.at[sdim:, 512:].set(cw)
    b_cat = jnp.concatenate([sb, cb]).reshape(1, 1024)

    def deconv(name):
        w_pt, b = params[name]                 # (Cin, Cout, KH, KW), (Cout,)
        cin, cout, kh, kw = w_pt.shape
        w_flip = w_pt[:, :, ::-1, ::-1]        # transposed conv -> direct conv
        # layout (Cout, kh*kw*Cin), matching the im2col row order (tap-major, Cin-minor)
        w2d = jnp.transpose(w_flip, (1, 2, 3, 0)).reshape(cout, kh * kw * cin)
        return w2d.astype(GEMM_DTYPE), b.reshape(cout, 1).astype(jnp.float32)

    return {
        "linear_w": w_blk, "linear_b": b_cat,
        "deconv1": deconv("deconv1"),
        "deconv2": deconv("deconv2"),
        "deconv3": deconv("deconv3"),
        "deconv4": deconv("deconv4"),
    }


# ----------------------------------------------------------------------------
# Decoder forward (mirrors the PyTorch module)
# ----------------------------------------------------------------------------
def decoder_forward(prep, style_embeddings, class_embeddings):
    x_in = jnp.concatenate([style_embeddings, class_embeddings], axis=1)
    x = fused_linear_lrelu(x_in, prep["linear_w"], prep["linear_b"])   # (B, 1024)
    B = x.shape[0]
    x = x.reshape(B, 256, 2, 2)                                        # NCHW

    w1, b1 = prep["deconv1"]
    x = conv_transpose2d(x, w1, b1, ksize=4, stride=2, padding=0, apply_norm=True)
    w2, b2 = prep["deconv2"]
    x = conv_transpose2d(x, w2, b2, ksize=4, stride=2, padding=0, apply_norm=True)
    w3, b3 = prep["deconv3"]
    x = conv_transpose2d(x, w3, b3, ksize=4, stride=2, padding=0, apply_norm=True)
    w4, b4 = prep["deconv4"]
    x = conv_transpose2d(x, w4, b4, ksize=4, stride=2, padding=1, apply_norm=False)
    return x                                                            # (B, 3, 60, 60)


if __name__ == "__main__":
    key = jax.random.PRNGKey(0)
    k_params, k_style, k_class = jax.random.split(key, 3)

    batch, style_dim, class_dim = 2, 16, 16
    params = init_params(k_params, style_dim, class_dim)
    prep = prepare_params(params)          # one-time weight re-layout (not per call)
    style_emb = jax.random.normal(k_style, (batch, style_dim), jnp.float32)
    class_emb = jax.random.normal(k_class, (batch, class_dim), jnp.float32)

    fwd = jax.jit(decoder_forward)
    out = fwd(prep, style_emb, class_emb)
    out = jax.block_until_ready(out)
    assert out.shape == (batch, 3, 60, 60), out.shape
    assert out.dtype == jnp.float32
    assert bool(jnp.isfinite(out).all())
    print("KERNEL_OK")
</pallas_src>

<mosaic_0001>
module attributes {stable_mosaic.version = 11 : i64} {
  func.func @_fused_linear_lrelu_kernel(%arg0: i32, %arg1: memref<2x32xf32, #tpu.memory_space<vmem>>, %arg2: memref<32x1024xf32, #tpu.memory_space<vmem>>, %arg3: memref<1x1024xf32, #tpu.memory_space<vmem>>, %arg4: memref<2x1024xf32, #tpu.memory_space<vmem>>) attributes {dimension_semantics = [#tpu.dimension_semantics<arbitrary>], iteration_bounds = array<i64: 1>, scalar_prefetch = 0 : i64, scratch_operands = 0 : i64, tpu.core_type = #tpu.core_type<tc>, window_params = [{pipeline_mode = #tpu.pipeline_mode<synchronous>, transform_indices = @transform_0, window_bounds = array<i64: 2, 32>}, {pipeline_mode = #tpu.pipeline_mode<synchronous>, transform_indices = @transform_1, window_bounds = array<i64: 32, 1024>}, {pipeline_mode = #tpu.pipeline_mode<synchronous>, transform_indices = @transform_2, window_bounds = array<i64: 1, 1024>}, {pipeline_mode = #tpu.pipeline_mode<synchronous>, transform_indices = @transform_3, window_bounds = array<i64: 2, 1024>}]} {
    %c0 = arith.constant 0 : index
    %c0_0 = arith.constant 0 : index
    %0 = vector.load %arg1[%c0, %c0_0] : memref<2x32xf32, #tpu.memory_space<vmem>>, vector<2x32xf32>
    %c0_1 = arith.constant 0 : index
    %c0_2 = arith.constant 0 : index
    %1 = vector.load %arg2[%c0_1, %c0_2] : memref<32x1024xf32, #tpu.memory_space<vmem>>, vector<32x1024xf32>
    %cst = arith.constant dense<0.000000e+00> : vector<2x1024xf32>
    %2 = tpu.matmul %0, %1, %cst {dimension_numbers = #tpu.dot_dimension_numbers<[1], [0], [0], [1], [0, 0, 1, 1], [], []>} : vector<2x32xf32>, vector<32x1024xf32>, vector<2x1024xf32> -> vector<2x1024xf32>
    %c0_3 = arith.constant 0 : index
    %c0_4 = arith.constant 0 : index
    %3 = vector.load %arg3[%c0_3, %c0_4] : memref<1x1024xf32, #tpu.memory_space<vmem>>, vector<1x1024xf32>
    %4 = vector.broadcast %3 : vector<1x1024xf32> to vector<2x1024xf32>
    %5 = arith.addf %2, %4 : vector<2x1024xf32>
    %cst_5 = arith.constant 0.000000e+00 : f32
    %6 = vector.broadcast %cst_5 : f32 to vector<2x1024xf32>
    %7 = arith.cmpf oge, %5, %6 : vector<2x1024xf32>
    %cst_6 = arith.constant 2.000000e-01 : f32
    %8 = vector.broadcast %cst_6 : f32 to vector<2x1024xf32>
    %9 = arith.mulf %8, %5 : vector<2x1024xf32>
    %10 = arith.select %7, %5, %9 : vector<2x1024xi1>, vector<2x1024xf32>
    %c0_7 = arith.constant 0 : index
    %c0_8 = arith.constant 0 : index
    %11 = vector.load %arg4[%c0_7, %c0_8] : memref<2x1024xf32, #tpu.memory_space<vmem>>, vector<2x1024xf32>
    tpu.vector_store %arg4[%c0_7, %c0_8], %10 {strides = array<i32>} : memref<2x1024xf32, #tpu.memory_space<vmem>>, vector<2x1024xf32>,
    return
  }
  func.func @transform_0(%arg0: i32) -> (i32, i32) {
    %c0_i32 = arith.constant 0 : i32
    %c0_i32_0 = arith.constant 0 : i32
    %c0_i32_1 = arith.constant 0 : i32
    return %c0_i32, %c0_i32_0 : i32, i32
  }
  func.func @transform_1(%arg0: i32) -> (i32, i32) {
    %c0_i32 = arith.constant 0 : i32
    %c0_i32_0 = arith.constant 0 : i32
    %c0_i32_1 = arith.constant 0 : i32
    return %c0_i32, %c0_i32_0 : i32, i32
  }
  func.func @transform_2(%arg0: i32) -> (i32, i32) {
    %c0_i32 = arith.constant 0 : i32
    %c0_i32_0 = arith.constant 0 : i32
    %c0_i32_1 = arith.constant 0 : i32
    return %c0_i32, %c0_i32_0 : i32, i32
  }
  func.func @transform_3(%arg0: i32) -> (i32, i32) {
    %c0_i32 = arith.constant 0 : i32
    %c0_i32_0 = arith.constant 0 : i32
    %c0_i32_1 = arith.constant 0 : i32
    return %c0_i32, %c0_i32_0 : i32, i32
  }
}

module attributes {stable_mosaic.version = 11 : i64} {
  func.func @_deconv_gemm_kernel(%arg0: i32, %arg1: memref<1x4096x36xbf16, #tpu.memory_space<vmem>>, %arg2: memref<64x4096xbf16, #tpu.memory_space<vmem>>, %arg3: memref<64x1xf32, #tpu.memory_space<vmem>>, %arg4: memref<1x64x36xf32, #tpu.memory_space<vmem>>) attributes {dimension_semantics = [#tpu.dimension_semantics<parallel>], iteration_bounds = array<i64: 2>, scalar_prefetch = 0 : i64, scratch_operands = 0 : i64, tpu.core_type = #tpu.core_type<tc>, window_params = [{transform_indices = @transform_0, window_bounds = array<i64: 1, 4096, 36>}, {pipeline_mode = #tpu.pipeline_mode<synchronous>, transform_indices = @transform_1, window_bounds = array<i64: 64, 4096>}, {pipeline_mode = #tpu.pipeline_mode<synchronous>, transform_indices = @transform_2, window_bounds = array<i64: 64, 1>}, {transform_indices = @transform_3, window_bounds = array<i64: 1, 64, 36>}]} {
    %c0 = arith.constant 0 : index
    %c0_0 = arith.constant 0 : index
    %0 = vector.load %arg2[%c0, %c0_0] : memref<64x4096xbf16, #tpu.memory_space<vmem>>, vector<64x4096xbf16>
    %c0_1 = arith.constant 0 : index
    %c0_2 = arith.constant 0 : index
    %c0_3 = arith.constant 0 : index
    %1 = vector.load %arg1[%c0_1, %c0_2, %c0_3] : memref<1x4096x36xbf16, #tpu.memory_space<vmem>>, vector<1x4096x36xbf16>
    %2 = vector.shape_cast %1 : vector<1x4096x36xbf16> to vector<4096x36xbf16>
    %cst = arith.constant dense<0.000000e+00> : vector<64x36xf32>
    %3 = tpu.matmul %0, %2, %cst {dimension_numbers = #tpu.dot_dimension_numbers<[1], [0], [0], [1], [0, 0, 1, 1], [], []>} : vector<64x4096xbf16>, vector<4096x36xbf16>, vector<64x36xf32> -> vector<64x36xf32>
    %c0_4 = arith.constant 0 : index
    %c0_5 = arith.constant 0 : index
    %4 = vector.load %arg3[%c0_4, %c0_5] : memref<64x1xf32, #tpu.memory_space<vmem>>, vector<64x1xf32>
    %5 = vector.broadcast %4 : vector<64x1xf32> to vector<64x36xf32>
    %6 = arith.addf %3, %5 : vector<64x36xf32>
    %cst_6 = arith.constant dense<0.000000e+00> : vector<64xf32>
    %7 = vector.multi_reduction <add>, %6, %cst_6 [1] : vector<64x36xf32> to vector<64xf32>
    %8 = vector.shape_cast %7 : vector<64xf32> to vector<64x1xf32>
    %cst_7 = arith.constant 0.027777778 : f32
    %9 = vector.broadcast %cst_7 : f32 to vector<64x1xf32>
    %10 = arith.mulf %8, %9 : vector<64x1xf32>
    %11 = arith.mulf %6, %6 : vector<64x36xf32>
    %cst_8 = arith.constant dense<0.000000e+00> : vector<64xf32>
    %12 = vector.multi_reduction <add>, %11, %cst_8 [1] : vector<64x36xf32> to vector<64xf32>
    %13 = vector.shape_cast %12 : vector<64xf32> to vector<64x1xf32>
    %cst_9 = arith.constant 0.027777778 : f32
    %14 = vector.broadcast %cst_9 : f32 to vector<64x1xf32>
    %15 = arith.mulf %13, %14 : vector<64x1xf32>
    %16 = arith.mulf %10, %10 : vector<64x1xf32>
    %17 = arith.subf %15, %16 : vector<64x1xf32>
    %cst_10 = arith.constant 0.000000e+00 : f32
    %18 = vector.broadcast %cst_10 : f32 to vector<64x1xf32>
    %19 = arith.maximumf %17, %18 : vector<64x1xf32>
    %20 = vector.broadcast %10 : vector<64x1xf32> to vector<64x36xf32>
    %21 = arith.subf %6, %20 : vector<64x36xf32>
    %cst_11 = arith.constant 9.99999974E-6 : f32
    %22 = vector.broadcast %cst_11 : f32 to vector<64x1xf32>
    %23 = arith.addf %19, %22 : vector<64x1xf32>
    %24 = math.rsqrt %23 : vector<64x1xf32>
    %25 = vector.broadcast %24 : vector<64x1xf32> to vector<64x36xf32>
    %26 = arith.mulf %21, %25 : vector<64x36xf32>
    %cst_12 = arith.constant 0.000000e+00 : f32
    %27 = vector.broadcast %cst_12 : f32 to vector<64x36xf32>
    %28 = arith.cmpf oge, %26, %27 : vector<64x36xf32>
    %cst_13 = arith.constant 2.000000e-01 : f32
    %29 = vector.broadcast %cst_13 : f32 to vector<64x36xf32>
    %30 = arith.mulf %29, %26 : vector<64x36xf32>
    %31 = arith.select %28, %26, %30 : vector<64x36xi1>, vector<64x36xf32>
    %c0_14 = arith.constant 0 : index
    %c0_15 = arith.constant 0 : index
    %c0_16 = arith.constant 0 : index
    %32 = vector.load %arg4[%c0_14, %c0_15, %c0_16] : memref<1x64x36xf32, #tpu.memory_space<vmem>>, vector<1x64x36xf32>
    %33 = vector.shape_cast %32 : vector<1x64x36xf32> to vector<64x36xf32>
    %34 = vector.shape_cast %31 : vector<64x36xf32> to vector<1x64x36xf32>
    tpu.vector_store %arg4[%c0_14, %c0_15, %c0_16], %34 {strides = array<i32>} : memref<1x64x36xf32, #tpu.memory_space<vmem>>, vector<1x64x36xf32>,
    return
  }
  func.func @transform_0(%arg0: i32) -> (i32, i32, i32) {
    %c0_i32 = arith.constant 0 : i32
    %c0_i32_0 = arith.constant 0 : i32
    %c0_i32_1 = arith.constant 0 : i32
    return %arg0, %c0_i32, %c0_i32_0 : i32, i32, i32
  }
  func.func @transform_1(%arg0: i32) -> (i32, i32) {
    %c0_i32 = arith.constant 0 : i32
    %c0_i32_0 = arith.constant 0 : i32
    %c0_i32_1 = arith.constant 0 : i32
    return %c0_i32, %c0_i32_0 : i32, i32
  }
  func.func @transform_2(%arg0: i32) -> (i32, i32) {
    %c0_i32 = arith.constant 0 : i32
    %c0_i32_0 = arith.constant 0 : i32
    %c0_i32_1 = arith.constant 0 : i32
    return %c0_i32, %c0_i32_0 : i32, i32
  }
  func.func @transform_3(%arg0: i32) -> (i32, i32, i32) {
    %c0_i32 = arith.constant 0 : i32
    %c0_i32_0 = arith.constant 0 : i32
    %c0_i32_1 = arith.constant 0 : i32
    return %arg0, %c0_i32, %c0_i32_0 : i32, i32, i32
  }
}

module attributes {stable_mosaic.version = 11 : i64} {
  func.func @_deconv_gemm_kernel(%arg0: i32, %arg1: memref<1x1024x196xbf16, #tpu.memory_space<vmem>>, %arg2: memref<32x1024xbf16, #tpu.memory_space<vmem>>, %arg3: memref<32x1xf32, #tpu.memory_space<vmem>>, %arg4: memref<1x32x196xf32, #tpu.memory_space<vmem>>) attributes {dimension_semantics = [#tpu.dimension_semantics<parallel>], iteration_bounds = array<i64: 2>, scalar_prefetch = 0 : i64, scratch_operands = 0 : i64, tpu.core_type = #tpu.core_type<tc>, window_params = [{transform_indices = @transform_0, window_bounds = array<i64: 1, 1024, 196>}, {pipeline_mode = #tpu.pipeline_mode<synchronous>, transform_indices = @transform_1, window_bounds = array<i64: 32, 1024>}, {pipeline_mode = #tpu.pipeline_mode<synchronous>, transform_indices = @transform_2, window_bounds = array<i64: 32, 1>}, {transform_indices = @transform_3, window_bounds = array<i64: 1, 32, 196>}]} {
    %c0 = arith.constant 0 : index
    %c0_0 = arith.constant 0 : index
    %0 = vector.load %arg2[%c0, %c0_0] : memref<32x1024xbf16, #tpu.memory_space<vmem>>, vector<32x1024xbf16>
    %c0_1 = arith.constant 0 : index
    %c0_2 = arith.constant 0 : index
    %c0_3 = arith.constant 0 : index
    %1 = vector.load %arg1[%c0_1, %c0_2, %c0_3] : memref<1x1024x196xbf16, #tpu.memory_space<vmem>>, vector<1x1024x196xbf16>
    %2 = vector.shape_cast %1 : vector<1x1024x196xbf16> to vector<1024x196xbf16>
    %cst = arith.constant dense<0.000000e+00> : vector<32x196xf32>
    %3 = tpu.matmul %0, %2, %cst {dimension_numbers = #tpu.dot_dimension_numbers<[1], [0], [0], [1], [0, 0, 1, 1], [], []>} : vector<32x1024xbf16>, vector<1024x196xbf16>, vector<32x196xf32> -> vector<32x196xf32>
    %c0_4 = arith.constant 0 : index
    %c0_5 = arith.constant 0 : index
    %4 = vector.load %arg3[%c0_4, %c0_5] : memref<32x1xf32, #tpu.memory_space<vmem>>, vector<32x1xf32>
    %5 = vector.broadcast %4 : vector<32x1xf32> to vector<32x196xf32>
    %6 = arith.addf %3, %5 : vector<32x196xf32>
    %cst_6 = arith.constant dense<0.000000e+00> : vector<32xf32>
    %7 = vector.multi_reduction <add>, %6, %cst_6 [1] : vector<32x196xf32> to vector<32xf32>
    %8 = vector.shape_cast %7 : vector<32xf32> to vector<32x1xf32>
    %cst_7 = arith.constant 0.00510204071 : f32
    %9 = vector.broadcast %cst_7 : f32 to vector<32x1xf32>
    %10 = arith.mulf %8, %9 : vector<32x1xf32>
    %11 = arith.mulf %6, %6 : vector<32x196xf32>
    %cst_8 = arith.constant dense<0.000000e+00> : vector<32xf32>
    %12 = vector.multi_reduction <add>, %11, %cst_8 [1] : vector<32x196xf32> to vector<32xf32>
    %13 = vector.shape_cast %12 : vector<32xf32> to vector<32x1xf32>
    %cst_9 = arith.constant 0.00510204071 : f32
    %14 = vector.broadcast %cst_9 : f32 to vector<32x1xf32>
    %15 = arith.mulf %13, %14 : vector<32x1xf32>
    %16 = arith.mulf %10, %10 : vector<32x1xf32>
    %17 = arith.subf %15, %16 : vector<32x1xf32>
    %cst_10 = arith.constant 0.000000e+00 : f32
    %18 = vector.broadcast %cst_10 : f32 to vector<32x1xf32>
    %19 = arith.maximumf %17, %18 : vector<32x1xf32>
    %20 = vector.broadcast %10 : vector<32x1xf32> to vector<32x196xf32>
    %21 = arith.subf %6, %20 : vector<32x196xf32>
    %cst_11 = arith.constant 9.99999974E-6 : f32
    %22 = vector.broadcast %cst_11 : f32 to vector<32x1xf32>
    %23 = arith.addf %19, %22 : vector<32x1xf32>
    %24 = math.rsqrt %23 : vector<32x1xf32>
    %25 = vector.broadcast %24 : vector<32x1xf32> to vector<32x196xf32>
    %26 = arith.mulf %21, %25 : vector<32x196xf32>
    %cst_12 = arith.constant 0.000000e+00 : f32
    %27 = vector.broadcast %cst_12 : f32 to vector<32x196xf32>
    %28 = arith.cmpf oge, %26, %27 : vector<32x196xf32>
    %cst_13 = arith.constant 2.000000e-01 : f32
    %29 = vector.broadcast %cst_13 : f32 to vector<32x196xf32>
    %30 = arith.mulf %29, %26 : vector<32x196xf32>
    %31 = arith.select %28, %26, %30 : vector<32x196xi1>, vector<32x196xf32>
    %c0_14 = arith.constant 0 : index
    %c0_15 = arith.constant 0 : index
    %c0_16 = arith.constant 0 : index
    %32 = vector.load %arg4[%c0_14, %c0_15, %c0_16] : memref<1x32x196xf32, #tpu.memory_space<vmem>>, vector<1x32x196xf32>
    %33 = vector.shape_cast %32 : vector<1x32x196xf32> to vector<32x196xf32>
    %34 = vector.shape_cast %31 : vector<32x196xf32> to vector<1x32x196xf32>
    tpu.vector_store %arg4[%c0_14, %c0_15, %c0_16], %34 {strides = array<i32>} : memref<1x32x196xf32, #tpu.memory_space<vmem>>, vector<1x32x196xf32>,
    return
  }
  func.func @transform_0(%arg0: i32) -> (i32, i32, i32) {
    %c0_i32 = arith.constant 0 : i32
    %c0_i32_0 = arith.constant 0 : i32
    %c0_i32_1 = arith.constant 0 : i32
    return %arg0, %c0_i32, %c0_i32_0 : i32, i32, i32
  }
  func.func @transform_1(%arg0: i32) -> (i32, i32) {
    %c0_i32 = arith.constant 0 : i32
    %c0_i32_0 = arith.constant 0 : i32
    %c0_i32_1 = arith.constant 0 : i32
    return %c0_i32, %c0_i32_0 : i32, i32
  }
  func.func @transform_2(%arg0: i32) -> (i32, i32) {
    %c0_i32 = arith.constant 0 : i32
    %c0_i32_0 = arith.constant 0 : i32
    %c0_i32_1 = arith.constant 0 : i32
    return %c0_i32, %c0_i32_0 : i32, i32
  }
  func.func @transform_3(%arg0: i32) -> (i32, i32, i32) {
    %c0_i32 = arith.constant 0 : i32
    %c0_i32_0 = arith.constant 0 : i32
    %c0_i32_1 = arith.constant 0 : i32
    return %arg0, %c0_i32, %c0_i32_0 : i32, i32, i32
  }
}

module attributes {stable_mosaic.version = 11 : i64} {
  func.func @_deconv_gemm_kernel(%arg0: i32, %arg1: memref<1x512x900xbf16, #tpu.memory_space<vmem>>, %arg2: memref<16x512xbf16, #tpu.memory_space<vmem>>, %arg3: memref<16x1xf32, #tpu.memory_space<vmem>>, %arg4: memref<1x16x900xf32, #tpu.memory_space<vmem>>) attributes {dimension_semantics = [#tpu.dimension_semantics<parallel>], iteration_bounds = array<i64: 2>, scalar_prefetch = 0 : i64, scratch_operands = 0 : i64, tpu.core_type = #tpu.core_type<tc>, window_params = [{transform_indices = @transform_0, window_bounds = array<i64: 1, 512, 900>}, {pipeline_mode = #tpu.pipeline_mode<synchronous>, transform_indices = @transform_1, window_bounds = array<i64: 16, 512>}, {pipeline_mode = #tpu.pipeline_mode<synchronous>, transform_indices = @transform_2, window_bounds = array<i64: 16, 1>}, {transform_indices = @transform_3, window_bounds = array<i64: 1, 16, 900>}]} {
    %c0 = arith.constant 0 : index
    %c0_0 = arith.constant 0 : index
    %0 = vector.load %arg2[%c0, %c0_0] : memref<16x512xbf16, #tpu.memory_space<vmem>>, vector<16x512xbf16>
    %c0_1 = arith.constant 0 : index
    %c0_2 = arith.constant 0 : index
    %c0_3 = arith.constant 0 : index
    %1 = vector.load %arg1[%c0_1, %c0_2, %c0_3] : memref<1x512x900xbf16, #tpu.memory_space<vmem>>, vector<1x512x900xbf16>
    %2 = vector.shape_cast %1 : vector<1x512x900xbf16> to vector<512x900xbf16>
    %cst = arith.constant dense<0.000000e+00> : vector<16x900xf32>
    %3 = tpu.matmul %0, %2, %cst {dimension_numbers = #tpu.dot_dimension_numbers<[1], [0], [0], [1], [0, 0, 1, 1], [], []>} : vector<16x512xbf16>, vector<512x900xbf16>, vector<16x900xf32> -> vector<16x900xf32>
    %c0_4 = arith.constant 0 : index
    %c0_5 = arith.constant 0 : index
    %4 = vector.load %arg3[%c0_4, %c0_5] : memref<16x1xf32, #tpu.memory_space<vmem>>, vector<16x1xf32>
    %5 = vector.broadcast %4 : vector<16x1xf32> to vector<16x900xf32>
    %6 = arith.addf %3, %5 : vector<16x900xf32>
    %cst_6 = arith.constant dense<0.000000e+00> : vector<16xf32>
    %7 = vector.multi_reduction <add>, %6, %cst_6 [1] : vector<16x900xf32> to vector<16xf32>
    %8 = vector.shape_cast %7 : vector<16xf32> to vector<16x1xf32>
    %cst_7 = arith.constant 0.00111111114 : f32
    %9 = vector.broadcast %cst_7 : f32 to vector<16x1xf32>
    %10 = arith.mulf %8, %9 : vector<16x1xf32>
    %11 = arith.mulf %6, %6 : vector<16x900xf32>
    %cst_8 = arith.constant dense<0.000000e+00> : vector<16xf32>
    %12 = vector.multi_reduction <add>, %11, %cst_8 [1] : vector<16x900xf32> to vector<16xf32>
    %13 = vector.shape_cast %12 : vector<16xf32> to vector<16x1xf32>
    %cst_9 = arith.constant 0.00111111114 : f32
    %14 = vector.broadcast %cst_9 : f32 to vector<16x1xf32>
    %15 = arith.mulf %13, %14 : vector<16x1xf32>
    %16 = arith.mulf %10, %10 : vector<16x1xf32>
    %17 = arith.subf %15, %16 : vector<16x1xf32>
    %cst_10 = arith.constant 0.000000e+00 : f32
    %18 = vector.broadcast %cst_10 : f32 to vector<16x1xf32>
    %19 = arith.maximumf %17, %18 : vector<16x1xf32>
    %20 = vector.broadcast %10 : vector<16x1xf32> to vector<16x900xf32>
    %21 = arith.subf %6, %20 : vector<16x900xf32>
    %cst_11 = arith.constant 9.99999974E-6 : f32
    %22 = vector.broadcast %cst_11 : f32 to vector<16x1xf32>
    %23 = arith.addf %19, %22 : vector<16x1xf32>
    %24 = math.rsqrt %23 : vector<16x1xf32>
    %25 = vector.broadcast %24 : vector<16x1xf32> to vector<16x900xf32>
    %26 = arith.mulf %21, %25 : vector<16x900xf32>
    %cst_12 = arith.constant 0.000000e+00 : f32
    %27 = vector.broadcast %cst_12 : f32 to vector<16x900xf32>
    %28 = arith.cmpf oge, %26, %27 : vector<16x900xf32>
    %cst_13 = arith.constant 2.000000e-01 : f32
    %29 = vector.broadcast %cst_13 : f32 to vector<16x900xf32>
    %30 = arith.mulf %29, %26 : vector<16x900xf32>
    %31 = arith.select %28, %26, %30 : vector<16x900xi1>, vector<16x900xf32>
    %c0_14 = arith.constant 0 : index
    %c0_15 = arith.constant 0 : index
    %c0_16 = arith.constant 0 : index
    %32 = vector.load %arg4[%c0_14, %c0_15, %c0_16] : memref<1x16x900xf32, #tpu.memory_space<vmem>>, vector<1x16x900xf32>
    %33 = vector.shape_cast %32 : vector<1x16x900xf32> to vector<16x900xf32>
    %34 = vector.shape_cast %31 : vector<16x900xf32> to vector<1x16x900xf32>
    tpu.vector_store %arg4[%c0_14, %c0_15, %c0_16], %34 {strides = array<i32>} : memref<1x16x900xf32, #tpu.memory_space<vmem>>, vector<1x16x900xf32>,
    return
  }
  func.func @transform_0(%arg0: i32) -> (i32, i32, i32) {
    %c0_i32 = arith.constant 0 : i32
    %c0_i32_0 = arith.constant 0 : i32
    %c0_i32_1 = arith.constant 0 : i32
    return %arg0, %c0_i32, %c0_i32_0 : i32, i32, i32
  }
  func.func @transform_1(%arg0: i32) -> (i32, i32) {
    %c0_i32 = arith.constant 0 : i32
    %c0_i32_0 = arith.constant 0 : i32
    %c0_i32_1 = arith.constant 0 : i32
    return %c0_i32, %c0_i32_0 : i32, i32
  }
  func.func @transform_2(%arg0: i32) -> (i32, i32) {
    %c0_i32 = arith.constant 0 : i32
    %c0_i32_0 = arith.constant 0 : i32
    %c0_i32_1 = arith.constant 0 : i32
    return %c0_i32, %c0_i32_0 : i32, i32
  }
  func.func @transform_3(%arg0: i32) -> (i32, i32, i32) {
    %c0_i32 = arith.constant 0 : i32
    %c0_i32_0 = arith.constant 0 : i32
    %c0_i32_1 = arith.constant 0 : i32
    return %arg0, %c0_i32, %c0_i32_0 : i32, i32, i32
  }
}

module attributes {stable_mosaic.version = 11 : i64} {
  func.func @_deconv_gemm_kernel(%arg0: i32, %arg1: memref<1x256x3600xbf16, #tpu.memory_space<vmem>>, %arg2: memref<3x256xbf16, #tpu.memory_space<vmem>>, %arg3: memref<3x1xf32, #tpu.memory_space<vmem>>, %arg4: memref<1x3x3600xf32, #tpu.memory_space<vmem>>) attributes {dimension_semantics = [#tpu.dimension_semantics<parallel>], iteration_bounds = array<i64: 2>, scalar_prefetch = 0 : i64, scratch_operands = 0 : i64, tpu.core_type = #tpu.core_type<tc>, window_params = [{transform_indices = @transform_0, window_bounds = array<i64: 1, 256, 3600>}, {pipeline_mode = #tpu.pipeline_mode<synchronous>, transform_indices = @transform_1, window_bounds = array<i64: 3, 256>}, {pipeline_mode = #tpu.pipeline_mode<synchronous>, transform_indices = @transform_2, window_bounds = array<i64: 3, 1>}, {transform_indices = @transform_3, window_bounds = array<i64: 1, 3, 3600>}]} {
    %c0 = arith.constant 0 : index
    %c0_0 = arith.constant 0 : index
    %0 = vector.load %arg2[%c0, %c0_0] : memref<3x256xbf16, #tpu.memory_space<vmem>>, vector<3x256xbf16>
    %c0_1 = arith.constant 0 : index
    %c0_2 = arith.constant 0 : index
    %c0_3 = arith.constant 0 : index
    %1 = vector.load %arg1[%c0_1, %c0_2, %c0_3] : memref<1x256x3600xbf16, #tpu.memory_space<vmem>>, vector<1x256x3600xbf16>
    %2 = vector.shape_cast %1 : vector<1x256x3600xbf16> to vector<256x3600xbf16>
    %cst = arith.constant dense<0.000000e+00> : vector<3x3600xf32>
    %3 = tpu.matmul %0, %2, %cst {dimension_numbers = #tpu.dot_dimension_numbers<[1], [0], [0], [1], [0, 0, 1, 1], [], []>} : vector<3x256xbf16>, vector<256x3600xbf16>, vector<3x3600xf32> -> vector<3x3600xf32>
    %c0_4 = arith.constant 0 : index
    %c0_5 = arith.constant 0 : index
    %4 = vector.load %arg3[%c0_4, %c0_5] : memref<3x1xf32, #tpu.memory_space<vmem>>, vector<3x1xf32>
    %5 = vector.broadcast %4 : vector<3x1xf32> to vector<3x3600xf32>
    %6 = arith.addf %3, %5 : vector<3x3600xf32>
    %c0_6 = arith.constant 0 : index
    %c0_7 = arith.constant 0 : index
    %c0_8 = arith.constant 0 : index
    %7 = vector.load %arg4[%c0_6, %c0_7, %c0_8] : memref<1x3x3600xf32, #tpu.memory_space<vmem>>, vector<1x3x3600xf32>
    %8 = vector.shape_cast %7 : vector<1x3x3600xf32> to vector<3x3600xf32>
    %9 = vector.shape_cast %6 : vector<3x3600xf32> to vector<1x3x3600xf32>
    tpu.vector_store %arg4[%c0_6, %c0_7, %c0_8], %9 {strides = array<i32>} : memref<1x3x3600xf32, #tpu.memory_space<vmem>>, vector<1x3x3600xf32>,
    return
  }
  func.func @transform_0(%arg0: i32) -> (i32, i32, i32) {
    %c0_i32 = arith.constant 0 : i32
    %c0_i32_0 = arith.constant 0 : i32
    %c0_i32_1 = arith.constant 0 : i32
    return %arg0, %c0_i32, %c0_i32_0 : i32, i32, i32
  }
  func.func @transform_1(%arg0: i32) -> (i32, i32) {
    %c0_i32 = arith.constant 0 : i32
    %c0_i32_0 = arith.constant 0 : i32
    %c0_i32_1 = arith.constant 0 : i32
    return %c0_i32, %c0_i32_0 : i32, i32
  }
  func.func @transform_2(%arg0: i32) -> (i32, i32) {
    %c0_i32 = arith.constant 0 : i32
    %c0_i32_0 = arith.constant 0 : i32
    %c0_i32_1 = arith.constant 0 : i32
    return %c0_i32, %c0_i32_0 : i32, i32
  }
  func.func @transform_3(%arg0: i32) -> (i32, i32, i32) {
    %c0_i32 = arith.constant 0 : i32
    %c0_i32_0 = arith.constant 0 : i32
    %c0_i32_1 = arith.constant 0 : i32
    return %arg0, %c0_i32, %c0_i32_0 : i32, i32, i32
  }
}

</mosaic_0001>

<bundles_post_ra>
// kernel: decoder_forward.5
= control target key start
LH: loop header
LB: loop body
LE: loop exit
PB: predicated region body
PF: predicated region fallthrough
CT: control target
= control target key end

     0   :  { %8 = vsyncpa [#allocation3], 0  ;;  %s582_s0 = inlined_call_operand.vmem [shape: f32[2,32], index: 0, kind: input, shape index: {}]   ;;  %s583_s1 = inlined_call_operand.hbm [shape: f32[32,1024], index: 1, kind: input, shape index: {}]   ;;  %s584_s2 = inlined_call_operand.hbm [shape: f32[1,1024], index: 2, kind: input, shape index: {}]   ;;  %s585_s3 = inlined_call_operand.vmem [shape: f32[2,1024], index: 3, kind: output, shape index: {}]  }
   0x1   :  { %9 = vsyncpa [#allocation5], 0  ;;  %s533_s12 = smov [#allocation2]  }
   0x2   :  { %s17_s13 = sshll.u32 %s533_s12, 4  ;;  %s18_s13 = int_to_ptr.vmem [resolvable:$true] %s17_s13 }
   0x3   :  { %s497_s14 = scalar_lea.vmem %s18_s13, 4096  ;;  %p502_p1 = scmp.lt.s32.totalorder %s18_s13, %s18_s13 }
   0x4   :  { %p498_p0 = scmp.ne.s32.totalorder %s18_s13, %s497_s14  ;;  %p503_p2 = scmp.lt.s32.totalorder %s497_s14, %s497_s14 }
   0x6   :  { %p504_p3 = por %p503_p2, %p502_p1 }
   0x8   :  { %p505_p4 = pnand %p504_p3, %p498_p0 }
   0xa   :  { %508 = shalt.err (!%p505_p4)
}
   0xb   :  { %s534_s15 = smov 1024   ;;  %s535_s16 = smov 64  }
   0xc   :  { %23 = dma.hbm_to_vmem [thread:$0]  %s583_s1, 4096, %s18_s13, [#allocation3], %s534_s15, %s534_s15, %s535_s16  }
   0xd   :  { %s536_s19 = smov [#allocation4]  }
   0xe   :  { %s30_s20 = sshll.u32 %s536_s19, 4  ;;  %s31_s20 = int_to_ptr.vmem [resolvable:$true] %s30_s20 }
   0xf   :  { %s517_s21 = scalar_lea.vmem %s31_s20, 128  ;;  %p522_p6 = scmp.lt.s32.totalorder %s31_s20, %s31_s20 }
  0x10   :  { %p518_p5 = scmp.ne.s32.totalorder %s31_s20, %s517_s21  ;;  %p523_p7 = scmp.lt.s32.totalorder %s517_s21, %s517_s21 }
  0x12   :  { %p524_p8 = por %p523_p7, %p522_p6 }
  0x14   :  { %p525_p9 = pnand %p524_p8, %p518_p5 }
  0x16   :  { %528 = shalt.err (!%p525_p9)
}
  0x17   :  { %33 = dma.hbm_to_vmem [thread:$0]  %s584_s2, 128, %s31_s20, [#allocation5]  }
  0x18   :  { %529 = dma.done.wait [#allocation3], 4096  }
  0x19   :  { %530 = vsyncadd [#allocation3], 4294963200 }
  0x1a   :  { %531 = dma.done.wait [#allocation5], 128  }
  0x1b   :  { %532 = vsyncadd [#allocation5], 4294967168  ;;  %v537_v0 = vmov 0.0   ;;  %v66_v1 = vld [vmem:[#allocation2 + $0xc8] sm:$0xff]  ;;  %v68_v2 = vld [vmem:[#allocation2 + $0xd8] sm:$0xff]  ;;  %vm115_vm0 = vcmask 261120   ;;  %v75_v34 = vlaneseq }
  0x1c   :  { %183 = vmatprep.mubr.f32.mxu0 %v537_v0  ;;  %254 = vmatprep.mubr.f32.mxu1 %v537_v0  ;;  %v65_v3 = vld [vmem:[#allocation2 + $0xc0] sm:$0xff]  ;;  %v67_v4 = vld [vmem:[#allocation2 + $0xd0] sm:$0xff]  ;;  %v58_v5 = vld [vmem:[#allocation2 + $0x88] sm:$0xff]  ;;  %v538_v43 = vmov 1983009808  }
  0x1d   :  { %143 = vmatprep.subr.mxu0 %v66_v1  ;;  %214 = vmatprep.subr.mxu1 %v68_v2  ;;  %v60_v6 = vld [vmem:[#allocation2 + $0x98] sm:$0xff]  ;;  %v57_v7 = vld [vmem:[#allocation2 + $0x80] sm:$0xff]  ;;  %v59_v8 = vld [vmem:[#allocation2 + $0x90] sm:$0xff]  ;;  %v76_v35 = vshrl.u32 %v75_v34, 7  ;;  %v438_v44 = vunpack.c.l.s4 %v538_v43 }
  0x1e   :  { %144 = vmatpush1.msra.mxu0 %v65_v3  ;;  %215 = vmatpush1.msra.mxu1 %v67_v4  ;;  %v50_v9 = vld [vmem:[#allocation2 + $0x48] sm:$0xff]  ;;  %v52_v10 = vld [vmem:[#allocation2 + $0x58] sm:$0xff]  ;;  %v49_v11 = vld [vmem:[#allocation2 + $0x40] sm:$0xff] }
  0x1f   :  { %145 = vmatprep.subr.mxu0 %v58_v5  ;;  %216 = vmatprep.subr.mxu1 %v60_v6  ;;  %v51_v12 = vld [vmem:[#allocation2 + $0x50] sm:$0xff]  ;;  %v42_v13 = vld [vmem:[#allocation2 + $0x8] sm:$0xff]  ;;  %v44_v14 = vld [vmem:[#allocation2 + $0x18] sm:$0xff]  ;;  %v77_v36 = vsub.s32 0, %v76_v35  ;;  %v85_v37 = vsub.s32 2, %v76_v35  ;;  %v81_v39 = vsub.s32 1, %v76_v35  ;;  %v439_v53 = vunpack.c.0.s8 %v438_v44 }
  0x20   :  { %146 = vmatpush1.msra.mxu0 %v57_v7  ;;  %217 = vmatpush1.msra.mxu1 %v59_v8  ;;  %v41_v15 = vld [vmem:[#allocation2] sm:$0xff]  ;;  %v43_v16 = vld [vmem:[#allocation2 + $0x10] sm:$0xff]  ;;  %v70_v18 = vld [vmem:[#allocation2 + $0xe8] sm:$0xff]  ;;  %v89_v40 = vsub.s32 3, %v76_v35  ;;  %v93_v54 = vsub.s32 4, %v76_v35  ;;  %v101_v55 = vsub.s32 6, %v76_v35 }
  0x21   :  { %147 = vmatprep.subr.mxu0 %v50_v9  ;;  %218 = vmatprep.subr.mxu1 %v52_v10  ;;  %v40_v17 = vld [vmem:[%s582_s0] sm:$0x3]  ;;  %v72_v19 = vld [vmem:[#allocation2 + $0xf8] sm:$0xff]  ;;  %v71_v21 = vld [vmem:[#allocation2 + $0xf0] sm:$0xff]  ;;  %v97_v60 = vsub.s32 5, %v76_v35  ;;  %v105_v61 = vsub.s32 7, %v76_v35 }
  0x22   :  { %148 = vmatpush1.msra.mxu0 %v49_v11  ;;  %219 = vmatpush1.msra.mxu1 %v51_v12  ;;  %v69_v20 = vld [vmem:[#allocation2 + $0xe0] sm:$0xff]  ;;  %v62_v22 = vld [vmem:[#allocation2 + $0xa8] sm:$0xff]  ;;  %v64_v23 = vld [vmem:[#allocation2 + $0xb8] sm:$0xff] }
  0x23   :  { %149 = vmatprep.subr.mxu0 %v42_v13  ;;  %220 = vmatprep.subr.mxu1 %v44_v14  ;;  %v61_v24 = vld [vmem:[#allocation2 + $0xa0] sm:$0xff]  ;;  %v63_v25 = vld [vmem:[#allocation2 + $0xb0] sm:$0xff]  ;;  %v54_v26 = vld [vmem:[#allocation2 + $0x68] sm:$0xff] }
  0x24   :  { %150 = vmatpush1.msra.mxu0 %v41_v15  ;;  %221 = vmatpush1.msra.mxu1 %v43_v16  ;;  %v56_v27 = vld [vmem:[#allocation2 + $0x78] sm:$0xff]  ;;  %v53_v28 = vld [vmem:[#allocation2 + $0x60] sm:$0xff]  ;;  %v55_v29 = vld [vmem:[#allocation2 + $0x70] sm:$0xff] }
  0x25   :  { %479 = vmatmul.mubr.msk.f32.vlgmr.msra.gmra.mxu0 %vm115_vm0, %v40_v17  ;;  %480 = vmatmul.mubr.msk.f32.vlgmr.msra.gmra.mxu1 %vm115_vm0, %v40_v17  ;;  %v46_v30 = vld [vmem:[#allocation2 + $0x28] sm:$0xff]  ;;  %v48_v31 = vld [vmem:[#allocation2 + $0x38] sm:$0xff]  ;;  %v45_v32 = vld [vmem:[#allocation2 + $0x20] sm:$0xff] }
  0x26   :  { %285 = vmatprep.subr.mxu0 %v70_v18  ;;  %356 = vmatprep.subr.mxu1 %v72_v19  ;;  %v47_v33 = vld [vmem:[#allocation2 + $0x30] sm:$0xff]  ;;  %v73_v38 = vld [vmem:[#allocation4] sm:$0xff] }
  0x27   :  { %286 = vmatpush1.msra.mxu0 %v69_v20  ;;  %357 = vmatpush1.msra.mxu1 %v71_v21  ;;  %v78_v41 = vrot.slane %v73_v38, %v77_v36  ;;  %v86_v42 = vrot.slane %v73_v38, %v85_v37  ;;  %v82_v47 = vrot.slane %v73_v38, %v81_v39 }
  0x28   :  { %287 = vmatprep.subr.mxu0 %v62_v22  ;;  %358 = vmatprep.subr.mxu1 %v64_v23  ;;  %v90_v48 = vrot.slane %v73_v38, %v89_v40  ;;  %v94_v1 = vrot.slane %v73_v38, %v93_v54  ;;  %v102_v2 = vrot.slane %v73_v38, %v101_v55 }
  0x29   :  { %288 = vmatpush1.msra.mxu0 %v61_v24  ;;  %359 = vmatpush1.msra.mxu1 %v63_v25  ;;  %v98_v11 = vrot.slane %v73_v38, %v97_v60  ;;  %v106_v12 = vrot.slane %v73_v38, %v105_v61 }
  0x2a   :  { %289 = vmatprep.subr.mxu0 %v54_v26  ;;  %360 = vmatprep.subr.mxu1 %v56_v27 }
  0x2b   :  { %290 = vmatpush1.msra.mxu0 %v53_v28  ;;  %361 = vmatpush1.msra.mxu1 %v55_v29 }
  0x2c   :  { %291 = vmatprep.subr.mxu0 %v46_v30  ;;  %362 = vmatprep.subr.mxu1 %v48_v31 }
  0x2d   :  { %292 = vmatpush1.msra.mxu0 %v45_v32  ;;  %325 = vmatprep.mubr.f32.mxu0 %v537_v0 }
  0x2e   :  { %363 = vmatpush1.msra.mxu1 %v47_v33  ;;  %396 = vmatprep.mubr.f32.mxu1 %v537_v0  ;;  %v442_v0 = vsub.s32 %v439_v53, %v76_v35 }
  0x2f   :  { %481 = vmatmul.mubr.msk.f32.vlgmr.msra.gmra.mxu0 %vm115_vm0, %v40_v17  ;;  %482 = vmatmul.mubr.msk.f32.vlgmr.msra.gmra.mxu1 %vm115_vm0, %v40_v17 }
  0xe5   :  { %v185_v45 = vpop.f32.mrf.mxu0  ;;  %v256_v46 = vpop.f32.mrf.mxu1 }
  0xe6   :  { %v186_v49 = vadd.f32 %v185_v45, %v78_v41  ;;  %v257_v50 = vadd.f32 %v256_v46, %v86_v42 }
  0xe7   :  { %v187_v51 = vpop.f32.mrf.mxu0  ;;  %v258_v52 = vpop.f32.mrf.mxu1 }
  0xe8   :  { %v411_v56 = vmul.f32 0.2, %v186_v49  ;;  %v413_v57 = vmul.f32 0.2, %v257_v50  ;;  %v188_v58 = vadd.f32 %v187_v51, %v82_v47  ;;  %v259_v59 = vadd.f32 %v258_v52, %v90_v48 }
  0xe9   :  { %vm403_vm1 = vcmp.ge.f32.partialorder %v186_v49, 0.0  ;;  %vm405_vm2 = vcmp.ge.f32.partialorder %v257_v50, 0.0 }
  0xea   :  { %vm404_vm3 = vcmp.ge.f32.partialorder %v188_v58, 0.0  ;;  %v412_v62 = vmul.f32 0.2, %v188_v58  ;;  %vm406_vm4 = vcmp.ge.f32.partialorder %v259_v59, 0.0  ;;  %v414_v63 = vmul.f32 0.2, %v259_v59 }
  0xeb   :  { %v419_v3 = vsel %vm403_vm1, %v186_v49, %v411_v56  ;;  %v421_v4 = vsel %vm405_vm2, %v257_v50, %v413_v57 }
  0xec   :  { %v420_v5 = vsel %vm404_vm3, %v188_v58, %v412_v62  ;;  %v422_v6 = vsel %vm406_vm4, %v259_v59, %v414_v63 }
  0xed   :  { %v435_v7 = vcombine.low %v419_v3, %v420_v5  ;;  %v436_v8 = vcombine.low %v421_v4, %v422_v6 }
  0xef   :  { %v327_v9 = vpop.f32.mrf.mxu0  ;;  %v398_v10 = vpop.f32.mrf.mxu1  ;;  %v443_v13 = vrot.slane %v435_v7, %v442_v0  ;;  %v450_v14 = vrot.slane %v436_v8, %v442_v0 }
  0xf0   :  { %v328_v15 = vadd.f32 %v327_v9, %v94_v1  ;;  %v399_v16 = vadd.f32 %v398_v10, %v102_v2 }
  0xf1   :  { %v329_v17 = vpop.f32.mrf.mxu0  ;;  %v400_v18 = vpop.f32.mrf.mxu1  ;;  %v451_v19 = vcombine.low %v443_v13, %v450_v14 }
  0xf2   :  { %v415_v20 = vmul.f32 0.2, %v328_v15  ;;  %v330_v21 = vadd.f32 %v329_v17, %v98_v11  ;;  %v401_v22 = vadd.f32 %v400_v18, %v106_v12  ;;  %vm407_vm5 = vcmp.ge.f32.partialorder %v328_v15, 0.0 }
  0xf3   :  { %471 = vst [vmem:[%s585_s3] sm:$0xff] %v451_v19  ;;  %v417_v23 = vmul.f32 0.2, %v399_v16  ;;  %vm409_vm6 = vcmp.ge.f32.partialorder %v399_v16, 0.0 }
  0xf4   :  { %vm408_vm7 = vcmp.ge.f32.partialorder %v330_v21, 0.0  ;;  %v416_v24 = vmul.f32 0.2, %v330_v21  ;;  %vm410_vm8 = vcmp.ge.f32.partialorder %v401_v22, 0.0  ;;  %v418_v25 = vmul.f32 0.2, %v401_v22 }
  0xf5   :  { %v423_v26 = vsel %vm407_vm5, %v328_v15, %v415_v20  ;;  %v425_v28 = vsel %vm409_vm6, %v399_v16, %v417_v23 }
  0xf6   :  { %v424_v27 = vsel %vm408_vm7, %v330_v21, %v416_v24  ;;  %v426_v30 = vsel %vm410_vm8, %v401_v22, %v418_v25 }
  0xf7   :  { %v452_v29 = vcombine.low %v423_v26, %v424_v27  ;;  %v453_v31 = vcombine.low %v425_v28, %v426_v30 }
  0xf9   :  { %v460_v32 = vrot.slane %v452_v29, %v442_v0  ;;  %v467_v33 = vrot.slane %v453_v31, %v442_v0 }
  0xfb   :  { %v468_v34 = vcombine.low %v460_v32, %v467_v33 }
  0xfd   :  { %472 = vst [vmem:[%s585_s3 + $0x8] sm:$0xff] %v468_v34 }
  0xfe   :  { %477 = vsyncpa [#allocation3], 1 }
  0xff   :  { %478 = vsyncpa [#allocation5], 1 }

// kernel: decoder_forward.6
= control target key start
LH: loop header
LB: loop body
LE: loop exit
PB: predicated region body
PF: predicated region fallthrough
CT: control target
= control target key end

     0   :  { %s5641_s12 = smov 0   ;;  %s6694_s0 = inlined_call_operand.vmem [shape: bf16[2,4096,36], index: 0, kind: input, shape index: {}]   ;;  %s6695_s1 = inlined_call_operand.vmem [shape: bf16[64,4096], index: 1, kind: input, shape index: {}]   ;;  %s6696_s2 = inlined_call_operand.vmem [shape: f32[64,1], index: 2, kind: input, shape index: {}]   ;;  %s6697_s3 = inlined_call_operand.vmem [shape: f32[2,64,36], index: 3, kind: output, shape index: {}]  }
   0x1 LB: > { %s4292_s13 = sadd.s32 4294967295, %s5618_s12   ;;  %p4296_p0 = scmp.ge.s32.totalorder %s5618_s12, 1  ;;  %s5618_s12 = sphi %s5641_s12, %s13_s12  }
   0x2   : > { %p137_p1 = scmp.lt.s32.totalorder %s5618_s12, 3 }
   0x4   : > { %p138_p2 = pnand %p4296_p0, %p137_p1 }
   0x6   : > { %141 = sbr.rel (%p138_p2) target bundleno = 705 (0x2c1), region = 32 }
   0xb   : > { %p161_p3 = scmp.lt.s32.totalorder %s4292_s13, 1  ;;  %v5652_v0 = vld [vmem:[%s6695_s1] sm:$0xff]  ;;  %v5662_v2 = vld [vmem:[%s6695_s1 + $0x8] sm:$0xff]  ;;  %v5620_v5 = vmov 0   ;;  %vm4076_vm0 = vcmask 293888  }
   0xc   : > { %v5657_v1 = vld [vmem:[%s6695_s1 + $0x80] sm:$0xff]  ;;  %v5669_v4 = vld [vmem:[%s6695_s1 + $0x88] sm:$0xff]  ;;  %5338 = vset.pattern.permute.xlu0 %v5620_v5  ;;  %5339 = vset.pattern.permute.xlu1 %v5620_v5 }
   0xd   : > { %v4302_v3 = vcombine.high %v5652_v0, %v5657_v1  ;;  %s6729_s13 = smov (!%p161_p3, %s4292_s13), 1  ;;  %v4304_v6 = vcombine.high %v5662_v2, %v5669_v4  ;;  %v204_v36 = vld [vmem:[%s6695_s1 + $0x100] sm:$0xff]  ;;  %v205_v39 = vld [vmem:[%s6695_s1 + $0x108] sm:$0xff]  ;;  %v4301_v43 = vcombine.low %v5652_v0, %v5657_v1  ;;  %v4303_v44 = vcombine.low %v5662_v2, %v5669_v4 }
   0xe   : > { %s4687_s22 = sshll.u32 %s6729_s13, 11  ;;  %v220_v37 = vld [vmem:[%s6695_s1 + $0x180] sm:$0xff]  ;;  %v221_v40 = vld [vmem:[%s6695_s1 + $0x188] sm:$0xff]  ;;  %s4688_s23 = sshll.u32 %s6729_s13, 6 }
   0xf   : > { %3068 = vmatprep.mubr.bf16.mxu0 %v4302_v3  ;;  %3133 = vmatprep.mubr.bf16.mxu1 %v4304_v6  ;;  %s5679_s25 = scalar_lea.vmem %s6694_s0, %s4687_s22  ;;  %v4334_v47 = vcombine.high %v204_v36, %v220_v37  ;;  %v4336_v49 = vcombine.high %v205_v39, %v221_v40  ;;  %v236_v52 = vld [vmem:[%s6695_s1 + $0x200] sm:$0xff]  ;;  %v237_v55 = vld [vmem:[%s6695_s1 + $0x208] sm:$0xff]  ;;  %v4333_v59 = vcombine.low %v204_v36, %v220_v37  ;;  %v175_v37 = vld [vmem:[%s6695_s1 + $0x18] sm:$0xff]  ;;  %s6657_s27 = scalar_lea.vmem %s6697_s3, %s4688_s23 }
  0x10   : > { %v5340_v7 = vld [vmem:[%s5679_s25 + $0x78] sm:$0xff]   ;;  %v5344_v11 = vld [vmem:[%s5679_s25 + $0x70] sm:$0xff]   ;;  %v5348_v15 = vld [vmem:[%s5679_s25 + $0x68] sm:$0xff]   ;;  %v4335_v60 = vcombine.low %v205_v39, %v221_v40 }
  0x11   : > { %v5341_v8 = vld [vmem:[%s5679_s25 + $0xf8] sm:$0xff]   ;;  %4689 = vmatprep.subr.bf16.mxu0 %v5340_v7  ;;  %v5345_v12 = vld [vmem:[%s5679_s25 + $0xf0] sm:$0xff]   ;;  %v5349_v16 = vld [vmem:[%s5679_s25 + $0xe8] sm:$0xff]  }
  0x12   : > { %v5342_v9 = vld [vmem:[%s5679_s25 + $0x38] sm:$0xff]   ;;  %4729 = vmatprep.subr.bf16.mxu1 %v5341_v8  ;;  %v5346_v13 = vld [vmem:[%s5679_s25 + $0x30] sm:$0xff]   ;;  %v5350_v17 = vld [vmem:[%s5679_s25 + $0x28] sm:$0xff]  }
  0x13   : > { %v5343_v10 = vld [vmem:[%s5679_s25 + $0xb8] sm:$0xff]   ;;  %4690 = vmatpush3.bf16.msra.mxu0 %v5342_v9  ;;  %v5347_v14 = vld [vmem:[%s5679_s25 + $0xb0] sm:$0xff]   ;;  %v5351_v18 = vld [vmem:[%s5679_s25 + $0xa8] sm:$0xff]  }
  0x14   : > { %4730 = vmatpush3.bf16.msra.mxu1 %v5343_v10  ;;  %4691 = vmatprep.subr.bf16.mxu0 %v5344_v11  ;;  %v5352_v19 = vld [vmem:[%s5679_s25 + $0x60] sm:$0xff]   ;;  %v5356_v23 = vld [vmem:[%s5679_s25 + $0x58] sm:$0xff]   ;;  %v5360_v27 = vld [vmem:[%s5679_s25 + $0x50] sm:$0xff]  }
  0x15   : > { %4731 = vmatprep.subr.bf16.mxu1 %v5345_v12  ;;  %v5353_v20 = vld [vmem:[%s5679_s25 + $0xe0] sm:$0xff]   ;;  %v5357_v24 = vld [vmem:[%s5679_s25 + $0xd8] sm:$0xff]   ;;  %v5361_v28 = vld [vmem:[%s5679_s25 + $0xd0] sm:$0xff]  }
  0x16   : > { %v5354_v21 = vld [vmem:[%s5679_s25 + $0x20] sm:$0xff]   ;;  %v5358_v25 = vld [vmem:[%s5679_s25 + $0x18] sm:$0xff]   ;;  %v5362_v29 = vld [vmem:[%s5679_s25 + $0x10] sm:$0xff]  }
  0x17   : > { %4692 = vmatpush3.bf16.msra.mxu0 %v5346_v13  ;;  %v5355_v22 = vld [vmem:[%s5679_s25 + $0xa0] sm:$0xff]   ;;  %v5359_v26 = vld [vmem:[%s5679_s25 + $0x98] sm:$0xff]   ;;  %v5363_v30 = vld [vmem:[%s5679_s25 + $0x90] sm:$0xff]  }
  0x18   : > { %4732 = vmatpush3.bf16.msra.mxu1 %v5347_v14  ;;  %4693 = vmatprep.subr.bf16.mxu0 %v5348_v15  ;;  %v5364_v31 = vld [vmem:[%s5679_s25 + $0x48] sm:$0xff]   ;;  %v5368_v35 = vld [vmem:[%s5679_s25 + $0x40] sm:$0xff]   ;;  %v5372_v45 = vld [vmem:[%s5679_s25 + $0x178] sm:$0xff]  }
  0x19   : > { %4733 = vmatprep.subr.bf16.mxu1 %v5349_v16  ;;  %v5365_v32 = vld [vmem:[%s5679_s25 + $0xc8] sm:$0xff]   ;;  %v5369_v38 = vld [vmem:[%s5679_s25 + $0xc0] sm:$0xff]   ;;  %v5373_v46 = vld [vmem:[%s5679_s25 + $0x1f8] sm:$0xff]  }
  0x1a   : > { %v5366_v33 = vld [vmem:[%s5679_s25 + $0x8] sm:$0xff]   ;;  %v5370_v41 = vld [vmem:[%s5679_s25] sm:$0xff]   ;;  %v5374_v48 = vld [vmem:[%s5679_s25 + $0x138] sm:$0xff]  }
  0x1b   : > { %4694 = vmatpush3.bf16.msra.mxu0 %v5350_v17  ;;  %v5367_v34 = vld [vmem:[%s5679_s25 + $0x88] sm:$0xff]   ;;  %v5371_v42 = vld [vmem:[%s5679_s25 + $0x80] sm:$0xff]   ;;  %v5375_v50 = vld [vmem:[%s5679_s25 + $0x1b8] sm:$0xff]  }
  0x1c   : > { %4734 = vmatpush3.bf16.msra.mxu1 %v5351_v18  ;;  %4695 = vmatprep.subr.bf16.mxu0 %v5352_v19  ;;  %v5376_v51 = vld [vmem:[%s5679_s25 + $0x170] sm:$0xff]   ;;  %v252_v53 = vld [vmem:[%s6695_s1 + $0x280] sm:$0xff]  ;;  %v253_v56 = vld [vmem:[%s6695_s1 + $0x288] sm:$0xff] }
  0x1d   : > { %4735 = vmatprep.subr.bf16.mxu1 %v5353_v20  ;;  %v5377_v54 = vld [vmem:[%s5679_s25 + $0x1f0] sm:$0xff]   ;;  %v5380_v61 = vld [vmem:[%s5679_s25 + $0x168] sm:$0xff]   ;;  %v4366_v63 = vcombine.high %v236_v52, %v252_v53  ;;  %v4368_v1 = vcombine.high %v237_v55, %v253_v56  ;;  %v5384_v3 = vld [vmem:[%s5679_s25 + $0x160] sm:$0xff]   ;;  %v4365_v11 = vcombine.low %v236_v52, %v252_v53  ;;  %v4367_v12 = vcombine.low %v237_v55, %v253_v56 }
  0x1e   : > { %v5378_v57 = vld [vmem:[%s5679_s25 + $0x130] sm:$0xff]   ;;  %v5381_v62 = vld [vmem:[%s5679_s25 + $0x1e8] sm:$0xff]   ;;  %v268_v4 = vld [vmem:[%s6695_s1 + $0x300] sm:$0xff] }
  0x1f   : > { %4696 = vmatpush3.bf16.msra.mxu0 %v5354_v21  ;;  %v5379_v58 = vld [vmem:[%s5679_s25 + $0x1b0] sm:$0xff]   ;;  %v5382_v0 = vld [vmem:[%s5679_s25 + $0x128] sm:$0xff]   ;;  %v284_v5 = vld [vmem:[%s6695_s1 + $0x380] sm:$0xff] }
  0x20   : > { %4736 = vmatpush3.bf16.msra.mxu1 %v5355_v22  ;;  %4697 = vmatprep.subr.bf16.mxu0 %v5356_v23  ;;  %v5383_v2 = vld [vmem:[%s5679_s25 + $0x1a8] sm:$0xff]   ;;  %v5385_v6 = vld [vmem:[%s5679_s25 + $0x1e0] sm:$0xff]   ;;  %v5388_v13 = vld [vmem:[%s5679_s25 + $0x158] sm:$0xff]   ;;  %v4398_v15 = vcombine.high %v268_v4, %v284_v5 }
  0x21   : > { %4737 = vmatprep.subr.bf16.mxu1 %v5357_v24  ;;  %v269_v7 = vld [vmem:[%s6695_s1 + $0x308] sm:$0xff]  ;;  %v5386_v9 = vld [vmem:[%s5679_s25 + $0x120] sm:$0xff]   ;;  %v5389_v14 = vld [vmem:[%s5679_s25 + $0x1d8] sm:$0xff]  }
  0x22   : > { %v285_v8 = vld [vmem:[%s6695_s1 + $0x388] sm:$0xff]  ;;  %v5387_v10 = vld [vmem:[%s5679_s25 + $0x1a0] sm:$0xff]   ;;  %v5390_v16 = vld [vmem:[%s5679_s25 + $0x118] sm:$0xff]  }
  0x23   : > { %4698 = vmatpush3.bf16.msra.mxu0 %v5358_v25  ;;  %v4400_v17 = vcombine.high %v269_v7, %v285_v8  ;;  %v5391_v18 = vld [vmem:[%s5679_s25 + $0x198] sm:$0xff]   ;;  %v5392_v19 = vld [vmem:[%s5679_s25 + $0x150] sm:$0xff]   ;;  %v4397_v25 = vcombine.low %v268_v4, %v284_v5 }
  0x24   : > { %4738 = vmatpush3.bf16.msra.mxu1 %v5359_v26  ;;  %4699 = vmatprep.subr.bf16.mxu0 %v5360_v27  ;;  %v174_v20 = vld [vmem:[%s6695_s1 + $0x10] sm:$0xff]  ;;  %v4399_v26 = vcombine.low %v269_v7, %v285_v8  ;;  %v5396_v27 = vld [vmem:[%s5679_s25 + $0x148] sm:$0xff]   ;;  %v223_v52 = vld [vmem:[%s6695_s1 + $0x198] sm:$0xff] }
  0x25   : > { %4739 = vmatprep.subr.bf16.mxu1 %v5361_v28  ;;  %v190_v21 = vld [vmem:[%s6695_s1 + $0x90] sm:$0xff]  ;;  %v5397_v28 = vld [vmem:[%s5679_s25 + $0x1c8] sm:$0xff]   ;;  %v255_v5 = vld [vmem:[%s6695_s1 + $0x298] sm:$0xff] }
  0x26   : > { %v5393_v22 = vld [vmem:[%s5679_s25 + $0x1d0] sm:$0xff]   ;;  %v4305_v36 = vcombine.low %v174_v20, %v190_v21 }
  0x27   : > { %4700 = vmatpush3.bf16.msra.mxu0 %v5362_v29  ;;  %v5394_v23 = vld [vmem:[%s5679_s25 + $0x110] sm:$0xff]   ;;  %v4306_v29 = vcombine.high %v174_v20, %v190_v21  ;;  %v271_v20 = vld [vmem:[%s6695_s1 + $0x318] sm:$0xff] }
  0x28   : > { %4740 = vmatpush3.bf16.msra.mxu1 %v5363_v30  ;;  %4701 = vmatprep.subr.bf16.mxu0 %v5364_v31  ;;  %v5395_v24 = vld [vmem:[%s5679_s25 + $0x190] sm:$0xff]   ;;  %v5398_v30 = vld [vmem:[%s5679_s25 + $0x108] sm:$0xff]   ;;  %v287_v21 = vld [vmem:[%s6695_s1 + $0x398] sm:$0xff] }
  0x29   : > { %4741 = vmatprep.subr.bf16.mxu1 %v5365_v32  ;;  %v5399_v31 = vld [vmem:[%s5679_s25 + $0x188] sm:$0xff]   ;;  %v5400_v32 = vld [vmem:[%s5679_s25 + $0x140] sm:$0xff]  }
  0x2b   : > { %4702 = vmatpush3.bf16.msra.mxu0 %v5366_v33  ;;  %v5401_v33 = vld [vmem:[%s5679_s25 + $0x1c0] sm:$0xff]  }
  0x2c   : > { %4742 = vmatpush3.bf16.msra.mxu1 %v5367_v34  ;;  %4703 = vmatprep.subr.bf16.mxu0 %v5368_v35  ;;  %v5402_v34 = vld [vmem:[%s5679_s25 + $0x100] sm:$0xff]  }
  0x2d   : > { %4743 = vmatprep.subr.bf16.mxu1 %v5369_v38  ;;  %v5403_v35 = vld [vmem:[%s5679_s25 + $0x180] sm:$0xff]   ;;  %v191_v38 = vld [vmem:[%s6695_s1 + $0x98] sm:$0xff] }
  0x2e   : > { %v4307_v39 = vcombine.low %v175_v37, %v191_v38  ;;  %v4308_v40 = vcombine.high %v175_v37, %v191_v38 }
  0x2f   : > { %4704 = vmatpush3.bf16.msra.mxu0 %v5370_v41  ;;  %v5404_v41 = vld [vmem:[%s5679_s25 + $0x278] sm:$0xff]  }
  0x30   : > { %4744 = vmatpush3.bf16.msra.mxu1 %v5371_v42  ;;  %4769 = vmatprep.subr.bf16.mxu0 %v5372_v45  ;;  %v5405_v42 = vld [vmem:[%s5679_s25 + $0x2f8] sm:$0xff]   ;;  %v5408_v45 = vld [vmem:[%s5679_s25 + $0x270] sm:$0xff]  }
  0x31   : > { %4809 = vmatprep.subr.bf16.mxu1 %v5373_v46  ;;  %v5409_v46 = vld [vmem:[%s5679_s25 + $0x2f0] sm:$0xff]  }
  0x32   : > { %3069 = vmatmul.mubr.bf16.vlgmr.msra.gmra.mxu0 %v4301_v43  ;;  %v5406_v43 = vld [vmem:[%s5679_s25 + $0x238] sm:$0xff]  }
  0x33   : > { %3134 = vmatmul.mubr.bf16.vlgmr.msra.gmra.mxu1 %v4303_v44  ;;  %4770 = vmatpush3.bf16.msra.mxu0 %v5374_v48  ;;  %v5407_v44 = vld [vmem:[%s5679_s25 + $0x2b8] sm:$0xff]   ;;  %v5411_v48 = vld [vmem:[%s5679_s25 + $0x2b0] sm:$0xff]  }
  0x34   : > { %4810 = vmatpush3.bf16.msra.mxu1 %v5375_v50  ;;  %3076 = vmatprep.mubr.bf16.mxu0 %v4334_v47  ;;  %v5410_v47 = vld [vmem:[%s5679_s25 + $0x230] sm:$0xff]  }
  0x35   : > { %4771 = vmatprep.subr.bf16.mxu0 %v5376_v51  ;;  %3141 = vmatprep.mubr.bf16.mxu1 %v4336_v49  ;;  %v206_v49 = vld [vmem:[%s6695_s1 + $0x110] sm:$0xff]  ;;  %v207_v51 = vld [vmem:[%s6695_s1 + $0x118] sm:$0xff] }
  0x36   : > { %4811 = vmatprep.subr.bf16.mxu1 %v5377_v54  ;;  %v222_v50 = vld [vmem:[%s6695_s1 + $0x190] sm:$0xff]  ;;  %v4340_v54 = vcombine.high %v207_v51, %v223_v52  ;;  %v4339_v56 = vcombine.low %v207_v51, %v223_v52  ;;  %v209_v51 = vld [vmem:[%s6695_s1 + $0x128] sm:$0xff] }
  0x37   : > { %4772 = vmatpush3.bf16.msra.mxu0 %v5378_v57  ;;  %v4338_v53 = vcombine.high %v206_v49, %v222_v50  ;;  %v4337_v55 = vcombine.low %v206_v49, %v222_v50  ;;  %v5412_v57 = vld [vmem:[%s5679_s25 + $0x268] sm:$0xff]   ;;  %v208_v49 = vld [vmem:[%s6695_s1 + $0x120] sm:$0xff] }
  0x38   : > { %4812 = vmatpush3.bf16.msra.mxu1 %v5379_v58  ;;  %4773 = vmatprep.subr.bf16.mxu0 %v5380_v61  ;;  %v5413_v58 = vld [vmem:[%s5679_s25 + $0x2e8] sm:$0xff]   ;;  %v5416_v61 = vld [vmem:[%s5679_s25 + $0x260] sm:$0xff]  }
  0x39   : > { %4813 = vmatprep.subr.bf16.mxu1 %v5381_v62  ;;  %v5417_v62 = vld [vmem:[%s5679_s25 + $0x2e0] sm:$0xff]  }
  0x3a   : > { %3077 = vmatmul.mubr.bf16.gmra.mxu0 %v4333_v59  ;;  %v5414_v59 = vld [vmem:[%s5679_s25 + $0x228] sm:$0xff]   ;;  %v224_v50 = vld [vmem:[%s6695_s1 + $0x1a0] sm:$0xff] }
  0x3b   : > { %3142 = vmatmul.mubr.bf16.gmra.mxu1 %v4335_v60  ;;  %4774 = vmatpush3.bf16.msra.mxu0 %v5382_v0  ;;  %v5415_v60 = vld [vmem:[%s5679_s25 + $0x2a8] sm:$0xff]   ;;  %v5419_v0 = vld [vmem:[%s5679_s25 + $0x2a0] sm:$0xff]   ;;  %v4342_v52 = vcombine.high %v208_v49, %v224_v50 }
  0x3c   : > { %4814 = vmatpush3.bf16.msra.mxu1 %v5383_v2  ;;  %3084 = vmatprep.mubr.bf16.mxu0 %v4366_v63  ;;  %v5418_v63 = vld [vmem:[%s5679_s25 + $0x220] sm:$0xff]   ;;  %v254_v2 = vld [vmem:[%s6695_s1 + $0x290] sm:$0xff] }
  0x3d   : > { %4775 = vmatprep.subr.bf16.mxu0 %v5384_v3  ;;  %3149 = vmatprep.mubr.bf16.mxu1 %v4368_v1  ;;  %v238_v1 = vld [vmem:[%s6695_s1 + $0x210] sm:$0xff]  ;;  %v239_v3 = vld [vmem:[%s6695_s1 + $0x218] sm:$0xff] }
  0x3e   : > { %4815 = vmatprep.subr.bf16.mxu1 %v5385_v6  ;;  %v4370_v4 = vcombine.high %v238_v1, %v254_v2  ;;  %v4369_v6 = vcombine.low %v238_v1, %v254_v2  ;;  %v4372_v7 = vcombine.high %v239_v3, %v255_v5  ;;  %v4371_v8 = vcombine.low %v239_v3, %v255_v5  ;;  %v5450_v1 = vld [vmem:[%s5679_s25 + $0x320] sm:$0xff]   ;;  %v241_v5 = vld [vmem:[%s6695_s1 + $0x228] sm:$0xff] }
  0x3f   : > { %4776 = vmatpush3.bf16.msra.mxu0 %v5386_v9  ;;  %v5420_v9 = vld [vmem:[%s5679_s25 + $0x258] sm:$0xff]   ;;  %v5451_v2 = vld [vmem:[%s5679_s25 + $0x3a0] sm:$0xff]  }
  0x40   : > { %4816 = vmatpush3.bf16.msra.mxu1 %v5387_v10  ;;  %4777 = vmatprep.subr.bf16.mxu0 %v5388_v13  ;;  %v5421_v10 = vld [vmem:[%s5679_s25 + $0x2d8] sm:$0xff]   ;;  %v5424_v13 = vld [vmem:[%s5679_s25 + $0x250] sm:$0xff]   ;;  %v240_v3 = vld [vmem:[%s6695_s1 + $0x220] sm:$0xff] }
  0x41   : > { %4817 = vmatprep.subr.bf16.mxu1 %v5389_v14  ;;  %v5425_v14 = vld [vmem:[%s5679_s25 + $0x2d0] sm:$0xff]  }
  0x42   : > { %3085 = vmatmul.mubr.bf16.gmra.mxu0 %v4365_v11  ;;  %v5422_v11 = vld [vmem:[%s5679_s25 + $0x218] sm:$0xff]  }
  0x43   : > { %3150 = vmatmul.mubr.bf16.gmra.mxu1 %v4367_v12  ;;  %4778 = vmatpush3.bf16.msra.mxu0 %v5390_v16  ;;  %v5423_v12 = vld [vmem:[%s5679_s25 + $0x298] sm:$0xff]   ;;  %v5427_v16 = vld [vmem:[%s5679_s25 + $0x290] sm:$0xff]  }
  0x44   : > { %4818 = vmatpush3.bf16.msra.mxu1 %v5391_v18  ;;  %3092 = vmatprep.mubr.bf16.mxu0 %v4398_v15  ;;  %v5426_v15 = vld [vmem:[%s5679_s25 + $0x210] sm:$0xff]  }
  0x45   : > { %4779 = vmatprep.subr.bf16.mxu0 %v5392_v19  ;;  %3157 = vmatprep.mubr.bf16.mxu1 %v4400_v17  ;;  %v270_v17 = vld [vmem:[%s6695_s1 + $0x310] sm:$0xff] }
  0x46   : > { %4819 = vmatprep.subr.bf16.mxu1 %v5393_v22  ;;  %v286_v18 = vld [vmem:[%s6695_s1 + $0x390] sm:$0xff] }
  0x47   : > { %4780 = vmatpush3.bf16.msra.mxu0 %v5394_v23  ;;  %v4402_v19 = vcombine.high %v270_v17, %v286_v18  ;;  %v4401_v22 = vcombine.low %v270_v17, %v286_v18  ;;  %v4404_v23 = vcombine.high %v271_v20, %v287_v21  ;;  %v5457_v17 = vld [vmem:[%s5679_s25 + $0x3d0] sm:$0xff]   ;;  %v815_v18 = vld [vmem:[%s6696_s2 + $0x18] sm:$0xff] }
  0x48   : > { %4820 = vmatpush3.bf16.msra.mxu1 %v5395_v24  ;;  %4781 = vmatprep.subr.bf16.mxu0 %v5396_v27  ;;  %v4403_v24 = vcombine.low %v271_v20, %v287_v21  ;;  %v5430_v27 = vld [vmem:[%s5679_s25 + $0x208] sm:$0xff]   ;;  %v5459_v20 = vld [vmem:[%s5679_s25 + $0x390] sm:$0xff]   ;;  %v272_v21 = vld [vmem:[%s6695_s1 + $0x320] sm:$0xff] }
  0x49   : > { %4821 = vmatprep.subr.bf16.mxu1 %v5397_v28  ;;  %v5431_v28 = vld [vmem:[%s5679_s25 + $0x288] sm:$0xff]  }
  0x4a   : > { %3093 = vmatmul.mubr.bf16.gmra.mxu0 %v4397_v25  ;;  %v5428_v25 = vld [vmem:[%s5679_s25 + $0x248] sm:$0xff]  }
  0x4b   : > { %3158 = vmatmul.mubr.bf16.gmra.mxu1 %v4399_v26  ;;  %4782 = vmatpush3.bf16.msra.mxu0 %v5398_v30  ;;  %v5429_v26 = vld [vmem:[%s5679_s25 + $0x2c8] sm:$0xff]   ;;  %v5433_v30 = vld [vmem:[%s5679_s25 + $0x2c0] sm:$0xff]  }
  0x4c   : > { %4822 = vmatpush3.bf16.msra.mxu1 %v5399_v31  ;;  %3198 = vmatprep.mubr.bf16.mxu0 %v4306_v29  ;;  %v5432_v29 = vld [vmem:[%s5679_s25 + $0x240] sm:$0xff]  }
  0x4d   : > { %4783 = vmatprep.subr.bf16.mxu0 %v5400_v32  ;;  %4823 = vmatprep.subr.bf16.mxu1 %v5401_v33  ;;  %v5434_v31 = vld [vmem:[%s5679_s25 + $0x200] sm:$0xff]  }
  0x4e   : > { %3263 = vmatprep.mubr.bf16.mxu1 %v4308_v40  ;;  %v5435_v32 = vld [vmem:[%s5679_s25 + $0x280] sm:$0xff]  }
  0x4f   : > { %4784 = vmatpush3.bf16.msra.mxu0 %v5402_v34  ;;  %v176_v33 = vld [vmem:[%s6695_s1 + $0x20] sm:$0xff] }
  0x50   : > { %4824 = vmatpush3.bf16.msra.mxu1 %v5403_v35  ;;  %4849 = vmatprep.subr.bf16.mxu0 %v5404_v41  ;;  %v192_v34 = vld [vmem:[%s6695_s1 + $0xa0] sm:$0xff]  ;;  %v177_v35 = vld [vmem:[%s6695_s1 + $0x28] sm:$0xff]  ;;  %v5436_v41 = vld [vmem:[%s5679_s25 + $0x378] sm:$0xff]  }
  0x51   : > { %4889 = vmatprep.subr.bf16.mxu1 %v5405_v42  ;;  %v4309_v37 = vcombine.low %v176_v33, %v192_v34  ;;  %v4310_v38 = vcombine.high %v176_v33, %v192_v34  ;;  %v5437_v42 = vld [vmem:[%s5679_s25 + $0x3f8] sm:$0xff]   ;;  %v5463_v33 = vld [vmem:[%s5679_s25 + $0x388] sm:$0xff]   ;;  %v5464_v34 = vld [vmem:[%s5679_s25 + $0x340] sm:$0xff]  }
  0x52   : > { %3199 = vmatmul.mubr.bf16.vlgmr.msra.gmra.mxu0 %v4305_v36  ;;  %v193_v36 = vld [vmem:[%s6695_s1 + $0xa8] sm:$0xff] }
  0x53   : > { %3264 = vmatmul.mubr.bf16.vlgmr.msra.gmra.mxu1 %v4307_v39  ;;  %4850 = vmatpush3.bf16.msra.mxu0 %v5406_v43  ;;  %v4311_v39 = vcombine.low %v177_v35, %v193_v36  ;;  %v4312_v40 = vcombine.high %v177_v35, %v193_v36  ;;  %v5438_v43 = vld [vmem:[%s5679_s25 + $0x338] sm:$0xff]   ;;  %v5465_v35 = vld [vmem:[%s5679_s25 + $0x3c0] sm:$0xff]   ;;  %v817_v36 = vld [vmem:[%s6696_s2 + $0x28] sm:$0xff] }
  0x54   : > { %4890 = vmatpush3.bf16.msra.mxu1 %v5407_v44  ;;  %4851 = vmatprep.subr.bf16.mxu0 %v5408_v45  ;;  %v5439_v44 = vld [vmem:[%s5679_s25 + $0x3b8] sm:$0xff]   ;;  %v5440_v45 = vld [vmem:[%s5679_s25 + $0x370] sm:$0xff]  }
  0x55   : > { %4891 = vmatprep.subr.bf16.mxu1 %v5409_v46  ;;  %3206 = vmatprep.mubr.bf16.mxu0 %v4338_v53  ;;  %v5441_v46 = vld [vmem:[%s5679_s25 + $0x3f0] sm:$0xff]   ;;  %v225_v53 = vld [vmem:[%s6695_s1 + $0x1a8] sm:$0xff] }
  0x56   : > { %3271 = vmatprep.mubr.bf16.mxu1 %v4340_v54  ;;  %v4341_v54 = vcombine.low %v208_v49, %v224_v50  ;;  %v818_v49 = vld [vmem:[%s6696_s2 + $0x30] sm:$0xff]  ;;  %v5470_v50 = vld [vmem:[%s5679_s25 + $0x438] sm:$0xff]  }
  0x57   : > { %4852 = vmatpush3.bf16.msra.mxu0 %v5410_v47  ;;  %v5442_v47 = vld [vmem:[%s5679_s25 + $0x330] sm:$0xff]  }
  0x58   : > { %4892 = vmatpush3.bf16.msra.mxu1 %v5411_v48  ;;  %4853 = vmatprep.subr.bf16.mxu0 %v5412_v57  ;;  %v5443_v48 = vld [vmem:[%s5679_s25 + $0x3b0] sm:$0xff]   ;;  %v5444_v57 = vld [vmem:[%s5679_s25 + $0x368] sm:$0xff]  }
  0x59   : > { %4893 = vmatprep.subr.bf16.mxu1 %v5413_v58  ;;  %v5445_v58 = vld [vmem:[%s5679_s25 + $0x3e8] sm:$0xff]  }
  0x5a   : > { %3207 = vmatmul.mubr.bf16.gmra.mxu0 %v4337_v55  ;;  %v4344_v55 = vcombine.high %v209_v51, %v225_v53 }
  0x5b   : > { %3272 = vmatmul.mubr.bf16.gmra.mxu1 %v4339_v56  ;;  %4854 = vmatpush3.bf16.msra.mxu0 %v5414_v59  ;;  %v4343_v56 = vcombine.low %v209_v51, %v225_v53  ;;  %v812_v59 = vld [vmem:[%s6696_s2] sm:$0xff]  ;;  %v5471_v51 = vld [vmem:[%s5679_s25 + $0x4b8] sm:$0xff]   ;;  %v5473_v53 = vld [vmem:[%s5679_s25 + $0x4f0] sm:$0xff]  }
  0x5c   : > { %4894 = vmatpush3.bf16.msra.mxu1 %v5415_v60  ;;  %4855 = vmatprep.subr.bf16.mxu0 %v5416_v61  ;;  %v5446_v60 = vld [vmem:[%s5679_s25 + $0x328] sm:$0xff]  }
  0x5d   : > { %4895 = vmatprep.subr.bf16.mxu1 %v5417_v62  ;;  %3214 = vmatprep.mubr.bf16.mxu0 %v4370_v4  ;;  %v5447_v61 = vld [vmem:[%s5679_s25 + $0x3a8] sm:$0xff]   ;;  %v5448_v62 = vld [vmem:[%s5679_s25 + $0x360] sm:$0xff]  }
  0x5e   : > { %3279 = vmatprep.mubr.bf16.mxu1 %v4372_v7  ;;  %822 = vperm.xlu0 %5338, %v812_v59   ;;  %v256_v4 = vld [vmem:[%s6695_s1 + $0x2a0] sm:$0xff]  ;;  %v257_v7 = vld [vmem:[%s6695_s1 + $0x2a8] sm:$0xff]  ;;  %v211_v59 = vld [vmem:[%s6695_s1 + $0x138] sm:$0xff] }
  0x5f   : > { %4856 = vmatpush3.bf16.msra.mxu0 %v5418_v63  ;;  %v5449_v63 = vld [vmem:[%s5679_s25 + $0x3e0] sm:$0xff]  }
  0x60   : > { %4896 = vmatpush3.bf16.msra.mxu1 %v5419_v0  ;;  %4857 = vmatprep.subr.bf16.mxu0 %v5420_v9  ;;  %v813_v0 = vld [vmem:[%s6696_s2 + $0x8] sm:$0xff]  ;;  %v4376_v9 = vcombine.high %v241_v5, %v257_v7 }
  0x61   : > { %4897 = vmatprep.subr.bf16.mxu1 %v5421_v10  ;;  %v4375_v10 = vcombine.low %v241_v5, %v257_v7  ;;  %v5480_v5 = vld [vmem:[%s5679_s25 + $0x460] sm:$0xff]  }
  0x62   : > { %3215 = vmatmul.mubr.bf16.gmra.mxu0 %v4369_v6  ;;  %827 = vperm.xlu0 %5338, %v813_v0   ;;  %v4374_v6 = vcombine.high %v240_v3, %v256_v4  ;;  %v5482_v7 = vld [vmem:[%s5679_s25 + $0x420] sm:$0xff]  }
  0x63   : > { %3280 = vmatmul.mubr.bf16.gmra.mxu1 %v4371_v8  ;;  %4858 = vmatpush3.bf16.msra.mxu0 %v5422_v11  ;;  %v4373_v8 = vcombine.low %v240_v3, %v256_v4  ;;  %v5452_v11 = vld [vmem:[%s5679_s25 + $0x358] sm:$0xff]   ;;  %v5478_v3 = vld [vmem:[%s5679_s25 + $0x428] sm:$0xff]  }
  0x64   : > { %4898 = vmatpush3.bf16.msra.mxu1 %v5423_v12  ;;  %4859 = vmatprep.subr.bf16.mxu0 %v5424_v13  ;;  %v5453_v12 = vld [vmem:[%s5679_s25 + $0x3d8] sm:$0xff]   ;;  %v814_v13 = vld [vmem:[%s6696_s2 + $0x10] sm:$0xff]  ;;  %v5479_v4 = vld [vmem:[%s5679_s25 + $0x4a8] sm:$0xff]  }
  0x65   : > { %4899 = vmatprep.subr.bf16.mxu1 %v5425_v14  ;;  %3222 = vmatprep.mubr.bf16.mxu0 %v4402_v19  ;;  %v5454_v14 = vld [vmem:[%s5679_s25 + $0x318] sm:$0xff]   ;;  %v5458_v19 = vld [vmem:[%s5679_s25 + $0x310] sm:$0xff]  }
  0x66   : > { %3287 = vmatprep.mubr.bf16.mxu1 %v4404_v23  ;;  %832 = vperm.xlu1 %5339, %v814_v13   ;;  %v273_v23 = vld [vmem:[%s6695_s1 + $0x328] sm:$0xff]  ;;  %v259_v13 = vld [vmem:[%s6695_s1 + $0x2b8] sm:$0xff] }
  0x67   : > { %4860 = vmatpush3.bf16.msra.mxu0 %v5426_v15  ;;  %v5455_v15 = vld [vmem:[%s5679_s25 + $0x398] sm:$0xff]  }
  0x68   : > { %4900 = vmatpush3.bf16.msra.mxu1 %v5427_v16  ;;  %4861 = vmatprep.subr.bf16.mxu0 %v5428_v25  ;;  %v5456_v16 = vld [vmem:[%s5679_s25 + $0x350] sm:$0xff]   ;;  %v289_v25 = vld [vmem:[%s6695_s1 + $0x3a8] sm:$0xff] }
  0x69   : > { %4901 = vmatprep.subr.bf16.mxu1 %v5429_v26 }
  0x6a   : > { %3223 = vmatmul.mubr.bf16.gmra.mxu0 %v4401_v22  ;;  %837 = vperm.xlu1 %5339, %v815_v18   ;;  %v288_v22 = vld [vmem:[%s6695_s1 + $0x3a0] sm:$0xff]  ;;  %v5485_v18 = vld [vmem:[%s5679_s25 + $0x4d8] sm:$0xff]  }
  0x6b   : > { %3288 = vmatmul.mubr.bf16.gmra.mxu1 %v4403_v24  ;;  %4862 = vmatpush3.bf16.msra.mxu0 %v5430_v27  ;;  %v4406_v24 = vcombine.high %v272_v21, %v288_v22  ;;  %v4405_v26 = vcombine.low %v272_v21, %v288_v22  ;;  %v4408_v27 = vcombine.high %v273_v23, %v289_v25  ;;  %v5488_v21 = vld [vmem:[%s5679_s25 + $0x450] sm:$0xff]  }
  0x6c   : > { %4902 = vmatpush3.bf16.msra.mxu1 %v5431_v28  ;;  %4863 = vmatprep.subr.bf16.mxu0 %v5432_v29  ;;  %v4407_v28 = vcombine.low %v273_v23, %v289_v25  ;;  %v5460_v29 = vld [vmem:[%s5679_s25 + $0x348] sm:$0xff]   ;;  %v5489_v22 = vld [vmem:[%s5679_s25 + $0x4d0] sm:$0xff]  }
  0x6d   : > { %4903 = vmatprep.subr.bf16.mxu1 %v5433_v30  ;;  %3328 = vmatprep.mubr.bf16.mxu0 %v4310_v38  ;;  %v5461_v30 = vld [vmem:[%s5679_s25 + $0x3c8] sm:$0xff]   ;;  %v5467_v38 = vld [vmem:[%s5679_s25 + $0x380] sm:$0xff]   ;;  %v5490_v23 = vld [vmem:[%s5679_s25 + $0x410] sm:$0xff]  }
  0x6e   : > { %3393 = vmatprep.mubr.bf16.mxu1 %v4312_v40  ;;  %847 = vperm.xlu1 %5339, %v817_v36   ;;  %v194_v40 = vld [vmem:[%s6695_s1 + $0xb0] sm:$0xff]  ;;  %v5495_v36 = vld [vmem:[%s5679_s25 + $0x488] sm:$0xff]  }
  0x6f   : > { %4864 = vmatpush3.bf16.msra.mxu0 %v5434_v31  ;;  %v816_v31 = vld [vmem:[%s6696_s2 + $0x20] sm:$0xff]  ;;  %v274_v25 = vld [vmem:[%s6695_s1 + $0x330] sm:$0xff] }
  0x70   : > { %4904 = vmatpush3.bf16.msra.mxu1 %v5435_v32  ;;  %4929 = vmatprep.subr.bf16.mxu0 %v5436_v41  ;;  %v5462_v32 = vld [vmem:[%s5679_s25 + $0x308] sm:$0xff]   ;;  %v179_v41 = vld [vmem:[%s6695_s1 + $0x38] sm:$0xff] }
  0x71   : > { %4969 = vmatprep.subr.bf16.mxu1 %v5437_v42  ;;  %842 = vperm.xlu0 %5338, %v816_v31  }
  0x72   : > { %3329 = vmatmul.mubr.bf16.vlgmr.msra.gmra.mxu0 %v4309_v37  ;;  %v5466_v37 = vld [vmem:[%s5679_s25 + $0x300] sm:$0xff]  }
  0x73   : > { %3394 = vmatmul.mubr.bf16.vlgmr.msra.gmra.mxu1 %v4311_v39  ;;  %4930 = vmatpush3.bf16.msra.mxu0 %v5438_v43  ;;  %v178_v39 = vld [vmem:[%s6695_s1 + $0x30] sm:$0xff] }
  0x74   : > { %4970 = vmatpush3.bf16.msra.mxu1 %v5439_v44  ;;  %4931 = vmatprep.subr.bf16.mxu0 %v5440_v45  ;;  %v4313_v42 = vcombine.low %v178_v39, %v194_v40  ;;  %v4314_v43 = vcombine.high %v178_v39, %v194_v40  ;;  %v195_v44 = vld [vmem:[%s6695_s1 + $0xb8] sm:$0xff]  ;;  %v5498_v39 = vld [vmem:[%s5679_s25 + $0x400] sm:$0xff]  }
  0x75   : > { %4971 = vmatprep.subr.bf16.mxu1 %v5441_v46  ;;  %3336 = vmatprep.mubr.bf16.mxu0 %v4342_v52  ;;  %v4315_v45 = vcombine.low %v179_v41, %v195_v44  ;;  %v4316_v46 = vcombine.high %v179_v41, %v195_v44  ;;  %v5472_v52 = vld [vmem:[%s5679_s25 + $0x470] sm:$0xff]   ;;  %v5499_v40 = vld [vmem:[%s5679_s25 + $0x480] sm:$0xff]  }
  0x76   : > { %3401 = vmatprep.mubr.bf16.mxu1 %v4344_v55  ;;  %852 = vperm.xlu0 %5338, %v818_v49   ;;  %v5474_v55 = vld [vmem:[%s5679_s25 + $0x430] sm:$0xff]   ;;  %v180_v41 = vld [vmem:[%s6695_s1 + $0x40] sm:$0xff]  ;;  %v5500_v49 = vld [vmem:[%s5679_s25 + $0x578] sm:$0xff]  }
  0x77   : > { %4932 = vmatpush3.bf16.msra.mxu0 %v5442_v47  ;;  %v5468_v47 = vld [vmem:[%s5679_s25 + $0x478] sm:$0xff]  }
  0x78   : > { %4972 = vmatpush3.bf16.msra.mxu1 %v5443_v48  ;;  %4933 = vmatprep.subr.bf16.mxu0 %v5444_v57  ;;  %v5469_v48 = vld [vmem:[%s5679_s25 + $0x4f8] sm:$0xff]   ;;  %v210_v57 = vld [vmem:[%s6695_s1 + $0x130] sm:$0xff] }
  0x79   : > { %4973 = vmatprep.subr.bf16.mxu1 %v5445_v58  ;;  %v226_v58 = vld [vmem:[%s6695_s1 + $0x1b0] sm:$0xff] }
  0x7a   : > { %3337 = vmatmul.mubr.bf16.gmra.mxu0 %v4341_v54  ;;  %v819_v54 = vld [vmem:[%s6696_s2 + $0x38] sm:$0xff] }
  0x7b   : > { %3402 = vmatmul.mubr.bf16.gmra.mxu1 %v4343_v56  ;;  %4934 = vmatpush3.bf16.msra.mxu0 %v5446_v60  ;;  %v5475_v56 = vld [vmem:[%s5679_s25 + $0x4b0] sm:$0xff]   ;;  %v4346_v60 = vcombine.high %v210_v57, %v226_v58 }
  0x7c   : > { %4974 = vmatpush3.bf16.msra.mxu1 %v5447_v61  ;;  %4935 = vmatprep.subr.bf16.mxu0 %v5448_v62  ;;  %v227_v61 = vld [vmem:[%s6695_s1 + $0x1b8] sm:$0xff]  ;;  %v4345_v62 = vcombine.low %v210_v57, %v226_v58  ;;  %v212_v57 = vld [vmem:[%s6695_s1 + $0x140] sm:$0xff] }
  0x7d   : > { %4975 = vmatprep.subr.bf16.mxu1 %v5449_v63  ;;  %3344 = vmatprep.mubr.bf16.mxu0 %v4374_v6  ;;  %v4348_v63 = vcombine.high %v211_v59, %v227_v61  ;;  %v4347_v0 = vcombine.low %v211_v59, %v227_v61  ;;  %v5481_v6 = vld [vmem:[%s5679_s25 + $0x4e0] sm:$0xff]   ;;  %v229_v61 = vld [vmem:[%s6695_s1 + $0x1c8] sm:$0xff] }
  0x7e   : > { %3409 = vmatprep.mubr.bf16.mxu1 %v4376_v9  ;;  %857 = vperm.xlu1 %5339, %v819_v54   ;;  %v242_v9 = vld [vmem:[%s6695_s1 + $0x230] sm:$0xff]  ;;  %v228_v58 = vld [vmem:[%s6695_s1 + $0x1c0] sm:$0xff] }
  0x7f   : > { %4936 = vmatpush3.bf16.msra.mxu0 %v5450_v1  ;;  %v5476_v1 = vld [vmem:[%s5679_s25 + $0x468] sm:$0xff]   ;;  %v5505_v54 = vld [vmem:[%s5679_s25 + $0x5f0] sm:$0xff]   ;;  %v4350_v59 = vcombine.high %v212_v57, %v228_v58 }
  0x80   : > { %4976 = vmatpush3.bf16.msra.mxu1 %v5451_v2  ;;  %4937 = vmatprep.subr.bf16.mxu0 %v5452_v11  ;;  %v5477_v2 = vld [vmem:[%s5679_s25 + $0x4e8] sm:$0xff]  }
  0x81   : > { %4977 = vmatprep.subr.bf16.mxu1 %v5453_v12  ;;  %v243_v12 = vld [vmem:[%s6695_s1 + $0x238] sm:$0xff] }
  0x82   : > { %3345 = vmatmul.mubr.bf16.gmra.mxu0 %v4373_v8  ;;  %v5483_v8 = vld [vmem:[%s5679_s25 + $0x4a0] sm:$0xff]  }
  0x83   : > { %3410 = vmatmul.mubr.bf16.gmra.mxu1 %v4375_v10  ;;  %4938 = vmatpush3.bf16.msra.mxu0 %v5454_v14  ;;  %v258_v10 = vld [vmem:[%s6695_s1 + $0x2b0] sm:$0xff] }
  0x84   : > { %4978 = vmatpush3.bf16.msra.mxu1 %v5455_v15  ;;  %4939 = vmatprep.subr.bf16.mxu0 %v5456_v16  ;;  %v4378_v11 = vcombine.high %v242_v9, %v258_v10  ;;  %v4377_v14 = vcombine.low %v242_v9, %v258_v10  ;;  %v4380_v15 = vcombine.high %v243_v12, %v259_v13  ;;  %v244_v9 = vld [vmem:[%s6695_s1 + $0x240] sm:$0xff] }
  0x85   : > { %4979 = vmatprep.subr.bf16.mxu1 %v5457_v17  ;;  %3352 = vmatprep.mubr.bf16.mxu0 %v4406_v24  ;;  %v4379_v16 = vcombine.low %v243_v12, %v259_v13  ;;  %v5484_v17 = vld [vmem:[%s5679_s25 + $0x458] sm:$0xff]   ;;  %v5491_v24 = vld [vmem:[%s5679_s25 + $0x490] sm:$0xff]   ;;  %v260_v10 = vld [vmem:[%s6695_s1 + $0x2c0] sm:$0xff] }
  0x86   : > { %3417 = vmatprep.mubr.bf16.mxu1 %v4408_v27  ;;  %v275_v27 = vld [vmem:[%s6695_s1 + $0x338] sm:$0xff]  ;;  %v261_v12 = vld [vmem:[%s6695_s1 + $0x2c8] sm:$0xff]  ;;  %v4382_v13 = vcombine.high %v244_v9, %v260_v10 }
  0x87   : > { %4940 = vmatpush3.bf16.msra.mxu0 %v5458_v19  ;;  %v5486_v19 = vld [vmem:[%s5679_s25 + $0x418] sm:$0xff]  }
  0x88   : > { %4980 = vmatpush3.bf16.msra.mxu1 %v5459_v20  ;;  %4941 = vmatprep.subr.bf16.mxu0 %v5460_v29  ;;  %v5487_v20 = vld [vmem:[%s5679_s25 + $0x498] sm:$0xff]  }
  0x89   : > { %4981 = vmatprep.subr.bf16.mxu1 %v5461_v30 }
  0x8a   : > { %3353 = vmatmul.mubr.bf16.gmra.mxu0 %v4405_v26  ;;  %v290_v26 = vld [vmem:[%s6695_s1 + $0x3b0] sm:$0xff] }
  0x8b   : > { %3418 = vmatmul.mubr.bf16.gmra.mxu1 %v4407_v28  ;;  %4942 = vmatpush3.bf16.msra.mxu0 %v5462_v32  ;;  %v291_v28 = vld [vmem:[%s6695_s1 + $0x3b8] sm:$0xff]  ;;  %v4410_v29 = vcombine.high %v274_v25, %v290_v26  ;;  %v4409_v31 = vcombine.low %v274_v25, %v290_v26  ;;  %v276_v25 = vld [vmem:[%s6695_s1 + $0x340] sm:$0xff] }
  0x8c   : > { %4982 = vmatpush3.bf16.msra.mxu1 %v5463_v33  ;;  %4943 = vmatprep.subr.bf16.mxu0 %v5464_v34  ;;  %v4412_v30 = vcombine.high %v275_v27, %v291_v28  ;;  %v4411_v32 = vcombine.low %v275_v27, %v291_v28  ;;  %v5492_v33 = vld [vmem:[%s5679_s25 + $0x448] sm:$0xff]   ;;  %v292_v26 = vld [vmem:[%s6695_s1 + $0x3c0] sm:$0xff] }
  0x8d   : > { %4983 = vmatprep.subr.bf16.mxu1 %v5465_v35  ;;  %3458 = vmatprep.mubr.bf16.mxu0 %v4314_v43  ;;  %v5493_v34 = vld [vmem:[%s5679_s25 + $0x4c8] sm:$0xff]   ;;  %v4414_v28 = vcombine.high %v276_v25, %v292_v26 }
  0x8e   : > { %3523 = vmatprep.mubr.bf16.mxu1 %v4316_v46  ;;  %v5494_v35 = vld [vmem:[%s5679_s25 + $0x408] sm:$0xff]  }
  0x8f   : > { %4944 = vmatpush3.bf16.msra.mxu0 %v5466_v37  ;;  %v5496_v37 = vld [vmem:[%s5679_s25 + $0x440] sm:$0xff]   ;;  %v181_v43 = vld [vmem:[%s6695_s1 + $0x48] sm:$0xff] }
  0x90   : > { %4984 = vmatpush3.bf16.msra.mxu1 %v5467_v38  ;;  %5009 = vmatprep.subr.bf16.mxu0 %v5468_v47  ;;  %v5497_v38 = vld [vmem:[%s5679_s25 + $0x4c0] sm:$0xff]   ;;  %v197_v46 = vld [vmem:[%s6695_s1 + $0xc8] sm:$0xff] }
  0x91   : > { %5049 = vmatprep.subr.bf16.mxu1 %v5469_v48  ;;  %v4319_v47 = vcombine.low %v181_v43, %v197_v46  ;;  %v4320_v48 = vcombine.high %v181_v43, %v197_v46  ;;  %v277_v27 = vld [vmem:[%s6695_s1 + $0x348] sm:$0xff]  ;;  %v199_v46 = vld [vmem:[%s6695_s1 + $0xd8] sm:$0xff] }
  0x92   : > { %3459 = vmatmul.mubr.bf16.vlgmr.msra.gmra.mxu0 %v4313_v42  ;;  %v196_v42 = vld [vmem:[%s6695_s1 + $0xc0] sm:$0xff] }
  0x93   : > { %3524 = vmatmul.mubr.bf16.vlgmr.msra.gmra.mxu1 %v4315_v45  ;;  %5010 = vmatpush3.bf16.msra.mxu0 %v5470_v50  ;;  %v4317_v44 = vcombine.low %v180_v41, %v196_v42  ;;  %v4318_v45 = vcombine.high %v180_v41, %v196_v42  ;;  %v5501_v50 = vld [vmem:[%s5679_s25 + $0x5f8] sm:$0xff]   ;;  %v182_v41 = vld [vmem:[%s6695_s1 + $0x50] sm:$0xff] }
  0x94   : > { %5050 = vmatpush3.bf16.msra.mxu1 %v5471_v51  ;;  %5011 = vmatprep.subr.bf16.mxu0 %v5472_v52  ;;  %v5502_v51 = vld [vmem:[%s5679_s25 + $0x538] sm:$0xff]   ;;  %v198_v42 = vld [vmem:[%s6695_s1 + $0xd0] sm:$0xff] }
  0x95   : > { %5051 = vmatprep.subr.bf16.mxu1 %v5473_v53  ;;  %3466 = vmatprep.mubr.bf16.mxu0 %v4346_v60  ;;  %v5503_v52 = vld [vmem:[%s5679_s25 + $0x5b8] sm:$0xff]   ;;  %v5504_v53 = vld [vmem:[%s5679_s25 + $0x570] sm:$0xff]   ;;  %v213_v60 = vld [vmem:[%s6695_s1 + $0x148] sm:$0xff]  ;;  %v4321_v43 = vcombine.low %v182_v41, %v198_v42 }
  0x96   : > { %3531 = vmatprep.mubr.bf16.mxu1 %v4348_v63  ;;  %v4352_v63 = vcombine.high %v213_v60, %v229_v61 }
  0x97   : > { %5012 = vmatpush3.bf16.msra.mxu0 %v5474_v55  ;;  %v5506_v55 = vld [vmem:[%s5679_s25 + $0x530] sm:$0xff]  }
  0x98   : > { %5052 = vmatpush3.bf16.msra.mxu1 %v5475_v56  ;;  %5013 = vmatprep.subr.bf16.mxu0 %v5476_v1  ;;  %v5507_v56 = vld [vmem:[%s5679_s25 + $0x5b0] sm:$0xff]   ;;  %v5508_v1 = vld [vmem:[%s5679_s25 + $0x568] sm:$0xff]  }
  0x99   : > { %5053 = vmatprep.subr.bf16.mxu1 %v5477_v2  ;;  %v5509_v2 = vld [vmem:[%s5679_s25 + $0x5e8] sm:$0xff]  }
  0x9a   : > { %3467 = vmatmul.mubr.bf16.gmra.mxu0 %v4345_v62  ;;  %v4349_v62 = vcombine.low %v212_v57, %v228_v58  ;;  %v214_v57 = vld [vmem:[%s6695_s1 + $0x150] sm:$0xff] }
  0x9b   : > { %3532 = vmatmul.mubr.bf16.gmra.mxu1 %v4347_v0  ;;  %5014 = vmatpush3.bf16.msra.mxu0 %v5478_v3  ;;  %v4351_v0 = vcombine.low %v213_v60, %v229_v61  ;;  %v5510_v3 = vld [vmem:[%s5679_s25 + $0x528] sm:$0xff]   ;;  %v230_v58 = vld [vmem:[%s6695_s1 + $0x1d0] sm:$0xff]  ;;  %v231_v60 = vld [vmem:[%s6695_s1 + $0x1d8] sm:$0xff] }
  0x9c   : > { %5054 = vmatpush3.bf16.msra.mxu1 %v5479_v4  ;;  %5015 = vmatprep.subr.bf16.mxu0 %v5480_v5  ;;  %v5511_v4 = vld [vmem:[%s5679_s25 + $0x5a8] sm:$0xff]   ;;  %v5512_v5 = vld [vmem:[%s5679_s25 + $0x560] sm:$0xff]   ;;  %v4354_v61 = vcombine.high %v214_v57, %v230_v58 }
  0x9d   : > { %5055 = vmatprep.subr.bf16.mxu1 %v5481_v6  ;;  %3474 = vmatprep.mubr.bf16.mxu0 %v4378_v11  ;;  %v5513_v6 = vld [vmem:[%s5679_s25 + $0x5e0] sm:$0xff]   ;;  %v245_v11 = vld [vmem:[%s6695_s1 + $0x248] sm:$0xff] }
  0x9e   : > { %3539 = vmatprep.mubr.bf16.mxu1 %v4380_v15  ;;  %v4381_v15 = vcombine.low %v244_v9, %v260_v10 }
  0x9f   : > { %5016 = vmatpush3.bf16.msra.mxu0 %v5482_v7  ;;  %v5514_v7 = vld [vmem:[%s5679_s25 + $0x520] sm:$0xff]  }
  0xa0   : > { %5056 = vmatpush3.bf16.msra.mxu1 %v5483_v8  ;;  %5017 = vmatprep.subr.bf16.mxu0 %v5484_v17  ;;  %v5515_v8 = vld [vmem:[%s5679_s25 + $0x5a0] sm:$0xff]   ;;  %v5516_v17 = vld [vmem:[%s5679_s25 + $0x558] sm:$0xff]  }
  0xa1   : > { %5057 = vmatprep.subr.bf16.mxu1 %v5485_v18  ;;  %v5517_v18 = vld [vmem:[%s5679_s25 + $0x5d8] sm:$0xff]  }
  0xa2   : > { %3475 = vmatmul.mubr.bf16.gmra.mxu0 %v4377_v14  ;;  %v4384_v14 = vcombine.high %v245_v11, %v261_v12 }
  0xa3   : > { %3540 = vmatmul.mubr.bf16.gmra.mxu1 %v4379_v16  ;;  %5018 = vmatpush3.bf16.msra.mxu0 %v5486_v19  ;;  %v4383_v16 = vcombine.low %v245_v11, %v261_v12  ;;  %v5518_v19 = vld [vmem:[%s5679_s25 + $0x518] sm:$0xff]   ;;  %v5545_v11 = vld [vmem:[%s5679_s25 + $0x6e0] sm:$0xff]  }
  0xa4   : > { %5058 = vmatpush3.bf16.msra.mxu1 %v5487_v20  ;;  %5019 = vmatprep.subr.bf16.mxu0 %v5488_v21  ;;  %v5519_v20 = vld [vmem:[%s5679_s25 + $0x598] sm:$0xff]   ;;  %v5520_v21 = vld [vmem:[%s5679_s25 + $0x550] sm:$0xff]  }
  0xa5   : > { %5059 = vmatprep.subr.bf16.mxu1 %v5489_v22  ;;  %3482 = vmatprep.mubr.bf16.mxu0 %v4410_v29  ;;  %v5521_v22 = vld [vmem:[%s5679_s25 + $0x5d0] sm:$0xff]   ;;  %v293_v29 = vld [vmem:[%s6695_s1 + $0x3c8] sm:$0xff] }
  0xa6   : > { %3547 = vmatprep.mubr.bf16.mxu1 %v4412_v30  ;;  %v4413_v30 = vcombine.low %v276_v25, %v292_v26 }
  0xa7   : > { %5020 = vmatpush3.bf16.msra.mxu0 %v5490_v23  ;;  %v5522_v23 = vld [vmem:[%s5679_s25 + $0x510] sm:$0xff]  }
  0xa8   : > { %5060 = vmatpush3.bf16.msra.mxu1 %v5491_v24  ;;  %5021 = vmatprep.subr.bf16.mxu0 %v5492_v33  ;;  %v5523_v24 = vld [vmem:[%s5679_s25 + $0x590] sm:$0xff]   ;;  %v5524_v33 = vld [vmem:[%s5679_s25 + $0x548] sm:$0xff]  }
  0xa9   : > { %5061 = vmatprep.subr.bf16.mxu1 %v5493_v34  ;;  %v5525_v34 = vld [vmem:[%s5679_s25 + $0x5c8] sm:$0xff]  }
  0xaa   : > { %3483 = vmatmul.mubr.bf16.gmra.mxu0 %v4409_v31  ;;  %v4416_v31 = vcombine.high %v277_v27, %v293_v29 }
  0xab   : > { %3548 = vmatmul.mubr.bf16.gmra.mxu1 %v4411_v32  ;;  %5022 = vmatpush3.bf16.msra.mxu0 %v5494_v35  ;;  %v4415_v32 = vcombine.low %v277_v27, %v293_v29  ;;  %v5526_v35 = vld [vmem:[%s5679_s25 + $0x508] sm:$0xff]  }
  0xac   : > { %5062 = vmatpush3.bf16.msra.mxu1 %v5495_v36  ;;  %5023 = vmatprep.subr.bf16.mxu0 %v5496_v37  ;;  %v5527_v36 = vld [vmem:[%s5679_s25 + $0x588] sm:$0xff]   ;;  %v5528_v37 = vld [vmem:[%s5679_s25 + $0x540] sm:$0xff]  }
  0xad   : > { %5063 = vmatprep.subr.bf16.mxu1 %v5497_v38  ;;  %3588 = vmatprep.mubr.bf16.mxu0 %v4318_v45  ;;  %v5529_v38 = vld [vmem:[%s5679_s25 + $0x5c0] sm:$0xff]   ;;  %v183_v45 = vld [vmem:[%s6695_s1 + $0x58] sm:$0xff] }
  0xae   : > { %3653 = vmatprep.mubr.bf16.mxu1 %v4320_v48  ;;  %v4324_v48 = vcombine.high %v183_v45, %v199_v46 }
  0xaf   : > { %5024 = vmatpush3.bf16.msra.mxu0 %v5498_v39  ;;  %v5530_v39 = vld [vmem:[%s5679_s25 + $0x500] sm:$0xff]  }
  0xb0   : > { %5064 = vmatpush3.bf16.msra.mxu1 %v5499_v40  ;;  %5089 = vmatprep.subr.bf16.mxu0 %v5500_v49  ;;  %v5531_v40 = vld [vmem:[%s5679_s25 + $0x580] sm:$0xff]   ;;  %v5532_v49 = vld [vmem:[%s5679_s25 + $0x678] sm:$0xff]  }
  0xb1   : > { %5129 = vmatprep.subr.bf16.mxu1 %v5501_v50  ;;  %v5533_v50 = vld [vmem:[%s5679_s25 + $0x6f8] sm:$0xff]  }
  0xb2   : > { %3589 = vmatmul.mubr.bf16.vlgmr.msra.gmra.mxu0 %v4317_v44  ;;  %v4322_v44 = vcombine.high %v182_v41, %v198_v42  ;;  %v5552_v41 = vld [vmem:[%s5679_s25 + $0x650] sm:$0xff]  }
  0xb3   : > { %3654 = vmatmul.mubr.bf16.vlgmr.msra.gmra.mxu1 %v4319_v47  ;;  %5090 = vmatpush3.bf16.msra.mxu0 %v5502_v51  ;;  %v4323_v47 = vcombine.low %v183_v45, %v199_v46  ;;  %v5534_v51 = vld [vmem:[%s5679_s25 + $0x638] sm:$0xff]   ;;  %v5554_v46 = vld [vmem:[%s5679_s25 + $0x610] sm:$0xff]  }
  0xb4   : > { %5130 = vmatpush3.bf16.msra.mxu1 %v5503_v52  ;;  %5091 = vmatprep.subr.bf16.mxu0 %v5504_v53  ;;  %v5535_v52 = vld [vmem:[%s5679_s25 + $0x6b8] sm:$0xff]   ;;  %v5536_v53 = vld [vmem:[%s5679_s25 + $0x670] sm:$0xff]  }
  0xb5   : > { %5131 = vmatprep.subr.bf16.mxu1 %v5505_v54  ;;  %3596 = vmatprep.mubr.bf16.mxu0 %v4350_v59  ;;  %v5537_v54 = vld [vmem:[%s5679_s25 + $0x6f0] sm:$0xff]   ;;  %v215_v59 = vld [vmem:[%s6695_s1 + $0x158] sm:$0xff] }
  0xb6   : > { %3661 = vmatprep.mubr.bf16.mxu1 %v4352_v63  ;;  %v4353_v63 = vcombine.low %v214_v57, %v230_v58  ;;  %v279_v57 = vld [vmem:[%s6695_s1 + $0x358] sm:$0xff] }
  0xb7   : > { %5092 = vmatpush3.bf16.msra.mxu0 %v5506_v55  ;;  %v5538_v55 = vld [vmem:[%s5679_s25 + $0x630] sm:$0xff]   ;;  %v295_v58 = vld [vmem:[%s6695_s1 + $0x3d8] sm:$0xff] }
  0xb8   : > { %5132 = vmatpush3.bf16.msra.mxu1 %v5507_v56  ;;  %5093 = vmatprep.subr.bf16.mxu0 %v5508_v1  ;;  %v5539_v56 = vld [vmem:[%s5679_s25 + $0x6b0] sm:$0xff]   ;;  %v5540_v1 = vld [vmem:[%s5679_s25 + $0x668] sm:$0xff]  }
  0xb9   : > { %5133 = vmatprep.subr.bf16.mxu1 %v5509_v2  ;;  %v5541_v2 = vld [vmem:[%s5679_s25 + $0x6e8] sm:$0xff]  }
  0xba   : > { %3597 = vmatmul.mubr.bf16.gmra.mxu0 %v4349_v62  ;;  %v4356_v62 = vcombine.high %v215_v59, %v231_v60 }
  0xbb   : > { %3662 = vmatmul.mubr.bf16.gmra.mxu1 %v4351_v0  ;;  %5094 = vmatpush3.bf16.msra.mxu0 %v5510_v3  ;;  %v4355_v0 = vcombine.low %v215_v59, %v231_v60 }
  0xbc   : > { %5134 = vmatpush3.bf16.msra.mxu1 %v5511_v4  ;;  %5095 = vmatprep.subr.bf16.mxu0 %v5512_v5  ;;  %v5542_v4 = vld [vmem:[%s5679_s25 + $0x628] sm:$0xff]  }
  0xbd   : > { %5135 = vmatprep.subr.bf16.mxu1 %v5513_v6  ;;  %3604 = vmatprep.mubr.bf16.mxu0 %v4382_v13  ;;  %v5543_v6 = vld [vmem:[%s5679_s25 + $0x6a8] sm:$0xff]  }
  0xbe   : > { %3669 = vmatprep.mubr.bf16.mxu1 %v4384_v14  ;;  %v5546_v14 = vld [vmem:[%s5679_s25 + $0x620] sm:$0xff]  }
  0xbf   : > { %5096 = vmatpush3.bf16.msra.mxu0 %v5514_v7 }
  0xc0   : > { %5136 = vmatpush3.bf16.msra.mxu1 %v5515_v8  ;;  %5097 = vmatprep.subr.bf16.mxu0 %v5516_v17  ;;  %v5544_v8 = vld [vmem:[%s5679_s25 + $0x660] sm:$0xff]  }
  0xc1   : > { %5137 = vmatprep.subr.bf16.mxu1 %v5517_v18  ;;  %v246_v18 = vld [vmem:[%s6695_s1 + $0x250] sm:$0xff] }
  0xc2   : > { %3605 = vmatmul.mubr.bf16.gmra.mxu0 %v4381_v15 }
  0xc3   : > { %3670 = vmatmul.mubr.bf16.gmra.mxu1 %v4383_v16  ;;  %5098 = vmatpush3.bf16.msra.mxu0 %v5518_v19  ;;  %v5547_v16 = vld [vmem:[%s5679_s25 + $0x6a0] sm:$0xff]   ;;  %v262_v19 = vld [vmem:[%s6695_s1 + $0x2d0] sm:$0xff] }
  0xc4   : > { %5138 = vmatpush3.bf16.msra.mxu1 %v5519_v20  ;;  %5099 = vmatprep.subr.bf16.mxu0 %v5520_v21  ;;  %v247_v20 = vld [vmem:[%s6695_s1 + $0x258] sm:$0xff]  ;;  %v4385_v25 = vcombine.low %v246_v18, %v262_v19 }
  0xc5   : > { %5139 = vmatprep.subr.bf16.mxu1 %v5521_v22  ;;  %3612 = vmatprep.mubr.bf16.mxu0 %v4414_v28 }
  0xc6   : > { %3677 = vmatprep.mubr.bf16.mxu1 %v4416_v31 }
  0xc7   : > { %5100 = vmatpush3.bf16.msra.mxu0 %v5522_v23  ;;  %v4386_v23 = vcombine.high %v246_v18, %v262_v19  ;;  %v5562_v18 = vld [vmem:[%s5679_s25 + $0x600] sm:$0xff]  }
  0xc8   : > { %5140 = vmatpush3.bf16.msra.mxu1 %v5523_v24  ;;  %5101 = vmatprep.subr.bf16.mxu0 %v5524_v33  ;;  %v263_v24 = vld [vmem:[%s6695_s1 + $0x2d8] sm:$0xff] }
  0xc9   : > { %5141 = vmatprep.subr.bf16.mxu1 %v5525_v34  ;;  %v4388_v28 = vcombine.high %v247_v20, %v263_v24  ;;  %v4387_v29 = vcombine.low %v247_v20, %v263_v24  ;;  %v5550_v34 = vld [vmem:[%s5679_s25 + $0x618] sm:$0xff]  }
  0xca   : > { %3613 = vmatmul.mubr.bf16.gmra.mxu0 %v4413_v30  ;;  %v5548_v30 = vld [vmem:[%s5679_s25 + $0x658] sm:$0xff]  }
  0xcb   : > { %3678 = vmatmul.mubr.bf16.gmra.mxu1 %v4415_v32  ;;  %5102 = vmatpush3.bf16.msra.mxu0 %v5526_v35  ;;  %v5549_v32 = vld [vmem:[%s5679_s25 + $0x6d8] sm:$0xff]  }
  0xcc   : > { %5142 = vmatpush3.bf16.msra.mxu1 %v5527_v36  ;;  %5103 = vmatprep.subr.bf16.mxu0 %v5528_v37  ;;  %v5551_v37 = vld [vmem:[%s5679_s25 + $0x698] sm:$0xff]  }
  0xcd   : > { %5143 = vmatprep.subr.bf16.mxu1 %v5529_v38  ;;  %3718 = vmatprep.mubr.bf16.mxu0 %v4322_v44  ;;  %v5553_v44 = vld [vmem:[%s5679_s25 + $0x6d0] sm:$0xff]  }
  0xce   : > { %3783 = vmatprep.mubr.bf16.mxu1 %v4324_v48 }
  0xcf   : > { %5104 = vmatpush3.bf16.msra.mxu0 %v5530_v39 }
  0xd0   : > { %5144 = vmatpush3.bf16.msra.mxu1 %v5531_v40  ;;  %5169 = vmatprep.subr.bf16.mxu0 %v5532_v49 }
  0xd1   : > { %5209 = vmatprep.subr.bf16.mxu1 %v5533_v50  ;;  %v5555_v50 = vld [vmem:[%s5679_s25 + $0x690] sm:$0xff]  }
  0xd2   : > { %3719 = vmatmul.mubr.bf16.vlgmr.msra.gmra.mxu0 %v4321_v43 }
  0xd3   : > { %3784 = vmatmul.mubr.bf16.vlgmr.msra.gmra.mxu1 %v4323_v47  ;;  %5170 = vmatpush3.bf16.msra.mxu0 %v5534_v51  ;;  %v278_v51 = vld [vmem:[%s6695_s1 + $0x350] sm:$0xff] }
  0xd4   : > { %5210 = vmatpush3.bf16.msra.mxu1 %v5535_v52  ;;  %5171 = vmatprep.subr.bf16.mxu0 %v5536_v53  ;;  %v294_v52 = vld [vmem:[%s6695_s1 + $0x3d0] sm:$0xff] }
  0xd5   : > { %5211 = vmatprep.subr.bf16.mxu1 %v5537_v54  ;;  %3726 = vmatprep.mubr.bf16.mxu0 %v4354_v61  ;;  %v4417_v59 = vcombine.low %v278_v51, %v294_v52 }
  0xd6   : > { %3791 = vmatprep.mubr.bf16.mxu1 %v4356_v62  ;;  %v4420_v62 = vcombine.high %v279_v57, %v295_v58 }
  0xd7   : > { %5172 = vmatpush3.bf16.msra.mxu0 %v5538_v55 }
  0xd8   : > { %5212 = vmatpush3.bf16.msra.mxu1 %v5539_v56  ;;  %5173 = vmatprep.subr.bf16.mxu0 %v5540_v1  ;;  %v4418_v56 = vcombine.high %v278_v51, %v294_v52 }
  0xd9   : > { %5213 = vmatprep.subr.bf16.mxu1 %v5541_v2  ;;  %v823_v38 = vpop.permute.xlu0 %822  ;;  %v5557_v2 = vld [vmem:[%s5679_s25 + $0x6c8] sm:$0xff]  }
  0xda   : > { %3727 = vmatmul.mubr.bf16.gmra.mxu0 %v4353_v63  ;;  %v4419_v63 = vcombine.low %v279_v57, %v295_v58  ;;  %v5571_v57 = vld [vmem:[%s5679_s25 + $0x7b0] sm:$0xff]  }
  0xdb   : > { %3792 = vmatmul.mubr.bf16.gmra.mxu1 %v4355_v0  ;;  %5174 = vmatpush3.bf16.msra.mxu0 %v5542_v4  ;;  %v5556_v0 = vld [vmem:[%s5679_s25 + $0x648] sm:$0xff]  }
  0xdc   : > { %5214 = vmatpush3.bf16.msra.mxu1 %v5543_v6  ;;  %5175 = vmatprep.subr.bf16.mxu0 %v5544_v8  ;;  %v5558_v6 = vld [vmem:[%s5679_s25 + $0x608] sm:$0xff]  }
  0xdd   : > { %5215 = vmatprep.subr.bf16.mxu1 %v5545_v11  ;;  %3734 = vmatprep.mubr.bf16.mxu0 %v4386_v23  ;;  %v828_v53 = vpop.permute.xlu0 %827  ;;  %v5560_v11 = vld [vmem:[%s5679_s25 + $0x640] sm:$0xff]  }
  0xde   : > { %3799 = vmatprep.mubr.bf16.mxu1 %v4388_v28 }
  0xdf   : > { %5176 = vmatpush3.bf16.msra.mxu0 %v5546_v14  ;;  %v5561_v14 = vld [vmem:[%s5679_s25 + $0x6c0] sm:$0xff]  }
  0xe0   : > { %5216 = vmatpush3.bf16.msra.mxu1 %v5547_v16  ;;  %5177 = vmatprep.subr.bf16.mxu0 %v5548_v30 }
  0xe1   : > { %5217 = vmatprep.subr.bf16.mxu1 %v5549_v32 }
  0xe2   : > { %3735 = vmatmul.mubr.bf16.gmra.mxu0 %v4385_v25  ;;  %v200_v25 = vld [vmem:[%s6695_s1 + $0xe0] sm:$0xff] }
  0xe3   : > { %3800 = vmatmul.mubr.bf16.gmra.mxu1 %v4387_v29  ;;  %5178 = vmatpush3.bf16.msra.mxu0 %v5550_v34  ;;  %v5564_v34 = vld [vmem:[%s5679_s25 + $0x778] sm:$0xff]  }
  0xe4   : > { %5218 = vmatpush3.bf16.msra.mxu1 %v5551_v37  ;;  %5179 = vmatprep.subr.bf16.mxu0 %v5552_v41  ;;  %v5566_v41 = vld [vmem:[%s5679_s25 + $0x738] sm:$0xff]  }
  0xe5   : > { %5219 = vmatprep.subr.bf16.mxu1 %v5553_v44  ;;  %3742 = vmatprep.mubr.bf16.mxu0 %v4418_v56 }
  0xe6   : > { %3807 = vmatprep.mubr.bf16.mxu1 %v4420_v62  ;;  %v217_v62 = vld [vmem:[%s6695_s1 + $0x168] sm:$0xff] }
  0xe7   : > { %5180 = vmatpush3.bf16.msra.mxu0 %v5554_v46  ;;  %v5568_v46 = vld [vmem:[%s5679_s25 + $0x770] sm:$0xff]  }
  0xe8   : > { %5220 = vmatpush3.bf16.msra.mxu1 %v5555_v50  ;;  %5181 = vmatprep.subr.bf16.mxu0 %v5556_v0  ;;  %v5569_v50 = vld [vmem:[%s5679_s25 + $0x7f0] sm:$0xff]  }
  0xe9   : > { %5221 = vmatprep.subr.bf16.mxu1 %v5557_v2 }
  0xea   : > { %3743 = vmatmul.mubr.bf16.gmra.mxu0 %v4417_v59 }
  0xeb   : > { %3808 = vmatmul.mubr.bf16.gmra.mxu1 %v4419_v63  ;;  %5182 = vmatpush3.bf16.msra.mxu0 %v5558_v6 }
  0xec   : > { %5183 = vmatprep.subr.bf16.mxu0 %v5560_v11  ;;  %v843_v51 = vpop.permute.xlu0 %842 }
  0xef   : > { %5184 = vmatpush3.bf16.msra.mxu0 %v5562_v18 }
  0xf0   : > { %5249 = vmatprep.subr.bf16.mxu0 %v5564_v34 }
  0xf2   : > { %v4705_v3 = vpop.f32.mrf.mxu0 }
  0xf3   : > { %v4745_v5 = vpop.f32.mrf.mxu1 }
  0xf4   : > { %v4706_v7 = vpop.f32.mrf.mxu0 }
  0xf5   : > { %v4707_v9 = vadd.f32 %v4706_v7, %v4705_v3  ;;  %v4746_v10 = vpop.f32.mrf.mxu1 }
  0xf6   : > { %v4747_v12 = vadd.f32 %v4746_v10, %v4745_v5  ;;  %v4708_v13 = vpop.f32.mrf.mxu0 }
  0xf7   : > { %v4748_v15 = vpop.f32.mrf.mxu1  ;;  %v3071_v42 = vadd.f32 %v4707_v9, %v823_v38  ;;  %v5559_v9 = vld [vmem:[%s5679_s25 + $0x688] sm:$0xff]  }
  0xf8   : > { %v4709_v17 = vpop.f32.mrf.mxu0  ;;  %5222 = vmatpush3.bf16.msra.mxu1 %v5559_v9 }
  0xf9   : > { %v4710_v21 = vadd.f32 %v4709_v17, %v4708_v13  ;;  %v4749_v22 = vpop.f32.mrf.mxu1  ;;  %v6190_v47 = vadd.f32 %v4747_v12, %v3071_v42  ;;  %v833_v12 = vpop.permute.xlu1 %832  ;;  %5223 = vmatprep.subr.bf16.mxu1 %v5561_v14 }
  0xfa   : > { %v4750_v26 = vadd.f32 %v4749_v22, %v4748_v15  ;;  %v4711_v27 = vpop.f32.mrf.mxu0  ;;  %v184_v22 = vld [vmem:[%s6695_s1 + $0x60] sm:$0xff] }
  0xfb   : > { %v4751_v31 = vpop.f32.mrf.mxu1  ;;  %v3074_v60 = vadd.f32 %v4710_v21, %v828_v53  ;;  %v5563_v21 = vld [vmem:[%s5679_s25 + $0x680] sm:$0xff]   ;;  %v4325_v30 = vcombine.low %v184_v22, %v200_v25 }
  0xfc   : > { %v4712_v33 = vpop.f32.mrf.mxu0  ;;  %5224 = vmatpush3.bf16.msra.mxu1 %v5563_v21 }
  0xfd   : > { %v4713_v35 = vadd.f32 %v4712_v33, %v4711_v27  ;;  %v4752_v36 = vpop.f32.mrf.mxu1  ;;  %v6211_v3 = vadd.f32 %v4750_v26, %v3074_v60  ;;  %v185_v26 = vld [vmem:[%s6695_s1 + $0x68] sm:$0xff]  ;;  %v838_v28 = vpop.permute.xlu1 %837  ;;  %v216_v60 = vld [vmem:[%s6695_s1 + $0x160] sm:$0xff] }
  0xfe   : > { %v6185_v39 = vadd.f32 %v4752_v36, %v4751_v31  ;;  %v4714_v40 = vpop.f32.mrf.mxu0  ;;  %v201_v27 = vld [vmem:[%s6695_s1 + $0xe8] sm:$0xff]  ;;  %v4326_v31 = vcombine.high %v184_v22, %v200_v25  ;;  %v5565_v36 = vld [vmem:[%s5679_s25 + $0x7f8] sm:$0xff]   ;;  %v5577_v25 = vld [vmem:[%s5679_s25 + $0x7e0] sm:$0xff]  }
  0xff   : > { %v4754_v43 = vpop.f32.mrf.mxu1  ;;  %v3079_v15 = vadd.f32 %v4713_v35, %v833_v12  ;;  %v4327_v32 = vcombine.low %v185_v26, %v201_v27  ;;  %v4328_v33 = vcombine.high %v185_v26, %v201_v27  ;;  %5289 = vmatprep.subr.bf16.mxu1 %v5565_v36  ;;  %v853_v26 = vpop.permute.xlu0 %852 }
 0x100   : > { %v4715_v45 = vpop.f32.mrf.mxu0  ;;  %3848 = vmatprep.mubr.bf16.mxu0 %v4326_v31 }
 0x101   : > { %v6192_v48 = vadd.f32 %v4715_v45, %v4714_v40  ;;  %v4755_v49 = vpop.f32.mrf.mxu1  ;;  %v6229_v23 = vadd.f32 %v6185_v39, %v3079_v15  ;;  %3913 = vmatprep.mubr.bf16.mxu1 %v4328_v33  ;;  %3849 = vmatmul.mubr.bf16.vlgmr.msra.gmra.mxu0 %v4325_v30  ;;  %v848_v58 = vpop.permute.xlu1 %847  ;;  %v5573_v15 = vld [vmem:[%s5679_s25 + $0x7e8] sm:$0xff]   ;;  %v248_v33 = vld [vmem:[%s6695_s1 + $0x260] sm:$0xff] }
 0x102   : > { %v6201_v54 = vadd.f32 %v4755_v49, %v4754_v43  ;;  %v4717_v55 = vpop.f32.mrf.mxu0  ;;  %3914 = vmatmul.mubr.bf16.vlgmr.msra.gmra.mxu1 %v4327_v32  ;;  %v5567_v43 = vld [vmem:[%s5679_s25 + $0x7b8] sm:$0xff]   ;;  %5250 = vmatpush3.bf16.msra.mxu0 %v5566_v41  ;;  %v5579_v32 = vld [vmem:[%s5679_s25 + $0x7a0] sm:$0xff]  }
 0x103   : > { %v4757_v61 = vpop.f32.mrf.mxu1  ;;  %v3082_v37 = vadd.f32 %v6192_v48, %v838_v28  ;;  %5290 = vmatpush3.bf16.msra.mxu1 %v5567_v43  ;;  %5251 = vmatprep.subr.bf16.mxu0 %v5568_v46  ;;  %v5578_v28 = vld [vmem:[%s5679_s25 + $0x720] sm:$0xff]  }
 0x104   : > { %v4718_v1 = vpop.f32.mrf.mxu0  ;;  %5291 = vmatprep.subr.bf16.mxu1 %v5569_v50 }
 0x105   : > { %v6213_v4 = vadd.f32 %v4718_v1, %v4717_v55  ;;  %v4758_v5 = vpop.f32.mrf.mxu1  ;;  %v6250_v44 = vadd.f32 %v6201_v54, %v3082_v37  ;;  %v5570_v55 = vld [vmem:[%s5679_s25 + $0x730] sm:$0xff]   ;;  %v858_v34 = vpop.permute.xlu1 %857  ;;  %v249_v37 = vld [vmem:[%s6695_s1 + $0x268] sm:$0xff] }
 0x106   : > { %v6216_v7 = vadd.f32 %v4758_v5, %v4757_v61  ;;  %v4720_v8 = vpop.f32.mrf.mxu0  ;;  %v232_v61 = vld [vmem:[%s6695_s1 + $0x1e0] sm:$0xff]  ;;  %5252 = vmatpush3.bf16.msra.mxu0 %v5570_v55  ;;  %v233_v5 = vld [vmem:[%s6695_s1 + $0x1e8] sm:$0xff]  ;;  %v5581_v55 = vld [vmem:[%s5679_s25 + $0x7d8] sm:$0xff]  }
 0x107   : > { %v4760_v10 = vpop.f32.mrf.mxu1  ;;  %v3087_v54 = vadd.f32 %v6213_v4, %v843_v51  ;;  %5292 = vmatpush3.bf16.msra.mxu1 %v5571_v57  ;;  %v4358_v4 = vcombine.high %v216_v60, %v232_v61  ;;  %v4357_v6 = vcombine.low %v216_v60, %v232_v61  ;;  %v4359_v11 = vcombine.low %v217_v62, %v233_v5  ;;  %v5584_v61 = vld [vmem:[%s5679_s25 + $0x750] sm:$0xff]  }
 0x108   : > { %v4721_v13 = vpop.f32.mrf.mxu0  ;;  %5293 = vmatprep.subr.bf16.mxu1 %v5573_v15 }
 0x109   : > { %v4722_v16 = vadd.f32 %v4721_v13, %v4720_v8  ;;  %v4761_v17 = vpop.f32.mrf.mxu1  ;;  %v6271_v63 = vadd.f32 %v6216_v7, %v3087_v54  ;;  %v5572_v7 = vld [vmem:[%s5679_s25 + $0x768] sm:$0xff]   ;;  %3856 = vmatprep.mubr.bf16.mxu0 %v4358_v4 }
 0x10a   : > { %v6222_v19 = vadd.f32 %v4761_v17, %v4760_v10  ;;  %v4723_v20 = vpop.f32.mrf.mxu0  ;;  %v4360_v10 = vcombine.high %v217_v62, %v233_v5  ;;  %3857 = vmatmul.mubr.bf16.gmra.mxu0 %v4357_v6  ;;  %v5574_v17 = vld [vmem:[%s5679_s25 + $0x728] sm:$0xff]   ;;  %5253 = vmatprep.subr.bf16.mxu0 %v5572_v7  ;;  %v5587_v5 = vld [vmem:[%s5679_s25 + $0x790] sm:$0xff]   ;;  %v280_v6 = vld [vmem:[%s6695_s1 + $0x360] sm:$0xff] }
 0x10b   : > { %v4763_v24 = vpop.f32.mrf.mxu1  ;;  %v3090_v0 = vadd.f32 %v4722_v16, %v848_v58  ;;  %5254 = vmatpush3.bf16.msra.mxu0 %v5574_v17  ;;  %v5583_v58 = vld [vmem:[%s5679_s25 + $0x798] sm:$0xff]  }
 0x10c   : > { %v4724_v29 = vpop.f32.mrf.mxu0  ;;  %3921 = vmatprep.mubr.bf16.mxu1 %v4360_v10  ;;  %v281_v10 = vld [vmem:[%s6695_s1 + $0x368] sm:$0xff] }
 0x10d   : > { %v4764_v35 = vpop.f32.mrf.mxu1  ;;  %v6243_v38 = vadd.f32 %v4724_v29, %v4723_v20  ;;  %v6278_v12 = vadd.f32 %v6222_v19, %v3090_v0  ;;  %3922 = vmatmul.mubr.bf16.gmra.mxu1 %v4359_v11  ;;  %v5575_v19 = vld [vmem:[%s5679_s25 + $0x7a8] sm:$0xff]   ;;  %v5585_v0 = vld [vmem:[%s5679_s25 + $0x7d0] sm:$0xff]  }
 0x10e   : > { %v6245_v39 = vadd.f32 %v4764_v35, %v4763_v24  ;;  %v4726_v40 = vpop.f32.mrf.mxu0  ;;  %5294 = vmatpush3.bf16.msra.mxu1 %v5575_v19  ;;  %v297_v11 = vld [vmem:[%s6695_s1 + $0x3e8] sm:$0xff] }
 0x10f   : > { %v4766_v42 = vpop.f32.mrf.mxu1  ;;  %v3095_v29 = vadd.f32 %v6243_v38, %v853_v26  ;;  %5295 = vmatprep.subr.bf16.mxu1 %v5577_v25  ;;  %v265_v38 = vld [vmem:[%s6695_s1 + $0x2e8] sm:$0xff]  ;;  %v4424_v15 = vcombine.high %v281_v10, %v297_v11  ;;  %v4423_v17 = vcombine.low %v281_v10, %v297_v11 }
 0x110   : > { %v4727_v45 = vpop.f32.mrf.mxu0  ;;  %v4391_v46 = vcombine.low %v249_v37, %v265_v38  ;;  %v5589_v19 = vld [vmem:[%s5679_s25 + $0x7c8] sm:$0xff]  }
 0x111   : > { %v6253_v48 = vadd.f32 %v4727_v45, %v4726_v40  ;;  %v4767_v49 = vpop.f32.mrf.mxu1  ;;  %v6307_v41 = vadd.f32 %v6245_v39, %v3095_v29  ;;  %v4392_v45 = vcombine.high %v249_v37, %v265_v38  ;;  %v5590_v25 = vld [vmem:[%s5679_s25 + $0x708] sm:$0xff]   ;;  %v5595_v37 = vld [vmem:[%s5679_s25 + $0x780] sm:$0xff]  }
 0x112   : > { %v6256_v52 = vadd.f32 %v4767_v49, %v4766_v42  ;;  %v4785_v53 = vpop.f32.mrf.mxu0  ;;  %5296 = vmatpush3.bf16.msra.mxu1 %v5579_v32  ;;  %v5580_v49 = vld [vmem:[%s5679_s25 + $0x758] sm:$0xff]   ;;  %v5592_v32 = vld [vmem:[%s5679_s25 + $0x740] sm:$0xff]  }
 0x113   : > { %v4825_v56 = vpop.f32.mrf.mxu1  ;;  %v3098_v42 = vadd.f32 %v6253_v48, %v858_v34  ;;  %3929 = vmatprep.mubr.bf16.mxu1 %v4392_v45  ;;  %v5582_v48 = vld [vmem:[%s5679_s25 + $0x718] sm:$0xff]   ;;  %5297 = vmatprep.subr.bf16.mxu1 %v5581_v55  ;;  %v234_v55 = vld [vmem:[%s6695_s1 + $0x1f0] sm:$0xff] }
 0x114   : > { %v4786_v59 = vpop.f32.mrf.mxu0 }
 0x115   : > { %v4787_v1 = vadd.f32 %v4786_v59, %v4785_v53  ;;  %v4826_v2 = vpop.f32.mrf.mxu1  ;;  %v6313_v54 = vadd.f32 %v6256_v52, %v3098_v42  ;;  %3930 = vmatmul.mubr.bf16.gmra.mxu1 %v4391_v46  ;;  %v186_v42 = vld [vmem:[%s6695_s1 + $0x70] sm:$0xff] }
 0x116   : > { %v4827_v8 = vadd.f32 %v4826_v2, %v4825_v56  ;;  %v4788_v9 = vpop.f32.mrf.mxu0  ;;  %5298 = vmatpush3.bf16.msra.mxu1 %v5583_v58  ;;  %3937 = vmatprep.mubr.bf16.mxu1 %v4424_v15 }
 0x117   : > { %v3201_v13 = vadd.f32 %v4787_v1, %v6190_v47  ;;  %v4828_v14 = vpop.f32.mrf.mxu1  ;;  %v5576_v47 = vld [vmem:[%s5679_s25 + $0x760] sm:$0xff]   ;;  %5299 = vmatprep.subr.bf16.mxu1 %v5585_v0 }
 0x118   : > { %v4789_v16 = vpop.f32.mrf.mxu0  ;;  %5255 = vmatprep.subr.bf16.mxu0 %v5576_v47 }
 0x119   : > { %v6283_v18 = vadd.f32 %v4827_v8, %v3201_v13  ;;  %v4790_v20 = vadd.f32 %v4789_v16, %v4788_v9  ;;  %v4829_v21 = vpop.f32.mrf.mxu1  ;;  %5256 = vmatpush3.bf16.msra.mxu0 %v5578_v28 }
 0x11a   : > { %v4830_v22 = vadd.f32 %v4829_v21, %v4828_v14  ;;  %v4791_v27 = vpop.f32.mrf.mxu0  ;;  %5257 = vmatprep.subr.bf16.mxu0 %v5580_v49  ;;  %5300 = vmatpush3.bf16.msra.mxu1 %v5587_v5 }
 0x11b   : > { %v3204_v24 = vadd.f32 %v4790_v20, %v6211_v3  ;;  %v4831_v31 = vpop.f32.mrf.mxu1  ;;  %v264_v3 = vld [vmem:[%s6695_s1 + $0x2e0] sm:$0xff]  ;;  %v5588_v20 = vld [vmem:[%s5679_s25 + $0x748] sm:$0xff]   ;;  %5301 = vmatprep.subr.bf16.mxu1 %v5589_v19 }
 0x11c   : > { %v4792_v35 = vpop.f32.mrf.mxu0  ;;  %v4390_v36 = vcombine.high %v248_v33, %v264_v3  ;;  %v4389_v40 = vcombine.low %v248_v33, %v264_v3  ;;  %v5593_v33 = vld [vmem:[%s5679_s25 + $0x7c0] sm:$0xff]  }
 0x11d   : > { %v6291_v30 = vadd.f32 %v4830_v22, %v3204_v24  ;;  %v4832_v43 = vpop.f32.mrf.mxu1  ;;  %v4793_v50 = vadd.f32 %v4792_v35, %v4791_v27  ;;  %5258 = vmatpush3.bf16.msra.mxu0 %v5582_v48  ;;  %3938 = vmatmul.mubr.bf16.gmra.mxu1 %v4423_v17  ;;  %v5591_v27 = vld [vmem:[%s5679_s25 + $0x788] sm:$0xff]   ;;  %v5594_v35 = vld [vmem:[%s5679_s25 + $0x700] sm:$0xff]  }
 0x11e   : > { %v4833_v51 = vadd.f32 %v4832_v43, %v4831_v31  ;;  %v4794_v53 = vpop.f32.mrf.mxu0  ;;  %3864 = vmatprep.mubr.bf16.mxu0 %v4390_v36  ;;  %5259 = vmatprep.subr.bf16.mxu0 %v5584_v61  ;;  %v202_v43 = vld [vmem:[%s6695_s1 + $0xf0] sm:$0xff] }
 0x11f   : > { %v4834_v39 = vpop.f32.mrf.mxu1  ;;  %3865 = vmatmul.mubr.bf16.gmra.mxu0 %v4389_v40  ;;  %v3209_v56 = vadd.f32 %v4793_v50, %v6229_v23  ;;  %v5586_v23 = vld [vmem:[%s5679_s25 + $0x710] sm:$0xff]   ;;  %5302 = vmatpush3.bf16.msra.mxu1 %v5591_v27  ;;  %v4329_v49 = vcombine.low %v186_v42, %v202_v43  ;;  %v4330_v50 = vcombine.high %v186_v42, %v202_v43 }
 0x120   : > { %v4795_v57 = vpop.f32.mrf.mxu0  ;;  %5303 = vmatprep.subr.bf16.mxu1 %v5593_v33  ;;  %v299_v33 = vld [vmem:[%s6695_s1 + $0x3f8] sm:$0xff] }
 0x121   : > { %v4796_v59 = vadd.f32 %v4795_v57, %v4794_v53  ;;  %v4835_v60 = vpop.f32.mrf.mxu1  ;;  %v6319_v52 = vadd.f32 %v4833_v51, %v3209_v56  ;;  %5260 = vmatpush3.bf16.msra.mxu0 %v5586_v23  ;;  %v203_v51 = vld [vmem:[%s6695_s1 + $0xf8] sm:$0xff]  ;;  %v218_v53 = vld [vmem:[%s6695_s1 + $0x170] sm:$0xff] }
 0x122   : > { %v4836_v62 = vadd.f32 %v4835_v60, %v4834_v39  ;;  %v4797_v2 = vpop.f32.mrf.mxu0  ;;  %5261 = vmatprep.subr.bf16.mxu0 %v5588_v20  ;;  %v4362_v58 = vcombine.high %v218_v53, %v234_v55  ;;  %v235_v60 = vld [vmem:[%s6695_s1 + $0x1f8] sm:$0xff]  ;;  %v250_v23 = vld [vmem:[%s6695_s1 + $0x270] sm:$0xff] }
 0x123   : > { %v3212_v1 = vadd.f32 %v4796_v59, %v6250_v44  ;;  %v4837_v4 = vpop.f32.mrf.mxu1  ;;  %v296_v44 = vld [vmem:[%s6695_s1 + $0x3e0] sm:$0xff]  ;;  %5304 = vmatpush3.bf16.msra.mxu1 %v5595_v37  ;;  %v219_v59 = vld [vmem:[%s6695_s1 + $0x178] sm:$0xff] }
 0x124   : > { %v4798_v9 = vpop.f32.mrf.mxu0  ;;  %v4422_v14 = vcombine.high %v280_v6, %v296_v44  ;;  %v4421_v16 = vcombine.low %v280_v6, %v296_v44 }
 0x125   : > { %v6328_v8 = vadd.f32 %v4836_v62, %v3212_v1  ;;  %v4799_v7 = vadd.f32 %v4798_v9, %v4797_v2  ;;  %v4838_v13 = vpop.f32.mrf.mxu1  ;;  %5262 = vmatpush3.bf16.msra.mxu0 %v5590_v25  ;;  %v4364_v62 = vcombine.high %v219_v59, %v235_v60  ;;  %v267_v9 = vld [vmem:[%s6695_s1 + $0x2f8] sm:$0xff] }
 0x126   : > { %v4800_v21 = vpop.f32.mrf.mxu0  ;;  %v4839_v47 = vadd.f32 %v4838_v13, %v4837_v4  ;;  %3872 = vmatprep.mubr.bf16.mxu0 %v4422_v14  ;;  %5263 = vmatprep.subr.bf16.mxu0 %v5592_v32  ;;  %v266_v4 = vld [vmem:[%s6695_s1 + $0x2f0] sm:$0xff]  ;;  %v4363_v14 = vcombine.low %v219_v59, %v235_v60 }
 0x127   : > { %v3217_v22 = vadd.f32 %v4799_v7, %v6271_v63  ;;  %v4840_v24 = vpop.f32.mrf.mxu1  ;;  %3873 = vmatmul.mubr.bf16.gmra.mxu0 %v4421_v16  ;;  %v4361_v7 = vcombine.low %v218_v53, %v234_v55  ;;  %v4394_v15 = vcombine.high %v250_v23, %v266_v4 }
 0x128   : > { %v4801_v26 = vpop.f32.mrf.mxu0  ;;  %3978 = vmatprep.mubr.bf16.mxu0 %v4330_v50 }
 0x129   : > { %v6344_v28 = vadd.f32 %v4839_v47, %v3217_v22  ;;  %v4802_v29 = vadd.f32 %v4801_v26, %v4800_v21  ;;  %v4841_v31 = vpop.f32.mrf.mxu1  ;;  %5264 = vmatpush3.bf16.msra.mxu0 %v5594_v35 }
 0x12a   : > { %v4842_v63 = vadd.f32 %v4841_v31, %v4840_v24  ;;  %v4803_v34 = vpop.f32.mrf.mxu0 }
 0x12b   : > { %v3220_v3 = vadd.f32 %v4802_v29, %v6278_v12  ;;  %v4843_v36 = vpop.f32.mrf.mxu1  ;;  %v187_v12 = vld [vmem:[%s6695_s1 + $0x78] sm:$0xff]  ;;  %v298_v29 = vld [vmem:[%s6695_s1 + $0x3f0] sm:$0xff] }
 0x12c   : > { %v4804_v40 = vpop.f32.mrf.mxu0  ;;  %v4331_v56 = vcombine.low %v187_v12, %v203_v51  ;;  %v4332_v57 = vcombine.high %v187_v12, %v203_v51 }
 0x12d   : > { %v6351_v38 = vadd.f32 %v4842_v63, %v3220_v3  ;;  %v4805_v45 = vadd.f32 %v4804_v40, %v4803_v34  ;;  %v4844_v46 = vpop.f32.mrf.mxu1  ;;  %v4393_v3 = vcombine.low %v250_v23, %v266_v4 }
 0x12e   : > { %v4845_v39 = vadd.f32 %v4844_v46, %v4843_v36  ;;  %v4806_v48 = vpop.f32.mrf.mxu0  ;;  %4043 = vmatprep.mubr.bf16.mxu1 %v4332_v57 }
 0x12f   : > { %v4846_v61 = vpop.f32.mrf.mxu1  ;;  %v3225_v0 = vadd.f32 %v4805_v45, %v6307_v41  ;;  %3979 = vmatmul.mubr.bf16.vlgmr.msra.gmra.mxu0 %v4329_v49  ;;  %4044 = vmatmul.mubr.bf16.vlgmr.msra.gmra.mxu1 %v4331_v56  ;;  %v251_v41 = vld [vmem:[%s6695_s1 + $0x278] sm:$0xff] }
 0x130   : > { %v4807_v1 = vpop.f32.mrf.mxu0  ;;  %3986 = vmatprep.mubr.bf16.mxu0 %v4362_v58  ;;  %4051 = vmatprep.mubr.bf16.mxu1 %v4364_v62  ;;  %v4396_v20 = vcombine.high %v251_v41, %v267_v9  ;;  %v4395_v36 = vcombine.low %v251_v41, %v267_v9 }
 0x131   : > { %v4847_v2 = vpop.f32.mrf.mxu1  ;;  %v6384_v5 = vadd.f32 %v4845_v39, %v3225_v0  ;;  %v4808_v6 = vadd.f32 %v4807_v1, %v4806_v48 }
 0x132   : > { %v4848_v44 = vadd.f32 %v4847_v2, %v4846_v61  ;;  %v4865_v10 = vpop.f32.mrf.mxu0 }
 0x133   : > { %v4905_v11 = vpop.f32.mrf.mxu1  ;;  %v3228_v13 = vadd.f32 %v4808_v6, %v6313_v54  ;;  %v282_v54 = vld [vmem:[%s6695_s1 + $0x370] sm:$0xff] }
 0x134   : > { %v4866_v16 = vpop.f32.mrf.mxu0  ;;  %v4426_v37 = vcombine.high %v282_v54, %v298_v29  ;;  %v4425_v56 = vcombine.low %v282_v54, %v298_v29 }
 0x135   : > { %v4906_v17 = vpop.f32.mrf.mxu1  ;;  %v6393_v21 = vadd.f32 %v4848_v44, %v3228_v13  ;;  %v4867_v19 = vadd.f32 %v4866_v16, %v4865_v10 }
 0x136   : > { %v4907_v22 = vadd.f32 %v4906_v17, %v4905_v11  ;;  %v4868_v47 = vpop.f32.mrf.mxu0 }
 0x137   : > { %v4908_v24 = vpop.f32.mrf.mxu1  ;;  %3987 = vmatmul.mubr.bf16.gmra.mxu0 %v4361_v7  ;;  %v3331_v25 = vadd.f32 %v4867_v19, %v6283_v18  ;;  %4052 = vmatmul.mubr.bf16.gmra.mxu1 %v4363_v14  ;;  %v283_v18 = vld [vmem:[%s6695_s1 + $0x378] sm:$0xff] }
 0x138   : > { %3994 = vmatprep.mubr.bf16.mxu0 %v4394_v15  ;;  %v4869_v26 = vpop.f32.mrf.mxu0  ;;  %4059 = vmatprep.mubr.bf16.mxu1 %v4396_v20  ;;  %v4428_v42 = vcombine.high %v283_v18, %v299_v33  ;;  %v4427_v58 = vcombine.low %v283_v18, %v299_v33 }
 0x139   : > { %v4909_v27 = vpop.f32.mrf.mxu1  ;;  %v6402_v31 = vadd.f32 %v4907_v22, %v3331_v25  ;;  %v4870_v32 = vadd.f32 %v4869_v26, %v4868_v47 }
 0x13a   : > { %v4910_v63 = vadd.f32 %v4909_v27, %v4908_v24  ;;  %v4871_v35 = vpop.f32.mrf.mxu0 }
 0x13b   : > { %v3334_v34 = vadd.f32 %v4870_v32, %v6291_v30  ;;  %v4911_v40 = vpop.f32.mrf.mxu1 }
 0x13c   : > { %v4872_v12 = vpop.f32.mrf.mxu0 }
 0x13d   : > { %v6411_v43 = vadd.f32 %v4910_v63, %v3334_v34  ;;  %v4873_v45 = vadd.f32 %v4872_v12, %v4871_v35  ;;  %v4912_v46 = vpop.f32.mrf.mxu1 }
 0x13e   : > { %v4913_v49 = vadd.f32 %v4912_v46, %v4911_v40  ;;  %v4874_v50 = vpop.f32.mrf.mxu0 }
 0x13f   : > { %3995 = vmatmul.mubr.bf16.gmra.mxu0 %v4393_v3  ;;  %4060 = vmatmul.mubr.bf16.gmra.mxu1 %v4395_v36  ;;  %v3339_v51 = vadd.f32 %v4873_v45, %v6319_v52  ;;  %v4914_v53 = vpop.f32.mrf.mxu1 }
 0x140   : > { %4002 = vmatprep.mubr.bf16.mxu0 %v4426_v37  ;;  %4067 = vmatprep.mubr.bf16.mxu1 %v4428_v42  ;;  %v4875_v30 = vpop.f32.mrf.mxu0 }
 0x141   : > { %v6414_v55 = vadd.f32 %v4913_v49, %v3339_v51  ;;  %v4876_v39 = vadd.f32 %v4875_v30, %v4874_v50  ;;  %v4915_v48 = vpop.f32.mrf.mxu1 }
 0x142   : > { %v4916_v57 = vadd.f32 %v4915_v48, %v4914_v53  ;;  %v4877_v60 = vpop.f32.mrf.mxu0 }
 0x143   : > { %v3342_v59 = vadd.f32 %v4876_v39, %v6328_v8  ;;  %v4917_v62 = vpop.f32.mrf.mxu1 }
 0x144   : > { %v4878_v0 = vpop.f32.mrf.mxu0 }
 0x145   : > { %v6417_v61 = vadd.f32 %v4916_v57, %v3342_v59  ;;  %v4879_v52 = vadd.f32 %v4878_v0, %v4877_v60  ;;  %v4918_v1 = vpop.f32.mrf.mxu1 }
 0x146   : > { %v4919_v2 = vadd.f32 %v4918_v1, %v4917_v62  ;;  %v4880_v23 = vpop.f32.mrf.mxu0 }
 0x147   : > { %4003 = vmatmul.mubr.bf16.gmra.mxu0 %v4425_v56  ;;  %4068 = vmatmul.mubr.bf16.gmra.mxu1 %v4427_v58  ;;  %v3347_v4 = vadd.f32 %v4879_v52, %v6344_v28  ;;  %v4920_v6 = vpop.f32.mrf.mxu1 }
 0x148   : > { %v4881_v41 = vpop.f32.mrf.mxu0 }
 0x149   : > { %v3412_v9 = vadd.f32 %v4919_v2, %v3347_v4  ;;  %v4882_v44 = vadd.f32 %v4881_v41, %v4880_v23  ;;  %v4921_v10 = vpop.f32.mrf.mxu1 }
 0x14a   : > { %v4922_v11 = vadd.f32 %v4921_v10, %v4920_v6  ;;  %v4883_v7 = vpop.f32.mrf.mxu0 }
 0x14b   : > { %v3350_v8 = vadd.f32 %v4882_v44, %v6351_v38  ;;  %v4923_v14 = vpop.f32.mrf.mxu1 }
 0x14c   : > { %v4884_v15 = vpop.f32.mrf.mxu0 }
 0x14d   : > { %v3415_v13 = vadd.f32 %v4922_v11, %v3350_v8  ;;  %v4885_v16 = vadd.f32 %v4884_v15, %v4883_v7  ;;  %v4924_v17 = vpop.f32.mrf.mxu1 }
 0x14e   : > { %v4925_v20 = vadd.f32 %v4924_v17, %v4923_v14  ;;  %v4886_v19 = vpop.f32.mrf.mxu0 }
 0x14f   : > { %v3355_v22 = vadd.f32 %v4885_v16, %v6384_v5  ;;  %v4926_v47 = vpop.f32.mrf.mxu1 }
 0x150   : > { %v4887_v28 = vpop.f32.mrf.mxu0 }
 0x151   : > { %v3420_v24 = vadd.f32 %v4925_v20, %v3355_v22  ;;  %v4888_v25 = vadd.f32 %v4887_v28, %v4886_v19  ;;  %v4927_v26 = vpop.f32.mrf.mxu1 }
 0x152   : > { %v4928_v27 = vadd.f32 %v4927_v26, %v4926_v47  ;;  %v4945_v29 = vpop.f32.mrf.mxu0 }
 0x153   : > { %v3358_v54 = vadd.f32 %v4888_v25, %v6393_v21  ;;  %v4985_v32 = vpop.f32.mrf.mxu1 }
 0x154   : > { %v4946_v63 = vpop.f32.mrf.mxu0 }
 0x155   : > { %v3423_v38 = vadd.f32 %v4928_v27, %v3358_v54  ;;  %v4947_v18 = vadd.f32 %v4946_v63, %v4945_v29  ;;  %v4986_v33 = vpop.f32.mrf.mxu1 }
 0x156   : > { %v4987_v3 = vadd.f32 %v4986_v33, %v4985_v32  ;;  %v4948_v34 = vpop.f32.mrf.mxu0 }
 0x157   : > { %v3461_v35 = vadd.f32 %v4947_v18, %v6402_v31  ;;  %v4988_v36 = vpop.f32.mrf.mxu1 }
 0x158   : > { %v4949_v5 = vpop.f32.mrf.mxu0 }
 0x159   : > { %v3526_v37 = vadd.f32 %v4987_v3, %v3461_v35  ;;  %v4950_v40 = vadd.f32 %v4949_v5, %v4948_v34  ;;  %v4989_v42 = vpop.f32.mrf.mxu1 }
 0x15a   : > { %v4990_v12 = vadd.f32 %v4989_v42, %v4988_v36  ;;  %v4951_v46 = vpop.f32.mrf.mxu0 }
 0x15b   : > { %v3464_v45 = vadd.f32 %v4950_v40, %v6411_v43  ;;  %v4991_v49 = vpop.f32.mrf.mxu1 }
 0x15c   : > { %v4952_v50 = vpop.f32.mrf.mxu0 }
 0x15d   : > { %v3529_v21 = vadd.f32 %v4990_v12, %v3464_v45  ;;  %v4953_v51 = vadd.f32 %v4952_v50, %v4951_v46  ;;  %v4992_v53 = vpop.f32.mrf.mxu1 }
 0x15e   : > { %v4993_v30 = vadd.f32 %v4992_v53, %v4991_v49  ;;  %v4954_v39 = vpop.f32.mrf.mxu0 }
 0x15f   : > { %v3469_v48 = vadd.f32 %v4953_v51, %v6414_v55  ;;  %v4994_v56 = vpop.f32.mrf.mxu1 }
 0x160   : > { %v4955_v31 = vpop.f32.mrf.mxu0 }
 0x161   : > { %v3534_v57 = vadd.f32 %v4993_v30, %v3469_v48  ;;  %v4956_v58 = vadd.f32 %v4955_v31, %v4954_v39  ;;  %v4995_v59 = vpop.f32.mrf.mxu1 }
 0x162   : > { %v4996_v60 = vadd.f32 %v4995_v59, %v4994_v56  ;;  %v4957_v0 = vpop.f32.mrf.mxu0 }
 0x163   : > { %v3472_v62 = vadd.f32 %v4956_v58, %v6417_v61  ;;  %v4997_v43 = vpop.f32.mrf.mxu1 }
 0x164   : > { %v4958_v1 = vpop.f32.mrf.mxu0 }
 0x165   : > { %v3537_v52 = vadd.f32 %v4996_v60, %v3472_v62  ;;  %v4959_v2 = vadd.f32 %v4958_v1, %v4957_v0  ;;  %v4998_v23 = vpop.f32.mrf.mxu1 }
 0x166   : > { %v4999_v4 = vadd.f32 %v4998_v23, %v4997_v43  ;;  %v4960_v6 = vpop.f32.mrf.mxu0 }
 0x167   : > { %v3477_v41 = vadd.f32 %v4959_v2, %v3412_v9  ;;  %v5000_v44 = vpop.f32.mrf.mxu1 }
 0x168   : > { %v4961_v10 = vpop.f32.mrf.mxu0 }
 0x169   : > { %v3542_v55 = vadd.f32 %v4999_v4, %v3477_v41  ;;  %v4962_v11 = vadd.f32 %v4961_v10, %v4960_v6  ;;  %v5001_v8 = vpop.f32.mrf.mxu1 }
 0x16a   : > { %v5002_v7 = vadd.f32 %v5001_v8, %v5000_v44  ;;  %v4963_v15 = vpop.f32.mrf.mxu0 }
 0x16b   : > { %v3480_v14 = vadd.f32 %v4962_v11, %v3415_v13  ;;  %v5003_v16 = vpop.f32.mrf.mxu1 }
 0x16c   : > { %v4964_v61 = vpop.f32.mrf.mxu0 }
 0x16d   : > { %v3545_v17 = vadd.f32 %v5002_v7, %v3480_v14  ;;  %v5004_v20 = vpop.f32.mrf.mxu1  ;;  %v4965_v19 = vadd.f32 %v4964_v61, %v4963_v15 }
 0x16e   : > { %v5005_v22 = vadd.f32 %v5004_v20, %v5003_v16  ;;  %v4966_v47 = vpop.f32.mrf.mxu0 }
 0x16f   : > { %v5006_v28 = vpop.f32.mrf.mxu1  ;;  %v3485_v25 = vadd.f32 %v4965_v19, %v3420_v24 }
 0x170   : > { %v4967_v26 = vpop.f32.mrf.mxu0 }
 0x171   : > { %v5007_v27 = vpop.f32.mrf.mxu1  ;;  %v3550_v9 = vadd.f32 %v5005_v22, %v3485_v25  ;;  %v4968_v54 = vadd.f32 %v4967_v26, %v4966_v47 }
 0x172   : > { %v5008_v29 = vadd.f32 %v5007_v27, %v5006_v28  ;;  %v5025_v63 = vpop.f32.mrf.mxu0 }
 0x173   : > { %v3488_v32 = vadd.f32 %v4968_v54, %v3423_v38  ;;  %v5065_v18 = vpop.f32.mrf.mxu1 }
 0x174   : > { %v5026_v13 = vpop.f32.mrf.mxu0 }
 0x175   : > { %v3553_v33 = vadd.f32 %v5008_v29, %v3488_v32  ;;  %v5027_v3 = vadd.f32 %v5026_v13, %v5025_v63  ;;  %v5066_v34 = vpop.f32.mrf.mxu1 }
 0x176   : > { %v5067_v35 = vadd.f32 %v5066_v34, %v5065_v18  ;;  %v5028_v36 = vpop.f32.mrf.mxu0 }
 0x177   : > { %v3591_v5 = vadd.f32 %v5027_v3, %v3526_v37  ;;  %v5068_v40 = vpop.f32.mrf.mxu1 }
 0x178   : > { %v5029_v42 = vpop.f32.mrf.mxu0 }
 0x179   : > { %v6427_v12 = vadd.f32 %v5067_v35, %v3591_v5  ;;  %v5030_v24 = vadd.f32 %v5029_v42, %v5028_v36  ;;  %v5069_v45 = vpop.f32.mrf.mxu1 }
 0x17a   : > { %v5070_v46 = vadd.f32 %v5069_v45, %v5068_v40  ;;  %v5031_v50 = vpop.f32.mrf.mxu0 }
 0x17b   : > { %v3594_v49 = vadd.f32 %v5030_v24, %v3529_v21  ;;  %v5071_v51 = vpop.f32.mrf.mxu1 }
 0x17c   : > { %v5032_v53 = vpop.f32.mrf.mxu0 }
 0x17d   : > { %v6429_v38 = vadd.f32 %v5070_v46, %v3594_v49  ;;  %v5033_v30 = vadd.f32 %v5032_v53, %v5031_v50  ;;  %v5072_v39 = vpop.f32.mrf.mxu1 }
 0x17e   : > { %v5073_v48 = vadd.f32 %v5072_v39, %v5071_v51  ;;  %v5034_v56 = vpop.f32.mrf.mxu0 }
 0x17f   : > { %v3599_v31 = vadd.f32 %v5033_v30, %v3534_v57  ;;  %v5074_v58 = vpop.f32.mrf.mxu1 }
 0x180   : > { %v5035_v37 = vpop.f32.mrf.mxu0 }
 0x181   : > { %v6431_v59 = vadd.f32 %v5073_v48, %v3599_v31  ;;  %v5036_v60 = vadd.f32 %v5035_v37, %v5034_v56  ;;  %v5075_v62 = vpop.f32.mrf.mxu1 }
 0x182   : > { %v5076_v0 = vadd.f32 %v5075_v62, %v5074_v58  ;;  %v5037_v1 = vpop.f32.mrf.mxu0 }
 0x183   : > { %v3602_v43 = vadd.f32 %v5036_v60, %v3537_v52  ;;  %v5077_v21 = vpop.f32.mrf.mxu1 }
 0x184   : > { %v5038_v23 = vpop.f32.mrf.mxu0 }
 0x185   : > { %v6433_v2 = vadd.f32 %v5076_v0, %v3602_v43  ;;  %v5078_v4 = vpop.f32.mrf.mxu1  ;;  %v5039_v6 = vadd.f32 %v5038_v23, %v5037_v1 }
 0x186   : > { %v5079_v41 = vadd.f32 %v5078_v4, %v5077_v21  ;;  %v5040_v44 = vpop.f32.mrf.mxu0 }
 0x187   : > { %v5080_v10 = vpop.f32.mrf.mxu1  ;;  %v3607_v11 = vadd.f32 %v5039_v6, %v3542_v55 }
 0x188   : > { %v5041_v57 = vpop.f32.mrf.mxu0 }
 0x189   : > { %v5081_v8 = vpop.f32.mrf.mxu1  ;;  %v6435_v7 = vadd.f32 %v5079_v41, %v3607_v11  ;;  %v5042_v14 = vadd.f32 %v5041_v57, %v5040_v44 }
 0x18a   : > { %v5082_v15 = vadd.f32 %v5081_v8, %v5080_v10  ;;  %v5043_v61 = vpop.f32.mrf.mxu0 }
 0x18b   : > { %v3610_v16 = vadd.f32 %v5042_v14, %v3545_v17  ;;  %v5083_v52 = vpop.f32.mrf.mxu1 }
 0x18c   : > { %v5044_v19 = vpop.f32.mrf.mxu0 }
 0x18d   : > { %v6437_v20 = vadd.f32 %v5082_v15, %v3610_v16  ;;  %v5045_v22 = vadd.f32 %v5044_v19, %v5043_v61  ;;  %v5084_v47 = vpop.f32.mrf.mxu1 }
 0x18e   : > { %v5085_v28 = vadd.f32 %v5084_v47, %v5083_v52  ;;  %v5046_v25 = vpop.f32.mrf.mxu0 }
 0x18f   : > { %v3615_v26 = vadd.f32 %v5045_v22, %v3550_v9  ;;  %v5086_v27 = vpop.f32.mrf.mxu1 }
 0x190   : > { %v5047_v54 = vpop.f32.mrf.mxu0 }
 0x191   : > { %v6439_v55 = vadd.f32 %v5085_v28, %v3615_v26  ;;  %v5048_v29 = vadd.f32 %v5047_v54, %v5046_v25  ;;  %v5087_v32 = vpop.f32.mrf.mxu1 }
 0x192   : > { %v5088_v63 = vadd.f32 %v5087_v32, %v5086_v27  ;;  %v5105_v13 = vpop.f32.mrf.mxu0 }
 0x193   : > { %v3618_v18 = vadd.f32 %v5048_v29, %v3553_v33  ;;  %v6441_v17 = vpop.f32.mrf.mxu1 }
 0x194   : > { %v5106_v34 = vpop.f32.mrf.mxu0 }
 0x195   : > { %v6443_v3 = vadd.f32 %v5088_v63, %v3618_v18  ;;  %v5146_v35 = vpop.f32.mrf.mxu1 }
 0x196   : > { %v5108_v36 = vpop.f32.mrf.mxu0 }
 0x197   : > { %6698 = vst [vmem:[#allocation2_spill] sm:$0xff] %v6443_v3  ;;  %v6445_v5 = vpop.f32.mrf.mxu1 }
 0x198   : > { %v5109_v40 = vpop.f32.mrf.mxu0 }
 0x199   : > { %v6447_v9 = vpop.f32.mrf.mxu1 }
 0x19a   : > { %v5111_v42 = vpop.f32.mrf.mxu0 }
 0x19b   : > { %v6449_v24 = vpop.f32.mrf.mxu1 }
 0x19c   : > { %v5112_v45 = vpop.f32.mrf.mxu0 }
 0x19d   : > { %v6451_v46 = vpop.f32.mrf.mxu1 }
 0x19e   : > { %v5114_v33 = vpop.f32.mrf.mxu0 }
 0x19f   : > { %v6453_v49 = vpop.f32.mrf.mxu1 }
 0x1a0   : > { %v5115_v50 = vpop.f32.mrf.mxu0 }
 0x1a1   : > { %v6455_v51 = vpop.f32.mrf.mxu1 }
 0x1a2   : > { %v6457_v53 = vpop.f32.mrf.mxu0 }
 0x1a3   : > { %v6459_v30 = vpop.f32.mrf.mxu1 }
 0x1a4   : > { %v6461_v39 = vpop.f32.mrf.mxu0 }
 0x1a5   : > { %v6463_v48 = vpop.f32.mrf.mxu1 }
 0x1a6   : > { %v6465_v56 = vpop.f32.mrf.mxu0 }
 0x1a7   : > { %v6467_v31 = vpop.f32.mrf.mxu1 }
 0x1a8   : > { %v6469_v58 = vpop.f32.mrf.mxu0 }
 0x1a9   : > { %v6471_v37 = vpop.f32.mrf.mxu1 }
 0x1aa   : > { %v6473_v60 = vpop.f32.mrf.mxu0 }
 0x1ab   : > { %v6475_v62 = vpop.f32.mrf.mxu1 }
 0x1ac   : > { %6699 = vst [vmem:[#allocation3_spill] sm:$0xff] %v6475_v62  ;;  %v6477_v0 = vpop.f32.mrf.mxu0 }
 0x1ad   : > { %v6479_v43 = vpop.f32.mrf.mxu1 }
 0x1ae   : > { %6700 = vst [vmem:[#allocation4_spill] sm:$0xff] %v6479_v43  ;;  %v6481_v1 = vpop.f32.mrf.mxu0 }
 0x1af   : > { %6701 = vst [vmem:[#allocation5_spill] sm:$0xff] %v6481_v1  ;;  %v6483_v21 = vpop.f32.mrf.mxu1 }
 0x1b0   : > { %6702 = vst [vmem:[#allocation6_spill] sm:$0xff] %v6483_v21  ;;  %v6485_v23 = vpop.f32.mrf.mxu0 }
 0x1b1   : > { %6703 = vst [vmem:[#allocation7_spill] sm:$0xff] %v6485_v23  ;;  %v6487_v4 = vpop.f32.mrf.mxu1 }
 0x1b2   : > { %6704 = vst [vmem:[#allocation8_spill] sm:$0xff] %v6487_v4  ;;  %v5107_v4 = vadd.f32 %v5106_v34, %v5105_v13  ;;  %v5113_v34 = vadd.f32 %v5112_v45, %v5111_v42 }
 0x1b4   : > { %v3721_v23 = vadd.f32 %v5107_v4, %v6427_v12  ;;  %v5116_v12 = vadd.f32 %v5115_v50, %v5114_v33 }
 0x1b6   : > { %v3732_v42 = vadd.f32 %v5116_v12, %v6433_v2 }
 0x1c1   : > { %v5185_v6 = vpop.f32.mrf.mxu0 }
 0x1c2   : > { %v5225_v41 = vpop.f32.mrf.mxu1 }
 0x1c3   : > { %v5186_v44 = vpop.f32.mrf.mxu0 }
 0x1c4   : > { %v5226_v10 = vpop.f32.mrf.mxu1  ;;  %v5187_v62 = vadd.f32 %v5186_v44, %v5185_v6  ;;  %v3729_v6 = vadd.f32 %v5113_v34, %v6431_v59  ;;  %v5122_v59 = vadd.f32 %v6469_v58, %v6465_v56 }
 0x1c5   : > { %v5188_v11 = vpop.f32.mrf.mxu0  ;;  %v5227_v44 = vadd.f32 %v5226_v10, %v5225_v41 }
 0x1c6   : > { %v5228_v57 = vpop.f32.mrf.mxu1  ;;  %v3740_v56 = vadd.f32 %v5122_v59, %v6437_v20  ;;  %v6716_v59 = vld [vmem:[#allocation5_spill] sm:$0xff] }
 0x1c7   : > { %v5189_v8 = vpop.f32.mrf.mxu0 }
 0x1c8   : > { %v5229_v14 = vpop.f32.mrf.mxu1  ;;  %v5190_v4 = vadd.f32 %v5189_v8, %v5188_v11 }
 0x1ca   : > { %v5191_v15 = vpop.f32.mrf.mxu0 }
 0x1cc   : > { %v5192_v61 = vpop.f32.mrf.mxu0 }
 0x1cd   : > { %v6489_v16 = vpop.f32.mrf.mxu1  ;;  %v5193_v33 = vadd.f32 %v5192_v61, %v5191_v15 }
 0x1ce   : > { %v5194_v19 = vpop.f32.mrf.mxu0 }
 0x1cf   : > { %v6491_v52 = vpop.f32.mrf.mxu1 }
 0x1d0   : > { %v5195_v47 = vpop.f32.mrf.mxu0  ;;  %v5233_v58 = vadd.f32 %v6491_v52, %v6489_v16 }
 0x1d1   : > { %v6493_v22 = vpop.f32.mrf.mxu1  ;;  %v5196_v8 = vadd.f32 %v5195_v47, %v5194_v19 }
 0x1d3   : > { %v6495_v28 = vpop.f32.mrf.mxu1 }
 0x1d5   : > { %v6499_v26 = vpop.f32.mrf.mxu1 }
 0x1d6   : > { %6705 = vst [vmem:[#allocation9_spill] sm:$0xff] %v6499_v26  ;;  %v5110_v26 = vadd.f32 %v5109_v40, %v5108_v36  ;;  %v5150_v36 = vadd.f32 %v6447_v9, %v6445_v5  ;;  %v5156_v5 = vadd.f32 %v6455_v51, %v6453_v49  ;;  %v5119_v9 = vadd.f32 %v6461_v39, %v6457_v53 }
 0x1d7   : > { %v6503_v54 = vpop.f32.mrf.mxu1  ;;  %v5159_v39 = vadd.f32 %v6463_v48, %v6459_v30  ;;  %v5125_v30 = vadd.f32 %v6477_v0, %v6473_v60 }
 0x1d8   : > { %6706 = vst [vmem:[#allocation10_spill] sm:$0xff] %v6503_v54  ;;  %v5147_v54 = vadd.f32 %v5146_v35, %v6441_v17  ;;  %v3724_v13 = vadd.f32 %v5110_v26, %v6429_v38  ;;  %v5153_v38 = vadd.f32 %v6451_v46, %v6449_v24  ;;  %v5230_v24 = vadd.f32 %v5229_v14, %v5228_v57 }
 0x1d9   : > { %v6507_v32 = vpop.f32.mrf.mxu1  ;;  %v3797_v11 = vadd.f32 %v5156_v5, %v3732_v42  ;;  %v3737_v53 = vadd.f32 %v5119_v9, %v6435_v7  ;;  %v5162_v7 = vadd.f32 %v6471_v37, %v6467_v31  ;;  %v5236_v31 = vadd.f32 %v6495_v28, %v6493_v22  ;;  %v6715_v5 = vld [vmem:[#allocation4_spill] sm:$0xff] }
 0x1da   : > { %6707 = vst [vmem:[#allocation11_spill] sm:$0xff] %v6507_v32  ;;  %v3789_v35 = vadd.f32 %v5150_v36, %v3724_v13  ;;  %v3794_v41 = vadd.f32 %v5153_v38, %v3729_v6 }
 0x1db   : > { %v6511_v18 = vpop.f32.mrf.mxu1  ;;  %v3862_v20 = vadd.f32 %v5196_v8, %v3797_v11  ;;  %v3805_v60 = vadd.f32 %v5162_v7, %v3740_v56 }
 0x1dc   : > { %6709 = vst [vmem:[#allocation13_spill] sm:$0xff] %v6511_v18  ;;  %v3786_v18 = vadd.f32 %v5147_v54, %v3721_v23  ;;  %v3854_v26 = vadd.f32 %v5190_v4, %v3789_v35 }
 0x1dd   : > { %v6515_v3 = vpop.f32.mrf.mxu1 }
 0x1de   : > { %6711 = vst [vmem:[#allocation15_spill] sm:$0xff] %v6515_v3  ;;  %v3851_v40 = vadd.f32 %v5187_v62, %v3786_v18  ;;  %v3919_v61 = vadd.f32 %v5230_v24, %v3854_v26  ;;  %v3859_v18 = vadd.f32 %v5193_v33, %v3794_v41  ;;  %v6718_v41 = vld [vmem:[#allocation9_spill] sm:$0xff] }
 0x1df   : > { %v6497_v25 = vpop.f32.mrf.mxu0  ;;  %v6520_v43 = vpop.f32.mrf.mxu1  ;;  %v6719_v24 = vld [vmem:[#allocation10_spill] sm:$0xff] }
 0x1e0   : > { %v3916_v23 = vadd.f32 %v5227_v44, %v3851_v40  ;;  %v3924_v52 = vadd.f32 %v5233_v58, %v3859_v18  ;;  %v3927_v44 = vadd.f32 %v5236_v31, %v3862_v20 }
 0x1e1   : > { %v6501_v27 = vpop.f32.mrf.mxu0 }
 0x1e2   : > { %v5199_v48 = vadd.f32 %v6501_v27, %v6497_v25  ;;  %v3745_v27 = vadd.f32 %v5125_v30, %v6439_v55  ;;  %v6717_v55 = vld [vmem:[#allocation7_spill] sm:$0xff] }
 0x1e3   : > { %v6505_v29 = vpop.f32.mrf.mxu0 }
 0x1e5   : > { %v6509_v63 = vpop.f32.mrf.mxu0 }
 0x1e6   : > { %6708 = vst [vmem:[#allocation12_spill] sm:$0xff] %v6509_v63  ;;  %v6525_v63 = vpop.f32.mrf.mxu1 }
 0x1e7   : > { %v6513_v21 = vpop.f32.mrf.mxu0  ;;  %6712 = vst [vmem:[#allocation16_spill] sm:$0xff] %v6525_v63 }
 0x1e8   : > { %6710 = vst [vmem:[#allocation14_spill] sm:$0xff] %v6513_v21  ;;  %v6530_v3 = vpop.f32.mrf.mxu1 }
 0x1e9   : > { %v6518_v1 = vpop.f32.mrf.mxu0 }
 0x1eb   : > { %v6523_v32 = vpop.f32.mrf.mxu0 }
 0x1ed   : > { %v6528_v21 = vpop.f32.mrf.mxu0  ;;  %v6713_v42 = vld [vmem:[#allocation12_spill] sm:$0xff] }
 0x1ef   : > { %v5265_v17 = vpop.f32.mrf.mxu0  ;;  %v5305_v63 = vpop.f32.mrf.mxu1 }
 0x1f1   : > { %v5266_v45 = vpop.f32.mrf.mxu0  ;;  %v5306_v54 = vpop.f32.mrf.mxu1 }
 0x1f2   : > { %v5267_v50 = vadd.f32 %v5266_v45, %v5265_v17  ;;  %v5307_v2 = vadd.f32 %v5306_v54, %v5305_v63  ;;  %v3802_v17 = vadd.f32 %v5159_v39, %v3737_v53  ;;  %v5202_v45 = vadd.f32 %v6713_v42, %v6505_v29  ;;  %v6714_v54 = vld [vmem:[#allocation3_spill] sm:$0xff] }
 0x1f3   : > { %v5268_v62 = vpop.f32.mrf.mxu0  ;;  %v5308_v10 = vpop.f32.mrf.mxu1  ;;  %v5165_v9 = vadd.f32 %v6715_v5, %v6714_v54 }
 0x1f4   : > { %v3981_v46 = vadd.f32 %v5267_v50, %v3916_v23  ;;  %v3867_v38 = vadd.f32 %v5199_v48, %v3802_v17  ;;  %v3870_v18 = vadd.f32 %v5202_v45, %v3805_v60  ;;  %v5208_v17 = vadd.f32 %v6528_v21, %v6523_v32 }
 0x1f5   : > { %v5269_v15 = vpop.f32.mrf.mxu0  ;;  %v5309_v51 = vpop.f32.mrf.mxu1 }
 0x1f6   : > { %v6544_v13 = vadd.f32 %v5307_v2, %v3981_v46  ;;  %v5270_v49 = vadd.f32 %v5269_v15, %v5268_v62  ;;  %v5310_v19 = vadd.f32 %v5309_v51, %v5308_v10  ;;  %v5128_v62 = vadd.f32 %v6717_v55, %v6716_v59 }
 0x1f7   : > { %v5271_v57 = vpop.f32.mrf.mxu0  ;;  %v5311_v47 = vpop.f32.mrf.mxu1  ;;  %v5239_v46 = vadd.f32 %v6719_v24, %v6718_v41  ;;  %v3810_v15 = vadd.f32 %v5165_v9, %v3745_v27  ;;  %v6726_v27 = vld [vmem:[#allocation15_spill] sm:$0xff]  ;;  %v6727_v9 = vld [vmem:[#allocation16_spill] sm:$0xff] }
 0x1f8   : > { %v3984_v14 = vadd.f32 %v5270_v49, %v3919_v61  ;;  %v4077_v63 = vsel %vm4076_vm0, %v6544_v13, 0.0  ;;  %v4109_v34 = vmul.f32 %v6544_v13, %v6544_v13  ;;  %v6720_v49 = vld [vmem:[#allocation14_spill] sm:$0xff]  ;;  %v5248_v59 = vadd.f32 %v6530_v3, %v6727_v9 }
 0x1f9   : > { %v5272_v16 = vpop.f32.mrf.mxu0  ;;  %4078 = vadd.xlane.f32.xlu0 %v4077_v63  ;;  %v5312_v40 = vpop.f32.mrf.mxu1  ;;  %v3932_v61 = vadd.f32 %v5239_v46, %v3867_v38  ;;  %v5205_v51 = vadd.f32 %v6518_v1, %v6720_v49  ;;  %v6722_v63 = vld [vmem:[#allocation11_spill] sm:$0xff] }
 0x1fa   : > { %v6562_v12 = vadd.f32 %v5310_v19, %v3984_v14  ;;  %v5273_v36 = vadd.f32 %v5272_v16, %v5271_v57  ;;  %v4117_v4 = vsel %vm4076_vm0, %v4109_v34, 0.0  ;;  %v5313_v37 = vadd.f32 %v5312_v40, %v5311_v47  ;;  %v6721_v19 = vld [vmem:[#allocation2_spill] sm:$0xff]  ;;  %v6723_v34 = vld [vmem:[#allocation13_spill] sm:$0xff] }
 0x1fb   : > { %v5274_v35 = vpop.f32.mrf.mxu0  ;;  %4118 = vadd.xlane.f32.xlu1 %v4117_v4  ;;  %v5314_v6 = vpop.f32.mrf.mxu1  ;;  %v3748_v47 = vadd.f32 %v5128_v62, %v6721_v19  ;;  %v5242_v7 = vadd.f32 %v6723_v34, %v6722_v63  ;;  %v6724_v16 = vld [vmem:[#allocation6_spill] sm:$0xff]  ;;  %v3875_v4 = vadd.f32 %v5205_v51, %v3810_v15 }
 0x1fc   : > { %v3989_v0 = vadd.f32 %v5273_v36, %v3924_v52  ;;  %v4110_v25 = vmul.f32 %v6562_v12, %v6562_v12  ;;  %v4080_v33 = vsel %vm4076_vm0, %v6562_v12, 0.0  ;;  %v6725_v52 = vld [vmem:[#allocation8_spill] sm:$0xff] }
 0x1fd   : > { %v5275_v23 = vpop.f32.mrf.mxu0  ;;  %v5315_v28 = vpop.f32.mrf.mxu1  ;;  %v5168_v36 = vadd.f32 %v6725_v52, %v6724_v16  ;;  %v3935_v40 = vadd.f32 %v5242_v7, %v3870_v18 }
 0x1fe   : > { %v6572_v26 = vadd.f32 %v5313_v37, %v3989_v0  ;;  %v5276_v22 = vadd.f32 %v5275_v23, %v5274_v35  ;;  %v4120_v50 = vsel %vm4076_vm0, %v4110_v25, 0.0  ;;  %v5316_v10 = vadd.f32 %v5315_v28, %v5314_v6 }
 0x1ff   : > { %v5277_v29 = vpop.f32.mrf.mxu0  ;;  %4081 = vadd.xlane.f32.xlu1 %v4080_v33  ;;  %4121 = vadd.xlane.f32.xlu0 %v4120_v50  ;;  %v5317_v11 = vpop.f32.mrf.mxu1  ;;  %v3813_v25 = vadd.f32 %v5168_v36, %v3748_v47 }
 0x200   : > { %v3992_v2 = vadd.f32 %v5276_v22, %v3927_v44  ;;  %v4111_v8 = vmul.f32 %v6572_v26, %v6572_v26  ;;  %v4083_v14 = vsel %vm4076_vm0, %v6572_v26, 0.0  ;;  %v5245_v44 = vadd.f32 %v6520_v43, %v6726_v27 }
 0x201   : > { %v5278_v53 = vpop.f32.mrf.mxu0  ;;  %v5318_v58 = vpop.f32.mrf.mxu1  ;;  %v3878_v22 = vadd.f32 %v5208_v17, %v3813_v25 }
 0x202   : > { %v6587_v39 = vadd.f32 %v5316_v10, %v3992_v2  ;;  %v5279_v56 = vadd.f32 %v5278_v53, %v5277_v29  ;;  %v4123_v57 = vsel %vm4076_vm0, %v4111_v8, 0.0  ;;  %v5319_v30 = vadd.f32 %v5318_v58, %v5317_v11 }
 0x203   : > { %v5280_v20 = vpop.f32.mrf.mxu0  ;;  %4124 = vadd.xlane.f32.xlu1 %v4123_v57  ;;  %4084 = vadd.xlane.f32.xlu0 %v4083_v14  ;;  %v5320_v48 = vpop.f32.mrf.mxu1  ;;  %v3940_v33 = vadd.f32 %v5245_v44, %v3875_v4  ;;  %v3943_v29 = vadd.f32 %v5248_v59, %v3878_v22 }
 0x204   : > { %v3997_v1 = vadd.f32 %v5279_v56, %v3932_v61  ;;  %v4086_v0 = vsel %vm4076_vm0, %v6587_v39, 0.0  ;;  %v4112_v6 = vmul.f32 %v6587_v39, %v6587_v39 }
 0x205   : > { %v5281_v31 = vpop.f32.mrf.mxu0  ;;  %v5321_v60 = vpop.f32.mrf.mxu1 }
 0x206   : > { %v6599_v37 = vadd.f32 %v5319_v30, %v3997_v1  ;;  %v5282_v35 = vadd.f32 %v5281_v31, %v5280_v20  ;;  %v5322_v45 = vadd.f32 %v5321_v60, %v5320_v48  ;;  %v4126_v43 = vsel %vm4076_vm0, %v4112_v6, 0.0 }
 0x207   : > { %v5283_v38 = vpop.f32.mrf.mxu0  ;;  %4087 = vadd.xlane.f32.xlu0 %v4086_v0  ;;  %v5323_v21 = vpop.f32.mrf.mxu1 }
 0x208   : > { %v4000_v42 = vadd.f32 %v5282_v35, %v3935_v40  ;;  %v4089_v32 = vsel %vm4076_vm0, %v6599_v37, 0.0  ;;  %v4113_v23 = vmul.f32 %v6599_v37, %v6599_v37 }
 0x209   : > { %v5284_v28 = vpop.f32.mrf.mxu0  ;;  %4090 = vadd.xlane.f32.xlu1 %v4089_v32  ;;  %v5324_v5 = vpop.f32.mrf.mxu1 }
 0x20a   : > { %v6611_v50 = vadd.f32 %v5322_v45, %v4000_v42  ;;  %v5285_v54 = vadd.f32 %v5284_v28, %v5283_v38  ;;  %v5325_v55 = vadd.f32 %v5324_v5, %v5323_v21  ;;  %v4129_v46 = vsel %vm4076_vm0, %v4113_v23, 0.0 }
 0x20b   : > { %v5286_v62 = vpop.f32.mrf.mxu0  ;;  %4127 = vadd.xlane.f32.xlu0 %v4126_v43  ;;  %v5326_v24 = vpop.f32.mrf.mxu1 }
 0x20c   : > { %v4005_v41 = vadd.f32 %v5285_v54, %v3940_v33  ;;  %v4092_v15 = vsel %vm4076_vm0, %v6611_v50, 0.0  ;;  %v4114_v3 = vmul.f32 %v6611_v50, %v6611_v50 }
 0x20d   : > { %v5287_v2 = vpop.f32.mrf.mxu0  ;;  %4130 = vadd.xlane.f32.xlu1 %v4129_v46  ;;  %v5327_v8 = vpop.f32.mrf.mxu1 }
 0x20e   : > { %v6617_v10 = vadd.f32 %v5325_v55, %v4005_v41  ;;  %v5288_v11 = vadd.f32 %v5287_v2, %v5286_v62  ;;  %v5328_v18 = vadd.f32 %v5327_v8, %v5326_v24  ;;  %v4132_v56 = vsel %vm4076_vm0, %v4114_v3, 0.0 }
 0x20f   : > { %4093 = vadd.xlane.f32.xlu0 %v4092_v15 }
 0x210   : > { %v4008_v61 = vadd.f32 %v5288_v11, %v3943_v29  ;;  %v4095_v49 = vsel %vm4076_vm0, %v6617_v10, 0.0  ;;  %v4115_v51 = vmul.f32 %v6617_v10, %v6617_v10 }
 0x211   : > { %4096 = vadd.xlane.f32.xlu1 %v4095_v49 }
 0x212   : > { %v6627_v53 = vadd.f32 %v5328_v18, %v4008_v61  ;;  %v4135_v58 = vsel %vm4076_vm0, %v4115_v51, 0.0 }
 0x213   : > { %4133 = vadd.xlane.f32.xlu0 %v4132_v56 }
 0x214   : > { %v4098_v57 = vsel %vm4076_vm0, %v6627_v53, 0.0  ;;  %v4116_v14 = vmul.f32 %v6627_v53, %v6627_v53 }
 0x215   : > { %4136 = vadd.xlane.f32.xlu1 %v4135_v58 }
 0x216   : > { %v4138_v19 = vsel %vm4076_vm0, %v4116_v14, 0.0 }
 0x217   : > { %4099 = vadd.xlane.f32.xlu0 %v4098_v57 }
 0x21b   : > { %4139 = vadd.xlane.f32.xlu0 %v4138_v19 }
 0x282   : > { %v4079_v47 = vpop.xlane.xlu0 %4078 }
 0x283   : > { %v4101_v63 = vmul.f32 0.027777778, %v4079_v47 }
 0x284   : > { %v4119_v34 = vpop.xlane.xlu1 %4118 }
 0x285   : > { %v4149_v7 = vmul.f32 %v4101_v63, %v4101_v63  ;;  %v4141_v30 = vmul.f32 0.027777778, %v4119_v34  ;;  %v4173_v55 = vsub.f32 %v6544_v13, %v4101_v63 }
 0x287   : > { %v4157_v20 = vsub.f32 %v4141_v30, %v4149_v7 }
 0x288   : > { %v4082_v1 = vpop.xlane.xlu1 %4081  ;;  %v4122_v48 = vpop.xlane.xlu0 %4121 }
 0x289   : > { %v4165_v16 = vmax.f32 %v4157_v20, 0.0  ;;  %v4102_v52 = vmul.f32 0.027777778, %v4082_v1  ;;  %v4142_v4 = vmul.f32 0.027777778, %v4122_v48 }
 0x28b   : > { %v4181_v36 = vadd.f32 1e-05, %v4165_v16  ;;  %v4150_v40 = vmul.f32 %v4102_v52, %v4102_v52  ;;  %v4174_v18 = vsub.f32 %v6562_v12, %v4102_v52 }
 0x28c   : > { %v4125_v17 = vpop.xlane.xlu1 %4124  ;;  %v4085_v31 = vpop.xlane.xlu0 %4084 }
 0x28d   : > { %5596 = vrsqrt.f32 %v4181_v36  ;;  %v4158_v35 = vsub.f32 %v4142_v4, %v4150_v40  ;;  %v6636_v60 = vmul.f32 0.027777778, %v4085_v31  ;;  %v4143_v6 = vmul.f32 0.027777778, %v4125_v17 }
 0x28f   : > { %v4166_v0 = vmax.f32 %v4158_v35, 0.0  ;;  %v4151_v25 = vmul.f32 %v6636_v60, %v6636_v60  ;;  %v4175_v1 = vsub.f32 %v6572_v26, %v6636_v60 }
 0x290   : > { %v4088_v27 = vpop.xlane.xlu0 %4087 }
 0x291   : > { %v4182_v44 = vadd.f32 1e-05, %v4166_v0  ;;  %v4159_v38 = vsub.f32 %v4143_v6, %v4151_v25  ;;  %v6640_v42 = vmul.f32 0.027777778, %v4088_v27 }
 0x292   : > { %v4091_v45 = vpop.xlane.xlu1 %4090 }
 0x293   : > { %5598 = vrsqrt.f32 %v4182_v44  ;;  %v4167_v21 = vmax.f32 %v4159_v38, 0.0  ;;  %v6642_v32 = vmul.f32 0.027777778, %v4091_v45  ;;  %v4152_v28 = vmul.f32 %v6640_v42, %v6640_v42 }
 0x294   : > { %v4128_v23 = vpop.xlane.xlu0 %4127  ;;  %v4176_v26 = vsub.f32 %v6587_v39, %v6640_v42 }
 0x295   : > { %v4183_v22 = vadd.f32 1e-05, %v4167_v21  ;;  %v4144_v33 = vmul.f32 0.027777778, %v4128_v23  ;;  %v4153_v5 = vmul.f32 %v6642_v32, %v6642_v32  ;;  %v4177_v44 = vsub.f32 %v6599_v37, %v6642_v32 }
 0x296   : > { %v4131_v54 = vpop.xlane.xlu1 %4130 }
 0x297   : > { %5600 = vrsqrt.f32 %v4183_v22  ;;  %v4160_v43 = vsub.f32 %v4144_v33, %v4152_v28  ;;  %v4145_v9 = vmul.f32 0.027777778, %v4131_v54 }
 0x298   : > { %v4094_v59 = vpop.xlane.xlu0 %4093 }
 0x299   : > { %v4168_v62 = vmax.f32 %v4160_v43, 0.0  ;;  %v4161_v41 = vsub.f32 %v4145_v9, %v4153_v5  ;;  %v6650_v46 = vmul.f32 0.027777778, %v4094_v59 }
 0x29a   : > { %v5597_v24 = vpop.eup %5596  ;;  %v4097_v29 = vpop.xlane.xlu1 %4096 }
 0x29b   : > { %v4197_v2 = vmul.f32 %v5597_v24, %v4173_v55  ;;  %v4184_v11 = vadd.f32 1e-05, %v4168_v62  ;;  %v4169_v8 = vmax.f32 %v4161_v41, 0.0  ;;  %v6652_v15 = vmul.f32 0.027777778, %v4097_v29 }
 0x29c   : > { %v4134_v3 = vpop.xlane.xlu0 %4133  ;;  %v4154_v49 = vmul.f32 %v6650_v46, %v6650_v46  ;;  %v4178_v37 = vsub.f32 %v6611_v50, %v6650_v46 }
 0x29d   : > { %vm4205_vm1 = vcmp.ge.f32.partialorder %v4197_v2, 0.0  ;;  %v4213_v13 = vmul.f32 0.2, %v4197_v2  ;;  %5602 = vrsqrt.f32 %v4184_v11  ;;  %v4185_v61 = vadd.f32 1e-05, %v4169_v8 }
 0x29e   : > { %v4146_v51 = vmul.f32 0.027777778, %v4134_v3  ;;  %v4137_v56 = vpop.xlane.xlu1 %4136  ;;  %v4155_v57 = vmul.f32 %v6652_v15, %v6652_v15  ;;  %v4179_v32 = vsub.f32 %v6617_v10, %v6652_v15 }
 0x29f   : > { %v4221_v58 = vsel %vm4205_vm1, %v4197_v2, %v4213_v13  ;;  %5604 = vrsqrt.f32 %v4185_v61  ;;  %v4147_v14 = vmul.f32 0.027777778, %v4137_v56 }
 0x2a0   : > { %v5599_v19 = vpop.eup %5598  ;;  %4229 = vst.msk [vmem:[%s6657_s27] sm:$0xff] %vm4076_vm0, %v4221_v58  ;;  %v4162_v47 = vsub.f32 %v4146_v51, %v4154_v49  ;;  %v4100_v63 = vpop.xlane.xlu0 %4099 }
 0x2a1   : > { %v4198_v34 = vmul.f32 %v5599_v19, %v4174_v18  ;;  %v4163_v7 = vsub.f32 %v4147_v14, %v4155_v57  ;;  %v4108_v12 = vmul.f32 0.027777778, %v4100_v63 }
 0x2a2   : > { %v4170_v30 = vmax.f32 %v4162_v47, 0.0 }
 0x2a3   : > { %vm4206_vm2 = vcmp.ge.f32.partialorder %v4198_v34, 0.0  ;;  %v4214_v20 = vmul.f32 0.2, %v4198_v34  ;;  %v4171_v48 = vmax.f32 %v4163_v7, 0.0  ;;  %v4156_v36 = vmul.f32 %v4108_v12, %v4108_v12 }
 0x2a4   : > { %v5601_v16 = vpop.eup %5600  ;;  %v4186_v52 = vadd.f32 1e-05, %v4170_v30  ;;  %v4140_v40 = vpop.xlane.xlu0 %4139  ;;  %v4180_v41 = vsub.f32 %v6627_v53, %v4108_v12 }
 0x2a5   : > { %v4222_v4 = vsel %vm4206_vm2, %v4198_v34, %v4214_v20  ;;  %v4199_v17 = vmul.f32 %v5601_v16, %v4175_v1  ;;  %v4187_v31 = vadd.f32 1e-05, %v4171_v48  ;;  %v4148_v35 = vmul.f32 0.027777778, %v4140_v40 }
 0x2a6   : > { %4230 = vst.msk [vmem:[%s6657_s27 + $0x8] sm:$0xff] %vm4076_vm0, %v4222_v4  ;;  %5606 = vrsqrt.f32 %v4186_v52 }
 0x2a7   : > { %vm4207_vm3 = vcmp.ge.f32.partialorder %v4199_v17, 0.0  ;;  %v4215_v0 = vmul.f32 0.2, %v4199_v17  ;;  %5608 = vrsqrt.f32 %v4187_v31  ;;  %v4164_v6 = vsub.f32 %v4148_v35, %v4156_v36 }
 0x2a9   : > { %v4223_v25 = vsel %vm4207_vm3, %v4199_v17, %v4215_v0  ;;  %v4172_v60 = vmax.f32 %v4164_v6, 0.0 }
 0x2aa   : > { %v5603_v27 = vpop.eup %5602  ;;  %4231 = vst.msk [vmem:[%s6657_s27 + $0x10] sm:$0xff] %vm4076_vm0, %v4223_v25 }
 0x2ab   : > { %v4200_v38 = vmul.f32 %v5603_v27, %v4176_v26  ;;  %v4188_v45 = vadd.f32 1e-05, %v4172_v60 }
 0x2ac   : > { %v5605_v21 = vpop.eup %5604 }
 0x2ad   : > { %vm4208_vm4 = vcmp.ge.f32.partialorder %v4200_v38, 0.0  ;;  %v4216_v23 = vmul.f32 0.2, %v4200_v38  ;;  %v4201_v22 = vmul.f32 %v5605_v21, %v4177_v44  ;;  %5610 = vrsqrt.f32 %v4188_v45 }
 0x2af   : > { %v4224_v28 = vsel %vm4208_vm4, %v4200_v38, %v4216_v23  ;;  %vm4209_vm5 = vcmp.ge.f32.partialorder %v4201_v22, 0.0  ;;  %v4217_v33 = vmul.f32 0.2, %v4201_v22 }
 0x2b0   : > { %4232 = vst.msk [vmem:[%s6657_s27 + $0x18] sm:$0xff] %vm4076_vm0, %v4224_v28 }
 0x2b1   : > { %v4225_v39 = vsel %vm4209_vm5, %v4201_v22, %v4217_v33 }
 0x2b2   : > { %4233 = vst.msk [vmem:[%s6657_s27 + $0x20] sm:$0xff] %vm4076_vm0, %v4225_v39 }
 0x2b3   : > { %v5607_v42 = vpop.eup %5606 }
 0x2b4   : > { %v5609_v54 = vpop.eup %5608  ;;  %v4202_v5 = vmul.f32 %v5607_v42, %v4178_v37 }
 0x2b5   : > { %v4203_v43 = vmul.f32 %v5609_v54, %v4179_v32 }
 0x2b6   : > { %vm4210_vm6 = vcmp.ge.f32.partialorder %v4202_v5, 0.0  ;;  %v4218_v9 = vmul.f32 0.2, %v4202_v5 }
 0x2b7   : > { %vm4211_vm7 = vcmp.ge.f32.partialorder %v4203_v43, 0.0  ;;  %v4219_v59 = vmul.f32 0.2, %v4203_v43 }
 0x2b8   : > { %v4226_v55 = vsel %vm4210_vm6, %v4202_v5, %v4218_v9 }
 0x2b9   : > { %4234 = vst.msk [vmem:[%s6657_s27 + $0x28] sm:$0xff] %vm4076_vm0, %v4226_v55  ;;  %v4227_v62 = vsel %vm4211_vm7, %v4203_v43, %v4219_v59 }
 0x2ba   : > { %v5611_v24 = vpop.eup %5610  ;;  %4235 = vst.msk [vmem:[%s6657_s27 + $0x30] sm:$0xff] %vm4076_vm0, %v4227_v62 }
 0x2bb   : > { %v4204_v50 = vmul.f32 %v5611_v24, %v4180_v41 }
 0x2bd   : > { %vm4212_vm8 = vcmp.ge.f32.partialorder %v4204_v50, 0.0  ;;  %v4220_v10 = vmul.f32 0.2, %v4204_v50 }
 0x2bf   : > { %v4228_v46 = vsel %vm4212_vm8, %v4204_v50, %v4220_v10 }
 0x2c0   : > { %4236 = vst.msk [vmem:[%s6657_s27 + $0x38] sm:$0xff] %vm4076_vm0, %v4228_v46 }
 0x2c1 PF: > { %s13_s12 = sadd.s32 1, %s5618_s12  }
 0x2c2   : > { %p10_p4 = scmp.ge.s32.totalorder %s13_s12, 4  }
 0x2c4   :  { %12 = sbr.rel (!%p10_p4) target bundleno = 1 (0x1), region = 62 }

// kernel: decoder_forward.7
= control target key start
LH: loop header
LB: loop body
LE: loop exit
PB: predicated region body
PF: predicated region fallthrough
CT: control target
= control target key end

     0   :  { %s1840_s12 = smov 0   ;;  %s2159_s0 = inlined_call_operand.vmem [shape: bf16[2,1024,196], index: 0, kind: input, shape index: {}]   ;;  %s2160_s1 = inlined_call_operand.vmem [shape: bf16[32,1024], index: 1, kind: input, shape index: {}]   ;;  %s2161_s2 = inlined_call_operand.vmem [shape: f32[32,1], index: 2, kind: input, shape index: {}]   ;;  %s2162_s3 = inlined_call_operand.vmem [shape: f32[2,32,196], index: 3, kind: output, shape index: {}]  }
   0x1 LB: > { %s1443_s13 = sadd.s32 4294967295, %s1817_s12   ;;  %p1447_p0 = scmp.ge.s32.totalorder %s1817_s12, 1  ;;  %s1817_s12 = sphi %s1840_s12, %s13_s12  }
   0x2   : > { %p137_p1 = scmp.lt.s32.totalorder %s1817_s12, 3 }
   0x4   : > { %p138_p2 = pnand %p1447_p0, %p137_p1 }
   0x5   : > { %p161_p3 = scmp.lt.s32.totalorder (!%p138_p2), %s1443_s13, 1 }
   0x6   : > { %141 = sbr.rel (%p138_p2) target bundleno = 531 (0x213), region = 32 }
   0xb   : > { %v1851_v0 = vld [vmem:[%s2160_s1] sm:$0xff]  ;;  %v1861_v2 = vld [vmem:[%s2160_s1 + $0x8] sm:$0xff]  ;;  %s2164_s13 = smov (!%p161_p3, %s1443_s13), 1  ;;  %v1819_v16 = vmov 0   ;;  %vm1271_vm0 = vcmask 556032  }
   0xc   : > { %v1856_v1 = vld [vmem:[%s2160_s1 + $0x20] sm:$0xff]  ;;  %v1870_v5 = vld [vmem:[%s2160_s1 + $0x28] sm:$0xff]  ;;  %s1598_s22 = sshll.u32 %s2164_s13, 10  ;;  %1609 = vset.pattern.permute.xlu0 %v1819_v16  ;;  %1610 = vset.pattern.permute.xlu1 %v1819_v16 }
   0xd   : > { %v1452_v3 = vcombine.low %v1851_v0, %v1856_v1  ;;  %v1453_v4 = vcombine.high %v1851_v0, %v1856_v1  ;;  %v1454_v6 = vcombine.low %v1861_v2, %v1870_v5  ;;  %v1455_v7 = vcombine.high %v1861_v2, %v1870_v5  ;;  %s1882_s25 = scalar_lea.vmem %s2159_s0, %s1598_s22  ;;  %v1979_v0 = vld [vmem:[%s2160_s1 + $0x10] sm:$0xff] }
   0xe   : > { %v1611_v8 = vld [vmem:[%s1882_s25 + $0x74] ss:$8 sps:$4 sm:$0xff]   ;;  %v1615_v10 = vld [vmem:[%s1882_s25 + $0x70] ss:$8 sps:$4 sm:$0xff]   ;;  %v1617_v12 = vld [vmem:[%s1882_s25 + $0x64] ss:$8 sps:$4 sm:$0xff]  }
   0xf   : > { %1091 = vmatprep.mubr.bf16.mxu0 %v1453_v4  ;;  %1144 = vmatprep.mubr.bf16.mxu1 %v1455_v7  ;;  %v1613_v9 = vld [vmem:[%s1882_s25 + $0x174] ss:$8 sps:$4 sm:$0xff]   ;;  %v1616_v11 = vld [vmem:[%s1882_s25 + $0x170] ss:$8 sps:$4 sm:$0xff]   ;;  %v1619_v13 = vld [vmem:[%s1882_s25 + $0x164] ss:$8 sps:$4 sm:$0xff]  }
  0x10   : > { %1059 = vmatprep.subr.bf16.mxu0 %v1611_v8  ;;  %1112 = vmatprep.subr.bf16.mxu1 %v1613_v9  ;;  %v1621_v14 = vld [vmem:[%s1882_s25 + $0x60] ss:$8 sps:$4 sm:$0xff]   ;;  %v1623_v17 = vld [vmem:[%s1882_s25 + $0x54] ss:$8 sps:$4 sm:$0xff]   ;;  %v1627_v19 = vld [vmem:[%s1882_s25 + $0x50] ss:$8 sps:$4 sm:$0xff]  }
  0x11   : > { %1060 = vmatpush1.bf16.msra.mxu0 %v1615_v10  ;;  %1113 = vmatpush1.bf16.msra.mxu1 %v1616_v11  ;;  %v1622_v15 = vld [vmem:[%s1882_s25 + $0x160] ss:$8 sps:$4 sm:$0xff]   ;;  %v1625_v18 = vld [vmem:[%s1882_s25 + $0x154] ss:$8 sps:$4 sm:$0xff]   ;;  %v1628_v20 = vld [vmem:[%s1882_s25 + $0x150] ss:$8 sps:$4 sm:$0xff]  }
  0x12   : > { %1061 = vmatprep.subr.bf16.mxu0 %v1617_v12  ;;  %1114 = vmatprep.subr.bf16.mxu1 %v1619_v13  ;;  %v1629_v21 = vld [vmem:[%s1882_s25 + $0x44] ss:$8 sps:$4 sm:$0xff]   ;;  %v1633_v23 = vld [vmem:[%s1882_s25 + $0x40] ss:$8 sps:$4 sm:$0xff]   ;;  %v1635_v25 = vld [vmem:[%s1882_s25 + $0x34] ss:$8 sps:$4 sm:$0xff]  }
  0x13   : > { %v1631_v22 = vld [vmem:[%s1882_s25 + $0x144] ss:$8 sps:$4 sm:$0xff]   ;;  %v1634_v24 = vld [vmem:[%s1882_s25 + $0x140] ss:$8 sps:$4 sm:$0xff]   ;;  %v1637_v26 = vld [vmem:[%s1882_s25 + $0x134] ss:$8 sps:$4 sm:$0xff]  }
  0x14   : > { %v1639_v27 = vld [vmem:[%s1882_s25 + $0x30] ss:$8 sps:$4 sm:$0xff]   ;;  %v1641_v29 = vld [vmem:[%s1882_s25 + $0x24] ss:$8 sps:$4 sm:$0xff]   ;;  %v1645_v31 = vld [vmem:[%s1882_s25 + $0x20] ss:$8 sps:$4 sm:$0xff]  }
  0x15   : > { %1062 = vmatpush1.bf16.msra.mxu0 %v1621_v14  ;;  %1115 = vmatpush1.bf16.msra.mxu1 %v1622_v15  ;;  %v1640_v28 = vld [vmem:[%s1882_s25 + $0x130] ss:$8 sps:$4 sm:$0xff]   ;;  %v1643_v30 = vld [vmem:[%s1882_s25 + $0x124] ss:$8 sps:$4 sm:$0xff]   ;;  %v1646_v32 = vld [vmem:[%s1882_s25 + $0x120] ss:$8 sps:$4 sm:$0xff]  }
  0x16   : > { %1063 = vmatprep.subr.bf16.mxu0 %v1623_v17  ;;  %1116 = vmatprep.subr.bf16.mxu1 %v1625_v18  ;;  %v1647_v33 = vld [vmem:[%s1882_s25 + $0x14] ss:$8 sps:$4 sm:$0xff]   ;;  %v1651_v35 = vld [vmem:[%s1882_s25 + $0x10] ss:$8 sps:$4 sm:$0xff]   ;;  %v1653_v37 = vld [vmem:[%s1882_s25 + $0x4] ss:$8 sps:$4 sm:$0xff]  }
  0x17   : > { %v1649_v34 = vld [vmem:[%s1882_s25 + $0x114] ss:$8 sps:$4 sm:$0xff]   ;;  %v1652_v36 = vld [vmem:[%s1882_s25 + $0x110] ss:$8 sps:$4 sm:$0xff]   ;;  %v1655_v38 = vld [vmem:[%s1882_s25 + $0x104] ss:$8 sps:$4 sm:$0xff]  }
  0x18   : > { %v1657_v39 = vld [vmem:[%s1882_s25] ss:$8 sps:$4 sm:$0xff]   ;;  %v1659_v41 = vld [vmem:[%s1882_s25 + $0xf4] ss:$8 sps:$4 sm:$0xff]   ;;  %v1663_v43 = vld [vmem:[%s1882_s25 + $0xf0] ss:$8 sps:$4 sm:$0xff]  }
  0x19   : > { %1064 = vmatpush1.bf16.msra.mxu0 %v1627_v19  ;;  %1117 = vmatpush1.bf16.msra.mxu1 %v1628_v20  ;;  %v1658_v40 = vld [vmem:[%s1882_s25 + $0x100] ss:$8 sps:$4 sm:$0xff]   ;;  %v1661_v42 = vld [vmem:[%s1882_s25 + $0x1f4] ss:$8 sps:$4 sm:$0xff]   ;;  %v1664_v44 = vld [vmem:[%s1882_s25 + $0x1f0] ss:$8 sps:$4 sm:$0xff]  }
  0x1a   : > { %1065 = vmatprep.subr.bf16.mxu0 %v1629_v21  ;;  %1118 = vmatprep.subr.bf16.mxu1 %v1631_v22  ;;  %v1665_v45 = vld [vmem:[%s1882_s25 + $0xe4] ss:$8 sps:$4 sm:$0xff]   ;;  %v1669_v47 = vld [vmem:[%s1882_s25 + $0xe0] ss:$8 sps:$4 sm:$0xff]   ;;  %v1671_v49 = vld [vmem:[%s1882_s25 + $0xd4] ss:$8 sps:$4 sm:$0xff]  }
  0x1b   : > { %v1667_v46 = vld [vmem:[%s1882_s25 + $0x1e4] ss:$8 sps:$4 sm:$0xff]   ;;  %v1670_v48 = vld [vmem:[%s1882_s25 + $0x1e0] ss:$8 sps:$4 sm:$0xff]   ;;  %v1673_v50 = vld [vmem:[%s1882_s25 + $0x1d4] ss:$8 sps:$4 sm:$0xff]  }
  0x1c   : > { %v1675_v51 = vld [vmem:[%s1882_s25 + $0xd0] ss:$8 sps:$4 sm:$0xff]   ;;  %v1677_v53 = vld [vmem:[%s1882_s25 + $0xc4] ss:$8 sps:$4 sm:$0xff]   ;;  %v1681_v55 = vld [vmem:[%s1882_s25 + $0xc0] ss:$8 sps:$4 sm:$0xff]  }
  0x1d   : > { %1066 = vmatpush1.bf16.msra.mxu0 %v1633_v23  ;;  %1119 = vmatpush1.bf16.msra.mxu1 %v1634_v24  ;;  %v1676_v52 = vld [vmem:[%s1882_s25 + $0x1d0] ss:$8 sps:$4 sm:$0xff]   ;;  %v1679_v54 = vld [vmem:[%s1882_s25 + $0x1c4] ss:$8 sps:$4 sm:$0xff]   ;;  %v1682_v56 = vld [vmem:[%s1882_s25 + $0x1c0] ss:$8 sps:$4 sm:$0xff]  }
  0x1e   : > { %1067 = vmatprep.subr.bf16.mxu0 %v1635_v25  ;;  %1120 = vmatprep.subr.bf16.mxu1 %v1637_v26  ;;  %v1683_v57 = vld [vmem:[%s1882_s25 + $0xb4] ss:$8 sps:$4 sm:$0xff]   ;;  %v1687_v59 = vld [vmem:[%s1882_s25 + $0xb0] ss:$8 sps:$4 sm:$0xff]   ;;  %v1689_v61 = vld [vmem:[%s1882_s25 + $0xa4] ss:$8 sps:$4 sm:$0xff]  }
  0x1f   : > { %v1685_v58 = vld [vmem:[%s1882_s25 + $0x1b4] ss:$8 sps:$4 sm:$0xff]   ;;  %v1688_v60 = vld [vmem:[%s1882_s25 + $0x1b0] ss:$8 sps:$4 sm:$0xff]   ;;  %v1691_v62 = vld [vmem:[%s1882_s25 + $0x1a4] ss:$8 sps:$4 sm:$0xff]  }
  0x20   : > { %v1693_v63 = vld [vmem:[%s1882_s25 + $0xa0] ss:$8 sps:$4 sm:$0xff]   ;;  %v1695_v7 = vld [vmem:[%s1882_s25 + $0x94] ss:$8 sps:$4 sm:$0xff]   ;;  %v1699_v9 = vld [vmem:[%s1882_s25 + $0x90] ss:$8 sps:$4 sm:$0xff]  }
  0x21   : > { %1068 = vmatpush1.bf16.msra.mxu0 %v1639_v27  ;;  %1121 = vmatpush1.bf16.msra.mxu1 %v1640_v28  ;;  %v1694_v4 = vld [vmem:[%s1882_s25 + $0x1a0] ss:$8 sps:$4 sm:$0xff]   ;;  %v1697_v8 = vld [vmem:[%s1882_s25 + $0x194] ss:$8 sps:$4 sm:$0xff]   ;;  %v1700_v10 = vld [vmem:[%s1882_s25 + $0x190] ss:$8 sps:$4 sm:$0xff]  }
  0x22   : > { %1069 = vmatprep.subr.bf16.mxu0 %v1641_v29  ;;  %1122 = vmatprep.subr.bf16.mxu1 %v1643_v30  ;;  %v1701_v11 = vld [vmem:[%s1882_s25 + $0x84] ss:$8 sps:$4 sm:$0xff]   ;;  %v1705_v13 = vld [vmem:[%s1882_s25 + $0x80] ss:$8 sps:$4 sm:$0xff]   ;;  %v1709_v15 = vld [vmem:[%s1882_s25 + $0x274] ss:$8 sps:$4 sm:$0xff]  }
  0x23   : > { %v1703_v12 = vld [vmem:[%s1882_s25 + $0x184] ss:$8 sps:$4 sm:$0xff]   ;;  %v1706_v14 = vld [vmem:[%s1882_s25 + $0x180] ss:$8 sps:$4 sm:$0xff]   ;;  %v1712_v16 = vld [vmem:[%s1882_s25 + $0x374] ss:$8 sps:$4 sm:$0xff]  }
  0x24   : > { %v179_v17 = vld [vmem:[%s2160_s1 + $0x40] sm:$0xff]  ;;  %v180_v19 = vld [vmem:[%s2160_s1 + $0x48] sm:$0xff]  ;;  %v1707_v21 = vld [vmem:[%s1882_s25 + $0x270] ss:$8 sps:$4 sm:$0xff]  }
  0x25   : > { %1070 = vmatpush1.bf16.msra.mxu0 %v1645_v31  ;;  %1123 = vmatpush1.bf16.msra.mxu1 %v1646_v32  ;;  %v183_v18 = vld [vmem:[%s2160_s1 + $0x60] sm:$0xff]  ;;  %v184_v20 = vld [vmem:[%s2160_s1 + $0x68] sm:$0xff]  ;;  %v1710_v22 = vld [vmem:[%s1882_s25 + $0x370] ss:$8 sps:$4 sm:$0xff]  }
  0x26   : > { %1071 = vmatprep.subr.bf16.mxu0 %v1647_v33  ;;  %1124 = vmatprep.subr.bf16.mxu1 %v1649_v34  ;;  %v1715_v23 = vld [vmem:[%s1882_s25 + $0x264] ss:$8 sps:$4 sm:$0xff]   ;;  %v1461_v25 = vcombine.high %v179_v17, %v183_v18  ;;  %v1463_v26 = vcombine.high %v180_v19, %v184_v20  ;;  %v1713_v27 = vld [vmem:[%s1882_s25 + $0x260] ss:$8 sps:$4 sm:$0xff]   ;;  %v1721_v29 = vld [vmem:[%s1882_s25 + $0x254] ss:$8 sps:$4 sm:$0xff]   ;;  %v1460_v5 = vcombine.low %v179_v17, %v183_v18 }
  0x27   : > { %v1718_v24 = vld [vmem:[%s1882_s25 + $0x364] ss:$8 sps:$4 sm:$0xff]   ;;  %v1716_v28 = vld [vmem:[%s1882_s25 + $0x360] ss:$8 sps:$4 sm:$0xff]   ;;  %v1724_v30 = vld [vmem:[%s1882_s25 + $0x354] ss:$8 sps:$4 sm:$0xff]  }
  0x28   : > { %v1984_v1 = vld [vmem:[%s2160_s1 + $0x30] sm:$0xff]  ;;  %v1727_v31 = vld [vmem:[%s1882_s25 + $0x244] ss:$8 sps:$4 sm:$0xff]   ;;  %v1725_v34 = vld [vmem:[%s1882_s25 + $0x240] ss:$8 sps:$4 sm:$0xff]  }
  0x29   : > { %1072 = vmatpush1.bf16.msra.mxu0 %v1651_v35  ;;  %1125 = vmatpush1.bf16.msra.mxu1 %v1652_v36  ;;  %v1719_v2 = vld [vmem:[%s1882_s25 + $0x250] ss:$8 sps:$4 sm:$0xff]   ;;  %v1730_v32 = vld [vmem:[%s1882_s25 + $0x344] ss:$8 sps:$4 sm:$0xff]   ;;  %v1457_v33 = vcombine.high %v1979_v0, %v1984_v1  ;;  %v1728_v35 = vld [vmem:[%s1882_s25 + $0x340] ss:$8 sps:$4 sm:$0xff]  }
  0x2a   : > { %1073 = vmatprep.subr.bf16.mxu0 %v1653_v37  ;;  %1126 = vmatprep.subr.bf16.mxu1 %v1655_v38  ;;  %v1733_v36 = vld [vmem:[%s1882_s25 + $0x234] ss:$8 sps:$4 sm:$0xff]   ;;  %v1731_v38 = vld [vmem:[%s1882_s25 + $0x230] ss:$8 sps:$4 sm:$0xff]  }
  0x2b   : > { %v1736_v37 = vld [vmem:[%s1882_s25 + $0x334] ss:$8 sps:$4 sm:$0xff]  }
  0x2c   : > { %v1781_v17 = vld [vmem:[%s1882_s25 + $0x2b4] ss:$8 sps:$4 sm:$0xff]  }
  0x2d   : > { %1074 = vmatpush1.bf16.msra.mxu0 %v1657_v39  ;;  %1127 = vmatpush1.bf16.msra.mxu1 %v1658_v40  ;;  %v1734_v39 = vld [vmem:[%s1882_s25 + $0x330] ss:$8 sps:$4 sm:$0xff]   ;;  %v1739_v40 = vld [vmem:[%s1882_s25 + $0x224] ss:$8 sps:$4 sm:$0xff]   ;;  %v1784_v18 = vld [vmem:[%s1882_s25 + $0x3b4] ss:$8 sps:$4 sm:$0xff]  }
  0x2e   : > { %1075 = vmatprep.subr.bf16.mxu0 %v1659_v41  ;;  %1128 = vmatprep.subr.bf16.mxu1 %v1661_v42  ;;  %v1742_v41 = vld [vmem:[%s1882_s25 + $0x324] ss:$8 sps:$4 sm:$0xff]   ;;  %v2003_v42 = vld [vmem:[%s2160_s1 + $0x18] sm:$0xff] }
  0x31   : > { %1076 = vmatpush2.bf16.msra.mxu0 %v1663_v43  ;;  %1129 = vmatpush2.bf16.msra.mxu1 %v1664_v44  ;;  %v1737_v43 = vld [vmem:[%s1882_s25 + $0x220] ss:$8 sps:$4 sm:$0xff]  }
  0x32   : > { %1077 = vmatprep.subr.bf16.mxu0 %v1665_v45  ;;  %1130 = vmatprep.subr.bf16.mxu1 %v1667_v46  ;;  %v1740_v44 = vld [vmem:[%s1882_s25 + $0x320] ss:$8 sps:$4 sm:$0xff]   ;;  %v1745_v45 = vld [vmem:[%s1882_s25 + $0x214] ss:$8 sps:$4 sm:$0xff]  }
  0x33   : > { %v1748_v46 = vld [vmem:[%s1882_s25 + $0x314] ss:$8 sps:$4 sm:$0xff]  }
  0x35   : > { %1078 = vmatpush2.bf16.msra.mxu0 %v1669_v47  ;;  %1131 = vmatpush2.bf16.msra.mxu1 %v1670_v48  ;;  %v2012_v47 = vld [vmem:[%s2160_s1 + $0x38] sm:$0xff]  ;;  %v315_v48 = vld [vmem:[%s2161_s2] sm:$0xff] }
  0x36   : > { %1079 = vmatprep.subr.bf16.mxu0 %v1671_v49  ;;  %1132 = vmatprep.subr.bf16.mxu1 %v1673_v50  ;;  %v1459_v49 = vcombine.high %v2003_v42, %v2012_v47  ;;  %v316_v50 = vld [vmem:[%s2161_s2 + $0x8] sm:$0xff] }
  0x37   : > { %321 = vperm.xlu0 %1609, %v315_v48  }
  0x39   : > { %1080 = vmatpush2.bf16.msra.mxu0 %v1675_v51  ;;  %1133 = vmatpush2.bf16.msra.mxu1 %v1676_v52  ;;  %v1743_v51 = vld [vmem:[%s1882_s25 + $0x210] ss:$8 sps:$4 sm:$0xff]  }
  0x3a   : > { %1081 = vmatprep.subr.bf16.mxu0 %v1677_v53  ;;  %1134 = vmatprep.subr.bf16.mxu1 %v1679_v54  ;;  %v1746_v52 = vld [vmem:[%s1882_s25 + $0x310] ss:$8 sps:$4 sm:$0xff]   ;;  %v1751_v54 = vld [vmem:[%s1882_s25 + $0x204] ss:$8 sps:$4 sm:$0xff]  }
  0x3b   : > { %v317_v53 = vld [vmem:[%s2161_s2 + $0x10] sm:$0xff]  ;;  %326 = vperm.xlu0 %1609, %v316_v50  }
  0x3c   : > { %331 = vperm.xlu1 %1610, %v317_v53  }
  0x3d   : > { %1082 = vmatpush2.bf16.msra.mxu0 %v1681_v55  ;;  %1135 = vmatpush2.bf16.msra.mxu1 %v1682_v56  ;;  %v1754_v55 = vld [vmem:[%s1882_s25 + $0x304] ss:$8 sps:$4 sm:$0xff]   ;;  %v1749_v56 = vld [vmem:[%s1882_s25 + $0x200] ss:$8 sps:$4 sm:$0xff]  }
  0x3e   : > { %1083 = vmatprep.subr.bf16.mxu0 %v1683_v57  ;;  %1136 = vmatprep.subr.bf16.mxu1 %v1685_v58  ;;  %v1752_v57 = vld [vmem:[%s1882_s25 + $0x300] ss:$8 sps:$4 sm:$0xff]   ;;  %v318_v58 = vld [vmem:[%s2161_s2 + $0x18] sm:$0xff] }
  0x40   : > { %336 = vperm.xlu1 %1610, %v318_v58  }
  0x41   : > { %1084 = vmatpush2.bf16.msra.mxu0 %v1687_v59  ;;  %1137 = vmatpush2.bf16.msra.mxu1 %v1688_v60  ;;  %v1757_v59 = vld [vmem:[%s1882_s25 + $0x2f4] ss:$8 sps:$4 sm:$0xff]  }
  0x42   : > { %1085 = vmatprep.subr.bf16.mxu0 %v1689_v61  ;;  %1138 = vmatprep.subr.bf16.mxu1 %v1691_v62  ;;  %v1760_v60 = vld [vmem:[%s1882_s25 + $0x3f4] ss:$8 sps:$4 sm:$0xff]   ;;  %v1755_v61 = vld [vmem:[%s1882_s25 + $0x2f0] ss:$8 sps:$4 sm:$0xff]  }
  0x43   : > { %v1758_v62 = vld [vmem:[%s1882_s25 + $0x3f0] ss:$8 sps:$4 sm:$0xff]  }
  0x45   : > { %1086 = vmatpush2.bf16.msra.mxu0 %v1693_v63  ;;  %1139 = vmatpush2.bf16.msra.mxu1 %v1694_v4  ;;  %v1763_v63 = vld [vmem:[%s1882_s25 + $0x2e4] ss:$8 sps:$4 sm:$0xff]  }
  0x46   : > { %1087 = vmatprep.subr.bf16.mxu0 %v1695_v7  ;;  %1140 = vmatprep.subr.bf16.mxu1 %v1697_v8  ;;  %v1766_v4 = vld [vmem:[%s1882_s25 + $0x3e4] ss:$8 sps:$4 sm:$0xff]   ;;  %v1761_v7 = vld [vmem:[%s1882_s25 + $0x2e0] ss:$8 sps:$4 sm:$0xff]  }
  0x47   : > { %v1764_v8 = vld [vmem:[%s1882_s25 + $0x3e0] ss:$8 sps:$4 sm:$0xff]  }
  0x49   : > { %1088 = vmatpush2.bf16.msra.mxu0 %v1699_v9  ;;  %1141 = vmatpush2.bf16.msra.mxu1 %v1700_v10  ;;  %v1769_v9 = vld [vmem:[%s1882_s25 + $0x2d4] ss:$8 sps:$4 sm:$0xff]  }
  0x4a   : > { %1089 = vmatprep.subr.bf16.mxu0 %v1701_v11  ;;  %1142 = vmatprep.subr.bf16.mxu1 %v1703_v12  ;;  %v1772_v10 = vld [vmem:[%s1882_s25 + $0x3d4] ss:$8 sps:$4 sm:$0xff]   ;;  %v1767_v11 = vld [vmem:[%s1882_s25 + $0x2d0] ss:$8 sps:$4 sm:$0xff]  }
  0x4b   : > { %v1770_v12 = vld [vmem:[%s1882_s25 + $0x3d0] ss:$8 sps:$4 sm:$0xff]  }
  0x4d   : > { %1090 = vmatpush2.bf16.msra.mxu0 %v1705_v13  ;;  %1143 = vmatpush2.bf16.msra.mxu1 %v1706_v14  ;;  %v1775_v13 = vld [vmem:[%s1882_s25 + $0x2c4] ss:$8 sps:$4 sm:$0xff]  }
  0x4e   : > { %1165 = vmatprep.subr.bf16.mxu0 %v1709_v15  ;;  %1218 = vmatprep.subr.bf16.mxu1 %v1712_v16  ;;  %v1778_v14 = vld [vmem:[%s1882_s25 + $0x3c4] ss:$8 sps:$4 sm:$0xff]   ;;  %v1773_v15 = vld [vmem:[%s1882_s25 + $0x2c0] ss:$8 sps:$4 sm:$0xff]  }
  0x4f   : > { %v1776_v16 = vld [vmem:[%s1882_s25 + $0x3c0] ss:$8 sps:$4 sm:$0xff]  }
  0x50   : > { %1092 = vmatmul.mubr.bf16.vlgmr.msra.gmra.mxu0 %v1452_v3  ;;  %1145 = vmatmul.mubr.bf16.vlgmr.msra.gmra.mxu1 %v1454_v6  ;;  %v1722_v3 = vld [vmem:[%s1882_s25 + $0x350] ss:$8 sps:$4 sm:$0xff]   ;;  %v1462_v6 = vcombine.low %v180_v19, %v184_v20 }
  0x51   : > { %1166 = vmatpush1.bf16.msra.mxu0 %v1707_v21  ;;  %1219 = vmatpush1.bf16.msra.mxu1 %v1710_v22  ;;  %v1779_v19 = vld [vmem:[%s1882_s25 + $0x2b0] ss:$8 sps:$4 sm:$0xff]   ;;  %v1787_v21 = vld [vmem:[%s1882_s25 + $0x2a4] ss:$8 sps:$4 sm:$0xff]  }
  0x52   : > { %1167 = vmatprep.subr.bf16.mxu0 %v1715_v23  ;;  %1220 = vmatprep.subr.bf16.mxu1 %v1718_v24  ;;  %v1782_v20 = vld [vmem:[%s1882_s25 + $0x3b0] ss:$8 sps:$4 sm:$0xff]   ;;  %v1790_v22 = vld [vmem:[%s1882_s25 + $0x3a4] ss:$8 sps:$4 sm:$0xff]   ;;  %v1785_v23 = vld [vmem:[%s1882_s25 + $0x2a0] ss:$8 sps:$4 sm:$0xff]  }
  0x53   : > { %1101 = vmatprep.mubr.bf16.mxu0 %v1461_v25  ;;  %1154 = vmatprep.mubr.bf16.mxu1 %v1463_v26  ;;  %v1788_v24 = vld [vmem:[%s1882_s25 + $0x3a0] ss:$8 sps:$4 sm:$0xff]   ;;  %v1793_v25 = vld [vmem:[%s1882_s25 + $0x294] ss:$8 sps:$4 sm:$0xff]  }
  0x54   : > { %v1796_v26 = vld [vmem:[%s1882_s25 + $0x394] ss:$8 sps:$4 sm:$0xff]  }
  0x55   : > { %1168 = vmatpush1.bf16.msra.mxu0 %v1713_v27  ;;  %1221 = vmatpush1.bf16.msra.mxu1 %v1716_v28  ;;  %v1791_v27 = vld [vmem:[%s1882_s25 + $0x290] ss:$8 sps:$4 sm:$0xff]  }
  0x56   : > { %1169 = vmatprep.subr.bf16.mxu0 %v1721_v29  ;;  %1222 = vmatprep.subr.bf16.mxu1 %v1724_v30  ;;  %v1794_v28 = vld [vmem:[%s1882_s25 + $0x390] ss:$8 sps:$4 sm:$0xff]   ;;  %v1799_v29 = vld [vmem:[%s1882_s25 + $0x284] ss:$8 sps:$4 sm:$0xff]  }
  0x57   : > { %v1802_v30 = vld [vmem:[%s1882_s25 + $0x384] ss:$8 sps:$4 sm:$0xff]  }
  0x58   : > { %1102 = vmatmul.mubr.bf16.gmra.mxu0 %v1460_v5  ;;  %1155 = vmatmul.mubr.bf16.gmra.mxu1 %v1462_v6  ;;  %v181_v5 = vld [vmem:[%s2160_s1 + $0x50] sm:$0xff] }
  0x59   : > { %1170 = vmatpush1.bf16.msra.mxu0 %v1719_v2  ;;  %1223 = vmatpush1.bf16.msra.mxu1 %v1722_v3  ;;  %v1797_v2 = vld [vmem:[%s1882_s25 + $0x280] ss:$8 sps:$4 sm:$0xff]   ;;  %v185_v6 = vld [vmem:[%s2160_s1 + $0x70] sm:$0xff] }
  0x5a   : > { %1171 = vmatprep.subr.bf16.mxu0 %v1727_v31  ;;  %1224 = vmatprep.subr.bf16.mxu1 %v1730_v32  ;;  %v1800_v3 = vld [vmem:[%s1882_s25 + $0x380] ss:$8 sps:$4 sm:$0xff]   ;;  %v182_v31 = vld [vmem:[%s2160_s1 + $0x58] sm:$0xff]  ;;  %s1599_s25 = sshll.u32 %s2164_s13, 6 }
  0x5b   : > { %1197 = vmatprep.mubr.bf16.mxu0 %v1457_v33  ;;  %1250 = vmatprep.mubr.bf16.mxu1 %v1459_v49  ;;  %v186_v32 = vld [vmem:[%s2160_s1 + $0x78] sm:$0xff]  ;;  %v1456_v33 = vcombine.low %v1979_v0, %v1984_v1  ;;  %s2136_s9 = scalar_lea.vmem %s2162_s3, %s1599_s25 }
  0x5d   : > { %1172 = vmatpush1.bf16.msra.mxu0 %v1725_v34  ;;  %1225 = vmatpush1.bf16.msra.mxu1 %v1728_v35  ;;  %v1458_v34 = vcombine.low %v2003_v42, %v2012_v47  ;;  %v1465_v35 = vcombine.high %v181_v5, %v185_v6 }
  0x5e   : > { %1173 = vmatprep.subr.bf16.mxu0 %v1733_v36  ;;  %1226 = vmatprep.subr.bf16.mxu1 %v1736_v37  ;;  %v1467_v36 = vcombine.high %v182_v31, %v186_v32  ;;  %v1464_v37 = vcombine.low %v181_v5, %v185_v6 }
  0x61   : > { %1174 = vmatpush1.bf16.msra.mxu0 %v1731_v38  ;;  %1227 = vmatpush1.bf16.msra.mxu1 %v1734_v39  ;;  %v1466_v38 = vcombine.low %v182_v31, %v186_v32 }
  0x62   : > { %1175 = vmatprep.subr.bf16.mxu0 %v1739_v40  ;;  %1228 = vmatprep.subr.bf16.mxu1 %v1742_v41 }
  0x65   : > { %1176 = vmatpush1.bf16.msra.mxu0 %v1737_v43  ;;  %1229 = vmatpush1.bf16.msra.mxu1 %v1740_v44 }
  0x66   : > { %1177 = vmatprep.subr.bf16.mxu0 %v1745_v45  ;;  %1230 = vmatprep.subr.bf16.mxu1 %v1748_v46 }
  0x69   : > { %1178 = vmatpush1.bf16.msra.mxu0 %v1743_v51  ;;  %1231 = vmatpush1.bf16.msra.mxu1 %v1746_v52 }
  0x6a   : > { %1179 = vmatprep.subr.bf16.mxu0 %v1751_v54  ;;  %1232 = vmatprep.subr.bf16.mxu1 %v1754_v55 }
  0x6d   : > { %1180 = vmatpush1.bf16.msra.mxu0 %v1749_v56  ;;  %1233 = vmatpush1.bf16.msra.mxu1 %v1752_v57 }
  0x6e   : > { %1181 = vmatprep.subr.bf16.mxu0 %v1757_v59  ;;  %1234 = vmatprep.subr.bf16.mxu1 %v1760_v60 }
  0x71   : > { %1182 = vmatpush2.bf16.msra.mxu0 %v1755_v61  ;;  %1235 = vmatpush2.bf16.msra.mxu1 %v1758_v62 }
  0x72   : > { %1183 = vmatprep.subr.bf16.mxu0 %v1763_v63  ;;  %1236 = vmatprep.subr.bf16.mxu1 %v1766_v4 }
  0x75   : > { %1184 = vmatpush2.bf16.msra.mxu0 %v1761_v7  ;;  %1237 = vmatpush2.bf16.msra.mxu1 %v1764_v8 }
  0x76   : > { %1185 = vmatprep.subr.bf16.mxu0 %v1769_v9  ;;  %1238 = vmatprep.subr.bf16.mxu1 %v1772_v10 }
  0x79   : > { %1186 = vmatpush2.bf16.msra.mxu0 %v1767_v11  ;;  %1239 = vmatpush2.bf16.msra.mxu1 %v1770_v12 }
  0x7a   : > { %1187 = vmatprep.subr.bf16.mxu0 %v1775_v13  ;;  %1240 = vmatprep.subr.bf16.mxu1 %v1778_v14 }
  0x7d   : > { %1188 = vmatpush2.bf16.msra.mxu0 %v1773_v15  ;;  %1241 = vmatpush2.bf16.msra.mxu1 %v1776_v16 }
  0x7e   : > { %1189 = vmatprep.subr.bf16.mxu0 %v1781_v17  ;;  %1242 = vmatprep.subr.bf16.mxu1 %v1784_v18 }
  0x81   : > { %1190 = vmatpush2.bf16.msra.mxu0 %v1779_v19  ;;  %1243 = vmatpush2.bf16.msra.mxu1 %v1782_v20 }
  0x82   : > { %1191 = vmatprep.subr.bf16.mxu0 %v1787_v21  ;;  %1244 = vmatprep.subr.bf16.mxu1 %v1790_v22 }
  0x85   : > { %1192 = vmatpush2.bf16.msra.mxu0 %v1785_v23  ;;  %1245 = vmatpush2.bf16.msra.mxu1 %v1788_v24 }
  0x86   : > { %1193 = vmatprep.subr.bf16.mxu0 %v1793_v25  ;;  %1246 = vmatprep.subr.bf16.mxu1 %v1796_v26 }
  0x89   : > { %1194 = vmatpush2.bf16.msra.mxu0 %v1791_v27  ;;  %1247 = vmatpush2.bf16.msra.mxu1 %v1794_v28 }
  0x8a   : > { %1195 = vmatprep.subr.bf16.mxu0 %v1799_v29  ;;  %1248 = vmatprep.subr.bf16.mxu1 %v1802_v30 }
  0x8d   : > { %1196 = vmatpush2.bf16.msra.mxu0 %v1797_v2  ;;  %1249 = vmatpush2.bf16.msra.mxu1 %v1800_v3 }
  0x90   : > { %1198 = vmatmul.mubr.bf16.vlgmr.msra.gmra.mxu0 %v1456_v33  ;;  %1251 = vmatmul.mubr.bf16.vlgmr.msra.gmra.mxu1 %v1458_v34 }
  0x91   : > { %1207 = vmatprep.mubr.bf16.mxu0 %v1465_v35  ;;  %1260 = vmatprep.mubr.bf16.mxu1 %v1467_v36 }
  0x98   : > { %1208 = vmatmul.mubr.bf16.gmra.mxu0 %v1464_v37  ;;  %1261 = vmatmul.mubr.bf16.gmra.mxu1 %v1466_v38 }
  0xb2   : > { %v322_v47 = vpop.permute.xlu0 %321 }
  0xb6   : > { %v327_v53 = vpop.permute.xlu0 %326 }
  0xb7   : > { %v332_v59 = vpop.permute.xlu1 %331 }
  0xbb   : > { %v337_v17 = vpop.permute.xlu1 %336 }
 0x110   : > { %v1093_v39 = vpop.f32.mrf.mxu0  ;;  %v1146_v40 = vpop.f32.mrf.mxu1 }
 0x111   : > { %v1094_v52 = vadd.f32 %v1093_v39, %v322_v47 }
 0x112   : > { %v1095_v41 = vpop.f32.mrf.mxu0  ;;  %v1148_v43 = vpop.f32.mrf.mxu1 }
 0x113   : > { %v1096_v54 = vadd.f32 %v1095_v41, %v322_v47  ;;  %v1147_v57 = vadd.f32 %v1146_v40, %v1094_v52 }
 0x114   : > { %v1097_v0 = vpop.f32.mrf.mxu0  ;;  %v1150_v1 = vpop.f32.mrf.mxu1 }
 0x115   : > { %v1098_v58 = vadd.f32 %v1097_v0, %v327_v53  ;;  %v1149_v62 = vadd.f32 %v1148_v43, %v1096_v54 }
 0x116   : > { %v1099_v44 = vpop.f32.mrf.mxu0  ;;  %v1152_v42 = vpop.f32.mrf.mxu1 }
 0x117   : > { %v1100_v63 = vadd.f32 %v1099_v44, %v327_v53  ;;  %v1151_v9 = vadd.f32 %v1150_v1, %v1098_v58 }
 0x118   : > { %v1103_v45 = vpop.f32.mrf.mxu0  ;;  %v1156_v46 = vpop.f32.mrf.mxu1 }
 0x119   : > { %v1104_v10 = vadd.f32 %v1103_v45, %v332_v59  ;;  %v1153_v16 = vadd.f32 %v1152_v42, %v1100_v63 }
 0x11a   : > { %v1105_v48 = vpop.f32.mrf.mxu0  ;;  %v1158_v49 = vpop.f32.mrf.mxu1 }
 0x11b   : > { %v1106_v12 = vadd.f32 %v1105_v48, %v332_v59  ;;  %v1157_v22 = vadd.f32 %v1156_v46, %v1104_v10 }
 0x11c   : > { %v1107_v50 = vpop.f32.mrf.mxu0  ;;  %v1160_v51 = vpop.f32.mrf.mxu1 }
 0x11d   : > { %v1159_v26 = vadd.f32 %v1158_v49, %v1106_v12  ;;  %v1108_v32 = vadd.f32 %v1107_v50, %v337_v17 }
 0x11e   : > { %v1109_v55 = vpop.f32.mrf.mxu0  ;;  %v1162_v56 = vpop.f32.mrf.mxu1 }
 0x11f   : > { %v1110_v3 = vadd.f32 %v1109_v55, %v337_v17  ;;  %v1161_v42 = vadd.f32 %v1160_v51, %v1108_v32 }
 0x121   : > { %v1163_v0 = vadd.f32 %v1162_v56, %v1110_v3 }
 0x150   : > { %v1199_v60 = vpop.f32.mrf.mxu0  ;;  %v1252_v61 = vpop.f32.mrf.mxu1 }
 0x151   : > { %v1200_v4 = vadd.f32 %v1199_v60, %v1147_v57 }
 0x152   : > { %v1201_v7 = vpop.f32.mrf.mxu0  ;;  %v1254_v8 = vpop.f32.mrf.mxu1 }
 0x153   : > { %v1202_v11 = vadd.f32 %v1201_v7, %v1149_v62  ;;  %v2082_v13 = vadd.f32 %v1252_v61, %v1200_v4 }
 0x154   : > { %v1203_v14 = vpop.f32.mrf.mxu0  ;;  %v1256_v15 = vpop.f32.mrf.mxu1 }
 0x155   : > { %v2084_v18 = vadd.f32 %v1254_v8, %v1202_v11  ;;  %v1204_v19 = vadd.f32 %v1203_v14, %v1151_v9  ;;  %v1292_v2 = vmul.f32 %v2082_v13, %v2082_v13 }
 0x156   : > { %v1205_v20 = vpop.f32.mrf.mxu0  ;;  %v1258_v21 = vpop.f32.mrf.mxu1 }
 0x157   : > { %v1206_v23 = vadd.f32 %v1205_v20, %v1153_v16  ;;  %v1272_v24 = vsel %vm1271_vm0, %v2084_v18, 0.0  ;;  %v1293_v25 = vmul.f32 %v2084_v18, %v2084_v18  ;;  %v2090_v27 = vadd.f32 %v1256_v15, %v1204_v19 }
 0x158   : > { %v1209_v28 = vpop.f32.mrf.mxu0  ;;  %v1262_v29 = vpop.f32.mrf.mxu1  ;;  %v1273_v30 = vadd.f32 %v1272_v24, %v2082_v13 }
 0x159   : > { %v2095_v5 = vadd.f32 %v1258_v21, %v1206_v23  ;;  %v1210_v6 = vadd.f32 %v1209_v28, %v1157_v22  ;;  %v1300_v31 = vsel %vm1271_vm0, %v1293_v25, 0.0  ;;  %v1294_v43 = vmul.f32 %v2090_v27, %v2090_v27 }
 0x15a   : > { %v1211_v33 = vpop.f32.mrf.mxu0  ;;  %v1264_v34 = vpop.f32.mrf.mxu1  ;;  %1274 = vadd.xlane.f32.xlu0 %v1273_v30  ;;  %v1301_v35 = vadd.f32 %v1300_v31, %v1292_v2 }
 0x15b   : > { %v1212_v36 = vadd.f32 %v1211_v33, %v1159_v26  ;;  %v1276_v37 = vsel %vm1271_vm0, %v2095_v5, 0.0  ;;  %v1295_v38 = vmul.f32 %v2095_v5, %v2095_v5  ;;  %v2102_v39 = vadd.f32 %v1262_v29, %v1210_v6 }
 0x15c   : > { %v1213_v40 = vpop.f32.mrf.mxu0  ;;  %v1266_v41 = vpop.f32.mrf.mxu1  ;;  %1302 = vadd.xlane.f32.xlu1 %v1301_v35  ;;  %v1277_v46 = vadd.f32 %v1276_v37, %v2090_v27 }
 0x15d   : > { %v2106_v1 = vadd.f32 %v1264_v34, %v1212_v36  ;;  %v1304_v44 = vsel %vm1271_vm0, %v1295_v38, 0.0  ;;  %v1214_v52 = vadd.f32 %v1213_v40, %v1161_v42  ;;  %v1296_v54 = vmul.f32 %v2102_v39, %v2102_v39 }
 0x15e   : > { %v1215_v45 = vpop.f32.mrf.mxu0  ;;  %v1305_v47 = vadd.f32 %v1304_v44, %v1294_v43  ;;  %v1268_v53 = vpop.f32.mrf.mxu1 }
 0x15f   : > { %v1216_v48 = vadd.f32 %v1215_v45, %v1163_v0  ;;  %v1297_v49 = vmul.f32 %v2106_v1, %v2106_v1  ;;  %v1280_v50 = vsel %vm1271_vm0, %v2106_v1, 0.0  ;;  %v2124_v60 = vadd.f32 %v1266_v41, %v1214_v52 }
 0x160   : > { %1278 = vadd.xlane.f32.xlu1 %v1277_v46  ;;  %1306 = vadd.xlane.f32.xlu0 %v1305_v47  ;;  %v1281_v57 = vadd.f32 %v1280_v50, %v2102_v39 }
 0x161   : > { %v2116_v55 = vadd.f32 %v1268_v53, %v1216_v48  ;;  %v1308_v51 = vsel %vm1271_vm0, %v1297_v49, 0.0  ;;  %v1298_v63 = vmul.f32 %v2124_v60, %v2124_v60 }
 0x162   : > { %v1309_v56 = vadd.f32 %v1308_v51, %v1296_v54 }
 0x163   : > { %v1284_v58 = vsel %vm1271_vm0, %v2116_v55, 0.0  ;;  %v1299_v59 = vmul.f32 %v2116_v55, %v2116_v55 }
 0x164   : > { %1310 = vadd.xlane.f32.xlu1 %v1309_v56  ;;  %1282 = vadd.xlane.f32.xlu0 %v1281_v57  ;;  %v1285_v61 = vadd.f32 %v1284_v58, %v2124_v60 }
 0x165   : > { %v1312_v62 = vsel %vm1271_vm0, %v1299_v59, 0.0 }
 0x166   : > { %v1313_v4 = vadd.f32 %v1312_v62, %v1298_v63 }
 0x168   : > { %1286 = vadd.xlane.f32.xlu0 %v1285_v61 }
 0x16c   : > { %1314 = vadd.xlane.f32.xlu0 %v1313_v4 }
 0x1e3   : > { %v1275_v7 = vpop.xlane.xlu0 %1274 }
 0x1e4   : > { %v1288_v8 = vmul.f32 0.0051020407, %v1275_v7 }
 0x1e5   : > { %v1303_v9 = vpop.xlane.xlu1 %1302 }
 0x1e6   : > { %v1316_v10 = vmul.f32 0.0051020407, %v1303_v9  ;;  %v1320_v11 = vmul.f32 %v1288_v8, %v1288_v8  ;;  %v1332_v37 = vsub.f32 %v2082_v13, %v1288_v8  ;;  %v1333_v38 = vsub.f32 %v2084_v18, %v1288_v8 }
 0x1e8   : > { %v1324_v12 = vsub.f32 %v1316_v10, %v1320_v11 }
 0x1e9   : > { %v1279_v14 = vpop.xlane.xlu1 %1278  ;;  %v1307_v15 = vpop.xlane.xlu0 %1306 }
 0x1ea   : > { %v1328_v16 = vmax.f32 %v1324_v12, 0.0  ;;  %v1289_v17 = vmul.f32 0.0051020407, %v1279_v14  ;;  %v1317_v21 = vmul.f32 0.0051020407, %v1307_v15 }
 0x1ec   : > { %v1340_v19 = vadd.f32 1e-05, %v1328_v16  ;;  %v1321_v20 = vmul.f32 %v1289_v17, %v1289_v17  ;;  %v1334_v46 = vsub.f32 %v2090_v27, %v1289_v17  ;;  %v1335_v47 = vsub.f32 %v2095_v5, %v1289_v17 }
 0x1ed   : > { %v1311_v22 = vpop.xlane.xlu1 %1310  ;;  %v1283_v23 = vpop.xlane.xlu0 %1282 }
 0x1ee   : > { %1803 = vrsqrt.f32 %v1340_v19  ;;  %v1325_v24 = vsub.f32 %v1317_v21, %v1321_v20  ;;  %v1290_v25 = vmul.f32 0.0051020407, %v1283_v23  ;;  %v1318_v28 = vmul.f32 0.0051020407, %v1311_v22 }
 0x1f0   : > { %v1329_v26 = vmax.f32 %v1325_v24, 0.0  ;;  %v1322_v29 = vmul.f32 %v1290_v25, %v1290_v25  ;;  %v1336_v52 = vsub.f32 %v2102_v39, %v1290_v25  ;;  %v1337_v53 = vsub.f32 %v2106_v1, %v1290_v25 }
 0x1f1   : > { %v1287_v30 = vpop.xlane.xlu0 %1286 }
 0x1f2   : > { %v1341_v2 = vadd.f32 1e-05, %v1329_v26  ;;  %v1326_v3 = vsub.f32 %v1318_v28, %v1322_v29  ;;  %v1291_v6 = vmul.f32 0.0051020407, %v1287_v30 }
 0x1f4   : > { %1805 = vrsqrt.f32 %v1341_v2  ;;  %v1330_v31 = vmax.f32 %v1326_v3, 0.0  ;;  %v1323_v34 = vmul.f32 %v1291_v6, %v1291_v6  ;;  %v1338_v62 = vsub.f32 %v2124_v60, %v1291_v6 }
 0x1f5   : > { %v1315_v32 = vpop.xlane.xlu0 %1314  ;;  %v1339_v63 = vsub.f32 %v2116_v55, %v1291_v6 }
 0x1f6   : > { %v1342_v33 = vadd.f32 1e-05, %v1330_v31  ;;  %v1319_v35 = vmul.f32 0.0051020407, %v1315_v32 }
 0x1f8   : > { %1807 = vrsqrt.f32 %v1342_v33  ;;  %v1327_v36 = vsub.f32 %v1319_v35, %v1323_v34 }
 0x1fa   : > { %v1331_v40 = vmax.f32 %v1327_v36, 0.0 }
 0x1fb   : > { %v1804_v41 = vpop.eup %1803 }
 0x1fc   : > { %v1348_v43 = vmul.f32 %v1804_v41, %v1332_v37  ;;  %v1349_v0 = vmul.f32 %v1804_v41, %v1333_v38  ;;  %v1343_v44 = vadd.f32 1e-05, %v1331_v40 }
 0x1fe   : > { %vm1356_vm1 = vcmp.ge.f32.partialorder %v1348_v43, 0.0  ;;  %vm1357_vm2 = vcmp.ge.f32.partialorder %v1349_v0, 0.0  ;;  %v1364_v42 = vmul.f32 0.2, %v1348_v43  ;;  %v1365_v45 = vmul.f32 0.2, %v1349_v0 }
 0x1ff   : > { %1809 = vrsqrt.f32 %v1343_v44 }
 0x200   : > { %v1372_v13 = vsel %vm1356_vm1, %v1348_v43, %v1364_v42  ;;  %v1373_v18 = vsel %vm1357_vm2, %v1349_v0, %v1365_v45 }
 0x201   : > { %v1806_v48 = vpop.eup %1805  ;;  %1380 = vst [vmem:[%s2136_s9] sm:$0xff] %v1372_v13  ;;  %1381 = vst.msk [vmem:[%s2136_s9 + $0x8] sm:$0xff] %vm1271_vm0, %v1373_v18 }
 0x202   : > { %v1350_v49 = vmul.f32 %v1806_v48, %v1334_v46  ;;  %v1351_v50 = vmul.f32 %v1806_v48, %v1335_v47 }
 0x204   : > { %vm1358_vm3 = vcmp.ge.f32.partialorder %v1350_v49, 0.0  ;;  %vm1359_vm4 = vcmp.ge.f32.partialorder %v1351_v50, 0.0  ;;  %v1366_v54 = vmul.f32 0.2, %v1350_v49  ;;  %v1367_v27 = vmul.f32 0.2, %v1351_v50 }
 0x205   : > { %v1808_v51 = vpop.eup %1807 }
 0x206   : > { %v1374_v5 = vsel %vm1358_vm3, %v1350_v49, %v1366_v54  ;;  %v1375_v56 = vsel %vm1359_vm4, %v1351_v50, %v1367_v27  ;;  %v1352_v57 = vmul.f32 %v1808_v51, %v1336_v52  ;;  %v1353_v58 = vmul.f32 %v1808_v51, %v1337_v53 }
 0x207   : > { %1382 = vst [vmem:[%s2136_s9 + $0x10] sm:$0xff] %v1374_v5  ;;  %1383 = vst.msk [vmem:[%s2136_s9 + $0x18] sm:$0xff] %vm1271_vm0, %v1375_v56 }
 0x208   : > { %vm1360_vm5 = vcmp.ge.f32.partialorder %v1352_v57, 0.0  ;;  %vm1361_vm6 = vcmp.ge.f32.partialorder %v1353_v58, 0.0  ;;  %v1368_v59 = vmul.f32 0.2, %v1352_v57  ;;  %v1369_v39 = vmul.f32 0.2, %v1353_v58 }
 0x20a   : > { %v1376_v1 = vsel %vm1360_vm5, %v1352_v57, %v1368_v59  ;;  %v1377_v61 = vsel %vm1361_vm6, %v1353_v58, %v1369_v39 }
 0x20b   : > { %1384 = vst [vmem:[%s2136_s9 + $0x20] sm:$0xff] %v1376_v1  ;;  %1385 = vst.msk [vmem:[%s2136_s9 + $0x28] sm:$0xff] %vm1271_vm0, %v1377_v61 }
 0x20c   : > { %v1810_v4 = vpop.eup %1809 }
 0x20d   : > { %v1354_v7 = vmul.f32 %v1810_v4, %v1338_v62  ;;  %v1355_v8 = vmul.f32 %v1810_v4, %v1339_v63 }
 0x20f   : > { %vm1362_vm7 = vcmp.ge.f32.partialorder %v1354_v7, 0.0  ;;  %vm1363_vm8 = vcmp.ge.f32.partialorder %v1355_v8, 0.0  ;;  %v1370_v9 = vmul.f32 0.2, %v1354_v7  ;;  %v1371_v10 = vmul.f32 0.2, %v1355_v8 }
 0x211   : > { %v1378_v11 = vsel %vm1362_vm7, %v1354_v7, %v1370_v9  ;;  %v1379_v12 = vsel %vm1363_vm8, %v1355_v8, %v1371_v10 }
 0x212   : > { %1386 = vst [vmem:[%s2136_s9 + $0x30] sm:$0xff] %v1378_v11  ;;  %1387 = vst.msk [vmem:[%s2136_s9 + $0x38] sm:$0xff] %vm1271_vm0, %v1379_v12 }
 0x213 PF: > { %s13_s12 = sadd.s32 1, %s1817_s12  }
 0x214   : > { %p10_p4 = scmp.ge.s32.totalorder %s13_s12, 4  }
 0x216   :  { %12 = sbr.rel (!%p10_p4) target bundleno = 1 (0x1), region = 62 }

// kernel: decoder_forward.8
= control target key start
LH: loop header
LB: loop body
LE: loop exit
PB: predicated region body
PF: predicated region fallthrough
CT: control target
= control target key end

     0   :  { %s2635_s12 = smov 0   ;;  %s3132_s0 = inlined_call_operand.vmem [shape: bf16[2,512,900], index: 0, kind: input, shape index: {}]   ;;  %s3133_s1 = inlined_call_operand.vmem [shape: bf16[16,512], index: 1, kind: input, shape index: {}]   ;;  %s3134_s2 = inlined_call_operand.vmem [shape: f32[16,1], index: 2, kind: input, shape index: {}]   ;;  %s3135_s3 = inlined_call_operand.vmem [shape: f32[2,16,900], index: 3, kind: output, shape index: {}]  }
   0x1 LB: > { %s2309_s13 = sadd.s32 4294967295, %s2612_s12   ;;  %p2313_p0 = scmp.ge.s32.totalorder %s2612_s12, 1  ;;  %s2612_s12 = sphi %s2635_s12, %s13_s12  }
   0x2   : > { %p137_p1 = scmp.lt.s32.totalorder %s2612_s12, 3 }
   0x4   : > { %p138_p2 = pnand %p2313_p0, %p137_p1 }
   0x5   : > { %p161_p3 = scmp.lt.s32.totalorder (!%p138_p2), %s2309_s13, 1 }
   0x6   : > { %141 = sbr.rel (%p138_p2) target bundleno = 658 (0x292), region = 32 }
   0xb   : > { %v2646_v0 = vld [vmem:[%s3133_s1 + $0x4] ss:$16 sps:$4 sm:$0xff]   ;;  %v2651_v1 = vld [vmem:[%s3133_s1 + $0xc] ss:$16 sps:$4 sm:$0xff]   ;;  %s3137_s13 = smov (!%p161_p3, %s2309_s13), 1  ;;  %v2614_v28 = vmov 0  }
   0xc   : > { %1775 = vmatprep.mubr.bf16.mxu0 %v2646_v0  ;;  %1818 = vmatprep.mubr.bf16.mxu1 %v2651_v1  ;;  %s2580_s18 = sshll.u32 %s3137_s13, 11  ;;  %vm2093_vm0 = vcmask 31744   ;;  %s2581_s11 = sshll.u32 %s3137_s13, 7 }
   0xd   : > { %s2661_s21 = scalar_lea.vmem %s3132_s0, %s2580_s18  ;;  %2591 = vset.pattern.permute.xlu0 %v2614_v28  ;;  %s3093_s16 = scalar_lea.vmem %s3135_s3, %s2581_s11 }
   0xe   : > { %v231_v2 = vld [vmem:[%s2661_s21 + $0x1c0] sm:$0xff] }
   0xf   : > { %v235_v3 = vld [vmem:[%s2661_s21 + $0x1e0] sm:$0xff] }
  0x10   : > { %v359_v4 = vld [vmem:[%s2661_s21 + $0x5c0] sm:$0xff]  ;;  %v2379_v5 = vcombine.high %v231_v2, %v235_v3  ;;  %v2378_v7 = vcombine.low %v231_v2, %v235_v3 }
  0x11   : > { %v363_v6 = vld [vmem:[%s2661_s21 + $0x5e0] sm:$0xff] }
  0x12   : > { %v223_v8 = vld [vmem:[%s2661_s21 + $0x180] sm:$0xff]  ;;  %v2507_v10 = vcombine.high %v359_v4, %v363_v6  ;;  %v2506_v11 = vcombine.low %v359_v4, %v363_v6  ;;  %1743 = vmatprep.subr.bf16.mxu0 %v2379_v5 }
  0x13   : > { %v227_v9 = vld [vmem:[%s2661_s21 + $0x1a0] sm:$0xff]  ;;  %1744 = vmatpush1.bf16.msra.mxu0 %v2378_v7 }
  0x14   : > { %v2371_v12 = vcombine.high %v223_v8, %v227_v9  ;;  %v351_v13 = vld [vmem:[%s2661_s21 + $0x580] sm:$0xff]  ;;  %1786 = vmatprep.subr.bf16.mxu1 %v2507_v10  ;;  %v2370_v20 = vcombine.low %v223_v8, %v227_v9 }
  0x15   : > { %v355_v14 = vld [vmem:[%s2661_s21 + $0x5a0] sm:$0xff]  ;;  %1787 = vmatpush1.bf16.msra.mxu1 %v2506_v11 }
  0x16   : > { %v215_v15 = vld [vmem:[%s2661_s21 + $0x140] sm:$0xff]  ;;  %v2499_v16 = vcombine.high %v351_v13, %v355_v14  ;;  %1745 = vmatprep.subr.bf16.mxu0 %v2371_v12  ;;  %v2498_v21 = vcombine.low %v351_v13, %v355_v14 }
  0x17   : > { %v219_v17 = vld [vmem:[%s2661_s21 + $0x160] sm:$0xff]  ;;  %1746 = vmatpush1.bf16.msra.mxu0 %v2370_v20 }
  0x18   : > { %v343_v18 = vld [vmem:[%s2661_s21 + $0x540] sm:$0xff]  ;;  %v2363_v22 = vcombine.high %v215_v15, %v219_v17  ;;  %1788 = vmatprep.subr.bf16.mxu1 %v2499_v16  ;;  %v2362_v29 = vcombine.low %v215_v15, %v219_v17 }
  0x19   : > { %v347_v19 = vld [vmem:[%s2661_s21 + $0x560] sm:$0xff]  ;;  %1789 = vmatpush1.bf16.msra.mxu1 %v2498_v21 }
  0x1a   : > { %v2491_v23 = vcombine.high %v343_v18, %v347_v19  ;;  %v207_v24 = vld [vmem:[%s2661_s21 + $0x100] sm:$0xff]  ;;  %1747 = vmatprep.subr.bf16.mxu0 %v2363_v22  ;;  %v2490_v30 = vcombine.low %v343_v18, %v347_v19 }
  0x1b   : > { %v211_v25 = vld [vmem:[%s2661_s21 + $0x120] sm:$0xff]  ;;  %1748 = vmatpush1.bf16.msra.mxu0 %v2362_v29 }
  0x1c   : > { %v335_v26 = vld [vmem:[%s2661_s21 + $0x500] sm:$0xff]  ;;  %v2355_v31 = vcombine.high %v207_v24, %v211_v25  ;;  %1790 = vmatprep.subr.bf16.mxu1 %v2491_v23  ;;  %v2354_v37 = vcombine.low %v207_v24, %v211_v25 }
  0x1d   : > { %v339_v27 = vld [vmem:[%s2661_s21 + $0x520] sm:$0xff]  ;;  %1791 = vmatpush1.bf16.msra.mxu1 %v2490_v30 }
  0x1e   : > { %v2483_v32 = vcombine.high %v335_v26, %v339_v27  ;;  %v199_v33 = vld [vmem:[%s2661_s21 + $0xc0] sm:$0xff]  ;;  %1749 = vmatprep.subr.bf16.mxu0 %v2355_v31  ;;  %v2482_v38 = vcombine.low %v335_v26, %v339_v27 }
  0x1f   : > { %v203_v34 = vld [vmem:[%s2661_s21 + $0xe0] sm:$0xff]  ;;  %1750 = vmatpush1.bf16.msra.mxu0 %v2354_v37 }
  0x20   : > { %v327_v35 = vld [vmem:[%s2661_s21 + $0x4c0] sm:$0xff]  ;;  %v2347_v39 = vcombine.high %v199_v33, %v203_v34  ;;  %1792 = vmatprep.subr.bf16.mxu1 %v2483_v32  ;;  %v2346_v45 = vcombine.low %v199_v33, %v203_v34 }
  0x21   : > { %v331_v36 = vld [vmem:[%s2661_s21 + $0x4e0] sm:$0xff]  ;;  %1793 = vmatpush1.bf16.msra.mxu1 %v2482_v38 }
  0x22   : > { %v2475_v40 = vcombine.high %v327_v35, %v331_v36  ;;  %v191_v41 = vld [vmem:[%s2661_s21 + $0x80] sm:$0xff]  ;;  %1751 = vmatprep.subr.bf16.mxu0 %v2347_v39  ;;  %v2474_v46 = vcombine.low %v327_v35, %v331_v36 }
  0x23   : > { %v195_v42 = vld [vmem:[%s2661_s21 + $0xa0] sm:$0xff]  ;;  %1752 = vmatpush1.bf16.msra.mxu0 %v2346_v45 }
  0x24   : > { %v319_v43 = vld [vmem:[%s2661_s21 + $0x480] sm:$0xff]  ;;  %v2339_v47 = vcombine.high %v191_v41, %v195_v42  ;;  %1794 = vmatprep.subr.bf16.mxu1 %v2475_v40  ;;  %v2338_v53 = vcombine.low %v191_v41, %v195_v42 }
  0x25   : > { %v323_v44 = vld [vmem:[%s2661_s21 + $0x4a0] sm:$0xff]  ;;  %1795 = vmatpush1.bf16.msra.mxu1 %v2474_v46 }
  0x26   : > { %v2467_v48 = vcombine.high %v319_v43, %v323_v44  ;;  %v183_v49 = vld [vmem:[%s2661_s21 + $0x40] sm:$0xff]  ;;  %1753 = vmatprep.subr.bf16.mxu0 %v2339_v47  ;;  %v2466_v54 = vcombine.low %v319_v43, %v323_v44 }
  0x27   : > { %v187_v50 = vld [vmem:[%s2661_s21 + $0x60] sm:$0xff]  ;;  %1754 = vmatpush1.bf16.msra.mxu0 %v2338_v53 }
  0x28   : > { %v311_v51 = vld [vmem:[%s2661_s21 + $0x440] sm:$0xff]  ;;  %v2331_v55 = vcombine.high %v183_v49, %v187_v50  ;;  %1796 = vmatprep.subr.bf16.mxu1 %v2467_v48  ;;  %v2330_v61 = vcombine.low %v183_v49, %v187_v50  ;;  %v432_v48 = vld [vmem:[%s3134_s2 + $0x8] sm:$0xff] }
  0x29   : > { %v315_v52 = vld [vmem:[%s2661_s21 + $0x460] sm:$0xff]  ;;  %1797 = vmatpush1.bf16.msra.mxu1 %v2466_v54 }
  0x2a   : > { %v2459_v56 = vcombine.high %v311_v51, %v315_v52  ;;  %v175_v57 = vld [vmem:[%s2661_s21] sm:$0xff]  ;;  %1755 = vmatprep.subr.bf16.mxu0 %v2331_v55  ;;  %v2458_v62 = vcombine.low %v311_v51, %v315_v52 }
  0x2b   : > { %v179_v58 = vld [vmem:[%s2661_s21 + $0x20] sm:$0xff]  ;;  %1756 = vmatpush1.bf16.msra.mxu0 %v2330_v61 }
  0x2c   : > { %v303_v59 = vld [vmem:[%s2661_s21 + $0x400] sm:$0xff]  ;;  %v2323_v63 = vcombine.high %v175_v57, %v179_v58  ;;  %1798 = vmatprep.subr.bf16.mxu1 %v2459_v56  ;;  %v2322_v7 = vcombine.low %v175_v57, %v179_v58 }
  0x2d   : > { %v307_v60 = vld [vmem:[%s2661_s21 + $0x420] sm:$0xff]  ;;  %1799 = vmatpush1.bf16.msra.mxu1 %v2458_v62 }
  0x2e   : > { %v2451_v2 = vcombine.high %v303_v59, %v307_v60  ;;  %v295_v3 = vld [vmem:[%s2661_s21 + $0x3c0] sm:$0xff]  ;;  %1757 = vmatprep.subr.bf16.mxu0 %v2323_v63  ;;  %v2450_v8 = vcombine.low %v303_v59, %v307_v60 }
  0x2f   : > { %v299_v4 = vld [vmem:[%s2661_s21 + $0x3e0] sm:$0xff]  ;;  %1758 = vmatpush1.bf16.msra.mxu0 %v2322_v7  ;;  %v232_v7 = vld [vmem:[%s2661_s21 + $0x1c8] sm:$0xff] }
  0x30   : > { %v423_v5 = vld [vmem:[%s2661_s21 + $0x7c0] sm:$0xff]  ;;  %v2443_v9 = vcombine.high %v295_v3, %v299_v4  ;;  %1800 = vmatprep.subr.bf16.mxu1 %v2451_v2  ;;  %v2442_v15 = vcombine.low %v295_v3, %v299_v4 }
  0x31   : > { %v427_v6 = vld [vmem:[%s2661_s21 + $0x7e0] sm:$0xff]  ;;  %1801 = vmatpush1.bf16.msra.mxu1 %v2450_v8  ;;  %v236_v8 = vld [vmem:[%s2661_s21 + $0x1e8] sm:$0xff] }
  0x32   : > { %v2571_v10 = vcombine.high %v423_v5, %v427_v6  ;;  %v287_v11 = vld [vmem:[%s2661_s21 + $0x380] sm:$0xff]  ;;  %1759 = vmatprep.subr.bf16.mxu0 %v2443_v9  ;;  %v2570_v16 = vcombine.low %v423_v5, %v427_v6  ;;  %v360_v9 = vld [vmem:[%s2661_s21 + $0x5c8] sm:$0xff] }
  0x33   : > { %v291_v12 = vld [vmem:[%s2661_s21 + $0x3a0] sm:$0xff]  ;;  %1760 = vmatpush2.bf16.msra.mxu0 %v2442_v15  ;;  %v224_v15 = vld [vmem:[%s2661_s21 + $0x188] sm:$0xff] }
  0x34   : > { %v415_v13 = vld [vmem:[%s2661_s21 + $0x780] sm:$0xff]  ;;  %v2435_v17 = vcombine.high %v287_v11, %v291_v12  ;;  %1802 = vmatprep.subr.bf16.mxu1 %v2571_v10  ;;  %v2434_v23 = vcombine.low %v287_v11, %v291_v12  ;;  %v364_v10 = vld [vmem:[%s2661_s21 + $0x5e8] sm:$0xff] }
  0x35   : > { %v419_v14 = vld [vmem:[%s2661_s21 + $0x7a0] sm:$0xff]  ;;  %1803 = vmatpush2.bf16.msra.mxu1 %v2570_v16  ;;  %v228_v16 = vld [vmem:[%s2661_s21 + $0x1a8] sm:$0xff] }
  0x36   : > { %v2563_v18 = vcombine.high %v415_v13, %v419_v14  ;;  %v279_v19 = vld [vmem:[%s2661_s21 + $0x340] sm:$0xff]  ;;  %1761 = vmatprep.subr.bf16.mxu0 %v2435_v17  ;;  %v2562_v24 = vcombine.low %v415_v13, %v419_v14  ;;  %v2381_v13 = vcombine.high %v232_v7, %v236_v8  ;;  %v2509_v14 = vcombine.high %v360_v9, %v364_v10 }
  0x37   : > { %v283_v20 = vld [vmem:[%s2661_s21 + $0x360] sm:$0xff]  ;;  %1762 = vmatpush2.bf16.msra.mxu0 %v2434_v23  ;;  %v2373_v23 = vcombine.high %v224_v15, %v228_v16 }
  0x38   : > { %v407_v21 = vld [vmem:[%s2661_s21 + $0x740] sm:$0xff]  ;;  %v2427_v25 = vcombine.high %v279_v19, %v283_v20  ;;  %1804 = vmatprep.subr.bf16.mxu1 %v2563_v18  ;;  %v2426_v31 = vcombine.low %v279_v19, %v283_v20  ;;  %v352_v18 = vld [vmem:[%s2661_s21 + $0x588] sm:$0xff] }
  0x39   : > { %v411_v22 = vld [vmem:[%s2661_s21 + $0x760] sm:$0xff]  ;;  %1805 = vmatpush2.bf16.msra.mxu1 %v2562_v24  ;;  %v356_v19 = vld [vmem:[%s2661_s21 + $0x5a8] sm:$0xff] }
  0x3a   : > { %v2555_v26 = vcombine.high %v407_v21, %v411_v22  ;;  %v271_v27 = vld [vmem:[%s2661_s21 + $0x300] sm:$0xff]  ;;  %1763 = vmatprep.subr.bf16.mxu0 %v2427_v25  ;;  %v2554_v32 = vcombine.low %v407_v21, %v411_v22  ;;  %v2749_v20 = vld [vmem:[%s3133_s1 + $0x8] ss:$16 sps:$4 sm:$0xff]   ;;  %v2380_v21 = vcombine.low %v232_v7, %v236_v8  ;;  %v2508_v22 = vcombine.low %v360_v9, %v364_v10 }
  0x3b   : > { %v275_v28 = vld [vmem:[%s2661_s21 + $0x320] sm:$0xff]  ;;  %1764 = vmatpush2.bf16.msra.mxu0 %v2426_v31  ;;  %v2501_v24 = vcombine.high %v352_v18, %v356_v19  ;;  %v216_v25 = vld [vmem:[%s2661_s21 + $0x148] sm:$0xff] }
  0x3c   : > { %v399_v29 = vld [vmem:[%s2661_s21 + $0x700] sm:$0xff]  ;;  %v2419_v33 = vcombine.high %v271_v27, %v275_v28  ;;  %1806 = vmatprep.subr.bf16.mxu1 %v2555_v26  ;;  %v2418_v39 = vcombine.low %v271_v27, %v275_v28  ;;  %v220_v26 = vld [vmem:[%s2661_s21 + $0x168] sm:$0xff] }
  0x3d   : > { %v403_v30 = vld [vmem:[%s2661_s21 + $0x720] sm:$0xff]  ;;  %1807 = vmatpush2.bf16.msra.mxu1 %v2554_v32  ;;  %v344_v27 = vld [vmem:[%s2661_s21 + $0x548] sm:$0xff]  ;;  %v2365_v31 = vcombine.high %v216_v25, %v220_v26 }
  0x3e   : > { %v2547_v34 = vcombine.high %v399_v29, %v403_v30  ;;  %v263_v35 = vld [vmem:[%s2661_s21 + $0x2c0] sm:$0xff]  ;;  %1765 = vmatprep.subr.bf16.mxu0 %v2419_v33  ;;  %v2546_v40 = vcombine.low %v399_v29, %v403_v30  ;;  %v348_v28 = vld [vmem:[%s2661_s21 + $0x568] sm:$0xff]  ;;  %v2372_v29 = vcombine.low %v224_v15, %v228_v16  ;;  %v2500_v30 = vcombine.low %v352_v18, %v356_v19 }
  0x3f   : > { %v267_v36 = vld [vmem:[%s2661_s21 + $0x2e0] sm:$0xff]  ;;  %1766 = vmatpush2.bf16.msra.mxu0 %v2418_v39  ;;  %v2493_v32 = vcombine.high %v344_v27, %v348_v28  ;;  %v208_v33 = vld [vmem:[%s2661_s21 + $0x108] sm:$0xff] }
  0x40   : > { %v391_v37 = vld [vmem:[%s2661_s21 + $0x6c0] sm:$0xff]  ;;  %v2411_v41 = vcombine.high %v263_v35, %v267_v36  ;;  %1808 = vmatprep.subr.bf16.mxu1 %v2547_v34  ;;  %v2410_v49 = vcombine.low %v263_v35, %v267_v36  ;;  %v212_v34 = vld [vmem:[%s2661_s21 + $0x128] sm:$0xff] }
  0x41   : > { %v395_v38 = vld [vmem:[%s2661_s21 + $0x6e0] sm:$0xff]  ;;  %1809 = vmatpush2.bf16.msra.mxu1 %v2546_v40  ;;  %v336_v35 = vld [vmem:[%s2661_s21 + $0x508] sm:$0xff]  ;;  %v2357_v39 = vcombine.high %v208_v33, %v212_v34 }
  0x42   : > { %v431_v42 = vld [vmem:[%s3134_s2] sm:$0xff]  ;;  %v2539_v43 = vcombine.high %v391_v37, %v395_v38  ;;  %1767 = vmatprep.subr.bf16.mxu0 %v2411_v41  ;;  %v2538_v50 = vcombine.low %v391_v37, %v395_v38  ;;  %v340_v36 = vld [vmem:[%s2661_s21 + $0x528] sm:$0xff]  ;;  %v2364_v37 = vcombine.low %v216_v25, %v220_v26  ;;  %v2492_v38 = vcombine.low %v344_v27, %v348_v28 }
  0x43   : > { %v255_v44 = vld [vmem:[%s2661_s21 + $0x280] sm:$0xff]  ;;  %435 = vperm.xlu0 %2591, %v431_v42   ;;  %1768 = vmatpush2.bf16.msra.mxu0 %v2410_v49  ;;  %v2485_v40 = vcombine.high %v336_v35, %v340_v36  ;;  %v200_v41 = vld [vmem:[%s2661_s21 + $0xc8] sm:$0xff] }
  0x44   : > { %v259_v45 = vld [vmem:[%s2661_s21 + $0x2a0] sm:$0xff]  ;;  %1810 = vmatprep.subr.bf16.mxu1 %v2539_v43  ;;  %v204_v42 = vld [vmem:[%s2661_s21 + $0xe8] sm:$0xff] }
  0x45   : > { %v383_v46 = vld [vmem:[%s2661_s21 + $0x680] sm:$0xff]  ;;  %v2403_v51 = vcombine.high %v255_v44, %v259_v45  ;;  %v2402_v57 = vcombine.low %v255_v44, %v259_v45  ;;  %1811 = vmatpush2.bf16.msra.mxu1 %v2538_v50  ;;  %v328_v43 = vld [vmem:[%s2661_s21 + $0x4c8] sm:$0xff]  ;;  %v2356_v45 = vcombine.low %v208_v33, %v212_v34 }
  0x46   : > { %v387_v47 = vld [vmem:[%s2661_s21 + $0x6a0] sm:$0xff]  ;;  %v332_v44 = vld [vmem:[%s2661_s21 + $0x4e8] sm:$0xff] }
  0x47   : > { %v2531_v52 = vcombine.high %v383_v46, %v387_v47  ;;  %v247_v53 = vld [vmem:[%s2661_s21 + $0x240] sm:$0xff]  ;;  %440 = vperm.xlu0 %2591, %v432_v48   ;;  %1769 = vmatprep.subr.bf16.mxu0 %v2403_v51  ;;  %v2530_v58 = vcombine.low %v383_v46, %v387_v47  ;;  %v2484_v46 = vcombine.low %v336_v35, %v340_v36  ;;  %v192_v49 = vld [vmem:[%s2661_s21 + $0x88] sm:$0xff] }
  0x48   : > { %v251_v54 = vld [vmem:[%s2661_s21 + $0x260] sm:$0xff]  ;;  %1770 = vmatpush2.bf16.msra.mxu0 %v2402_v57  ;;  %v2349_v47 = vcombine.high %v200_v41, %v204_v42  ;;  %v2477_v48 = vcombine.high %v328_v43, %v332_v44  ;;  %v196_v50 = vld [vmem:[%s2661_s21 + $0xa8] sm:$0xff] }
  0x49   : > { %v375_v55 = vld [vmem:[%s2661_s21 + $0x640] sm:$0xff]  ;;  %v2395_v59 = vcombine.high %v247_v53, %v251_v54  ;;  %1812 = vmatprep.subr.bf16.mxu1 %v2531_v52  ;;  %v2394_v3 = vcombine.low %v247_v53, %v251_v54  ;;  %v320_v51 = vld [vmem:[%s2661_s21 + $0x488] sm:$0xff]  ;;  %v2348_v53 = vcombine.low %v200_v41, %v204_v42  ;;  %v2476_v54 = vcombine.low %v328_v43, %v332_v44 }
  0x4a   : > { %v379_v56 = vld [vmem:[%s2661_s21 + $0x660] sm:$0xff]  ;;  %1813 = vmatpush2.bf16.msra.mxu1 %v2530_v58  ;;  %v324_v52 = vld [vmem:[%s2661_s21 + $0x4a8] sm:$0xff] }
  0x4b   : > { %v2523_v60 = vcombine.high %v375_v55, %v379_v56  ;;  %v239_v61 = vld [vmem:[%s2661_s21 + $0x200] sm:$0xff]  ;;  %1771 = vmatprep.subr.bf16.mxu0 %v2395_v59  ;;  %v2522_v4 = vcombine.low %v375_v55, %v379_v56  ;;  %v2341_v55 = vcombine.high %v192_v49, %v196_v50  ;;  %v2469_v56 = vcombine.high %v320_v51, %v324_v52  ;;  %v184_v57 = vld [vmem:[%s2661_s21 + $0x48] sm:$0xff] }
  0x4c   : > { %v243_v62 = vld [vmem:[%s2661_s21 + $0x220] sm:$0xff]  ;;  %1772 = vmatpush2.bf16.msra.mxu0 %v2394_v3  ;;  %v188_v58 = vld [vmem:[%s2661_s21 + $0x68] sm:$0xff] }
  0x4d   : > { %v367_v63 = vld [vmem:[%s2661_s21 + $0x600] sm:$0xff]  ;;  %v2387_v5 = vcombine.high %v239_v61, %v243_v62  ;;  %1814 = vmatprep.subr.bf16.mxu1 %v2523_v60  ;;  %v2386_v11 = vcombine.low %v239_v61, %v243_v62  ;;  %v312_v59 = vld [vmem:[%s2661_s21 + $0x448] sm:$0xff]  ;;  %v2340_v61 = vcombine.low %v192_v49, %v196_v50  ;;  %v2468_v62 = vcombine.low %v320_v51, %v324_v52 }
  0x4e   : > { %v371_v2 = vld [vmem:[%s2661_s21 + $0x620] sm:$0xff]  ;;  %1815 = vmatpush2.bf16.msra.mxu1 %v2522_v4  ;;  %v316_v60 = vld [vmem:[%s2661_s21 + $0x468] sm:$0xff]  ;;  %v2332_v7 = vcombine.low %v184_v57, %v188_v58 }
  0x4f   : > { %v2515_v6 = vcombine.high %v367_v63, %v371_v2  ;;  %1773 = vmatprep.subr.bf16.mxu0 %v2387_v5  ;;  %v2514_v12 = vcombine.low %v367_v63, %v371_v2  ;;  %v2742_v17 = vld [vmem:[%s3133_s1] ss:$16 sps:$4 sm:$0xff]   ;;  %v2333_v63 = vcombine.high %v184_v57, %v188_v58  ;;  %v2461_v2 = vcombine.high %v312_v59, %v316_v60  ;;  %v176_v3 = vld [vmem:[%s2661_s21 + $0x8] sm:$0xff] }
  0x50   : > { %1774 = vmatpush2.bf16.msra.mxu0 %v2386_v11  ;;  %v180_v4 = vld [vmem:[%s2661_s21 + $0x28] sm:$0xff]  ;;  %v2460_v8 = vcombine.low %v312_v59, %v316_v60 }
  0x51   : > { %1816 = vmatprep.subr.bf16.mxu1 %v2515_v6  ;;  %1829 = vmatprep.subr.bf16.mxu0 %v2381_v13  ;;  %v304_v5 = vld [vmem:[%s2661_s21 + $0x408] sm:$0xff]  ;;  %v2325_v9 = vcombine.high %v176_v3, %v180_v4  ;;  %v2324_v15 = vcombine.low %v176_v3, %v180_v4 }
  0x52   : > { %1817 = vmatpush2.bf16.msra.mxu1 %v2514_v12  ;;  %v308_v6 = vld [vmem:[%s2661_s21 + $0x428] sm:$0xff] }
  0x53   : > { %1872 = vmatprep.subr.bf16.mxu1 %v2509_v14  ;;  %1776 = vmatmul.mubr.bf16.vlgmr.msra.gmra.mxu0 %v2742_v17  ;;  %v2453_v10 = vcombine.high %v304_v5, %v308_v6  ;;  %v296_v11 = vld [vmem:[%s2661_s21 + $0x3c8] sm:$0xff]  ;;  %v2452_v16 = vcombine.low %v304_v5, %v308_v6 }
  0x54   : > { %1830 = vmatpush1.bf16.msra.mxu0 %v2380_v21  ;;  %1861 = vmatprep.mubr.bf16.mxu0 %v2646_v0  ;;  %v300_v12 = vld [vmem:[%s2661_s21 + $0x3e8] sm:$0xff] }
  0x55   : > { %1819 = vmatmul.mubr.bf16.vlgmr.msra.gmra.mxu1 %v2749_v20  ;;  %1831 = vmatprep.subr.bf16.mxu0 %v2373_v23  ;;  %v424_v13 = vld [vmem:[%s2661_s21 + $0x7c8] sm:$0xff]  ;;  %v2445_v18 = vcombine.high %v296_v11, %v300_v12  ;;  %v2444_v25 = vcombine.low %v296_v11, %v300_v12 }
  0x56   : > { %1873 = vmatpush1.bf16.msra.mxu1 %v2508_v22  ;;  %1904 = vmatprep.mubr.bf16.mxu1 %v2651_v1  ;;  %v428_v14 = vld [vmem:[%s2661_s21 + $0x7e8] sm:$0xff] }
  0x57   : > { %1874 = vmatprep.subr.bf16.mxu1 %v2501_v24  ;;  %v2573_v19 = vcombine.high %v424_v13, %v428_v14  ;;  %v288_v21 = vld [vmem:[%s2661_s21 + $0x388] sm:$0xff]  ;;  %v2572_v26 = vcombine.low %v424_v13, %v428_v14 }
  0x58   : > { %1832 = vmatpush1.bf16.msra.mxu0 %v2372_v29  ;;  %v292_v22 = vld [vmem:[%s2661_s21 + $0x3a8] sm:$0xff] }
  0x59   : > { %1833 = vmatprep.subr.bf16.mxu0 %v2365_v31  ;;  %v416_v23 = vld [vmem:[%s2661_s21 + $0x788] sm:$0xff]  ;;  %v2437_v27 = vcombine.high %v288_v21, %v292_v22  ;;  %v2436_v33 = vcombine.low %v288_v21, %v292_v22 }
  0x5a   : > { %1875 = vmatpush1.bf16.msra.mxu1 %v2500_v30  ;;  %v420_v24 = vld [vmem:[%s2661_s21 + $0x7a8] sm:$0xff] }
  0x5b   : > { %1876 = vmatprep.subr.bf16.mxu1 %v2493_v32  ;;  %v2565_v28 = vcombine.high %v416_v23, %v420_v24  ;;  %v280_v29 = vld [vmem:[%s2661_s21 + $0x348] sm:$0xff]  ;;  %v2564_v34 = vcombine.low %v416_v23, %v420_v24 }
  0x5c   : > { %1834 = vmatpush1.bf16.msra.mxu0 %v2364_v37  ;;  %v284_v30 = vld [vmem:[%s2661_s21 + $0x368] sm:$0xff] }
  0x5d   : > { %1835 = vmatprep.subr.bf16.mxu0 %v2357_v39  ;;  %v408_v31 = vld [vmem:[%s2661_s21 + $0x748] sm:$0xff]  ;;  %v2429_v35 = vcombine.high %v280_v29, %v284_v30  ;;  %v2428_v41 = vcombine.low %v280_v29, %v284_v30 }
  0x5e   : > { %1877 = vmatpush1.bf16.msra.mxu1 %v2492_v38  ;;  %v412_v32 = vld [vmem:[%s2661_s21 + $0x768] sm:$0xff] }
  0x5f   : > { %1878 = vmatprep.subr.bf16.mxu1 %v2485_v40  ;;  %v2557_v36 = vcombine.high %v408_v31, %v412_v32  ;;  %v272_v37 = vld [vmem:[%s2661_s21 + $0x308] sm:$0xff]  ;;  %v2556_v42 = vcombine.low %v408_v31, %v412_v32 }
  0x60   : > { %1836 = vmatpush1.bf16.msra.mxu0 %v2356_v45  ;;  %v276_v38 = vld [vmem:[%s2661_s21 + $0x328] sm:$0xff] }
  0x61   : > { %1837 = vmatprep.subr.bf16.mxu0 %v2349_v47  ;;  %v400_v39 = vld [vmem:[%s2661_s21 + $0x708] sm:$0xff]  ;;  %v2421_v43 = vcombine.high %v272_v37, %v276_v38  ;;  %v2420_v49 = vcombine.low %v272_v37, %v276_v38 }
  0x62   : > { %1879 = vmatpush1.bf16.msra.mxu1 %v2484_v46  ;;  %v404_v40 = vld [vmem:[%s2661_s21 + $0x728] sm:$0xff] }
  0x63   : > { %1880 = vmatprep.subr.bf16.mxu1 %v2477_v48  ;;  %v2549_v44 = vcombine.high %v400_v39, %v404_v40  ;;  %v264_v45 = vld [vmem:[%s2661_s21 + $0x2c8] sm:$0xff]  ;;  %v2548_v50 = vcombine.low %v400_v39, %v404_v40 }
  0x64   : > { %1838 = vmatpush1.bf16.msra.mxu0 %v2348_v53  ;;  %v268_v46 = vld [vmem:[%s2661_s21 + $0x2e8] sm:$0xff] }
  0x65   : > { %1839 = vmatprep.subr.bf16.mxu0 %v2341_v55  ;;  %v392_v47 = vld [vmem:[%s2661_s21 + $0x6c8] sm:$0xff]  ;;  %v2413_v51 = vcombine.high %v264_v45, %v268_v46  ;;  %v2412_v57 = vcombine.low %v264_v45, %v268_v46 }
  0x66   : > { %1881 = vmatpush1.bf16.msra.mxu1 %v2476_v54  ;;  %v396_v48 = vld [vmem:[%s2661_s21 + $0x6e8] sm:$0xff] }
  0x67   : > { %1882 = vmatprep.subr.bf16.mxu1 %v2469_v56  ;;  %v2541_v52 = vcombine.high %v392_v47, %v396_v48  ;;  %v256_v53 = vld [vmem:[%s2661_s21 + $0x288] sm:$0xff]  ;;  %v2540_v58 = vcombine.low %v392_v47, %v396_v48 }
  0x68   : > { %1840 = vmatpush1.bf16.msra.mxu0 %v2340_v61  ;;  %v260_v54 = vld [vmem:[%s2661_s21 + $0x2a8] sm:$0xff] }
  0x69   : > { %1841 = vmatprep.subr.bf16.mxu0 %v2333_v63  ;;  %v384_v55 = vld [vmem:[%s2661_s21 + $0x688] sm:$0xff]  ;;  %v2405_v59 = vcombine.high %v256_v53, %v260_v54  ;;  %v2404_v3 = vcombine.low %v256_v53, %v260_v54 }
  0x6a   : > { %1883 = vmatpush1.bf16.msra.mxu1 %v2468_v62  ;;  %v388_v56 = vld [vmem:[%s2661_s21 + $0x6a8] sm:$0xff] }
  0x6b   : > { %1884 = vmatprep.subr.bf16.mxu1 %v2461_v2  ;;  %v2533_v60 = vcombine.high %v384_v55, %v388_v56  ;;  %v248_v61 = vld [vmem:[%s2661_s21 + $0x248] sm:$0xff]  ;;  %v2532_v4 = vcombine.low %v384_v55, %v388_v56  ;;  %v193_v55 = vld [vmem:[%s2661_s21 + $0x90] sm:$0xff] }
  0x6c   : > { %1842 = vmatpush1.bf16.msra.mxu0 %v2332_v7  ;;  %v252_v62 = vld [vmem:[%s2661_s21 + $0x268] sm:$0xff]  ;;  %v197_v56 = vld [vmem:[%s2661_s21 + $0xb0] sm:$0xff] }
  0x6d   : > { %1843 = vmatprep.subr.bf16.mxu0 %v2325_v9  ;;  %v376_v63 = vld [vmem:[%s2661_s21 + $0x648] sm:$0xff]  ;;  %v2397_v5 = vcombine.high %v248_v61, %v252_v62  ;;  %v2396_v11 = vcombine.low %v248_v61, %v252_v62  ;;  %v2343_v61 = vcombine.high %v193_v55, %v197_v56 }
  0x6e   : > { %1885 = vmatpush1.bf16.msra.mxu1 %v2460_v8  ;;  %v380_v2 = vld [vmem:[%s2661_s21 + $0x668] sm:$0xff] }
  0x6f   : > { %1886 = vmatprep.subr.bf16.mxu1 %v2453_v10  ;;  %v2525_v6 = vcombine.high %v376_v63, %v380_v2  ;;  %v240_v7 = vld [vmem:[%s2661_s21 + $0x208] sm:$0xff]  ;;  %v2524_v12 = vcombine.low %v376_v63, %v380_v2  ;;  %v185_v63 = vld [vmem:[%s2661_s21 + $0x50] sm:$0xff] }
  0x70   : > { %1844 = vmatpush1.bf16.msra.mxu0 %v2324_v15  ;;  %v244_v8 = vld [vmem:[%s2661_s21 + $0x228] sm:$0xff]  ;;  %v233_v15 = vld [vmem:[%s2661_s21 + $0x1d0] sm:$0xff] }
  0x71   : > { %1845 = vmatprep.subr.bf16.mxu0 %v2445_v18  ;;  %v368_v9 = vld [vmem:[%s2661_s21 + $0x608] sm:$0xff]  ;;  %v2389_v13 = vcombine.high %v240_v7, %v244_v8  ;;  %v361_v18 = vld [vmem:[%s2661_s21 + $0x5d0] sm:$0xff]  ;;  %v2388_v21 = vcombine.low %v240_v7, %v244_v8 }
  0x72   : > { %1887 = vmatpush1.bf16.msra.mxu1 %v2452_v16  ;;  %v372_v10 = vld [vmem:[%s2661_s21 + $0x628] sm:$0xff]  ;;  %v237_v16 = vld [vmem:[%s2661_s21 + $0x1f0] sm:$0xff] }
  0x73   : > { %1888 = vmatprep.subr.bf16.mxu1 %v2573_v19  ;;  %v2517_v14 = vcombine.high %v368_v9, %v372_v10  ;;  %v365_v19 = vld [vmem:[%s2661_s21 + $0x5f0] sm:$0xff]  ;;  %v2516_v22 = vcombine.low %v368_v9, %v372_v10  ;;  %v2383_v23 = vcombine.high %v233_v15, %v237_v16  ;;  %v2382_v29 = vcombine.low %v233_v15, %v237_v16 }
  0x74   : > { %1846 = vmatpush2.bf16.msra.mxu0 %v2444_v25  ;;  %v2511_v24 = vcombine.high %v361_v18, %v365_v19  ;;  %v225_v25 = vld [vmem:[%s2661_s21 + $0x190] sm:$0xff]  ;;  %v2510_v30 = vcombine.low %v361_v18, %v365_v19 }
  0x75   : > { %1847 = vmatprep.subr.bf16.mxu0 %v2437_v27  ;;  %v353_v27 = vld [vmem:[%s2661_s21 + $0x590] sm:$0xff] }
  0x76   : > { %1889 = vmatpush2.bf16.msra.mxu1 %v2572_v26  ;;  %v229_v26 = vld [vmem:[%s2661_s21 + $0x1b0] sm:$0xff] }
  0x77   : > { %1890 = vmatprep.subr.bf16.mxu1 %v2565_v28  ;;  %v357_v28 = vld [vmem:[%s2661_s21 + $0x5b0] sm:$0xff]  ;;  %v2375_v31 = vcombine.high %v225_v25, %v229_v26  ;;  %v2374_v37 = vcombine.low %v225_v25, %v229_v26 }
  0x78   : > { %1848 = vmatpush2.bf16.msra.mxu0 %v2436_v33  ;;  %v2503_v32 = vcombine.high %v353_v27, %v357_v28  ;;  %v217_v33 = vld [vmem:[%s2661_s21 + $0x150] sm:$0xff]  ;;  %v2502_v38 = vcombine.low %v353_v27, %v357_v28 }
  0x79   : > { %1849 = vmatprep.subr.bf16.mxu0 %v2429_v35  ;;  %v345_v35 = vld [vmem:[%s2661_s21 + $0x550] sm:$0xff] }
  0x7a   : > { %1891 = vmatpush2.bf16.msra.mxu1 %v2564_v34  ;;  %v221_v34 = vld [vmem:[%s2661_s21 + $0x170] sm:$0xff] }
  0x7b   : > { %1892 = vmatprep.subr.bf16.mxu1 %v2557_v36  ;;  %v349_v36 = vld [vmem:[%s2661_s21 + $0x570] sm:$0xff]  ;;  %v2367_v39 = vcombine.high %v217_v33, %v221_v34  ;;  %v2366_v45 = vcombine.low %v217_v33, %v221_v34 }
  0x7c   : > { %1850 = vmatpush2.bf16.msra.mxu0 %v2428_v41  ;;  %v2495_v40 = vcombine.high %v345_v35, %v349_v36  ;;  %v209_v41 = vld [vmem:[%s2661_s21 + $0x110] sm:$0xff]  ;;  %v2494_v46 = vcombine.low %v345_v35, %v349_v36 }
  0x7d   : > { %1851 = vmatprep.subr.bf16.mxu0 %v2421_v43  ;;  %v337_v43 = vld [vmem:[%s2661_s21 + $0x510] sm:$0xff] }
  0x7e   : > { %1893 = vmatpush2.bf16.msra.mxu1 %v2556_v42  ;;  %v213_v42 = vld [vmem:[%s2661_s21 + $0x130] sm:$0xff] }
  0x7f   : > { %1894 = vmatprep.subr.bf16.mxu1 %v2549_v44  ;;  %v341_v44 = vld [vmem:[%s2661_s21 + $0x530] sm:$0xff]  ;;  %v2359_v47 = vcombine.high %v209_v41, %v213_v42 }
  0x80   : > { %1852 = vmatpush2.bf16.msra.mxu0 %v2420_v49  ;;  %v2487_v48 = vcombine.high %v337_v43, %v341_v44  ;;  %v201_v49 = vld [vmem:[%s2661_s21 + $0xd0] sm:$0xff] }
  0x81   : > { %1853 = vmatprep.subr.bf16.mxu0 %v2413_v51  ;;  %v329_v51 = vld [vmem:[%s2661_s21 + $0x4d0] sm:$0xff] }
  0x82   : > { %1895 = vmatpush2.bf16.msra.mxu1 %v2548_v50  ;;  %v205_v50 = vld [vmem:[%s2661_s21 + $0xf0] sm:$0xff] }
  0x83   : > { %1896 = vmatprep.subr.bf16.mxu1 %v2541_v52  ;;  %v2358_v52 = vcombine.low %v209_v41, %v213_v42  ;;  %v2351_v53 = vcombine.high %v201_v49, %v205_v50  ;;  %v189_v2 = vld [vmem:[%s2661_s21 + $0x70] sm:$0xff] }
  0x84   : > { %1854 = vmatpush2.bf16.msra.mxu0 %v2412_v57  ;;  %v321_v57 = vld [vmem:[%s2661_s21 + $0x490] sm:$0xff]  ;;  %v2335_v7 = vcombine.high %v185_v63, %v189_v2 }
  0x85   : > { %1855 = vmatprep.subr.bf16.mxu0 %v2405_v59  ;;  %v2350_v59 = vcombine.low %v201_v49, %v205_v50  ;;  %v177_v9 = vld [vmem:[%s2661_s21 + $0x10] sm:$0xff] }
  0x86   : > { %1897 = vmatpush2.bf16.msra.mxu1 %v2540_v58  ;;  %v325_v58 = vld [vmem:[%s2661_s21 + $0x4b0] sm:$0xff] }
  0x87   : > { %1898 = vmatprep.subr.bf16.mxu1 %v2533_v60  ;;  %v2471_v62 = vcombine.high %v321_v57, %v325_v58  ;;  %v181_v10 = vld [vmem:[%s2661_s21 + $0x30] sm:$0xff] }
  0x88   : > { %1856 = vmatpush2.bf16.msra.mxu0 %v2404_v3  ;;  %v313_v3 = vld [vmem:[%s2661_s21 + $0x450] sm:$0xff]  ;;  %v2327_v15 = vcombine.high %v177_v9, %v181_v10 }
  0x89   : > { %1857 = vmatprep.subr.bf16.mxu0 %v2397_v5  ;;  %v2342_v5 = vcombine.low %v193_v55, %v197_v56  ;;  %v297_v18 = vld [vmem:[%s2661_s21 + $0x3d0] sm:$0xff] }
  0x8a   : > { %1899 = vmatpush2.bf16.msra.mxu1 %v2532_v4  ;;  %v317_v4 = vld [vmem:[%s2661_s21 + $0x470] sm:$0xff] }
  0x8b   : > { %1900 = vmatprep.subr.bf16.mxu1 %v2525_v6  ;;  %v2470_v6 = vcombine.low %v321_v57, %v325_v58  ;;  %v2463_v8 = vcombine.high %v313_v3, %v317_v4  ;;  %v301_v19 = vld [vmem:[%s2661_s21 + $0x3f0] sm:$0xff] }
  0x8c   : > { %1858 = vmatpush2.bf16.msra.mxu0 %v2396_v11  ;;  %v305_v11 = vld [vmem:[%s2661_s21 + $0x410] sm:$0xff]  ;;  %v2447_v25 = vcombine.high %v297_v18, %v301_v19 }
  0x8d   : > { %1859 = vmatprep.subr.bf16.mxu0 %v2389_v13  ;;  %v2334_v13 = vcombine.low %v185_v63, %v189_v2  ;;  %v289_v27 = vld [vmem:[%s2661_s21 + $0x390] sm:$0xff] }
  0x8e   : > { %1901 = vmatpush2.bf16.msra.mxu1 %v2524_v12  ;;  %v309_v12 = vld [vmem:[%s2661_s21 + $0x430] sm:$0xff] }
  0x8f   : > { %1902 = vmatprep.subr.bf16.mxu1 %v2517_v14  ;;  %v2462_v14 = vcombine.low %v313_v3, %v317_v4  ;;  %v2455_v16 = vcombine.high %v305_v11, %v309_v12  ;;  %v293_v28 = vld [vmem:[%s2661_s21 + $0x3b0] sm:$0xff] }
  0x90   : > { %1860 = vmatpush2.bf16.msra.mxu0 %v2388_v21  ;;  %v425_v21 = vld [vmem:[%s2661_s21 + $0x7d0] sm:$0xff]  ;;  %v2439_v33 = vcombine.high %v289_v27, %v293_v28 }
  0x91   : > { %1915 = vmatprep.subr.bf16.mxu0 %v2383_v23  ;;  %v2326_v23 = vcombine.low %v177_v9, %v181_v10  ;;  %v281_v35 = vld [vmem:[%s2661_s21 + $0x350] sm:$0xff] }
  0x92   : > { %1903 = vmatpush2.bf16.msra.mxu1 %v2516_v22  ;;  %v429_v22 = vld [vmem:[%s2661_s21 + $0x7f0] sm:$0xff] }
  0x93   : > { %1958 = vmatprep.subr.bf16.mxu1 %v2511_v24  ;;  %1862 = vmatmul.mubr.bf16.vlgmr.msra.gmra.mxu0 %v2742_v17  ;;  %v2454_v24 = vcombine.low %v305_v11, %v309_v12  ;;  %v2575_v26 = vcombine.high %v425_v21, %v429_v22  ;;  %v285_v36 = vld [vmem:[%s2661_s21 + $0x370] sm:$0xff] }
  0x94   : > { %1916 = vmatpush1.bf16.msra.mxu0 %v2382_v29  ;;  %1947 = vmatprep.mubr.bf16.mxu0 %v2646_v0  ;;  %v333_v0 = vld [vmem:[%s2661_s21 + $0x4f0] sm:$0xff]  ;;  %v2431_v41 = vcombine.high %v281_v35, %v285_v36 }
  0x95   : > { %1905 = vmatmul.mubr.bf16.vlgmr.msra.gmra.mxu1 %v2749_v20  ;;  %1917 = vmatprep.subr.bf16.mxu0 %v2375_v31  ;;  %v2479_v54 = vcombine.high %v329_v51, %v333_v0  ;;  %v2478_v60 = vcombine.low %v329_v51, %v333_v0  ;;  %v417_v29 = vld [vmem:[%s2661_s21 + $0x790] sm:$0xff]  ;;  %v2446_v31 = vcombine.low %v297_v18, %v301_v19 }
  0x96   : > { %1959 = vmatpush1.bf16.msra.mxu1 %v2510_v30  ;;  %1990 = vmatprep.mubr.bf16.mxu1 %v2651_v1  ;;  %v2486_v1 = vcombine.low %v337_v43, %v341_v44  ;;  %v421_v30 = vld [vmem:[%s2661_s21 + $0x7b0] sm:$0xff] }
  0x97   : > { %1960 = vmatprep.subr.bf16.mxu1 %v2503_v32  ;;  %v2574_v32 = vcombine.low %v425_v21, %v429_v22  ;;  %v2567_v34 = vcombine.high %v417_v29, %v421_v30  ;;  %v273_v43 = vld [vmem:[%s2661_s21 + $0x310] sm:$0xff]  ;;  %v234_v21 = vld [vmem:[%s2661_s21 + $0x1d8] sm:$0xff] }
  0x98   : > { %1918 = vmatpush1.bf16.msra.mxu0 %v2374_v37  ;;  %v409_v37 = vld [vmem:[%s2661_s21 + $0x750] sm:$0xff]  ;;  %v238_v22 = vld [vmem:[%s2661_s21 + $0x1f8] sm:$0xff] }
  0x99   : > { %1919 = vmatprep.subr.bf16.mxu0 %v2367_v39  ;;  %v2438_v39 = vcombine.low %v289_v27, %v293_v28  ;;  %v277_v44 = vld [vmem:[%s2661_s21 + $0x330] sm:$0xff]  ;;  %v2385_v27 = vcombine.high %v234_v21, %v238_v22 }
  0x9a   : > { %1961 = vmatpush1.bf16.msra.mxu1 %v2502_v38  ;;  %v413_v38 = vld [vmem:[%s2661_s21 + $0x770] sm:$0xff]  ;;  %v2423_v49 = vcombine.high %v273_v43, %v277_v44 }
  0x9b   : > { %1962 = vmatprep.subr.bf16.mxu1 %v2495_v40  ;;  %v2566_v40 = vcombine.low %v417_v29, %v421_v30  ;;  %v2559_v42 = vcombine.high %v409_v37, %v413_v38  ;;  %v265_v51 = vld [vmem:[%s2661_s21 + $0x2d0] sm:$0xff]  ;;  %v226_v29 = vld [vmem:[%s2661_s21 + $0x198] sm:$0xff] }
  0x9c   : > { %1920 = vmatpush1.bf16.msra.mxu0 %v2366_v45  ;;  %v401_v45 = vld [vmem:[%s2661_s21 + $0x710] sm:$0xff]  ;;  %v230_v30 = vld [vmem:[%s2661_s21 + $0x1b8] sm:$0xff] }
  0x9d   : > { %1921 = vmatprep.subr.bf16.mxu0 %v2359_v47  ;;  %v2430_v47 = vcombine.low %v281_v35, %v285_v36  ;;  %v269_v0 = vld [vmem:[%s2661_s21 + $0x2f0] sm:$0xff]  ;;  %v2377_v35 = vcombine.high %v226_v29, %v230_v30 }
  0x9e   : > { %1963 = vmatpush1.bf16.msra.mxu1 %v2494_v46  ;;  %v405_v46 = vld [vmem:[%s2661_s21 + $0x730] sm:$0xff]  ;;  %v2415_v55 = vcombine.high %v265_v51, %v269_v0 }
  0x9f   : > { %1964 = vmatprep.subr.bf16.mxu1 %v2487_v48  ;;  %v2558_v48 = vcombine.low %v409_v37, %v413_v38  ;;  %v2551_v50 = vcombine.high %v401_v45, %v405_v46  ;;  %v257_v57 = vld [vmem:[%s2661_s21 + $0x290] sm:$0xff]  ;;  %v218_v37 = vld [vmem:[%s2661_s21 + $0x158] sm:$0xff] }
  0xa0   : > { %1922 = vmatpush1.bf16.msra.mxu0 %v2358_v52  ;;  %v393_v52 = vld [vmem:[%s2661_s21 + $0x6d0] sm:$0xff]  ;;  %v222_v38 = vld [vmem:[%s2661_s21 + $0x178] sm:$0xff] }
  0xa1   : > { %1923 = vmatprep.subr.bf16.mxu0 %v2351_v53  ;;  %v2422_v53 = vcombine.low %v273_v43, %v277_v44  ;;  %v261_v58 = vld [vmem:[%s2661_s21 + $0x2b0] sm:$0xff]  ;;  %v2369_v43 = vcombine.high %v218_v37, %v222_v38 }
  0xa2   : > { %1965 = vmatpush1.bf16.msra.mxu1 %v2486_v1  ;;  %v397_v1 = vld [vmem:[%s2661_s21 + $0x6f0] sm:$0xff]  ;;  %v2407_v63 = vcombine.high %v257_v57, %v261_v58 }
  0xa3   : > { %1966 = vmatprep.subr.bf16.mxu1 %v2479_v54  ;;  %v2550_v54 = vcombine.low %v401_v45, %v405_v46  ;;  %v2543_v56 = vcombine.high %v393_v52, %v397_v1  ;;  %v249_v3 = vld [vmem:[%s2661_s21 + $0x250] sm:$0xff]  ;;  %v210_v45 = vld [vmem:[%s2661_s21 + $0x118] sm:$0xff] }
  0xa4   : > { %1924 = vmatpush1.bf16.msra.mxu0 %v2350_v59  ;;  %v385_v59 = vld [vmem:[%s2661_s21 + $0x690] sm:$0xff]  ;;  %v214_v46 = vld [vmem:[%s2661_s21 + $0x138] sm:$0xff] }
  0xa5   : > { %1925 = vmatprep.subr.bf16.mxu0 %v2343_v61  ;;  %v2414_v61 = vcombine.low %v265_v51, %v269_v0  ;;  %v253_v4 = vld [vmem:[%s2661_s21 + $0x270] sm:$0xff]  ;;  %v2361_v51 = vcombine.high %v210_v45, %v214_v46 }
  0xa6   : > { %1967 = vmatpush1.bf16.msra.mxu1 %v2478_v60  ;;  %v389_v60 = vld [vmem:[%s2661_s21 + $0x6b0] sm:$0xff]  ;;  %v2399_v9 = vcombine.high %v249_v3, %v253_v4 }
  0xa7   : > { %1968 = vmatprep.subr.bf16.mxu1 %v2471_v62  ;;  %v2542_v62 = vcombine.low %v393_v52, %v397_v1  ;;  %v2535_v2 = vcombine.high %v385_v59, %v389_v60  ;;  %v241_v11 = vld [vmem:[%s2661_s21 + $0x210] sm:$0xff]  ;;  %v202_v52 = vld [vmem:[%s2661_s21 + $0xd8] sm:$0xff] }
  0xa8   : > { %1926 = vmatpush1.bf16.msra.mxu0 %v2342_v5  ;;  %v377_v5 = vld [vmem:[%s2661_s21 + $0x650] sm:$0xff]  ;;  %v206_v1 = vld [vmem:[%s2661_s21 + $0xf8] sm:$0xff] }
  0xa9   : > { %1927 = vmatprep.subr.bf16.mxu0 %v2335_v7  ;;  %v2406_v7 = vcombine.low %v257_v57, %v261_v58  ;;  %v245_v12 = vld [vmem:[%s2661_s21 + $0x230] sm:$0xff]  ;;  %v2353_v57 = vcombine.high %v202_v52, %v206_v1 }
  0xaa   : > { %1969 = vmatpush1.bf16.msra.mxu1 %v2470_v6  ;;  %v381_v6 = vld [vmem:[%s2661_s21 + $0x670] sm:$0xff]  ;;  %v2391_v18 = vcombine.high %v241_v11, %v245_v12 }
  0xab   : > { %1970 = vmatprep.subr.bf16.mxu1 %v2463_v8  ;;  %v2534_v8 = vcombine.low %v385_v59, %v389_v60  ;;  %v2527_v10 = vcombine.high %v377_v5, %v381_v6  ;;  %v194_v59 = vld [vmem:[%s2661_s21 + $0x98] sm:$0xff] }
  0xac   : > { %1928 = vmatpush1.bf16.msra.mxu0 %v2334_v13  ;;  %v369_v13 = vld [vmem:[%s2661_s21 + $0x610] sm:$0xff]  ;;  %v198_v60 = vld [vmem:[%s2661_s21 + $0xb8] sm:$0xff] }
  0xad   : > { %1929 = vmatprep.subr.bf16.mxu0 %v2327_v15  ;;  %v2398_v15 = vcombine.low %v249_v3, %v253_v4  ;;  %v2345_v3 = vcombine.high %v194_v59, %v198_v60 }
  0xae   : > { %1971 = vmatpush1.bf16.msra.mxu1 %v2462_v14  ;;  %v373_v14 = vld [vmem:[%s2661_s21 + $0x630] sm:$0xff] }
  0xaf   : > { %1972 = vmatprep.subr.bf16.mxu1 %v2455_v16  ;;  %v2526_v16 = vcombine.low %v377_v5, %v381_v6  ;;  %v2519_v19 = vcombine.high %v369_v13, %v373_v14  ;;  %v186_v5 = vld [vmem:[%s2661_s21 + $0x58] sm:$0xff] }
  0xb0   : > { %1930 = vmatpush1.bf16.msra.mxu0 %v2326_v23  ;;  %v362_v23 = vld [vmem:[%s2661_s21 + $0x5d8] sm:$0xff] }
  0xb1   : > { %1931 = vmatprep.subr.bf16.mxu0 %v2447_v25  ;;  %v2390_v25 = vcombine.low %v241_v11, %v245_v12  ;;  %v190_v6 = vld [vmem:[%s2661_s21 + $0x78] sm:$0xff] }
  0xb2   : > { %1973 = vmatpush1.bf16.msra.mxu1 %v2454_v24  ;;  %v366_v24 = vld [vmem:[%s2661_s21 + $0x5f8] sm:$0xff]  ;;  %v2337_v11 = vcombine.high %v186_v5, %v190_v6 }
  0xb3   : > { %1974 = vmatprep.subr.bf16.mxu1 %v2575_v26  ;;  %v2518_v26 = vcombine.low %v369_v13, %v373_v14  ;;  %v2513_v28 = vcombine.high %v362_v23, %v366_v24  ;;  %v178_v13 = vld [vmem:[%s2661_s21 + $0x18] sm:$0xff] }
  0xb4   : > { %1932 = vmatpush2.bf16.msra.mxu0 %v2446_v31  ;;  %v354_v31 = vld [vmem:[%s2661_s21 + $0x598] sm:$0xff] }
  0xb5   : > { %1933 = vmatprep.subr.bf16.mxu0 %v2439_v33  ;;  %v2384_v33 = vcombine.low %v234_v21, %v238_v22  ;;  %v182_v14 = vld [vmem:[%s2661_s21 + $0x38] sm:$0xff] }
  0xb6   : > { %1975 = vmatpush2.bf16.msra.mxu1 %v2574_v32  ;;  %v358_v32 = vld [vmem:[%s2661_s21 + $0x5b8] sm:$0xff]  ;;  %v2329_v21 = vcombine.high %v178_v13, %v182_v14 }
  0xb7   : > { %1976 = vmatprep.subr.bf16.mxu1 %v2567_v34  ;;  %v2512_v34 = vcombine.low %v362_v23, %v366_v24  ;;  %v2505_v36 = vcombine.high %v354_v31, %v358_v32  ;;  %v298_v23 = vld [vmem:[%s2661_s21 + $0x3d8] sm:$0xff] }
  0xb8   : > { %1934 = vmatpush2.bf16.msra.mxu0 %v2438_v39  ;;  %v346_v39 = vld [vmem:[%s2661_s21 + $0x558] sm:$0xff] }
  0xb9   : > { %1935 = vmatprep.subr.bf16.mxu0 %v2431_v41  ;;  %v2376_v41 = vcombine.low %v226_v29, %v230_v30  ;;  %v302_v24 = vld [vmem:[%s2661_s21 + $0x3f8] sm:$0xff] }
  0xba   : > { %1977 = vmatpush2.bf16.msra.mxu1 %v2566_v40  ;;  %v350_v40 = vld [vmem:[%s2661_s21 + $0x578] sm:$0xff]  ;;  %v2449_v29 = vcombine.high %v298_v23, %v302_v24 }
  0xbb   : > { %1978 = vmatprep.subr.bf16.mxu1 %v2559_v42  ;;  %v2504_v42 = vcombine.low %v354_v31, %v358_v32  ;;  %v2497_v44 = vcombine.high %v346_v39, %v350_v40  ;;  %v290_v31 = vld [vmem:[%s2661_s21 + $0x398] sm:$0xff] }
  0xbc   : > { %1936 = vmatpush2.bf16.msra.mxu0 %v2430_v47  ;;  %v342_v47 = vld [vmem:[%s2661_s21 + $0x538] sm:$0xff] }
  0xbd   : > { %1937 = vmatprep.subr.bf16.mxu0 %v2423_v49  ;;  %v2368_v49 = vcombine.low %v218_v37, %v222_v38  ;;  %v294_v32 = vld [vmem:[%s2661_s21 + $0x3b8] sm:$0xff] }
  0xbe   : > { %1979 = vmatpush2.bf16.msra.mxu1 %v2558_v48  ;;  %v2603_v48 = vld [vmem:[%s3133_s1 + $0xc] ss:$16 sps:$4 sm:$0xff]   ;;  %v2441_v37 = vcombine.high %v290_v31, %v294_v32 }
  0xbf   : > { %1980 = vmatprep.subr.bf16.mxu1 %v2551_v50  ;;  %v2496_v50 = vcombine.low %v346_v39, %v350_v40  ;;  %v282_v39 = vld [vmem:[%s2661_s21 + $0x358] sm:$0xff] }
  0xc0   : > { %1938 = vmatpush2.bf16.msra.mxu0 %v2422_v53  ;;  %v330_v53 = vld [vmem:[%s2661_s21 + $0x4d8] sm:$0xff] }
  0xc1   : > { %1939 = vmatprep.subr.bf16.mxu0 %v2415_v55  ;;  %v2360_v55 = vcombine.low %v210_v45, %v214_v46  ;;  %v286_v40 = vld [vmem:[%s2661_s21 + $0x378] sm:$0xff] }
  0xc2   : > { %1981 = vmatpush2.bf16.msra.mxu1 %v2550_v54  ;;  %v334_v54 = vld [vmem:[%s2661_s21 + $0x4f8] sm:$0xff]  ;;  %v2433_v45 = vcombine.high %v282_v39, %v286_v40 }
  0xc3   : > { %1982 = vmatprep.subr.bf16.mxu1 %v2543_v56  ;;  %v2481_v58 = vcombine.high %v330_v53, %v334_v54 }
  0xc4   : > { %1940 = vmatpush2.bf16.msra.mxu0 %v2414_v61  ;;  %v322_v61 = vld [vmem:[%s2661_s21 + $0x498] sm:$0xff] }
  0xc5   : > { %1941 = vmatprep.subr.bf16.mxu0 %v2407_v63  ;;  %v2352_v63 = vcombine.low %v202_v52, %v206_v1  ;;  %v266_v52 = vld [vmem:[%s2661_s21 + $0x2d8] sm:$0xff] }
  0xc6   : > { %1983 = vmatpush2.bf16.msra.mxu1 %v2542_v62  ;;  %v326_v62 = vld [vmem:[%s2661_s21 + $0x4b8] sm:$0xff] }
  0xc7   : > { %1984 = vmatprep.subr.bf16.mxu1 %v2535_v2  ;;  %v2480_v2 = vcombine.low %v330_v53, %v334_v54  ;;  %v2473_v4 = vcombine.high %v322_v61, %v326_v62  ;;  %v270_v1 = vld [vmem:[%s2661_s21 + $0x2f8] sm:$0xff] }
  0xc8   : > { %1942 = vmatpush2.bf16.msra.mxu0 %v2406_v7  ;;  %v314_v7 = vld [vmem:[%s2661_s21 + $0x458] sm:$0xff] }
  0xc9   : > { %1943 = vmatprep.subr.bf16.mxu0 %v2399_v9  ;;  %v2344_v9 = vcombine.low %v194_v59, %v198_v60  ;;  %v394_v53 = vld [vmem:[%s2661_s21 + $0x6d8] sm:$0xff] }
  0xca   : > { %1985 = vmatpush2.bf16.msra.mxu1 %v2534_v8  ;;  %v318_v8 = vld [vmem:[%s2661_s21 + $0x478] sm:$0xff] }
  0xcb   : > { %1986 = vmatprep.subr.bf16.mxu1 %v2527_v10  ;;  %v2472_v10 = vcombine.low %v322_v61, %v326_v62  ;;  %v2465_v12 = vcombine.high %v314_v7, %v318_v8  ;;  %v398_v54 = vld [vmem:[%s2661_s21 + $0x6f8] sm:$0xff] }
  0xcc   : > { %1944 = vmatpush2.bf16.msra.mxu0 %v2398_v15  ;;  %v306_v15 = vld [vmem:[%s2661_s21 + $0x418] sm:$0xff] }
  0xcd   : > { %1945 = vmatprep.subr.bf16.mxu0 %v2391_v18  ;;  %v2336_v18 = vcombine.low %v186_v5, %v190_v6  ;;  %v258_v59 = vld [vmem:[%s2661_s21 + $0x298] sm:$0xff] }
  0xce   : > { %1987 = vmatpush2.bf16.msra.mxu1 %v2526_v16  ;;  %v310_v16 = vld [vmem:[%s2661_s21 + $0x438] sm:$0xff] }
  0xcf   : > { %1988 = vmatprep.subr.bf16.mxu1 %v2519_v19  ;;  %v2464_v19 = vcombine.low %v314_v7, %v318_v8  ;;  %v2457_v22 = vcombine.high %v306_v15, %v310_v16  ;;  %v262_v60 = vld [vmem:[%s2661_s21 + $0x2b8] sm:$0xff] }
  0xd0   : > { %1946 = vmatpush2.bf16.msra.mxu0 %v2390_v25  ;;  %v426_v25 = vld [vmem:[%s2661_s21 + $0x7d8] sm:$0xff] }
  0xd1   : > { %2001 = vmatprep.subr.bf16.mxu0 %v2385_v27  ;;  %v2328_v27 = vcombine.low %v178_v13, %v182_v14  ;;  %v386_v61 = vld [vmem:[%s2661_s21 + $0x698] sm:$0xff] }
  0xd2   : > { %1989 = vmatpush2.bf16.msra.mxu1 %v2518_v26  ;;  %v430_v26 = vld [vmem:[%s2661_s21 + $0x7f8] sm:$0xff] }
  0xd3   : > { %2044 = vmatprep.subr.bf16.mxu1 %v2513_v28  ;;  %1948 = vmatmul.mubr.bf16.vlgmr.msra.gmra.mxu0 %v2742_v17  ;;  %v2602_v17 = vld [vmem:[%s3133_s1 + $0x4] ss:$16 sps:$4 sm:$0xff]   ;;  %v2456_v28 = vcombine.low %v306_v15, %v310_v16  ;;  %v2577_v30 = vcombine.high %v426_v25, %v430_v26  ;;  %v390_v62 = vld [vmem:[%s2661_s21 + $0x6b8] sm:$0xff] }
  0xd4   : > { %2002 = vmatpush1.bf16.msra.mxu0 %v2384_v33  ;;  %2033 = vmatprep.mubr.bf16.mxu0 %v2602_v17  ;;  %v418_v33 = vld [vmem:[%s2661_s21 + $0x798] sm:$0xff] }
  0xd5   : > { %1991 = vmatmul.mubr.bf16.vlgmr.msra.gmra.mxu1 %v2749_v20  ;;  %2003 = vmatprep.subr.bf16.mxu0 %v2377_v35  ;;  %v338_v20 = vld [vmem:[%s2661_s21 + $0x518] sm:$0xff]  ;;  %v2448_v35 = vcombine.low %v298_v23, %v302_v24 }
  0xd6   : > { %2045 = vmatpush1.bf16.msra.mxu1 %v2512_v34  ;;  %2076 = vmatprep.mubr.bf16.mxu1 %v2603_v48  ;;  %v2489_v0 = vcombine.high %v338_v20, %v342_v47  ;;  %v2488_v56 = vcombine.low %v338_v20, %v342_v47  ;;  %v422_v34 = vld [vmem:[%s2661_s21 + $0x7b8] sm:$0xff] }
  0xd7   : > { %2046 = vmatprep.subr.bf16.mxu1 %v2505_v36  ;;  %v2576_v36 = vcombine.low %v426_v25, %v430_v26  ;;  %v2569_v38 = vcombine.high %v418_v33, %v422_v34  ;;  %v274_v17 = vld [vmem:[%s2661_s21 + $0x318] sm:$0xff]  ;;  %v2604_v25 = vld [vmem:[%s3133_s1] ss:$16 sps:$4 sm:$0xff]  }
  0xd8   : > { %2004 = vmatpush1.bf16.msra.mxu0 %v2376_v41  ;;  %v410_v41 = vld [vmem:[%s2661_s21 + $0x758] sm:$0xff] }
  0xd9   : > { %2005 = vmatprep.subr.bf16.mxu0 %v2369_v43  ;;  %v2440_v43 = vcombine.low %v290_v31, %v294_v32  ;;  %v278_v20 = vld [vmem:[%s2661_s21 + $0x338] sm:$0xff] }
  0xda   : > { %2047 = vmatpush1.bf16.msra.mxu1 %v2504_v42  ;;  %v414_v42 = vld [vmem:[%s2661_s21 + $0x778] sm:$0xff] }
  0xdb   : > { %2048 = vmatprep.subr.bf16.mxu1 %v2497_v44  ;;  %v2568_v44 = vcombine.low %v418_v33, %v422_v34  ;;  %v2561_v46 = vcombine.high %v410_v41, %v414_v42  ;;  %v402_v47 = vld [vmem:[%s2661_s21 + $0x718] sm:$0xff] }
  0xdc   : > { %2006 = vmatpush1.bf16.msra.mxu0 %v2368_v49  ;;  %v406_v48 = vld [vmem:[%s2661_s21 + $0x738] sm:$0xff]  ;;  %v2432_v49 = vcombine.low %v282_v39, %v286_v40  ;;  %v2957_v40 = vpop.permute.xlu0 %435 }
  0xdd   : > { %2007 = vmatprep.subr.bf16.mxu0 %v2361_v51  ;;  %v2425_v51 = vcombine.high %v274_v17, %v278_v20  ;;  %v250_v5 = vld [vmem:[%s2661_s21 + $0x258] sm:$0xff] }
  0xde   : > { %2049 = vmatpush1.bf16.msra.mxu1 %v2496_v50  ;;  %v2560_v50 = vcombine.low %v410_v41, %v414_v42  ;;  %v254_v6 = vld [vmem:[%s2661_s21 + $0x278] sm:$0xff] }
  0xdf   : > { %2050 = vmatprep.subr.bf16.mxu1 %v2489_v0  ;;  %v2553_v0 = vcombine.high %v402_v47, %v406_v48  ;;  %v378_v7 = vld [vmem:[%s2661_s21 + $0x658] sm:$0xff] }
  0xe0   : > { %2008 = vmatpush1.bf16.msra.mxu0 %v2360_v55  ;;  %v2424_v55 = vcombine.low %v274_v17, %v278_v20  ;;  %v382_v8 = vld [vmem:[%s2661_s21 + $0x678] sm:$0xff] }
  0xe1   : > { %2009 = vmatprep.subr.bf16.mxu0 %v2353_v57  ;;  %v2417_v57 = vcombine.high %v266_v52, %v270_v1  ;;  %v242_v13 = vld [vmem:[%s2661_s21 + $0x218] sm:$0xff] }
  0xe2   : > { %2051 = vmatpush1.bf16.msra.mxu1 %v2488_v56  ;;  %v2552_v56 = vcombine.low %v402_v47, %v406_v48  ;;  %v246_v14 = vld [vmem:[%s2661_s21 + $0x238] sm:$0xff]  ;;  %v2966_v47 = vpop.permute.xlu0 %440 }
  0xe3   : > { %2052 = vmatprep.subr.bf16.mxu1 %v2481_v58  ;;  %v2545_v58 = vcombine.high %v394_v53, %v398_v54  ;;  %v370_v15 = vld [vmem:[%s2661_s21 + $0x618] sm:$0xff]  ;;  %v2392_v23 = vcombine.low %v242_v13, %v246_v14 }
  0xe4   : > { %2010 = vmatpush1.bf16.msra.mxu0 %v2352_v63  ;;  %v2416_v63 = vcombine.low %v266_v52, %v270_v1  ;;  %v374_v16 = vld [vmem:[%s2661_s21 + $0x638] sm:$0xff] }
  0xe5   : > { %2011 = vmatprep.subr.bf16.mxu0 %v2345_v3  ;;  %v2409_v3 = vcombine.high %v258_v59, %v262_v60  ;;  %v2520_v24 = vcombine.low %v370_v15, %v374_v16  ;;  %v2605_v26 = vld [vmem:[%s3133_s1 + $0x8] ss:$16 sps:$4 sm:$0xff]  }
  0xe6   : > { %2053 = vmatpush1.bf16.msra.mxu1 %v2480_v2  ;;  %v2544_v2 = vcombine.low %v394_v53, %v398_v54 }
  0xe7   : > { %2054 = vmatprep.subr.bf16.mxu1 %v2473_v4  ;;  %v2537_v4 = vcombine.high %v386_v61, %v390_v62 }
  0xe8   : > { %2012 = vmatpush1.bf16.msra.mxu0 %v2344_v9  ;;  %v2408_v9 = vcombine.low %v258_v59, %v262_v60 }
  0xe9   : > { %2013 = vmatprep.subr.bf16.mxu0 %v2337_v11  ;;  %v2401_v11 = vcombine.high %v250_v5, %v254_v6 }
  0xea   : > { %2055 = vmatpush1.bf16.msra.mxu1 %v2472_v10  ;;  %v2536_v10 = vcombine.low %v386_v61, %v390_v62 }
  0xeb   : > { %2056 = vmatprep.subr.bf16.mxu1 %v2465_v12  ;;  %v2529_v12 = vcombine.high %v378_v7, %v382_v8 }
  0xec   : > { %2014 = vmatpush1.bf16.msra.mxu0 %v2336_v18  ;;  %v2400_v18 = vcombine.low %v250_v5, %v254_v6 }
  0xed   : > { %2015 = vmatprep.subr.bf16.mxu0 %v2329_v21  ;;  %v2393_v21 = vcombine.high %v242_v13, %v246_v14 }
  0xee   : > { %2057 = vmatpush1.bf16.msra.mxu1 %v2464_v19  ;;  %v2528_v19 = vcombine.low %v378_v7, %v382_v8 }
  0xef   : > { %2058 = vmatprep.subr.bf16.mxu1 %v2457_v22  ;;  %v2521_v22 = vcombine.high %v370_v15, %v374_v16 }
  0xf0   : > { %2016 = vmatpush1.bf16.msra.mxu0 %v2328_v27 }
  0xf1   : > { %2017 = vmatprep.subr.bf16.mxu0 %v2449_v29 }
  0xf2   : > { %2059 = vmatpush1.bf16.msra.mxu1 %v2456_v28 }
  0xf3   : > { %2060 = vmatprep.subr.bf16.mxu1 %v2577_v30 }
  0xf4   : > { %2018 = vmatpush2.bf16.msra.mxu0 %v2448_v35 }
  0xf5   : > { %2019 = vmatprep.subr.bf16.mxu0 %v2441_v37 }
  0xf6   : > { %2061 = vmatpush2.bf16.msra.mxu1 %v2576_v36 }
  0xf7   : > { %2062 = vmatprep.subr.bf16.mxu1 %v2569_v38 }
  0xf8   : > { %2020 = vmatpush2.bf16.msra.mxu0 %v2440_v43 }
  0xf9   : > { %2021 = vmatprep.subr.bf16.mxu0 %v2433_v45 }
  0xfa   : > { %2063 = vmatpush2.bf16.msra.mxu1 %v2568_v44 }
  0xfb   : > { %2064 = vmatprep.subr.bf16.mxu1 %v2561_v46 }
  0xfc   : > { %2022 = vmatpush2.bf16.msra.mxu0 %v2432_v49 }
  0xfd   : > { %2023 = vmatprep.subr.bf16.mxu0 %v2425_v51 }
  0xfe   : > { %2065 = vmatpush2.bf16.msra.mxu1 %v2560_v50 }
  0xff   : > { %2066 = vmatprep.subr.bf16.mxu1 %v2553_v0 }
 0x100   : > { %2024 = vmatpush2.bf16.msra.mxu0 %v2424_v55 }
 0x101   : > { %2025 = vmatprep.subr.bf16.mxu0 %v2417_v57 }
 0x102   : > { %2067 = vmatpush2.bf16.msra.mxu1 %v2552_v56 }
 0x103   : > { %2068 = vmatprep.subr.bf16.mxu1 %v2545_v58 }
 0x104   : > { %2026 = vmatpush2.bf16.msra.mxu0 %v2416_v63 }
 0x105   : > { %2027 = vmatprep.subr.bf16.mxu0 %v2409_v3 }
 0x106   : > { %2069 = vmatpush2.bf16.msra.mxu1 %v2544_v2 }
 0x107   : > { %2070 = vmatprep.subr.bf16.mxu1 %v2537_v4 }
 0x108   : > { %2028 = vmatpush2.bf16.msra.mxu0 %v2408_v9 }
 0x109   : > { %2029 = vmatprep.subr.bf16.mxu0 %v2401_v11 }
 0x10a   : > { %2071 = vmatpush2.bf16.msra.mxu1 %v2536_v10 }
 0x10b   : > { %2072 = vmatprep.subr.bf16.mxu1 %v2529_v12 }
 0x10c   : > { %2030 = vmatpush2.bf16.msra.mxu0 %v2400_v18 }
 0x10d   : > { %2031 = vmatprep.subr.bf16.mxu0 %v2393_v21 }
 0x10e   : > { %2073 = vmatpush2.bf16.msra.mxu1 %v2528_v19 }
 0x10f   : > { %2074 = vmatprep.subr.bf16.mxu1 %v2521_v22 }
 0x110   : > { %2032 = vmatpush2.bf16.msra.mxu0 %v2392_v23 }
 0x112   : > { %2075 = vmatpush2.bf16.msra.mxu1 %v2520_v24 }
 0x113   : > { %2034 = vmatmul.mubr.bf16.vlgmr.msra.gmra.mxu0 %v2604_v25  ;;  %v1777_v27 = vpop.f32.mrf.mxu0 }
 0x114   : > { %v1778_v41 = vadd.f32 %v1777_v27, %v2957_v40 }
 0x115   : > { %2077 = vmatmul.mubr.bf16.vlgmr.msra.gmra.mxu1 %v2605_v26  ;;  %v1820_v28 = vpop.f32.mrf.mxu1  ;;  %v1779_v29 = vpop.f32.mrf.mxu0 }
 0x116   : > { %v1780_v42 = vadd.f32 %v1779_v29, %v2957_v40  ;;  %v2962_v17 = vadd.f32 %v1820_v28, %v1778_v41 }
 0x117   : > { %v1822_v30 = vpop.f32.mrf.mxu1  ;;  %v1781_v31 = vpop.f32.mrf.mxu0 }
 0x118   : > { %v2964_v20 = vadd.f32 %v1822_v30, %v1780_v42  ;;  %v1782_v1 = vadd.f32 %v1781_v31, %v2966_v47  ;;  %v2110_v54 = vmul.f32 %v2962_v17, %v2962_v17 }
 0x119   : > { %v1824_v32 = vpop.f32.mrf.mxu1  ;;  %v1783_v33 = vpop.f32.mrf.mxu0 }
 0x11a   : > { %v1784_v49 = vadd.f32 %v1783_v33, %v2966_v47  ;;  %v2111_v55 = vmul.f32 %v2964_v20, %v2964_v20  ;;  %v2087_v58 = vadd.f32 %v2964_v20, %v2962_v17  ;;  %v2987_v63 = vadd.f32 %v1824_v32, %v1782_v1 }
 0x11b   : > { %v1826_v35 = vpop.f32.mrf.mxu1 }
 0x11c   : > { %v2979_v57 = vadd.f32 %v1826_v35, %v1784_v49  ;;  %v2126_v4 = vadd.f32 %v2111_v55, %v2110_v54  ;;  %v2118_v15 = vmul.f32 %v2987_v63, %v2987_v63 }
 0x11e   : > { %v2098_v7 = vadd.f32 %v2979_v57, %v2987_v63  ;;  %v2119_v8 = vmul.f32 %v2979_v57, %v2979_v57 }
 0x120   : > { %v2136_v23 = vadd.f32 %v2119_v8, %v2118_v15 }
 0x153   : > { %v1863_v34 = vpop.f32.mrf.mxu0 }
 0x154   : > { %v1864_v45 = vadd.f32 %v1863_v34, %v2957_v40 }
 0x155   : > { %v1906_v36 = vpop.f32.mrf.mxu1  ;;  %v1865_v37 = vpop.f32.mrf.mxu0 }
 0x156   : > { %v2969_v50 = vadd.f32 %v1906_v36, %v1864_v45  ;;  %v1866_v51 = vadd.f32 %v1865_v37, %v2957_v40 }
 0x157   : > { %v1908_v38 = vpop.f32.mrf.mxu1  ;;  %v1867_v39 = vpop.f32.mrf.mxu0 }
 0x158   : > { %v1868_v53 = vadd.f32 %v1867_v39, %v2966_v47  ;;  %v2112_v59 = vmul.f32 %v2969_v50, %v2969_v50  ;;  %v2985_v60 = vadd.f32 %v1908_v38, %v1866_v51  ;;  %v2088_v5 = vadd.f32 %v2087_v58, %v2969_v50 }
 0x159   : > { %v1910_v43 = vpop.f32.mrf.mxu1  ;;  %v1869_v44 = vpop.f32.mrf.mxu0 }
 0x15a   : > { %v2989_v2 = vadd.f32 %v1910_v43, %v1868_v53  ;;  %v1870_v3 = vadd.f32 %v1869_v44, %v2966_v47  ;;  %v2127_v11 = vadd.f32 %v2126_v4, %v2112_v59  ;;  %v2113_v12 = vmul.f32 %v2985_v60, %v2985_v60 }
 0x15b   : > { %v1912_v48 = vpop.f32.mrf.mxu1  ;;  %v2089_v21 = vadd.f32 %v2088_v5, %v2985_v60 }
 0x15c   : > { %v2099_v16 = vadd.f32 %v2098_v7, %v2989_v2  ;;  %v2120_v18 = vmul.f32 %v2989_v2, %v2989_v2  ;;  %v3008_v19 = vadd.f32 %v1912_v48, %v1870_v3  ;;  %v2128_v27 = vadd.f32 %v2127_v11, %v2113_v12 }
 0x15e   : > { %v2137_v30 = vadd.f32 %v2136_v23, %v2120_v18  ;;  %v2100_v31 = vadd.f32 %v2099_v16, %v3008_v19  ;;  %v2121_v32 = vmul.f32 %v3008_v19, %v3008_v19 }
 0x160   : > { %v2138_v48 = vadd.f32 %v2137_v30, %v2121_v32 }
 0x193   : > { %v1949_v46 = vpop.f32.mrf.mxu0 }
 0x194   : > { %v1950_v56 = vadd.f32 %v1949_v46, %v2957_v40 }
 0x195   : > { %v1992_v0 = vpop.f32.mrf.mxu1  ;;  %v1951_v52 = vpop.f32.mrf.mxu0 }
 0x196   : > { %v2993_v6 = vadd.f32 %v1992_v0, %v1950_v56  ;;  %v1952_v9 = vadd.f32 %v1951_v52, %v2957_v40 }
 0x197   : > { %v1994_v61 = vpop.f32.mrf.mxu1  ;;  %v1953_v62 = vpop.f32.mrf.mxu0 }
 0x198   : > { %v1954_v10 = vadd.f32 %v1953_v62, %v2966_v47  ;;  %v2114_v22 = vmul.f32 %v2993_v6, %v2993_v6  ;;  %v3013_v24 = vadd.f32 %v1994_v61, %v1952_v9  ;;  %v2090_v28 = vadd.f32 %v2089_v21, %v2993_v6 }
 0x199   : > { %v1996_v13 = vpop.f32.mrf.mxu1  ;;  %v1955_v14 = vpop.f32.mrf.mxu0 }
 0x19a   : > { %v3015_v25 = vadd.f32 %v1996_v13, %v1954_v10  ;;  %v1956_v26 = vadd.f32 %v1955_v14, %v2966_v47  ;;  %v2129_v34 = vadd.f32 %v2128_v27, %v2114_v22  ;;  %v2115_v37 = vmul.f32 %v3013_v24, %v3013_v24 }
 0x19b   : > { %v1998_v29 = vpop.f32.mrf.mxu1  ;;  %v2091_v46 = vadd.f32 %v2090_v28, %v3013_v24 }
 0x19c   : > { %v2101_v38 = vadd.f32 %v2100_v31, %v3015_v25  ;;  %v2122_v39 = vmul.f32 %v3015_v25, %v3015_v25  ;;  %v3028_v41 = vadd.f32 %v1998_v29, %v1956_v26  ;;  %v2130_v58 = vadd.f32 %v2129_v34, %v2115_v37 }
 0x19e   : > { %v2139_v54 = vadd.f32 %v2138_v48, %v2122_v39  ;;  %v2102_v55 = vadd.f32 %v2101_v38, %v3028_v41 }
 0x1d3   : > { %v2035_v33 = vpop.f32.mrf.mxu0 }
 0x1d4   : > { %v2036_v35 = vadd.f32 %v2035_v33, %v2957_v40 }
 0x1d5   : > { %v2078_v36 = vpop.f32.mrf.mxu1  ;;  %v2037_v42 = vpop.f32.mrf.mxu0 }
 0x1d6   : > { %v3030_v43 = vadd.f32 %v2078_v36, %v2036_v35  ;;  %v2038_v44 = vadd.f32 %v2037_v42, %v2957_v40  ;;  %v2123_v40 = vmul.f32 %v3028_v41, %v3028_v41 }
 0x1d7   : > { %v2080_v45 = vpop.f32.mrf.mxu1  ;;  %v2039_v49 = vpop.f32.mrf.mxu0 }
 0x1d8   : > { %v2116_v51 = vmul.f32 %v3030_v43, %v3030_v43  ;;  %v3036_v0 = vadd.f32 %v2080_v45, %v2038_v44  ;;  %v2040_v52 = vadd.f32 %v2039_v49, %v2966_v47  ;;  %v2092_v53 = vadd.f32 %v2091_v46, %v3030_v43 }
 0x1d9   : > { %v2082_v1 = vpop.f32.mrf.mxu1  ;;  %v2041_v56 = vpop.f32.mrf.mxu0  ;;  %v2140_v12 = vadd.f32 %v2139_v54, %v2123_v40 }
 0x1da   : > { %v3043_v59 = vadd.f32 %v2082_v1, %v2040_v52  ;;  %v2042_v61 = vadd.f32 %v2041_v56, %v2966_v47  ;;  %v2094_v62 = vsel %vm2093_vm0, %v3036_v0, 0.0  ;;  %v2117_v3 = vmul.f32 %v3036_v0, %v3036_v0 }
 0x1db   : > { %v2084_v4 = vpop.f32.mrf.mxu1  ;;  %v2095_v5 = vadd.f32 %v2094_v62, %v2092_v53  ;;  %v2131_v7 = vadd.f32 %v2130_v58, %v2116_v51 }
 0x1dc   : > { %v2124_v8 = vmul.f32 %v3043_v59, %v3043_v59  ;;  %v3052_v9 = vadd.f32 %v2084_v4, %v2042_v61  ;;  %v2132_v10 = vsel %vm2093_vm0, %v2117_v3, 0.0  ;;  %v2103_v11 = vadd.f32 %v2102_v55, %v3043_v59 }
 0x1dd   : > { %2096 = vadd.xlane.f32.xlu1 %v2095_v5  ;;  %v2133_v47 = vadd.f32 %v2132_v10, %v2131_v7 }
 0x1de   : > { %v2104_v13 = vsel %vm2093_vm0, %v3052_v9, 0.0  ;;  %v2125_v14 = vmul.f32 %v3052_v9, %v3052_v9  ;;  %v2141_v16 = vadd.f32 %v2140_v12, %v2124_v8 }
 0x1df   : > { %2134 = vadd.xlane.f32.xlu0 %v2133_v47  ;;  %v2105_v15 = vadd.f32 %v2104_v13, %v2103_v11 }
 0x1e0   : > { %v2142_v18 = vsel %vm2093_vm0, %v2125_v14, 0.0 }
 0x1e1   : > { %2106 = vadd.xlane.f32.xlu1 %v2105_v15  ;;  %v2143_v21 = vadd.f32 %v2142_v18, %v2141_v16 }
 0x1e5   : > { %2144 = vadd.xlane.f32.xlu1 %v2143_v21 }
 0x266   : > { %v2097_v22 = vpop.xlane.xlu1 %2096 }
 0x267   : > { %v2108_v23 = vmul.f32 0.0011111111, %v2097_v22 }
 0x268   : > { %v2135_v26 = vpop.xlane.xlu0 %2134 }
 0x269   : > { %v2146_v28 = vmul.f32 0.0011111111, %v2135_v26  ;;  %v2148_v29 = vmul.f32 %v2108_v23, %v2108_v23  ;;  %v2154_v42 = vsub.f32 %v2962_v17, %v2108_v23  ;;  %v2155_v44 = vsub.f32 %v2964_v20, %v2108_v23 }
 0x26a   : > { %v2107_v27 = vpop.xlane.xlu1 %2106  ;;  %v2156_v45 = vsub.f32 %v2969_v50, %v2108_v23  ;;  %v2157_v46 = vsub.f32 %v2985_v60, %v2108_v23  ;;  %v2158_v48 = vsub.f32 %v2993_v6, %v2108_v23  ;;  %v2159_v49 = vsub.f32 %v3013_v24, %v2108_v23 }
 0x26b   : > { %v3061_v30 = vmul.f32 0.0011111111, %v2107_v27  ;;  %v2150_v31 = vsub.f32 %v2146_v28, %v2148_v29  ;;  %v2160_v51 = vsub.f32 %v3030_v43, %v2108_v23  ;;  %v2161_v52 = vsub.f32 %v3036_v0, %v2108_v23 }
 0x26d   : > { %v2152_v33 = vmax.f32 %v2150_v31, 0.0  ;;  %v2149_v34 = vmul.f32 %v3061_v30, %v3061_v30  ;;  %v2162_v1 = vsub.f32 %v2987_v63, %v3061_v30  ;;  %v2163_v17 = vsub.f32 %v2979_v57, %v3061_v30 }
 0x26e   : > { %v2145_v32 = vpop.xlane.xlu1 %2144  ;;  %v2164_v20 = vsub.f32 %v2989_v2, %v3061_v30  ;;  %v2165_v50 = vsub.f32 %v3008_v19, %v3061_v30  ;;  %v2166_v6 = vsub.f32 %v3015_v25, %v3061_v30  ;;  %v2167_v24 = vsub.f32 %v3028_v41, %v3061_v30 }
 0x26f   : > { %v2147_v35 = vmul.f32 0.0011111111, %v2145_v32  ;;  %v2170_v36 = vadd.f32 1e-05, %v2152_v33  ;;  %v2168_v43 = vsub.f32 %v3043_v59, %v3061_v30  ;;  %v2169_v63 = vsub.f32 %v3052_v9, %v3061_v30 }
 0x271   : > { %v2151_v37 = vsub.f32 %v2147_v35, %v2149_v34  ;;  %2598 = vrsqrt.f32 %v2170_v36 }
 0x273   : > { %v2153_v38 = vmax.f32 %v2151_v37, 0.0 }
 0x275   : > { %v2171_v39 = vadd.f32 1e-05, %v2153_v38 }
 0x277   : > { %2600 = vrsqrt.f32 %v2171_v39 }
 0x27e   : > { %v2599_v60 = vpop.eup %2598 }
 0x27f   : > { %v2174_v57 = vmul.f32 %v2599_v60, %v2154_v42  ;;  %v2175_v0 = vmul.f32 %v2599_v60, %v2155_v44  ;;  %v2176_v53 = vmul.f32 %v2599_v60, %v2156_v45  ;;  %v2177_v2 = vmul.f32 %v2599_v60, %v2157_v46 }
 0x280   : > { %v2178_v54 = vmul.f32 %v2599_v60, %v2158_v48  ;;  %v2179_v19 = vmul.f32 %v2599_v60, %v2159_v49  ;;  %v2180_v55 = vmul.f32 %v2599_v60, %v2160_v51  ;;  %v2181_v40 = vmul.f32 %v2599_v60, %v2161_v52 }
 0x281   : > { %vm2190_vm1 = vcmp.ge.f32.partialorder %v2174_v57, 0.0  ;;  %vm2191_vm2 = vcmp.ge.f32.partialorder %v2175_v0, 0.0  ;;  %vm2192_vm3 = vcmp.ge.f32.partialorder %v2176_v53, 0.0  ;;  %vm2193_vm4 = vcmp.ge.f32.partialorder %v2177_v2, 0.0 }
 0x282   : > { %vm2194_vm5 = vcmp.ge.f32.partialorder %v2178_v54, 0.0  ;;  %vm2195_vm6 = vcmp.ge.f32.partialorder %v2179_v19, 0.0  ;;  %vm2196_vm7 = vcmp.ge.f32.partialorder %v2180_v55, 0.0  ;;  %vm2197_vm8 = vcmp.ge.f32.partialorder %v2181_v40, 0.0 }
 0x283   : > { %v2206_v41 = vmul.f32 0.2, %v2174_v57  ;;  %v2207_v56 = vmul.f32 0.2, %v2175_v0  ;;  %v2208_v58 = vmul.f32 0.2, %v2176_v53 }
 0x284   : > { %v2601_v25 = vpop.eup %2600  ;;  %v2209_v61 = vmul.f32 0.2, %v2177_v2  ;;  %v2210_v62 = vmul.f32 0.2, %v2178_v54  ;;  %v2211_v3 = vmul.f32 0.2, %v2179_v19 }
 0x285   : > { %v2182_v59 = vmul.f32 %v2601_v25, %v2162_v1  ;;  %v2183_v4 = vmul.f32 %v2601_v25, %v2163_v17  ;;  %v2212_v5 = vmul.f32 0.2, %v2180_v55  ;;  %v2213_v7 = vmul.f32 0.2, %v2181_v40 }
 0x286   : > { %v2222_v8 = vsel %vm2190_vm1, %v2174_v57, %v2206_v41  ;;  %v2223_v9 = vsel %vm2191_vm2, %v2175_v0, %v2207_v56  ;;  %v2224_v10 = vsel %vm2192_vm3, %v2176_v53, %v2208_v58  ;;  %v2225_v11 = vsel %vm2193_vm4, %v2177_v2, %v2209_v61 }
 0x287   : > { %v2226_v47 = vsel %vm2194_vm5, %v2178_v54, %v2210_v62  ;;  %v2227_v12 = vsel %vm2195_vm6, %v2179_v19, %v2211_v3  ;;  %2238 = vst [vmem:[%s3093_s16] sm:$0xff] %v2222_v8  ;;  %2239 = vst [vmem:[%s3093_s16 + $0x8] sm:$0xff] %v2223_v9  ;;  %v2228_v13 = vsel %vm2196_vm7, %v2180_v55, %v2212_v5  ;;  %vm2198_vm9 = vcmp.ge.f32.partialorder %v2182_v59, 0.0 }
 0x288   : > { %v2229_v14 = vsel %vm2197_vm8, %v2181_v40, %v2213_v7  ;;  %2240 = vst [vmem:[%s3093_s16 + $0x10] sm:$0xff] %v2224_v10  ;;  %2241 = vst [vmem:[%s3093_s16 + $0x18] sm:$0xff] %v2225_v11  ;;  %v2184_v15 = vmul.f32 %v2601_v25, %v2164_v20  ;;  %v2185_v16 = vmul.f32 %v2601_v25, %v2165_v50  ;;  %vm2199_vm10 = vcmp.ge.f32.partialorder %v2183_v4, 0.0 }
 0x289   : > { %2242 = vst [vmem:[%s3093_s16 + $0x20] sm:$0xff] %v2226_v47  ;;  %2243 = vst [vmem:[%s3093_s16 + $0x28] sm:$0xff] %v2227_v12  ;;  %v2186_v18 = vmul.f32 %v2601_v25, %v2166_v6  ;;  %v2187_v21 = vmul.f32 %v2601_v25, %v2167_v24  ;;  %v2188_v22 = vmul.f32 %v2601_v25, %v2168_v43  ;;  %v2214_v26 = vmul.f32 0.2, %v2182_v59 }
 0x28a   : > { %2244 = vst [vmem:[%s3093_s16 + $0x30] sm:$0xff] %v2228_v13  ;;  %2245 = vst.msk [vmem:[%s3093_s16 + $0x38] sm:$0xff] %vm2093_vm0, %v2229_v14  ;;  %v2189_v23 = vmul.f32 %v2601_v25, %v2169_v63  ;;  %vm2200_vm11 = vcmp.ge.f32.partialorder %v2184_v15, 0.0  ;;  %vm2201_vm12 = vcmp.ge.f32.partialorder %v2185_v16, 0.0  ;;  %v2215_v27 = vmul.f32 0.2, %v2183_v4 }
 0x28b   : > { %vm2202_vm13 = vcmp.ge.f32.partialorder %v2186_v18, 0.0  ;;  %vm2203_vm14 = vcmp.ge.f32.partialorder %v2187_v21, 0.0  ;;  %vm2204_vm15 = vcmp.ge.f32.partialorder %v2188_v22, 0.0  ;;  %v2216_v28 = vmul.f32 0.2, %v2184_v15 }
 0x28c   : > { %vm2205_vm1 = vcmp.ge.f32.partialorder %v2189_v23, 0.0  ;;  %v2217_v29 = vmul.f32 0.2, %v2185_v16  ;;  %v2218_v30 = vmul.f32 0.2, %v2186_v18  ;;  %v2230_v34 = vsel %vm2198_vm9, %v2182_v59, %v2214_v26 }
 0x28d   : > { %v2219_v31 = vmul.f32 0.2, %v2187_v21  ;;  %v2220_v32 = vmul.f32 0.2, %v2188_v22  ;;  %v2221_v33 = vmul.f32 0.2, %v2189_v23  ;;  %v2231_v35 = vsel %vm2199_vm10, %v2183_v4, %v2215_v27 }
 0x28e   : > { %v2232_v36 = vsel %vm2200_vm11, %v2184_v15, %v2216_v28  ;;  %v2233_v37 = vsel %vm2201_vm12, %v2185_v16, %v2217_v29  ;;  %v2234_v38 = vsel %vm2202_vm13, %v2186_v18, %v2218_v30  ;;  %2246 = vst [vmem:[%s3093_s16 + $0x40] sm:$0xff] %v2230_v34  ;;  %2247 = vst [vmem:[%s3093_s16 + $0x48] sm:$0xff] %v2231_v35 }
 0x28f   : > { %v2235_v39 = vsel %vm2203_vm14, %v2187_v21, %v2219_v31  ;;  %v2236_v42 = vsel %vm2204_vm15, %v2188_v22, %v2220_v32  ;;  %v2237_v44 = vsel %vm2205_vm1, %v2189_v23, %v2221_v33  ;;  %2248 = vst [vmem:[%s3093_s16 + $0x50] sm:$0xff] %v2232_v36  ;;  %2249 = vst [vmem:[%s3093_s16 + $0x58] sm:$0xff] %v2233_v37 }
 0x290   : > { %2250 = vst [vmem:[%s3093_s16 + $0x60] sm:$0xff] %v2234_v38  ;;  %2251 = vst [vmem:[%s3093_s16 + $0x68] sm:$0xff] %v2235_v39 }
 0x291   : > { %2252 = vst [vmem:[%s3093_s16 + $0x70] sm:$0xff] %v2236_v42  ;;  %2253 = vst.msk [vmem:[%s3093_s16 + $0x78] sm:$0xff] %vm2093_vm0, %v2237_v44 }
 0x292 PF: > { %s13_s12 = sadd.s32 1, %s2612_s12  }
 0x293   : > { %p10_p4 = scmp.ge.s32.totalorder %s13_s12, 4  }
 0x295   :  { %12 = sbr.rel (!%p10_p4) target bundleno = 1 (0x1), region = 62 }

// kernel: decoder_forward.9
= control target key start
LH: loop header
LB: loop body
LE: loop exit
PB: predicated region body
PF: predicated region fallthrough
CT: control target
= control target key end

     0   :  { %s4974_s12 = smov 0   ;;  %s5561_s0 = inlined_call_operand.vmem [shape: bf16[2,256,3600], index: 0, kind: input, shape index: {}]   ;;  %s5562_s1 = inlined_call_operand.vmem [shape: bf16[3,256], index: 1, kind: input, shape index: {}]   ;;  %s5563_s2 = inlined_call_operand.vmem [shape: f32[3,1], index: 2, kind: input, shape index: {}]   ;;  %s5564_s3 = inlined_call_operand.vmem [shape: f32[2,3,3600], index: 3, kind: output, shape index: {}]  }
   0x1 LB: > { %s3747_s13 = sadd.s32 4294967295, %s4951_s12   ;;  %p3751_p0 = scmp.ge.s32.totalorder %s4951_s12, 1  ;;  %s4951_s12 = sphi %s4974_s12, %s13_s12  }
   0x2   : > { %p137_p1 = scmp.lt.s32.totalorder %s4951_s12, 3 }
   0x4   : > { %p138_p2 = pnand %p3751_p0, %p137_p1 }
   0x5   : > { %p161_p3 = scmp.lt.s32.totalorder (!%p138_p2), %s3747_s13, 1 }
   0x6   : > { %141 = sbr.rel (%p138_p2) target bundleno = 696 (0x2b8), region = 32 }
   0xb   : > { %v4985_v0 = vld.sshfl [vmem:[%s5562_s1] sm:$0x33 pattern:$0x76325410]  ;;  %s5566_s13 = smov (!%p161_p3, %s3747_s13), 1  ;;  %v4953_v7 = vmov 0  }
   0xc   : > { %v4989_v1 = vcombine.high %v4985_v0, %v4985_v0  ;;  %s4243_s16 = smul.u32 3712, %s5566_s13  ;;  %4254 = vset.pattern.permute.xlu0 %v4953_v7  ;;  %vm3690_vm0 = vcmask 124928  }
   0xd   : > { %s4244_s24 = smul.u32 116, %s5566_s13 }
   0xe   : > { %3038 = vmatprep.mubr.bf16.mxu0 %v4989_v1  ;;  %3079 = vmatprep.mubr.bf16.mxu1 %v4989_v1  ;;  %s4999_s19 = scalar_lea.vmem %s5561_s0, %s4243_s16 }
   0xf   : > { %v4255_v2 = vld [vmem:[%s4999_s19 + $0x65c] ss:$116 sps:$4 sm:$0xff]   ;;  %v4257_v3 = vld [vmem:[%s4999_s19 + $0x658] ss:$116 sps:$4 sm:$0xff]   ;;  %v4258_v4 = vld [vmem:[%s4999_s19 + $0x574] ss:$116 sps:$4 sm:$0xff]   ;;  %s5292_s27 = scalar_lea.vmem %s5564_s3, %s4244_s24 }
  0x10   : > { %3006 = vmatprep.subr.bf16.mxu0 %v4255_v2  ;;  %v4260_v5 = vld [vmem:[%s4999_s19 + $0x570] ss:$116 sps:$4 sm:$0xff]   ;;  %v4261_v6 = vld [vmem:[%s4999_s19 + $0x48c] ss:$116 sps:$4 sm:$0xff]   ;;  %v4263_v8 = vld [vmem:[%s4999_s19 + $0x488] ss:$116 sps:$4 sm:$0xff]  }
  0x11   : > { %3007 = vmatpush1.bf16.msra.mxu0 %v4257_v3  ;;  %v4264_v9 = vld [vmem:[%s4999_s19 + $0x3a4] ss:$116 sps:$4 sm:$0xff]   ;;  %v4278_v11 = vld [vmem:[%s4999_s19 + $0x660] ss:$116 sps:$4 sm:$0xff]   ;;  %v4267_v13 = vld [vmem:[%s4999_s19 + $0x2bc] ss:$116 sps:$4 sm:$0xff]  }
  0x12   : > { %3008 = vmatprep.subr.bf16.mxu0 %v4258_v4  ;;  %v4276_v10 = vld [vmem:[%s4999_s19 + $0x664] ss:$116 sps:$4 sm:$0xff]   ;;  %v4266_v12 = vld [vmem:[%s4999_s19 + $0x3a0] ss:$116 sps:$4 sm:$0xff]   ;;  %v4282_v14 = vld [vmem:[%s4999_s19 + $0x57c] ss:$116 sps:$4 sm:$0xff]  }
  0x13   : > { %3047 = vmatprep.subr.bf16.mxu1 %v4276_v10  ;;  %v4284_v15 = vld [vmem:[%s4999_s19 + $0x578] ss:$116 sps:$4 sm:$0xff]   ;;  %v4288_v17 = vld [vmem:[%s4999_s19 + $0x494] ss:$116 sps:$4 sm:$0xff]   ;;  %v4290_v19 = vld [vmem:[%s4999_s19 + $0x490] ss:$116 sps:$4 sm:$0xff]  }
  0x14   : > { %3048 = vmatpush1.bf16.msra.mxu1 %v4278_v11  ;;  %v4269_v16 = vld [vmem:[%s4999_s19 + $0x2b8] ss:$116 sps:$4 sm:$0xff]   ;;  %v4270_v18 = vld [vmem:[%s4999_s19 + $0x1d4] ss:$116 sps:$4 sm:$0xff]   ;;  %v4272_v21 = vld [vmem:[%s4999_s19 + $0x1d0] ss:$116 sps:$4 sm:$0xff]  }
  0x15   : > { %3009 = vmatpush1.bf16.msra.mxu0 %v4260_v5  ;;  %3049 = vmatprep.subr.bf16.mxu1 %v4282_v14  ;;  %v4294_v20 = vld [vmem:[%s4999_s19 + $0x3ac] ss:$116 sps:$4 sm:$0xff]   ;;  %v4296_v23 = vld [vmem:[%s4999_s19 + $0x3a8] ss:$116 sps:$4 sm:$0xff]   ;;  %v4300_v24 = vld [vmem:[%s4999_s19 + $0x2c4] ss:$116 sps:$4 sm:$0xff]  }
  0x16   : > { %3010 = vmatprep.subr.bf16.mxu0 %v4261_v6  ;;  %v4273_v22 = vld [vmem:[%s4999_s19 + $0xec] ss:$116 sps:$4 sm:$0xff]   ;;  %v4275_v25 = vld [vmem:[%s4999_s19 + $0xe8] ss:$116 sps:$4 sm:$0xff]   ;;  %v4279_v26 = vld [vmem:[%s4999_s19 + $0x4] ss:$116 sps:$4 sm:$0xff]  }
  0x17   : > { %v4302_v27 = vld [vmem:[%s4999_s19 + $0x2c0] ss:$116 sps:$4 sm:$0xff]   ;;  %v4306_v28 = vld [vmem:[%s4999_s19 + $0x1dc] ss:$116 sps:$4 sm:$0xff]   ;;  %v4308_v31 = vld [vmem:[%s4999_s19 + $0x1d8] ss:$116 sps:$4 sm:$0xff]  }
  0x18   : > { %3050 = vmatpush1.bf16.msra.mxu1 %v4284_v15  ;;  %v4281_v29 = vld [vmem:[%s4999_s19] ss:$116 sps:$4 sm:$0xff]   ;;  %v4285_v30 = vld [vmem:[%s4999_s19 + $0xd9c] ss:$116 sps:$4 sm:$0xff]   ;;  %v4287_v33 = vld [vmem:[%s4999_s19 + $0xd98] ss:$116 sps:$4 sm:$0xff]  }
  0x19   : > { %3011 = vmatpush1.bf16.msra.mxu0 %v4263_v8  ;;  %3051 = vmatprep.subr.bf16.mxu1 %v4288_v17  ;;  %v4312_v32 = vld [vmem:[%s4999_s19 + $0xf4] ss:$116 sps:$4 sm:$0xff]   ;;  %v4314_v35 = vld [vmem:[%s4999_s19 + $0xf0] ss:$116 sps:$4 sm:$0xff]   ;;  %v4318_v36 = vld [vmem:[%s4999_s19 + $0xc] ss:$116 sps:$4 sm:$0xff]  }
  0x1a   : > { %3012 = vmatprep.subr.bf16.mxu0 %v4264_v9  ;;  %v4291_v34 = vld [vmem:[%s4999_s19 + $0xcb4] ss:$116 sps:$4 sm:$0xff]   ;;  %v4293_v37 = vld [vmem:[%s4999_s19 + $0xcb0] ss:$116 sps:$4 sm:$0xff]   ;;  %v4297_v38 = vld [vmem:[%s4999_s19 + $0xbcc] ss:$116 sps:$4 sm:$0xff]  }
  0x1b   : > { %v4320_v39 = vld [vmem:[%s4999_s19 + $0x8] ss:$116 sps:$4 sm:$0xff]   ;;  %v4324_v40 = vld [vmem:[%s4999_s19 + $0xda4] ss:$116 sps:$4 sm:$0xff]   ;;  %v4326_v43 = vld [vmem:[%s4999_s19 + $0xda0] ss:$116 sps:$4 sm:$0xff]  }
  0x1c   : > { %3052 = vmatpush1.bf16.msra.mxu1 %v4290_v19  ;;  %v4299_v41 = vld [vmem:[%s4999_s19 + $0xbc8] ss:$116 sps:$4 sm:$0xff]   ;;  %v4303_v42 = vld [vmem:[%s4999_s19 + $0xae4] ss:$116 sps:$4 sm:$0xff]   ;;  %v4305_v45 = vld [vmem:[%s4999_s19 + $0xae0] ss:$116 sps:$4 sm:$0xff]  }
  0x1d   : > { %3013 = vmatpush1.bf16.msra.mxu0 %v4266_v12  ;;  %3053 = vmatprep.subr.bf16.mxu1 %v4294_v20  ;;  %v4330_v44 = vld [vmem:[%s4999_s19 + $0xcbc] ss:$116 sps:$4 sm:$0xff]   ;;  %v4332_v47 = vld [vmem:[%s4999_s19 + $0xcb8] ss:$116 sps:$4 sm:$0xff]   ;;  %v4336_v48 = vld [vmem:[%s4999_s19 + $0xbd4] ss:$116 sps:$4 sm:$0xff]  }
  0x1e   : > { %3014 = vmatprep.subr.bf16.mxu0 %v4267_v13  ;;  %v4309_v46 = vld [vmem:[%s4999_s19 + $0x9fc] ss:$116 sps:$4 sm:$0xff]   ;;  %v4311_v49 = vld [vmem:[%s4999_s19 + $0x9f8] ss:$116 sps:$4 sm:$0xff]   ;;  %v4315_v50 = vld [vmem:[%s4999_s19 + $0x914] ss:$116 sps:$4 sm:$0xff]  }
  0x1f   : > { %v4338_v51 = vld [vmem:[%s4999_s19 + $0xbd0] ss:$116 sps:$4 sm:$0xff]   ;;  %v4342_v52 = vld [vmem:[%s4999_s19 + $0xaec] ss:$116 sps:$4 sm:$0xff]   ;;  %v4344_v55 = vld [vmem:[%s4999_s19 + $0xae8] ss:$116 sps:$4 sm:$0xff]  }
  0x20   : > { %3054 = vmatpush1.bf16.msra.mxu1 %v4296_v23  ;;  %v4317_v53 = vld [vmem:[%s4999_s19 + $0x910] ss:$116 sps:$4 sm:$0xff]   ;;  %v4321_v54 = vld [vmem:[%s4999_s19 + $0x82c] ss:$116 sps:$4 sm:$0xff]   ;;  %v4323_v57 = vld [vmem:[%s4999_s19 + $0x828] ss:$116 sps:$4 sm:$0xff]  }
  0x21   : > { %3015 = vmatpush1.bf16.msra.mxu0 %v4269_v16  ;;  %3055 = vmatprep.subr.bf16.mxu1 %v4300_v24  ;;  %v4348_v56 = vld [vmem:[%s4999_s19 + $0xa04] ss:$116 sps:$4 sm:$0xff]   ;;  %v4350_v59 = vld [vmem:[%s4999_s19 + $0xa00] ss:$116 sps:$4 sm:$0xff]   ;;  %v4354_v60 = vld [vmem:[%s4999_s19 + $0x91c] ss:$116 sps:$4 sm:$0xff]  }
  0x22   : > { %3016 = vmatprep.subr.bf16.mxu0 %v4270_v18  ;;  %v4327_v58 = vld [vmem:[%s4999_s19 + $0x744] ss:$116 sps:$4 sm:$0xff]   ;;  %v4329_v61 = vld [vmem:[%s4999_s19 + $0x740] ss:$116 sps:$4 sm:$0xff]   ;;  %v4333_v3 = vld [vmem:[%s4999_s19 + $0x668] ss:$116 sps:$4 sm:$0xff]  }
  0x23   : > { %v4335_v62 = vld [vmem:[%s4999_s19 + $0x66c] ss:$116 sps:$4 sm:$0xff]   ;;  %v4360_v2 = vld [vmem:[%s4999_s19 + $0x834] ss:$116 sps:$4 sm:$0xff]   ;;  %v4341_v4 = vld [vmem:[%s4999_s19 + $0x584] ss:$116 sps:$4 sm:$0xff]  }
  0x24   : > { %3056 = vmatpush1.bf16.msra.mxu1 %v4302_v27  ;;  %v4356_v63 = vld [vmem:[%s4999_s19 + $0x918] ss:$116 sps:$4 sm:$0xff]   ;;  %v4362_v5 = vld [vmem:[%s4999_s19 + $0x830] ss:$116 sps:$4 sm:$0xff]   ;;  %v4339_v7 = vld [vmem:[%s4999_s19 + $0x580] ss:$116 sps:$4 sm:$0xff]  }
  0x25   : > { %3017 = vmatpush1.bf16.msra.mxu0 %v4272_v21  ;;  %3057 = vmatprep.subr.bf16.mxu1 %v4306_v28  ;;  %v4366_v6 = vld [vmem:[%s4999_s19 + $0x74c] ss:$116 sps:$4 sm:$0xff]   ;;  %v4347_v8 = vld [vmem:[%s4999_s19 + $0x49c] ss:$116 sps:$4 sm:$0xff]   ;;  %v4374_v10 = vld [vmem:[%s4999_s19 + $0x674] ss:$116 sps:$4 sm:$0xff]  }
  0x26   : > { %3018 = vmatprep.subr.bf16.mxu0 %v4273_v22  ;;  %v4368_v9 = vld [vmem:[%s4999_s19 + $0x748] ss:$116 sps:$4 sm:$0xff]   ;;  %v4345_v11 = vld [vmem:[%s4999_s19 + $0x498] ss:$116 sps:$4 sm:$0xff]   ;;  %v4372_v13 = vld [vmem:[%s4999_s19 + $0x670] ss:$116 sps:$4 sm:$0xff]  }
  0x27   : > { %v4353_v12 = vld [vmem:[%s4999_s19 + $0x3b4] ss:$116 sps:$4 sm:$0xff]   ;;  %v4380_v14 = vld [vmem:[%s4999_s19 + $0x58c] ss:$116 sps:$4 sm:$0xff]   ;;  %v4351_v15 = vld [vmem:[%s4999_s19 + $0x3b0] ss:$116 sps:$4 sm:$0xff]  }
  0x28   : > { %3058 = vmatpush1.bf16.msra.mxu1 %v4308_v31  ;;  %v4359_v16 = vld [vmem:[%s4999_s19 + $0x2cc] ss:$116 sps:$4 sm:$0xff]   ;;  %v4378_v17 = vld [vmem:[%s4999_s19 + $0x588] ss:$116 sps:$4 sm:$0xff]   ;;  %v4386_v18 = vld [vmem:[%s4999_s19 + $0x4a4] ss:$116 sps:$4 sm:$0xff]  }
  0x29   : > { %3019 = vmatpush1.bf16.msra.mxu0 %v4275_v25  ;;  %3059 = vmatprep.subr.bf16.mxu1 %v4312_v32  ;;  %v4357_v19 = vld [vmem:[%s4999_s19 + $0x2c8] ss:$116 sps:$4 sm:$0xff]   ;;  %v4365_v20 = vld [vmem:[%s4999_s19 + $0x1e4] ss:$116 sps:$4 sm:$0xff]   ;;  %v4384_v21 = vld [vmem:[%s4999_s19 + $0x4a0] ss:$116 sps:$4 sm:$0xff]  }
  0x2a   : > { %3020 = vmatprep.subr.bf16.mxu0 %v4279_v26  ;;  %v653_v22 = vld [vmem:[%s5563_s2] sm:$0x7]  ;;  %v4392_v23 = vld [vmem:[%s4999_s19 + $0x3bc] ss:$116 sps:$4 sm:$0xff]   ;;  %v4390_v26 = vld [vmem:[%s4999_s19 + $0x3b8] ss:$116 sps:$4 sm:$0xff]  }
  0x2b   : > { %656 = vperm.xlu0 %4254, %v653_v22   ;;  %v4363_v24 = vld [vmem:[%s4999_s19 + $0x1e0] ss:$116 sps:$4 sm:$0xff]   ;;  %v4371_v25 = vld [vmem:[%s4999_s19 + $0xfc] ss:$116 sps:$4 sm:$0xff]   ;;  %v4369_v28 = vld [vmem:[%s4999_s19 + $0xf8] ss:$116 sps:$4 sm:$0xff]  }
  0x2c   : > { %3060 = vmatpush1.bf16.msra.mxu1 %v4314_v35  ;;  %v4398_v27 = vld [vmem:[%s4999_s19 + $0x2d4] ss:$116 sps:$4 sm:$0xff]   ;;  %v4404_v31 = vld [vmem:[%s4999_s19 + $0x1ec] ss:$116 sps:$4 sm:$0xff]   ;;  %v4375_v32 = vld [vmem:[%s4999_s19 + $0x10] ss:$116 sps:$4 sm:$0xff]  }
  0x2d   : > { %3021 = vmatpush1.bf16.msra.mxu0 %v4281_v29  ;;  %3061 = vmatprep.subr.bf16.mxu1 %v4318_v36  ;;  %v4377_v29 = vld [vmem:[%s4999_s19 + $0x14] ss:$116 sps:$4 sm:$0xff]   ;;  %v4410_v35 = vld [vmem:[%s4999_s19 + $0x104] ss:$116 sps:$4 sm:$0xff]  }
  0x2e   : > { %3022 = vmatprep.subr.bf16.mxu0 %v4285_v30  ;;  %v4396_v30 = vld [vmem:[%s4999_s19 + $0x2d0] ss:$116 sps:$4 sm:$0xff]   ;;  %v4381_v36 = vld [vmem:[%s4999_s19 + $0xda8] ss:$116 sps:$4 sm:$0xff]   ;;  %v4453_v22 = vld [vmem:[%s4999_s19 + $0x2d8] ss:$116 sps:$4 sm:$0xff]  }
  0x30   : > { %3062 = vmatpush1.bf16.msra.mxu1 %v4320_v39  ;;  %v4416_v39 = vld [vmem:[%s4999_s19 + $0x1c] ss:$116 sps:$4 sm:$0xff]  }
  0x31   : > { %3023 = vmatpush2.bf16.msra.mxu0 %v4287_v33  ;;  %3063 = vmatprep.subr.bf16.mxu1 %v4324_v40  ;;  %v4383_v33 = vld [vmem:[%s4999_s19 + $0xdac] ss:$116 sps:$4 sm:$0xff]  }
  0x32   : > { %3024 = vmatprep.subr.bf16.mxu0 %v4291_v34  ;;  %v4402_v34 = vld [vmem:[%s4999_s19 + $0x1e8] ss:$116 sps:$4 sm:$0xff]   ;;  %v4387_v40 = vld [vmem:[%s4999_s19 + $0xcc0] ss:$116 sps:$4 sm:$0xff]  }
  0x34   : > { %3064 = vmatpush2.bf16.msra.mxu1 %v4326_v43  ;;  %v4422_v43 = vld [vmem:[%s4999_s19 + $0xdb4] ss:$116 sps:$4 sm:$0xff]  }
  0x35   : > { %3025 = vmatpush2.bf16.msra.mxu0 %v4293_v37  ;;  %3065 = vmatprep.subr.bf16.mxu1 %v4330_v44  ;;  %v4389_v37 = vld [vmem:[%s4999_s19 + $0xcc4] ss:$116 sps:$4 sm:$0xff]  }
  0x36   : > { %3026 = vmatprep.subr.bf16.mxu0 %v4297_v38  ;;  %v4408_v38 = vld [vmem:[%s4999_s19 + $0x100] ss:$116 sps:$4 sm:$0xff]   ;;  %v4393_v44 = vld [vmem:[%s4999_s19 + $0xbd8] ss:$116 sps:$4 sm:$0xff]  }
  0x38   : > { %3066 = vmatpush2.bf16.msra.mxu1 %v4332_v47  ;;  %v4428_v47 = vld [vmem:[%s4999_s19 + $0xccc] ss:$116 sps:$4 sm:$0xff]  }
  0x39   : > { %3027 = vmatpush2.bf16.msra.mxu0 %v4299_v41  ;;  %3067 = vmatprep.subr.bf16.mxu1 %v4336_v48  ;;  %v4395_v41 = vld [vmem:[%s4999_s19 + $0xbdc] ss:$116 sps:$4 sm:$0xff]  }
  0x3a   : > { %3028 = vmatprep.subr.bf16.mxu0 %v4303_v42  ;;  %v4414_v42 = vld [vmem:[%s4999_s19 + $0x18] ss:$116 sps:$4 sm:$0xff]   ;;  %v4399_v48 = vld [vmem:[%s4999_s19 + $0xaf0] ss:$116 sps:$4 sm:$0xff]  }
  0x3c   : > { %3068 = vmatpush2.bf16.msra.mxu1 %v4338_v51  ;;  %v4434_v51 = vld [vmem:[%s4999_s19 + $0xbe4] ss:$116 sps:$4 sm:$0xff]  }
  0x3d   : > { %3029 = vmatpush2.bf16.msra.mxu0 %v4305_v45  ;;  %3069 = vmatprep.subr.bf16.mxu1 %v4342_v52  ;;  %v4401_v45 = vld [vmem:[%s4999_s19 + $0xaf4] ss:$116 sps:$4 sm:$0xff]  }
  0x3e   : > { %3030 = vmatprep.subr.bf16.mxu0 %v4309_v46  ;;  %v4420_v46 = vld [vmem:[%s4999_s19 + $0xdb0] ss:$116 sps:$4 sm:$0xff]   ;;  %v4405_v52 = vld [vmem:[%s4999_s19 + $0xa08] ss:$116 sps:$4 sm:$0xff]  }
  0x40   : > { %3070 = vmatpush2.bf16.msra.mxu1 %v4344_v55  ;;  %v4440_v55 = vld [vmem:[%s4999_s19 + $0xafc] ss:$116 sps:$4 sm:$0xff]  }
  0x41   : > { %3031 = vmatpush2.bf16.msra.mxu0 %v4311_v49  ;;  %3071 = vmatprep.subr.bf16.mxu1 %v4348_v56  ;;  %v4407_v49 = vld [vmem:[%s4999_s19 + $0xa0c] ss:$116 sps:$4 sm:$0xff]  }
  0x42   : > { %3032 = vmatprep.subr.bf16.mxu0 %v4315_v50  ;;  %v4426_v50 = vld [vmem:[%s4999_s19 + $0xcc8] ss:$116 sps:$4 sm:$0xff]   ;;  %v4411_v56 = vld [vmem:[%s4999_s19 + $0x920] ss:$116 sps:$4 sm:$0xff]  }
  0x44   : > { %3072 = vmatpush2.bf16.msra.mxu1 %v4350_v59  ;;  %v4446_v59 = vld [vmem:[%s4999_s19 + $0xa14] ss:$116 sps:$4 sm:$0xff]  }
  0x45   : > { %3033 = vmatpush2.bf16.msra.mxu0 %v4317_v53  ;;  %3073 = vmatprep.subr.bf16.mxu1 %v4354_v60  ;;  %v4413_v53 = vld [vmem:[%s4999_s19 + $0x924] ss:$116 sps:$4 sm:$0xff]  }
  0x46   : > { %3034 = vmatprep.subr.bf16.mxu0 %v4321_v54  ;;  %v4432_v54 = vld [vmem:[%s4999_s19 + $0xbe0] ss:$116 sps:$4 sm:$0xff]   ;;  %v4417_v60 = vld [vmem:[%s4999_s19 + $0x838] ss:$116 sps:$4 sm:$0xff]  }
  0x48   : > { %3074 = vmatpush2.bf16.msra.mxu1 %v4356_v63  ;;  %v4452_v63 = vld [vmem:[%s4999_s19 + $0x92c] ss:$116 sps:$4 sm:$0xff]  }
  0x49   : > { %3035 = vmatpush2.bf16.msra.mxu0 %v4323_v57  ;;  %3075 = vmatprep.subr.bf16.mxu1 %v4360_v2  ;;  %v4419_v57 = vld [vmem:[%s4999_s19 + $0x83c] ss:$116 sps:$4 sm:$0xff]  }
  0x4a   : > { %3036 = vmatprep.subr.bf16.mxu0 %v4327_v58  ;;  %v4438_v58 = vld [vmem:[%s4999_s19 + $0xaf8] ss:$116 sps:$4 sm:$0xff]   ;;  %v4423_v2 = vld [vmem:[%s4999_s19 + $0x750] ss:$116 sps:$4 sm:$0xff]  }
  0x4c   : > { %3076 = vmatpush2.bf16.msra.mxu1 %v4362_v5  ;;  %v4458_v5 = vld [vmem:[%s4999_s19 + $0x844] ss:$116 sps:$4 sm:$0xff]  }
  0x4d   : > { %3037 = vmatpush2.bf16.msra.mxu0 %v4329_v61  ;;  %3077 = vmatprep.subr.bf16.mxu1 %v4366_v6  ;;  %v4425_v61 = vld [vmem:[%s4999_s19 + $0x754] ss:$116 sps:$4 sm:$0xff]   ;;  %v4429_v6 = vld [vmem:[%s4999_s19 + $0x678] ss:$116 sps:$4 sm:$0xff]  }
  0x4e   : > { %3088 = vmatprep.subr.bf16.mxu0 %v4335_v62  ;;  %v4444_v62 = vld [vmem:[%s4999_s19 + $0xa10] ss:$116 sps:$4 sm:$0xff]  }
  0x50   : > { %3039 = vmatmul.mubr.bf16.vlgmr.msra.gmra.mxu0 %v4985_v0  ;;  %3078 = vmatpush2.bf16.msra.mxu1 %v4368_v9  ;;  %v4464_v9 = vld [vmem:[%s4999_s19 + $0x75c] ss:$116 sps:$4 sm:$0xff]  }
  0x51   : > { %3089 = vmatpush1.bf16.msra.mxu0 %v4333_v3  ;;  %3120 = vmatprep.mubr.bf16.mxu0 %v4989_v1  ;;  %v4431_v3 = vld [vmem:[%s4999_s19 + $0x67c] ss:$116 sps:$4 sm:$0xff]  }
  0x52   : > { %3090 = vmatprep.subr.bf16.mxu0 %v4341_v4  ;;  %3129 = vmatprep.subr.bf16.mxu1 %v4374_v10  ;;  %v4450_v4 = vld [vmem:[%s4999_s19 + $0x928] ss:$116 sps:$4 sm:$0xff]   ;;  %v4435_v10 = vld [vmem:[%s4999_s19 + $0x590] ss:$116 sps:$4 sm:$0xff]  }
  0x53   : > { %3080 = vmatmul.mubr.bf16.vlgmr.msra.gmra.mxu1 %v4985_v0 }
  0x54   : > { %3130 = vmatpush1.bf16.msra.mxu1 %v4372_v13  ;;  %3161 = vmatprep.mubr.bf16.mxu1 %v4989_v1  ;;  %v4470_v13 = vld [vmem:[%s4999_s19 + $0x684] ss:$116 sps:$4 sm:$0xff]  }
  0x55   : > { %3091 = vmatpush1.bf16.msra.mxu0 %v4339_v7  ;;  %3131 = vmatprep.subr.bf16.mxu1 %v4380_v14  ;;  %v4437_v7 = vld [vmem:[%s4999_s19 + $0x594] ss:$116 sps:$4 sm:$0xff]  }
  0x56   : > { %3092 = vmatprep.subr.bf16.mxu0 %v4347_v8  ;;  %v4456_v8 = vld [vmem:[%s4999_s19 + $0x840] ss:$116 sps:$4 sm:$0xff]   ;;  %v4441_v14 = vld [vmem:[%s4999_s19 + $0x4a8] ss:$116 sps:$4 sm:$0xff]  }
  0x58   : > { %3132 = vmatpush1.bf16.msra.mxu1 %v4378_v17  ;;  %v4476_v17 = vld [vmem:[%s4999_s19 + $0x59c] ss:$116 sps:$4 sm:$0xff]  }
  0x59   : > { %3093 = vmatpush1.bf16.msra.mxu0 %v4345_v11  ;;  %3133 = vmatprep.subr.bf16.mxu1 %v4386_v18  ;;  %v4443_v11 = vld [vmem:[%s4999_s19 + $0x4ac] ss:$116 sps:$4 sm:$0xff]  }
  0x5a   : > { %3094 = vmatprep.subr.bf16.mxu0 %v4353_v12  ;;  %v4462_v12 = vld [vmem:[%s4999_s19 + $0x758] ss:$116 sps:$4 sm:$0xff]   ;;  %v4447_v18 = vld [vmem:[%s4999_s19 + $0x3c0] ss:$116 sps:$4 sm:$0xff]  }
  0x5c   : > { %3134 = vmatpush1.bf16.msra.mxu1 %v4384_v21  ;;  %v4482_v21 = vld [vmem:[%s4999_s19 + $0x4b4] ss:$116 sps:$4 sm:$0xff]  }
  0x5d   : > { %3095 = vmatpush1.bf16.msra.mxu0 %v4351_v15  ;;  %3135 = vmatprep.subr.bf16.mxu1 %v4392_v23  ;;  %v4449_v15 = vld [vmem:[%s4999_s19 + $0x3c4] ss:$116 sps:$4 sm:$0xff]   ;;  %v4461_v23 = vld [vmem:[%s4999_s19 + $0x1f4] ss:$116 sps:$4 sm:$0xff]  }
  0x5e   : > { %3096 = vmatprep.subr.bf16.mxu0 %v4359_v16  ;;  %v4468_v16 = vld [vmem:[%s4999_s19 + $0x680] ss:$116 sps:$4 sm:$0xff]  }
  0x60   : > { %3136 = vmatpush1.bf16.msra.mxu1 %v4390_v26  ;;  %v4467_v26 = vld [vmem:[%s4999_s19 + $0x10c] ss:$116 sps:$4 sm:$0xff]  }
  0x61   : > { %3097 = vmatpush1.bf16.msra.mxu0 %v4357_v19  ;;  %3137 = vmatprep.subr.bf16.mxu1 %v4398_v27  ;;  %v4455_v19 = vld [vmem:[%s4999_s19 + $0x2dc] ss:$116 sps:$4 sm:$0xff]  }
  0x62   : > { %3098 = vmatprep.subr.bf16.mxu0 %v4365_v20  ;;  %v4474_v20 = vld [vmem:[%s4999_s19 + $0x598] ss:$116 sps:$4 sm:$0xff]   ;;  %v4486_v27 = vld [vmem:[%s4999_s19 + $0x3c8] ss:$116 sps:$4 sm:$0xff]  }
  0x64   : > { %3138 = vmatpush1.bf16.msra.mxu1 %v4396_v30  ;;  %v4473_v30 = vld [vmem:[%s4999_s19 + $0x24] ss:$116 sps:$4 sm:$0xff]  }
  0x65   : > { %3099 = vmatpush1.bf16.msra.mxu0 %v4363_v24  ;;  %3139 = vmatprep.subr.bf16.mxu1 %v4404_v31  ;;  %v4480_v24 = vld [vmem:[%s4999_s19 + $0x4b0] ss:$116 sps:$4 sm:$0xff]   ;;  %v4492_v31 = vld [vmem:[%s4999_s19 + $0x2e0] ss:$116 sps:$4 sm:$0xff]  }
  0x66   : > { %3100 = vmatprep.subr.bf16.mxu0 %v4371_v25  ;;  %v4459_v25 = vld [vmem:[%s4999_s19 + $0x1f0] ss:$116 sps:$4 sm:$0xff]  }
  0x68   : > { %3140 = vmatpush1.bf16.msra.mxu1 %v4402_v34  ;;  %v4479_v34 = vld [vmem:[%s4999_s19 + $0xdbc] ss:$116 sps:$4 sm:$0xff]  }
  0x69   : > { %3101 = vmatpush1.bf16.msra.mxu0 %v4369_v28  ;;  %3141 = vmatprep.subr.bf16.mxu1 %v4410_v35  ;;  %v4494_v28 = vld [vmem:[%s4999_s19 + $0x2e4] ss:$116 sps:$4 sm:$0xff]  }
  0x6a   : > { %3102 = vmatprep.subr.bf16.mxu0 %v4377_v29  ;;  %v4465_v29 = vld [vmem:[%s4999_s19 + $0x108] ss:$116 sps:$4 sm:$0xff]   ;;  %v4498_v35 = vld [vmem:[%s4999_s19 + $0x1f8] ss:$116 sps:$4 sm:$0xff]  }
  0x6c   : > { %3142 = vmatpush1.bf16.msra.mxu1 %v4408_v38  ;;  %v4485_v38 = vld [vmem:[%s4999_s19 + $0xcd4] ss:$116 sps:$4 sm:$0xff]  }
  0x6d   : > { %3103 = vmatpush1.bf16.msra.mxu0 %v4375_v32  ;;  %3143 = vmatprep.subr.bf16.mxu1 %v4416_v39  ;;  %v4500_v32 = vld [vmem:[%s4999_s19 + $0x1fc] ss:$116 sps:$4 sm:$0xff]  }
  0x6e   : > { %3104 = vmatprep.subr.bf16.mxu0 %v4383_v33  ;;  %v4471_v33 = vld [vmem:[%s4999_s19 + $0x20] ss:$116 sps:$4 sm:$0xff]   ;;  %v4504_v39 = vld [vmem:[%s4999_s19 + $0x110] ss:$116 sps:$4 sm:$0xff]  }
  0x70   : > { %3144 = vmatpush1.bf16.msra.mxu1 %v4414_v42  ;;  %v4491_v42 = vld [vmem:[%s4999_s19 + $0xbec] ss:$116 sps:$4 sm:$0xff]  }
  0x71   : > { %3105 = vmatpush2.bf16.msra.mxu0 %v4381_v36  ;;  %3145 = vmatprep.subr.bf16.mxu1 %v4422_v43  ;;  %v4506_v36 = vld [vmem:[%s4999_s19 + $0x114] ss:$116 sps:$4 sm:$0xff]  }
  0x72   : > { %3106 = vmatprep.subr.bf16.mxu0 %v4389_v37  ;;  %v4477_v37 = vld [vmem:[%s4999_s19 + $0xdb8] ss:$116 sps:$4 sm:$0xff]   ;;  %v4510_v43 = vld [vmem:[%s4999_s19 + $0x28] ss:$116 sps:$4 sm:$0xff]  }
  0x74   : > { %3146 = vmatpush2.bf16.msra.mxu1 %v4420_v46  ;;  %v4497_v46 = vld [vmem:[%s4999_s19 + $0xb04] ss:$116 sps:$4 sm:$0xff]  }
  0x75   : > { %3107 = vmatpush2.bf16.msra.mxu0 %v4387_v40  ;;  %3147 = vmatprep.subr.bf16.mxu1 %v4428_v47  ;;  %v4512_v40 = vld [vmem:[%s4999_s19 + $0x2c] ss:$116 sps:$4 sm:$0xff]  }
  0x76   : > { %3108 = vmatprep.subr.bf16.mxu0 %v4395_v41  ;;  %v4483_v41 = vld [vmem:[%s4999_s19 + $0xcd0] ss:$116 sps:$4 sm:$0xff]   ;;  %v4516_v47 = vld [vmem:[%s4999_s19 + $0xdc0] ss:$116 sps:$4 sm:$0xff]  }
  0x78   : > { %3148 = vmatpush2.bf16.msra.mxu1 %v4426_v50  ;;  %v4503_v50 = vld [vmem:[%s4999_s19 + $0xa1c] ss:$116 sps:$4 sm:$0xff]  }
  0x79   : > { %3109 = vmatpush2.bf16.msra.mxu0 %v4393_v44  ;;  %3149 = vmatprep.subr.bf16.mxu1 %v4434_v51  ;;  %v4518_v44 = vld [vmem:[%s4999_s19 + $0xdc4] ss:$116 sps:$4 sm:$0xff]  }
  0x7a   : > { %3110 = vmatprep.subr.bf16.mxu0 %v4401_v45  ;;  %v4489_v45 = vld [vmem:[%s4999_s19 + $0xbe8] ss:$116 sps:$4 sm:$0xff]   ;;  %v4522_v51 = vld [vmem:[%s4999_s19 + $0xcd8] ss:$116 sps:$4 sm:$0xff]  }
  0x7c   : > { %3150 = vmatpush2.bf16.msra.mxu1 %v4432_v54  ;;  %v4509_v54 = vld [vmem:[%s4999_s19 + $0x934] ss:$116 sps:$4 sm:$0xff]  }
  0x7d   : > { %3111 = vmatpush2.bf16.msra.mxu0 %v4399_v48  ;;  %3151 = vmatprep.subr.bf16.mxu1 %v4440_v55  ;;  %v4524_v48 = vld [vmem:[%s4999_s19 + $0xcdc] ss:$116 sps:$4 sm:$0xff]  }
  0x7e   : > { %3112 = vmatprep.subr.bf16.mxu0 %v4407_v49  ;;  %v4495_v49 = vld [vmem:[%s4999_s19 + $0xb00] ss:$116 sps:$4 sm:$0xff]   ;;  %v4528_v55 = vld [vmem:[%s4999_s19 + $0xbf0] ss:$116 sps:$4 sm:$0xff]  }
  0x80   : > { %3152 = vmatpush2.bf16.msra.mxu1 %v4438_v58  ;;  %v4515_v58 = vld [vmem:[%s4999_s19 + $0x84c] ss:$116 sps:$4 sm:$0xff]  }
  0x81   : > { %3113 = vmatpush2.bf16.msra.mxu0 %v4405_v52  ;;  %3153 = vmatprep.subr.bf16.mxu1 %v4446_v59  ;;  %v4530_v52 = vld [vmem:[%s4999_s19 + $0xbf4] ss:$116 sps:$4 sm:$0xff]  }
  0x82   : > { %3114 = vmatprep.subr.bf16.mxu0 %v4413_v53  ;;  %v4501_v53 = vld [vmem:[%s4999_s19 + $0xa18] ss:$116 sps:$4 sm:$0xff]   ;;  %v4534_v59 = vld [vmem:[%s4999_s19 + $0xb08] ss:$116 sps:$4 sm:$0xff]  }
  0x84   : > { %3154 = vmatpush2.bf16.msra.mxu1 %v4444_v62  ;;  %v4521_v62 = vld [vmem:[%s4999_s19 + $0x764] ss:$116 sps:$4 sm:$0xff]  }
  0x85   : > { %3115 = vmatpush2.bf16.msra.mxu0 %v4411_v56  ;;  %3155 = vmatprep.subr.bf16.mxu1 %v4452_v63  ;;  %v4536_v56 = vld [vmem:[%s4999_s19 + $0xb0c] ss:$116 sps:$4 sm:$0xff]  }
  0x86   : > { %3116 = vmatprep.subr.bf16.mxu0 %v4419_v57  ;;  %v4507_v57 = vld [vmem:[%s4999_s19 + $0x930] ss:$116 sps:$4 sm:$0xff]   ;;  %v4540_v63 = vld [vmem:[%s4999_s19 + $0xa20] ss:$116 sps:$4 sm:$0xff]  }
  0x88   : > { %3156 = vmatpush2.bf16.msra.mxu1 %v4450_v4  ;;  %v4527_v4 = vld [vmem:[%s4999_s19 + $0x68c] ss:$116 sps:$4 sm:$0xff]  }
  0x89   : > { %3117 = vmatpush2.bf16.msra.mxu0 %v4417_v60  ;;  %3157 = vmatprep.subr.bf16.mxu1 %v4458_v5  ;;  %v4542_v60 = vld [vmem:[%s4999_s19 + $0xa24] ss:$116 sps:$4 sm:$0xff]  }
  0x8a   : > { %3118 = vmatprep.subr.bf16.mxu0 %v4425_v61  ;;  %v4513_v61 = vld [vmem:[%s4999_s19 + $0x848] ss:$116 sps:$4 sm:$0xff]   ;;  %v4546_v5 = vld [vmem:[%s4999_s19 + $0x938] ss:$116 sps:$4 sm:$0xff]  }
  0x8c   : > { %3158 = vmatpush2.bf16.msra.mxu1 %v4456_v8  ;;  %v4533_v8 = vld [vmem:[%s4999_s19 + $0x5a4] ss:$116 sps:$4 sm:$0xff]  }
  0x8d   : > { %3119 = vmatpush2.bf16.msra.mxu0 %v4423_v2  ;;  %3159 = vmatprep.subr.bf16.mxu1 %v4464_v9  ;;  %v4548_v2 = vld [vmem:[%s4999_s19 + $0x93c] ss:$116 sps:$4 sm:$0xff]  }
  0x8e   : > { %3170 = vmatprep.subr.bf16.mxu0 %v4431_v3  ;;  %v4519_v3 = vld [vmem:[%s4999_s19 + $0x760] ss:$116 sps:$4 sm:$0xff]   ;;  %v4552_v9 = vld [vmem:[%s4999_s19 + $0x850] ss:$116 sps:$4 sm:$0xff]  }
  0x90   : > { %3121 = vmatmul.mubr.bf16.vlgmr.msra.gmra.mxu0 %v4985_v0  ;;  %3160 = vmatpush2.bf16.msra.mxu1 %v4462_v12  ;;  %v4531_v12 = vld [vmem:[%s4999_s19 + $0x5a0] ss:$116 sps:$4 sm:$0xff]  }
  0x91   : > { %3171 = vmatpush1.bf16.msra.mxu0 %v4429_v6  ;;  %3202 = vmatprep.mubr.bf16.mxu0 %v4989_v1  ;;  %v4554_v6 = vld [vmem:[%s4999_s19 + $0x854] ss:$116 sps:$4 sm:$0xff]  }
  0x92   : > { %3172 = vmatprep.subr.bf16.mxu0 %v4437_v7  ;;  %3211 = vmatprep.subr.bf16.mxu1 %v4470_v13  ;;  %v4525_v7 = vld [vmem:[%s4999_s19 + $0x688] ss:$116 sps:$4 sm:$0xff]  }
  0x93   : > { %3162 = vmatmul.mubr.bf16.vlgmr.msra.gmra.mxu1 %v4985_v0  ;;  %v4488_v0 = vld [vmem:[%s4999_s19 + $0x3cc] ss:$116 sps:$4 sm:$0xff]   ;;  %v4539_v13 = vld [vmem:[%s4999_s19 + $0x4bc] ss:$116 sps:$4 sm:$0xff]  }
  0x94   : > { %3212 = vmatpush1.bf16.msra.mxu1 %v4468_v16  ;;  %3243 = vmatprep.mubr.bf16.mxu1 %v4989_v1  ;;  %v4537_v16 = vld [vmem:[%s4999_s19 + $0x4b8] ss:$116 sps:$4 sm:$0xff]  }
  0x95   : > { %3173 = vmatpush1.bf16.msra.mxu0 %v4435_v10  ;;  %3213 = vmatprep.subr.bf16.mxu1 %v4476_v17  ;;  %v5208_v10 = vld.sshfl [vmem:[%s5562_s1] sm:$0x33 pattern:$0x76325410]  ;;  %v4545_v17 = vld [vmem:[%s4999_s19 + $0x3d4] ss:$116 sps:$4 sm:$0xff]  }
  0x96   : > { %3174 = vmatprep.subr.bf16.mxu0 %v4443_v11  ;;  %v4560_v11 = vld [vmem:[%s4999_s19 + $0x76c] ss:$116 sps:$4 sm:$0xff]  }
  0x98   : > { %3214 = vmatpush1.bf16.msra.mxu1 %v4474_v20  ;;  %v4543_v20 = vld [vmem:[%s4999_s19 + $0x3d0] ss:$116 sps:$4 sm:$0xff]  }
  0x99   : > { %3175 = vmatpush1.bf16.msra.mxu0 %v4441_v14  ;;  %3215 = vmatprep.subr.bf16.mxu1 %v4482_v21  ;;  %v4558_v14 = vld [vmem:[%s4999_s19 + $0x768] ss:$116 sps:$4 sm:$0xff]   ;;  %v4551_v21 = vld [vmem:[%s4999_s19 + $0x2ec] ss:$116 sps:$4 sm:$0xff]  }
  0x9a   : > { %3176 = vmatprep.subr.bf16.mxu0 %v4449_v15  ;;  %v4566_v15 = vld [vmem:[%s4999_s19 + $0x694] ss:$116 sps:$4 sm:$0xff]  }
  0x9c   : > { %3216 = vmatpush1.bf16.msra.mxu1 %v4480_v24  ;;  %v4549_v24 = vld [vmem:[%s4999_s19 + $0x2e8] ss:$116 sps:$4 sm:$0xff]  }
  0x9d   : > { %3177 = vmatpush1.bf16.msra.mxu0 %v4447_v18  ;;  %3217 = vmatprep.subr.bf16.mxu1 %v4488_v0  ;;  %v4564_v18 = vld [vmem:[%s4999_s19 + $0x690] ss:$116 sps:$4 sm:$0xff]  }
  0x9e   : > { %3178 = vmatprep.subr.bf16.mxu0 %v4455_v19  ;;  %v4572_v19 = vld [vmem:[%s4999_s19 + $0x5ac] ss:$116 sps:$4 sm:$0xff]   ;;  %v4557_v0 = vld [vmem:[%s4999_s19 + $0x204] ss:$116 sps:$4 sm:$0xff]  }
  0xa0   : > { %3218 = vmatpush1.bf16.msra.mxu1 %v4486_v27  ;;  %v4555_v27 = vld [vmem:[%s4999_s19 + $0x200] ss:$116 sps:$4 sm:$0xff]  }
  0xa1   : > { %3179 = vmatpush1.bf16.msra.mxu0 %v4453_v22  ;;  %3219 = vmatprep.subr.bf16.mxu1 %v4494_v28  ;;  %v4570_v22 = vld [vmem:[%s4999_s19 + $0x5a8] ss:$116 sps:$4 sm:$0xff]  }
  0xa2   : > { %3180 = vmatprep.subr.bf16.mxu0 %v4461_v23  ;;  %v4578_v23 = vld [vmem:[%s4999_s19 + $0x4c4] ss:$116 sps:$4 sm:$0xff]   ;;  %v4563_v28 = vld [vmem:[%s4999_s19 + $0x11c] ss:$116 sps:$4 sm:$0xff]  }
  0xa4   : > { %3220 = vmatpush1.bf16.msra.mxu1 %v4492_v31  ;;  %v4561_v31 = vld [vmem:[%s4999_s19 + $0x118] ss:$116 sps:$4 sm:$0xff]  }
  0xa5   : > { %3181 = vmatpush1.bf16.msra.mxu0 %v4459_v25  ;;  %3221 = vmatprep.subr.bf16.mxu1 %v4500_v32  ;;  %v4576_v25 = vld [vmem:[%s4999_s19 + $0x4c0] ss:$116 sps:$4 sm:$0xff]  }
  0xa6   : > { %3182 = vmatprep.subr.bf16.mxu0 %v4467_v26  ;;  %v4584_v26 = vld [vmem:[%s4999_s19 + $0x3dc] ss:$116 sps:$4 sm:$0xff]   ;;  %v4569_v32 = vld [vmem:[%s4999_s19 + $0x34] ss:$116 sps:$4 sm:$0xff]  }
  0xa8   : > { %3222 = vmatpush1.bf16.msra.mxu1 %v4498_v35  ;;  %v4567_v35 = vld [vmem:[%s4999_s19 + $0x30] ss:$116 sps:$4 sm:$0xff]  }
  0xa9   : > { %3183 = vmatpush1.bf16.msra.mxu0 %v4465_v29  ;;  %3223 = vmatprep.subr.bf16.mxu1 %v4506_v36  ;;  %v4582_v29 = vld [vmem:[%s4999_s19 + $0x3d8] ss:$116 sps:$4 sm:$0xff]  }
  0xaa   : > { %3184 = vmatprep.subr.bf16.mxu0 %v4473_v30  ;;  %v4590_v30 = vld [vmem:[%s4999_s19 + $0x2f4] ss:$116 sps:$4 sm:$0xff]   ;;  %v4575_v36 = vld [vmem:[%s4999_s19 + $0xdcc] ss:$116 sps:$4 sm:$0xff]  }
  0xac   : > { %3224 = vmatpush1.bf16.msra.mxu1 %v4504_v39  ;;  %v4573_v39 = vld [vmem:[%s4999_s19 + $0xdc8] ss:$116 sps:$4 sm:$0xff]  }
  0xad   : > { %3185 = vmatpush1.bf16.msra.mxu0 %v4471_v33  ;;  %3225 = vmatprep.subr.bf16.mxu1 %v4512_v40  ;;  %v4588_v33 = vld [vmem:[%s4999_s19 + $0x2f0] ss:$116 sps:$4 sm:$0xff]  }
  0xae   : > { %3186 = vmatprep.subr.bf16.mxu0 %v4479_v34  ;;  %v4596_v34 = vld [vmem:[%s4999_s19 + $0x20c] ss:$116 sps:$4 sm:$0xff]   ;;  %v4581_v40 = vld [vmem:[%s4999_s19 + $0xce4] ss:$116 sps:$4 sm:$0xff]  }
  0xb0   : > { %3226 = vmatpush1.bf16.msra.mxu1 %v4510_v43  ;;  %v4579_v43 = vld [vmem:[%s4999_s19 + $0xce0] ss:$116 sps:$4 sm:$0xff]  }
  0xb1   : > { %3187 = vmatpush2.bf16.msra.mxu0 %v4477_v37  ;;  %3227 = vmatprep.subr.bf16.mxu1 %v4518_v44  ;;  %v4594_v37 = vld [vmem:[%s4999_s19 + $0x208] ss:$116 sps:$4 sm:$0xff]  }
  0xb2   : > { %3188 = vmatprep.subr.bf16.mxu0 %v4485_v38  ;;  %v4602_v38 = vld [vmem:[%s4999_s19 + $0x124] ss:$116 sps:$4 sm:$0xff]   ;;  %v4587_v44 = vld [vmem:[%s4999_s19 + $0xbfc] ss:$116 sps:$4 sm:$0xff]  }
  0xb4   : > { %3228 = vmatpush2.bf16.msra.mxu1 %v4516_v47  ;;  %v4585_v47 = vld [vmem:[%s4999_s19 + $0xbf8] ss:$116 sps:$4 sm:$0xff]  }
  0xb5   : > { %3189 = vmatpush2.bf16.msra.mxu0 %v4483_v41  ;;  %3229 = vmatprep.subr.bf16.mxu1 %v4524_v48  ;;  %v4600_v41 = vld [vmem:[%s4999_s19 + $0x120] ss:$116 sps:$4 sm:$0xff]  }
  0xb6   : > { %3190 = vmatprep.subr.bf16.mxu0 %v4491_v42  ;;  %v4608_v42 = vld [vmem:[%s4999_s19 + $0x3c] ss:$116 sps:$4 sm:$0xff]   ;;  %v4593_v48 = vld [vmem:[%s4999_s19 + $0xb14] ss:$116 sps:$4 sm:$0xff]  }
  0xb8   : > { %3230 = vmatpush2.bf16.msra.mxu1 %v4522_v51  ;;  %v4591_v51 = vld [vmem:[%s4999_s19 + $0xb10] ss:$116 sps:$4 sm:$0xff]  }
  0xb9   : > { %3191 = vmatpush2.bf16.msra.mxu0 %v4489_v45  ;;  %3231 = vmatprep.subr.bf16.mxu1 %v4530_v52  ;;  %v4606_v45 = vld [vmem:[%s4999_s19 + $0x38] ss:$116 sps:$4 sm:$0xff]  }
  0xba   : > { %3192 = vmatprep.subr.bf16.mxu0 %v4497_v46  ;;  %v4614_v46 = vld [vmem:[%s4999_s19 + $0xdd4] ss:$116 sps:$4 sm:$0xff]   ;;  %v4599_v52 = vld [vmem:[%s4999_s19 + $0xa2c] ss:$116 sps:$4 sm:$0xff]  }
  0xbc   : > { %3232 = vmatpush2.bf16.msra.mxu1 %v4528_v55  ;;  %v4597_v55 = vld [vmem:[%s4999_s19 + $0xa28] ss:$116 sps:$4 sm:$0xff]  }
  0xbd   : > { %3193 = vmatpush2.bf16.msra.mxu0 %v4495_v49  ;;  %3233 = vmatprep.subr.bf16.mxu1 %v4536_v56  ;;  %v4612_v49 = vld [vmem:[%s4999_s19 + $0xdd0] ss:$116 sps:$4 sm:$0xff]  }
  0xbe   : > { %3194 = vmatprep.subr.bf16.mxu0 %v4503_v50  ;;  %v4620_v50 = vld [vmem:[%s4999_s19 + $0xcec] ss:$116 sps:$4 sm:$0xff]   ;;  %v4605_v56 = vld [vmem:[%s4999_s19 + $0x944] ss:$116 sps:$4 sm:$0xff]  }
  0xc0   : > { %3234 = vmatpush2.bf16.msra.mxu1 %v4534_v59  ;;  %v4603_v59 = vld [vmem:[%s4999_s19 + $0x940] ss:$116 sps:$4 sm:$0xff]  }
  0xc1   : > { %3195 = vmatpush2.bf16.msra.mxu0 %v4501_v53  ;;  %3235 = vmatprep.subr.bf16.mxu1 %v4542_v60  ;;  %v4618_v53 = vld [vmem:[%s4999_s19 + $0xce8] ss:$116 sps:$4 sm:$0xff]  }
  0xc2   : > { %3196 = vmatprep.subr.bf16.mxu0 %v4509_v54  ;;  %v4626_v54 = vld [vmem:[%s4999_s19 + $0xc04] ss:$116 sps:$4 sm:$0xff]   ;;  %v4611_v60 = vld [vmem:[%s4999_s19 + $0x85c] ss:$116 sps:$4 sm:$0xff]  }
  0xc4   : > { %3236 = vmatpush2.bf16.msra.mxu1 %v4540_v63  ;;  %v4609_v63 = vld [vmem:[%s4999_s19 + $0x858] ss:$116 sps:$4 sm:$0xff]  }
  0xc5   : > { %3197 = vmatpush2.bf16.msra.mxu0 %v4507_v57  ;;  %3237 = vmatprep.subr.bf16.mxu1 %v4548_v2  ;;  %v4624_v57 = vld [vmem:[%s4999_s19 + $0xc00] ss:$116 sps:$4 sm:$0xff]  }
  0xc6   : > { %3198 = vmatprep.subr.bf16.mxu0 %v4515_v58  ;;  %v4632_v58 = vld [vmem:[%s4999_s19 + $0xb1c] ss:$116 sps:$4 sm:$0xff]   ;;  %v4617_v2 = vld [vmem:[%s4999_s19 + $0x774] ss:$116 sps:$4 sm:$0xff]  }
  0xc8   : > { %3238 = vmatpush2.bf16.msra.mxu1 %v4546_v5  ;;  %v4615_v5 = vld [vmem:[%s4999_s19 + $0x770] ss:$116 sps:$4 sm:$0xff]  }
  0xc9   : > { %3199 = vmatpush2.bf16.msra.mxu0 %v4513_v61  ;;  %3239 = vmatprep.subr.bf16.mxu1 %v4554_v6  ;;  %v4630_v61 = vld [vmem:[%s4999_s19 + $0xb18] ss:$116 sps:$4 sm:$0xff]   ;;  %v4623_v6 = vld [vmem:[%s4999_s19 + $0x69c] ss:$116 sps:$4 sm:$0xff]  }
  0xca   : > { %3200 = vmatprep.subr.bf16.mxu0 %v4521_v62  ;;  %v4638_v62 = vld [vmem:[%s4999_s19 + $0xa34] ss:$116 sps:$4 sm:$0xff]  }
  0xcc   : > { %3240 = vmatpush2.bf16.msra.mxu1 %v4552_v9  ;;  %v4621_v9 = vld [vmem:[%s4999_s19 + $0x698] ss:$116 sps:$4 sm:$0xff]  }
  0xcd   : > { %3201 = vmatpush2.bf16.msra.mxu0 %v4519_v3  ;;  %3241 = vmatprep.subr.bf16.mxu1 %v4560_v11  ;;  %v4636_v3 = vld [vmem:[%s4999_s19 + $0xa30] ss:$116 sps:$4 sm:$0xff]   ;;  %v5276_v11 = vpop.permute.xlu0 %656 }
  0xce   : > { %3252 = vmatprep.subr.bf16.mxu0 %v4527_v4  ;;  %v4644_v4 = vld [vmem:[%s4999_s19 + $0x94c] ss:$116 sps:$4 sm:$0xff]  }
  0xd0   : > { %3203 = vmatmul.mubr.bf16.vlgmr.msra.gmra.mxu0 %v5208_v10  ;;  %3242 = vmatpush2.bf16.msra.mxu1 %v4558_v14 }
  0xd1   : > { %3253 = vmatpush1.bf16.msra.mxu0 %v4525_v7  ;;  %3284 = vmatprep.mubr.bf16.mxu0 %v4989_v1  ;;  %v4642_v7 = vld [vmem:[%s4999_s19 + $0x948] ss:$116 sps:$4 sm:$0xff]  }
  0xd2   : > { %3254 = vmatprep.subr.bf16.mxu0 %v4533_v8  ;;  %3293 = vmatprep.subr.bf16.mxu1 %v4566_v15  ;;  %v4650_v8 = vld [vmem:[%s4999_s19 + $0x864] ss:$116 sps:$4 sm:$0xff]   ;;  %v4656_v15 = vld [vmem:[%s4999_s19 + $0x77c] ss:$116 sps:$4 sm:$0xff]  }
  0xd3   : > { %3244 = vmatmul.mubr.bf16.vlgmr.msra.gmra.mxu1 %v5208_v10 }
  0xd4   : > { %3294 = vmatpush1.bf16.msra.mxu1 %v4564_v18  ;;  %3325 = vmatprep.mubr.bf16.mxu1 %v4989_v1 }
  0xd5   : > { %3255 = vmatpush1.bf16.msra.mxu0 %v4531_v12  ;;  %3295 = vmatprep.subr.bf16.mxu1 %v4572_v19  ;;  %v4629_v12 = vld [vmem:[%s4999_s19 + $0x5b4] ss:$116 sps:$4 sm:$0xff]   ;;  %v4635_v19 = vld [vmem:[%s4999_s19 + $0x4cc] ss:$116 sps:$4 sm:$0xff]  }
  0xd6   : > { %3256 = vmatprep.subr.bf16.mxu0 %v4539_v13  ;;  %v4648_v13 = vld [vmem:[%s4999_s19 + $0x860] ss:$116 sps:$4 sm:$0xff]  }
  0xd8   : > { %3296 = vmatpush1.bf16.msra.mxu1 %v4570_v22 }
  0xd9   : > { %3257 = vmatpush1.bf16.msra.mxu0 %v4537_v16  ;;  %3297 = vmatprep.subr.bf16.mxu1 %v4578_v23  ;;  %v4662_v23 = vld [vmem:[%s4999_s19 + $0x6a4] ss:$116 sps:$4 sm:$0xff]  }
  0xda   : > { %3258 = vmatprep.subr.bf16.mxu0 %v4545_v17  ;;  %v4627_v17 = vld [vmem:[%s4999_s19 + $0x5b0] ss:$116 sps:$4 sm:$0xff]  }
  0xdc   : > { %3298 = vmatpush1.bf16.msra.mxu1 %v4576_v25 }
  0xdd   : > { %3259 = vmatpush1.bf16.msra.mxu0 %v4543_v20  ;;  %3299 = vmatprep.subr.bf16.mxu1 %v4584_v26  ;;  %v4641_v26 = vld [vmem:[%s4999_s19 + $0x3e4] ss:$116 sps:$4 sm:$0xff]  }
  0xde   : > { %3260 = vmatprep.subr.bf16.mxu0 %v4551_v21  ;;  %v4654_v21 = vld [vmem:[%s4999_s19 + $0x778] ss:$116 sps:$4 sm:$0xff]  }
  0xe0   : > { %3300 = vmatpush1.bf16.msra.mxu1 %v4582_v29  ;;  %v4639_v29 = vld [vmem:[%s4999_s19 + $0x3e0] ss:$116 sps:$4 sm:$0xff]  }
  0xe1   : > { %3261 = vmatpush1.bf16.msra.mxu0 %v4549_v24  ;;  %3301 = vmatprep.subr.bf16.mxu1 %v4590_v30  ;;  %v4647_v30 = vld [vmem:[%s4999_s19 + $0x2fc] ss:$116 sps:$4 sm:$0xff]  }
  0xe2   : > { %3262 = vmatprep.subr.bf16.mxu0 %v4557_v0  ;;  %v4633_v0 = vld [vmem:[%s4999_s19 + $0x4c8] ss:$116 sps:$4 sm:$0xff]  }
  0xe4   : > { %3302 = vmatpush1.bf16.msra.mxu1 %v4588_v33 }
  0xe5   : > { %3263 = vmatpush1.bf16.msra.mxu0 %v4555_v27  ;;  %3303 = vmatprep.subr.bf16.mxu1 %v4596_v34  ;;  %v4660_v27 = vld [vmem:[%s4999_s19 + $0x6a0] ss:$116 sps:$4 sm:$0xff]  }
  0xe6   : > { %3264 = vmatprep.subr.bf16.mxu0 %v4563_v28  ;;  %v4668_v28 = vld [vmem:[%s4999_s19 + $0x5bc] ss:$116 sps:$4 sm:$0xff]  }
  0xe8   : > { %3304 = vmatpush1.bf16.msra.mxu1 %v4594_v37  ;;  %v4653_v37 = vld [vmem:[%s4999_s19 + $0x214] ss:$116 sps:$4 sm:$0xff]  }
  0xe9   : > { %3265 = vmatpush1.bf16.msra.mxu0 %v4561_v31  ;;  %3305 = vmatprep.subr.bf16.mxu1 %v4602_v38  ;;  %v4666_v31 = vld [vmem:[%s4999_s19 + $0x5b8] ss:$116 sps:$4 sm:$0xff]  }
  0xea   : > { %3266 = vmatprep.subr.bf16.mxu0 %v4569_v32 }
  0xec   : > { %3306 = vmatpush1.bf16.msra.mxu1 %v4600_v41 }
  0xed   : > { %3267 = vmatpush1.bf16.msra.mxu0 %v4567_v35  ;;  %3307 = vmatprep.subr.bf16.mxu1 %v4608_v42  ;;  %v4674_v35 = vld [vmem:[%s4999_s19 + $0x4d4] ss:$116 sps:$4 sm:$0xff]  }
  0xee   : > { %3268 = vmatprep.subr.bf16.mxu0 %v4575_v36  ;;  %v4645_v36 = vld [vmem:[%s4999_s19 + $0x2f8] ss:$116 sps:$4 sm:$0xff]  }
  0xf0   : > { %3308 = vmatpush1.bf16.msra.mxu1 %v4606_v45  ;;  %v4659_v45 = vld [vmem:[%s4999_s19 + $0x12c] ss:$116 sps:$4 sm:$0xff]  }
  0xf1   : > { %3269 = vmatpush2.bf16.msra.mxu0 %v4573_v39  ;;  %3309 = vmatprep.subr.bf16.mxu1 %v4614_v46  ;;  %v4672_v39 = vld [vmem:[%s4999_s19 + $0x4d0] ss:$116 sps:$4 sm:$0xff]   ;;  %v4678_v46 = vld [vmem:[%s4999_s19 + $0x3e8] ss:$116 sps:$4 sm:$0xff]  }
  0xf2   : > { %3270 = vmatprep.subr.bf16.mxu0 %v4581_v40 }
  0xf4   : > { %3310 = vmatpush2.bf16.msra.mxu1 %v4612_v49  ;;  %v4665_v49 = vld [vmem:[%s4999_s19 + $0x44] ss:$116 sps:$4 sm:$0xff]  }
  0xf5   : > { %3271 = vmatpush2.bf16.msra.mxu0 %v4579_v43  ;;  %3311 = vmatprep.subr.bf16.mxu1 %v4620_v50  ;;  %v4680_v43 = vld [vmem:[%s4999_s19 + $0x3ec] ss:$116 sps:$4 sm:$0xff]  }
  0xf6   : > { %3272 = vmatprep.subr.bf16.mxu0 %v4587_v44  ;;  %v4651_v44 = vld [vmem:[%s4999_s19 + $0x210] ss:$116 sps:$4 sm:$0xff]   ;;  %v4684_v50 = vld [vmem:[%s4999_s19 + $0x300] ss:$116 sps:$4 sm:$0xff]  }
  0xf8   : > { %3312 = vmatpush2.bf16.msra.mxu1 %v4618_v53  ;;  %v4671_v53 = vld [vmem:[%s4999_s19 + $0xddc] ss:$116 sps:$4 sm:$0xff]  }
  0xf9   : > { %3273 = vmatpush2.bf16.msra.mxu0 %v4585_v47  ;;  %3313 = vmatprep.subr.bf16.mxu1 %v4626_v54  ;;  %v4686_v47 = vld [vmem:[%s4999_s19 + $0x304] ss:$116 sps:$4 sm:$0xff]  }
  0xfa   : > { %3274 = vmatprep.subr.bf16.mxu0 %v4593_v48  ;;  %v4657_v48 = vld [vmem:[%s4999_s19 + $0x128] ss:$116 sps:$4 sm:$0xff]   ;;  %v4690_v54 = vld [vmem:[%s4999_s19 + $0x218] ss:$116 sps:$4 sm:$0xff]  }
  0xfc   : > { %3314 = vmatpush2.bf16.msra.mxu1 %v4624_v57  ;;  %v4677_v57 = vld [vmem:[%s4999_s19 + $0xcf4] ss:$116 sps:$4 sm:$0xff]  }
  0xfd   : > { %3275 = vmatpush2.bf16.msra.mxu0 %v4591_v51  ;;  %3315 = vmatprep.subr.bf16.mxu1 %v4632_v58  ;;  %v4692_v51 = vld [vmem:[%s4999_s19 + $0x21c] ss:$116 sps:$4 sm:$0xff]  }
  0xfe   : > { %3276 = vmatprep.subr.bf16.mxu0 %v4599_v52  ;;  %v4663_v52 = vld [vmem:[%s4999_s19 + $0x40] ss:$116 sps:$4 sm:$0xff]   ;;  %v4696_v58 = vld [vmem:[%s4999_s19 + $0x130] ss:$116 sps:$4 sm:$0xff]  }
 0x100   : > { %3316 = vmatpush2.bf16.msra.mxu1 %v4630_v61  ;;  %v4683_v61 = vld [vmem:[%s4999_s19 + $0xc0c] ss:$116 sps:$4 sm:$0xff]  }
 0x101   : > { %3277 = vmatpush2.bf16.msra.mxu0 %v4597_v55  ;;  %3317 = vmatprep.subr.bf16.mxu1 %v4638_v62  ;;  %v4698_v55 = vld [vmem:[%s4999_s19 + $0x134] ss:$116 sps:$4 sm:$0xff]  }
 0x102   : > { %3278 = vmatprep.subr.bf16.mxu0 %v4605_v56  ;;  %v4669_v56 = vld [vmem:[%s4999_s19 + $0xdd8] ss:$116 sps:$4 sm:$0xff]   ;;  %v4702_v62 = vld [vmem:[%s4999_s19 + $0x48] ss:$116 sps:$4 sm:$0xff]  }
 0x104   : > { %3318 = vmatpush2.bf16.msra.mxu1 %v4636_v3  ;;  %v4689_v3 = vld [vmem:[%s4999_s19 + $0xb24] ss:$116 sps:$4 sm:$0xff]  }
 0x105   : > { %3279 = vmatpush2.bf16.msra.mxu0 %v4603_v59  ;;  %3319 = vmatprep.subr.bf16.mxu1 %v4644_v4  ;;  %v4704_v59 = vld [vmem:[%s4999_s19 + $0x4c] ss:$116 sps:$4 sm:$0xff]  }
 0x106   : > { %3280 = vmatprep.subr.bf16.mxu0 %v4611_v60  ;;  %v4675_v60 = vld [vmem:[%s4999_s19 + $0xcf0] ss:$116 sps:$4 sm:$0xff]   ;;  %v4708_v4 = vld [vmem:[%s4999_s19 + $0xde0] ss:$116 sps:$4 sm:$0xff]  }
 0x108   : > { %3320 = vmatpush2.bf16.msra.mxu1 %v4642_v7  ;;  %v4695_v7 = vld [vmem:[%s4999_s19 + $0xa3c] ss:$116 sps:$4 sm:$0xff]  }
 0x109   : > { %3281 = vmatpush2.bf16.msra.mxu0 %v4609_v63  ;;  %3321 = vmatprep.subr.bf16.mxu1 %v4650_v8  ;;  %v4710_v63 = vld [vmem:[%s4999_s19 + $0xde4] ss:$116 sps:$4 sm:$0xff]  }
 0x10a   : > { %3282 = vmatprep.subr.bf16.mxu0 %v4617_v2  ;;  %v4681_v2 = vld [vmem:[%s4999_s19 + $0xc08] ss:$116 sps:$4 sm:$0xff]   ;;  %v4714_v8 = vld [vmem:[%s4999_s19 + $0xcf8] ss:$116 sps:$4 sm:$0xff]  }
 0x10c   : > { %3322 = vmatpush2.bf16.msra.mxu1 %v4648_v13  ;;  %v4701_v13 = vld [vmem:[%s4999_s19 + $0x954] ss:$116 sps:$4 sm:$0xff]  }
 0x10d   : > { %3283 = vmatpush2.bf16.msra.mxu0 %v4615_v5  ;;  %3323 = vmatprep.subr.bf16.mxu1 %v4656_v15  ;;  %v4716_v5 = vld [vmem:[%s4999_s19 + $0xcfc] ss:$116 sps:$4 sm:$0xff]   ;;  %v4728_v15 = vld [vmem:[%s4999_s19 + $0xb2c] ss:$116 sps:$4 sm:$0xff]  }
 0x10e   : > { %3334 = vmatprep.subr.bf16.mxu0 %v4623_v6  ;;  %v4687_v6 = vld [vmem:[%s4999_s19 + $0xb20] ss:$116 sps:$4 sm:$0xff]  }
 0x110   : > { %v3040_v14 = vpop.f32.mrf.mxu0  ;;  %3285 = vmatmul.mubr.bf16.vlgmr.msra.gmra.mxu0 %v5208_v10  ;;  %3324 = vmatpush2.bf16.msra.mxu1 %v4654_v21  ;;  %v4713_v21 = vld [vmem:[%s4999_s19 + $0x784] ss:$116 sps:$4 sm:$0xff]  }
 0x111   : > { %3335 = vmatpush1.bf16.msra.mxu0 %v4621_v9  ;;  %v3041_v16 = vadd.f32 %v3040_v14, %v5276_v11  ;;  %3366 = vmatprep.mubr.bf16.mxu0 %v4989_v1  ;;  %v4722_v9 = vld [vmem:[%s4999_s19 + $0xc14] ss:$116 sps:$4 sm:$0xff]   ;;  %v4720_v14 = vld [vmem:[%s4999_s19 + $0xc10] ss:$116 sps:$4 sm:$0xff]  }
 0x112   : > { %v3042_v18 = vpop.f32.mrf.mxu0  ;;  %3336 = vmatprep.subr.bf16.mxu0 %v4629_v12  ;;  %3375 = vmatprep.subr.bf16.mxu1 %v4662_v23  ;;  %v4693_v12 = vld [vmem:[%s4999_s19 + $0xa38] ss:$116 sps:$4 sm:$0xff]   ;;  %v4740_v23 = vld [vmem:[%s4999_s19 + $0x95c] ss:$116 sps:$4 sm:$0xff]  }
 0x113   : > { %v3043_v20 = vadd.f32 %v3042_v18, %v5276_v11  ;;  %v3081_v32 = vpop.f32.mrf.mxu1  ;;  %3326 = vmatmul.mubr.bf16.vlgmr.msra.gmra.mxu1 %v5208_v10  ;;  %v4726_v18 = vld [vmem:[%s4999_s19 + $0xb28] ss:$116 sps:$4 sm:$0xff]  }
 0x114   : > { %v3044_v22 = vpop.f32.mrf.mxu0  ;;  %v3082_v33 = vadd.f32 %v3081_v32, %v5276_v11  ;;  %3376 = vmatpush1.bf16.msra.mxu1 %v4660_v27  ;;  %3407 = vmatprep.mubr.bf16.mxu1 %v4989_v1  ;;  %v4717_v27 = vld [vmem:[%s4999_s19 + $0x6a8] ss:$116 sps:$4 sm:$0xff]  }
 0x115   : > { %v3648_v24 = vcombine.low %v3041_v16, %v3043_v20  ;;  %3337 = vmatpush1.bf16.msra.mxu0 %v4627_v17  ;;  %v3083_v34 = vpop.f32.mrf.mxu1  ;;  %3377 = vmatprep.subr.bf16.mxu1 %v4668_v28  ;;  %v4699_v16 = vld [vmem:[%s4999_s19 + $0x950] ss:$116 sps:$4 sm:$0xff]   ;;  %v4707_v17 = vld [vmem:[%s4999_s19 + $0x86c] ss:$116 sps:$4 sm:$0xff]   ;;  %v4705_v20 = vld [vmem:[%s4999_s19 + $0x868] ss:$116 sps:$4 sm:$0xff]  }
 0x116   : > { %v3045_v25 = vpop.f32.mrf.mxu0  ;;  %3338 = vmatprep.subr.bf16.mxu0 %v4635_v19  ;;  %v3084_v38 = vadd.f32 %v3083_v34, %v5276_v11  ;;  %v4734_v19 = vld [vmem:[%s4999_s19 + $0xa44] ss:$116 sps:$4 sm:$0xff]   ;;  %v4732_v22 = vld [vmem:[%s4999_s19 + $0xa40] ss:$116 sps:$4 sm:$0xff]  }
 0x117   : > { %3676 = vst [vmem:[%s5292_s27] sm:$0x77] %v3648_v24  ;;  %v3085_v40 = vpop.f32.mrf.mxu1  ;;  %v4711_v24 = vld [vmem:[%s4999_s19 + $0x780] ss:$116 sps:$4 sm:$0xff]   ;;  %v4738_v25 = vld [vmem:[%s4999_s19 + $0x958] ss:$116 sps:$4 sm:$0xff]  }
 0x118   : > { %v3649_v41 = vcombine.low %v3082_v33, %v3084_v38  ;;  %3378 = vmatpush1.bf16.msra.mxu1 %v4666_v31  ;;  %v4725_v28 = vld [vmem:[%s4999_s19 + $0x5c4] ss:$116 sps:$4 sm:$0xff]   ;;  %v4752_v31 = vld [vmem:[%s4999_s19 + $0x78c] ss:$116 sps:$4 sm:$0xff]  }
 0x119   : > { %3339 = vmatpush1.bf16.msra.mxu0 %v4633_v0  ;;  %v3086_v42 = vpop.f32.mrf.mxu1  ;;  %3379 = vmatprep.subr.bf16.mxu1 %v4674_v35  ;;  %v4719_v0 = vld [vmem:[%s4999_s19 + $0x6ac] ss:$116 sps:$4 sm:$0xff]   ;;  %v4731_v35 = vld [vmem:[%s4999_s19 + $0x4dc] ss:$116 sps:$4 sm:$0xff]  }
 0x11a   : > { %3340 = vmatprep.subr.bf16.mxu0 %v4641_v26  ;;  %3677 = vst [vmem:[%s5292_s27 + $0x8] sm:$0x77] %v3649_v41  ;;  %v4746_v26 = vld [vmem:[%s4999_s19 + $0x874] ss:$116 sps:$4 sm:$0xff]   ;;  %v4729_v41 = vld [vmem:[%s4999_s19 + $0x4d8] ss:$116 sps:$4 sm:$0xff]  }
 0x11b   : > { %v4723_v33 = vld [vmem:[%s4999_s19 + $0x5c0] ss:$116 sps:$4 sm:$0xff]  }
 0x11c   : > { %3380 = vmatpush1.bf16.msra.mxu1 %v4672_v39  ;;  %v4758_v39 = vld [vmem:[%s4999_s19 + $0x6b4] ss:$116 sps:$4 sm:$0xff]  }
 0x11d   : > { %3341 = vmatpush1.bf16.msra.mxu0 %v4639_v29  ;;  %3381 = vmatprep.subr.bf16.mxu1 %v4680_v43  ;;  %v4744_v29 = vld [vmem:[%s4999_s19 + $0x870] ss:$116 sps:$4 sm:$0xff]   ;;  %v4737_v43 = vld [vmem:[%s4999_s19 + $0x3f4] ss:$116 sps:$4 sm:$0xff]  }
 0x11e   : > { %3342 = vmatprep.subr.bf16.mxu0 %v4647_v30 }
 0x120   : > { %3382 = vmatpush1.bf16.msra.mxu1 %v4678_v46  ;;  %v4735_v46 = vld [vmem:[%s4999_s19 + $0x3f0] ss:$116 sps:$4 sm:$0xff]  }
 0x121   : > { %3343 = vmatpush1.bf16.msra.mxu0 %v4645_v36  ;;  %3383 = vmatprep.subr.bf16.mxu1 %v4686_v47  ;;  %v4743_v47 = vld [vmem:[%s4999_s19 + $0x30c] ss:$116 sps:$4 sm:$0xff]  }
 0x122   : > { %3344 = vmatprep.subr.bf16.mxu0 %v4653_v37  ;;  %v4750_v37 = vld [vmem:[%s4999_s19 + $0x788] ss:$116 sps:$4 sm:$0xff]  }
 0x124   : > { %3384 = vmatpush1.bf16.msra.mxu1 %v4684_v50  ;;  %v4762_v50 = vld [vmem:[%s4999_s19 + $0x5c8] ss:$116 sps:$4 sm:$0xff]  }
 0x125   : > { %3345 = vmatpush1.bf16.msra.mxu0 %v4651_v44  ;;  %3385 = vmatprep.subr.bf16.mxu1 %v4692_v51  ;;  %v4756_v44 = vld [vmem:[%s4999_s19 + $0x6b0] ss:$116 sps:$4 sm:$0xff]  }
 0x126   : > { %3346 = vmatprep.subr.bf16.mxu0 %v4659_v45  ;;  %v4764_v45 = vld [vmem:[%s4999_s19 + $0x5cc] ss:$116 sps:$4 sm:$0xff]  }
 0x128   : > { %3386 = vmatpush1.bf16.msra.mxu1 %v4690_v54 }
 0x129   : > { %3347 = vmatpush1.bf16.msra.mxu0 %v4657_v48  ;;  %3387 = vmatprep.subr.bf16.mxu1 %v4698_v55 }
 0x12a   : > { %3348 = vmatprep.subr.bf16.mxu0 %v4665_v49 }
 0x12c   : > { %3388 = vmatpush1.bf16.msra.mxu1 %v4696_v58 }
 0x12d   : > { %3349 = vmatpush1.bf16.msra.mxu0 %v4663_v52  ;;  %3389 = vmatprep.subr.bf16.mxu1 %v4704_v59  ;;  %v4770_v52 = vld [vmem:[%s4999_s19 + $0x4e4] ss:$116 sps:$4 sm:$0xff]   ;;  %v4776_v59 = vld [vmem:[%s4999_s19 + $0x3fc] ss:$116 sps:$4 sm:$0xff]  }
 0x12e   : > { %3350 = vmatprep.subr.bf16.mxu0 %v4671_v53  ;;  %v4741_v53 = vld [vmem:[%s4999_s19 + $0x308] ss:$116 sps:$4 sm:$0xff]  }
 0x130   : > { %3390 = vmatpush1.bf16.msra.mxu1 %v4702_v62  ;;  %v4774_v62 = vld [vmem:[%s4999_s19 + $0x3f8] ss:$116 sps:$4 sm:$0xff]  }
 0x131   : > { %3351 = vmatpush2.bf16.msra.mxu0 %v4669_v56  ;;  %3391 = vmatprep.subr.bf16.mxu1 %v4710_v63  ;;  %v4782_v63 = vld [vmem:[%s4999_s19 + $0x314] ss:$116 sps:$4 sm:$0xff]  }
 0x132   : > { %3352 = vmatprep.subr.bf16.mxu0 %v4677_v57  ;;  %v4768_v57 = vld [vmem:[%s4999_s19 + $0x4e0] ss:$116 sps:$4 sm:$0xff]  }
 0x134   : > { %3392 = vmatpush2.bf16.msra.mxu1 %v4708_v4  ;;  %v4780_v4 = vld [vmem:[%s4999_s19 + $0x310] ss:$116 sps:$4 sm:$0xff]  }
 0x135   : > { %3353 = vmatpush2.bf16.msra.mxu0 %v4675_v60  ;;  %3393 = vmatprep.subr.bf16.mxu1 %v4716_v5  ;;  %v4747_v60 = vld [vmem:[%s4999_s19 + $0x220] ss:$116 sps:$4 sm:$0xff]  }
 0x136   : > { %3354 = vmatprep.subr.bf16.mxu0 %v4683_v61  ;;  %v4755_v61 = vld [vmem:[%s4999_s19 + $0x13c] ss:$116 sps:$4 sm:$0xff]   ;;  %v4788_v5 = vld [vmem:[%s4999_s19 + $0x22c] ss:$116 sps:$4 sm:$0xff]  }
 0x138   : > { %3394 = vmatpush2.bf16.msra.mxu1 %v4714_v8  ;;  %v4786_v8 = vld [vmem:[%s4999_s19 + $0x228] ss:$116 sps:$4 sm:$0xff]  }
 0x139   : > { %3355 = vmatpush2.bf16.msra.mxu0 %v4681_v2  ;;  %3395 = vmatprep.subr.bf16.mxu1 %v4722_v9  ;;  %v4753_v2 = vld [vmem:[%s4999_s19 + $0x138] ss:$116 sps:$4 sm:$0xff]  }
 0x13a   : > { %3356 = vmatprep.subr.bf16.mxu0 %v4689_v3  ;;  %v4761_v3 = vld [vmem:[%s4999_s19 + $0x54] ss:$116 sps:$4 sm:$0xff]   ;;  %v4794_v9 = vld [vmem:[%s4999_s19 + $0x144] ss:$116 sps:$4 sm:$0xff]  }
 0x13c   : > { %3396 = vmatpush2.bf16.msra.mxu1 %v4720_v14  ;;  %v4792_v14 = vld [vmem:[%s4999_s19 + $0x140] ss:$116 sps:$4 sm:$0xff]  }
 0x13d   : > { %3357 = vmatpush2.bf16.msra.mxu0 %v4687_v6  ;;  %3397 = vmatprep.subr.bf16.mxu1 %v4728_v15  ;;  %v4759_v6 = vld [vmem:[%s4999_s19 + $0x50] ss:$116 sps:$4 sm:$0xff]  }
 0x13e   : > { %3358 = vmatprep.subr.bf16.mxu0 %v4695_v7  ;;  %v4767_v7 = vld [vmem:[%s4999_s19 + $0xdec] ss:$116 sps:$4 sm:$0xff]   ;;  %v4800_v15 = vld [vmem:[%s4999_s19 + $0x5c] ss:$116 sps:$4 sm:$0xff]  }
 0x140   : > { %3398 = vmatpush2.bf16.msra.mxu1 %v4726_v18  ;;  %v4798_v18 = vld [vmem:[%s4999_s19 + $0x58] ss:$116 sps:$4 sm:$0xff]  }
 0x141   : > { %3359 = vmatpush2.bf16.msra.mxu0 %v4693_v12  ;;  %3399 = vmatprep.subr.bf16.mxu1 %v4734_v19  ;;  %v4765_v12 = vld [vmem:[%s4999_s19 + $0xde8] ss:$116 sps:$4 sm:$0xff]  }
 0x142   : > { %3360 = vmatprep.subr.bf16.mxu0 %v4701_v13  ;;  %v4773_v13 = vld [vmem:[%s4999_s19 + $0xd04] ss:$116 sps:$4 sm:$0xff]   ;;  %v4806_v19 = vld [vmem:[%s4999_s19 + $0xdf4] ss:$116 sps:$4 sm:$0xff]  }
 0x144   : > { %3400 = vmatpush2.bf16.msra.mxu1 %v4732_v22  ;;  %v4804_v22 = vld [vmem:[%s4999_s19 + $0xdf0] ss:$116 sps:$4 sm:$0xff]  }
 0x145   : > { %3361 = vmatpush2.bf16.msra.mxu0 %v4699_v16  ;;  %3401 = vmatprep.subr.bf16.mxu1 %v4740_v23  ;;  %v4771_v16 = vld [vmem:[%s4999_s19 + $0xd00] ss:$116 sps:$4 sm:$0xff]  }
 0x146   : > { %3362 = vmatprep.subr.bf16.mxu0 %v4707_v17  ;;  %v4779_v17 = vld [vmem:[%s4999_s19 + $0xc1c] ss:$116 sps:$4 sm:$0xff]   ;;  %v4812_v23 = vld [vmem:[%s4999_s19 + $0xd0c] ss:$116 sps:$4 sm:$0xff]  }
 0x148   : > { %3402 = vmatpush2.bf16.msra.mxu1 %v4738_v25  ;;  %v4810_v25 = vld [vmem:[%s4999_s19 + $0xd08] ss:$116 sps:$4 sm:$0xff]  }
 0x149   : > { %3363 = vmatpush2.bf16.msra.mxu0 %v4705_v20  ;;  %3403 = vmatprep.subr.bf16.mxu1 %v4746_v26  ;;  %v4777_v20 = vld [vmem:[%s4999_s19 + $0xc18] ss:$116 sps:$4 sm:$0xff]  }
 0x14a   : > { %3364 = vmatprep.subr.bf16.mxu0 %v4713_v21  ;;  %v4785_v21 = vld [vmem:[%s4999_s19 + $0xb34] ss:$116 sps:$4 sm:$0xff]   ;;  %v4818_v26 = vld [vmem:[%s4999_s19 + $0xc24] ss:$116 sps:$4 sm:$0xff]  }
 0x14c   : > { %3404 = vmatpush2.bf16.msra.mxu1 %v4744_v29  ;;  %v4816_v29 = vld [vmem:[%s4999_s19 + $0xc20] ss:$116 sps:$4 sm:$0xff]  }
 0x14d   : > { %3365 = vmatpush2.bf16.msra.mxu0 %v4711_v24  ;;  %3405 = vmatprep.subr.bf16.mxu1 %v4752_v31  ;;  %v4783_v24 = vld [vmem:[%s4999_s19 + $0xb30] ss:$116 sps:$4 sm:$0xff]   ;;  %v4795_v31 = vld [vmem:[%s4999_s19 + $0x960] ss:$116 sps:$4 sm:$0xff]  }
 0x14e   : > { %3416 = vmatprep.subr.bf16.mxu0 %v4719_v0  ;;  %v4791_v0 = vld [vmem:[%s4999_s19 + $0xa4c] ss:$116 sps:$4 sm:$0xff]  }
 0x150   : > { %v3122_v30 = vpop.f32.mrf.mxu0  ;;  %3367 = vmatmul.mubr.bf16.vlgmr.msra.gmra.mxu0 %v5208_v10  ;;  %3406 = vmatpush2.bf16.msra.mxu1 %v4750_v37  ;;  %v4828_v37 = vld [vmem:[%s4999_s19 + $0xa50] ss:$116 sps:$4 sm:$0xff]  }
 0x151   : > { %v3123_v32 = vadd.f32 %v3122_v30, %v5276_v11  ;;  %3417 = vmatpush1.bf16.msra.mxu0 %v4717_v27  ;;  %3448 = vmatprep.mubr.bf16.mxu0 %v4989_v1  ;;  %v4789_v27 = vld [vmem:[%s4999_s19 + $0xa48] ss:$116 sps:$4 sm:$0xff]  }
 0x152   : > { %v3124_v34 = vpop.f32.mrf.mxu0  ;;  %3418 = vmatprep.subr.bf16.mxu0 %v4725_v28  ;;  %3457 = vmatprep.subr.bf16.mxu1 %v4758_v39  ;;  %v4797_v28 = vld [vmem:[%s4999_s19 + $0x964] ss:$116 sps:$4 sm:$0xff]   ;;  %v4824_v30 = vld [vmem:[%s4999_s19 + $0xb3c] ss:$116 sps:$4 sm:$0xff]  }
 0x153   : > { %v3125_v36 = vadd.f32 %v3124_v34, %v5276_v11  ;;  %v3163_v48 = vpop.f32.mrf.mxu1  ;;  %3408 = vmatmul.mubr.bf16.vlgmr.msra.gmra.mxu1 %v5208_v10  ;;  %v4749_v10 = vld [vmem:[%s4999_s19 + $0x224] ss:$116 sps:$4 sm:$0xff]   ;;  %v4830_v34 = vld [vmem:[%s4999_s19 + $0xa54] ss:$116 sps:$4 sm:$0xff]  }
 0x154   : > { %v3126_v38 = vpop.f32.mrf.mxu0  ;;  %v3164_v49 = vadd.f32 %v3163_v48, %v5276_v11  ;;  %3458 = vmatpush1.bf16.msra.mxu1 %v4756_v44  ;;  %3489 = vmatprep.mubr.bf16.mxu1 %v4989_v1  ;;  %v4807_v39 = vld [vmem:[%s4999_s19 + $0x790] ss:$116 sps:$4 sm:$0xff]   ;;  %v4821_v44 = vld [vmem:[%s4999_s19 + $0x5d4] ss:$116 sps:$4 sm:$0xff]  }
 0x155   : > { %v3650_v40 = vcombine.low %v3123_v32, %v3125_v36  ;;  %3419 = vmatpush1.bf16.msra.mxu0 %v4723_v33  ;;  %v3165_v51 = vpop.f32.mrf.mxu1  ;;  %3459 = vmatprep.subr.bf16.mxu1 %v4764_v45  ;;  %v4803_v32 = vld [vmem:[%s4999_s19 + $0x87c] ss:$116 sps:$4 sm:$0xff]   ;;  %v4822_v33 = vld [vmem:[%s4999_s19 + $0xb38] ss:$116 sps:$4 sm:$0xff]   ;;  %v4809_v36 = vld [vmem:[%s4999_s19 + $0x794] ss:$116 sps:$4 sm:$0xff]  }
 0x156   : > { %v3127_v42 = vpop.f32.mrf.mxu0  ;;  %3420 = vmatprep.subr.bf16.mxu0 %v4731_v35  ;;  %v3166_v54 = vadd.f32 %v3165_v51, %v5276_v11  ;;  %v4801_v35 = vld [vmem:[%s4999_s19 + $0x878] ss:$116 sps:$4 sm:$0xff]   ;;  %v4840_v45 = vld [vmem:[%s4999_s19 + $0x880] ss:$116 sps:$4 sm:$0xff]   ;;  %v4848_v48 = vld [vmem:[%s4999_s19 + $0x79c] ss:$116 sps:$4 sm:$0xff]  }
 0x157   : > { %3678 = vst [vmem:[%s5292_s27 + $0x10] sm:$0x77] %v3650_v40  ;;  %v3167_v55 = vpop.f32.mrf.mxu1  ;;  %v4836_v38 = vld [vmem:[%s4999_s19 + $0x96c] ss:$116 sps:$4 sm:$0xff]   ;;  %v4815_v40 = vld [vmem:[%s4999_s19 + $0x6bc] ss:$116 sps:$4 sm:$0xff]  }
 0x158   : > { %v3651_v56 = vcombine.low %v3164_v49, %v3166_v54  ;;  %3460 = vmatpush1.bf16.msra.mxu1 %v4762_v50  ;;  %v4842_v42 = vld [vmem:[%s4999_s19 + $0x884] ss:$116 sps:$4 sm:$0xff]  }
 0x159   : > { %3421 = vmatpush1.bf16.msra.mxu0 %v4729_v41  ;;  %v3168_v58 = vpop.f32.mrf.mxu1  ;;  %3461 = vmatprep.subr.bf16.mxu1 %v4770_v52  ;;  %v4834_v41 = vld [vmem:[%s4999_s19 + $0x968] ss:$116 sps:$4 sm:$0xff]   ;;  %v4819_v50 = vld [vmem:[%s4999_s19 + $0x5d0] ss:$116 sps:$4 sm:$0xff]   ;;  %v4827_v52 = vld [vmem:[%s4999_s19 + $0x4ec] ss:$116 sps:$4 sm:$0xff]  }
 0x15a   : > { %3422 = vmatprep.subr.bf16.mxu0 %v4737_v43  ;;  %3679 = vst [vmem:[%s5292_s27 + $0x18] sm:$0x77] %v3651_v56  ;;  %v4813_v43 = vld [vmem:[%s4999_s19 + $0x6b8] ss:$116 sps:$4 sm:$0xff]  }
 0x15b   : > { %v4846_v54 = vld [vmem:[%s4999_s19 + $0x798] ss:$116 sps:$4 sm:$0xff]  }
 0x15c   : > { %3462 = vmatpush1.bf16.msra.mxu1 %v4768_v57  ;;  %v4854_v55 = vld [vmem:[%s4999_s19 + $0x6c4] ss:$116 sps:$4 sm:$0xff]   ;;  %v4825_v57 = vld [vmem:[%s4999_s19 + $0x4e8] ss:$116 sps:$4 sm:$0xff]  }
 0x15d   : > { %3423 = vmatpush1.bf16.msra.mxu0 %v4735_v46  ;;  %3463 = vmatprep.subr.bf16.mxu1 %v4776_v59  ;;  %v4833_v59 = vld [vmem:[%s4999_s19 + $0x404] ss:$116 sps:$4 sm:$0xff]  }
 0x15e   : > { %3424 = vmatprep.subr.bf16.mxu0 %v4743_v47  ;;  %v5437_v47 = vld.sshfl [vmem:[%s5562_s1] sm:$0x33 pattern:$0x76325410] }
 0x160   : > { %3464 = vmatpush1.bf16.msra.mxu1 %v4774_v62  ;;  %v4831_v62 = vld [vmem:[%s4999_s19 + $0x400] ss:$116 sps:$4 sm:$0xff]  }
 0x161   : > { %3425 = vmatpush1.bf16.msra.mxu0 %v4741_v53  ;;  %3465 = vmatprep.subr.bf16.mxu1 %v4782_v63  ;;  %v4839_v63 = vld [vmem:[%s4999_s19 + $0x31c] ss:$116 sps:$4 sm:$0xff]  }
 0x162   : > { %3426 = vmatprep.subr.bf16.mxu0 %v4749_v10 }
 0x164   : > { %3466 = vmatpush1.bf16.msra.mxu1 %v4780_v4  ;;  %v4858_v4 = vld [vmem:[%s4999_s19 + $0x5d8] ss:$116 sps:$4 sm:$0xff]  }
 0x165   : > { %3427 = vmatpush1.bf16.msra.mxu0 %v4747_v60  ;;  %3467 = vmatprep.subr.bf16.mxu1 %v4788_v5  ;;  %v4852_v60 = vld [vmem:[%s4999_s19 + $0x6c0] ss:$116 sps:$4 sm:$0xff]  }
 0x166   : > { %3428 = vmatprep.subr.bf16.mxu0 %v4755_v61  ;;  %v4860_v61 = vld [vmem:[%s4999_s19 + $0x5dc] ss:$116 sps:$4 sm:$0xff]  }
 0x168   : > { %3468 = vmatpush1.bf16.msra.mxu1 %v4786_v8 }
 0x169   : > { %3429 = vmatpush1.bf16.msra.mxu0 %v4753_v2  ;;  %3469 = vmatprep.subr.bf16.mxu1 %v4794_v9  ;;  %v4845_v9 = vld [vmem:[%s4999_s19 + $0x234] ss:$116 sps:$4 sm:$0xff]  }
 0x16a   : > { %3430 = vmatprep.subr.bf16.mxu0 %v4761_v3 }
 0x16c   : > { %3470 = vmatpush1.bf16.msra.mxu1 %v4792_v14  ;;  %v4864_v14 = vld [vmem:[%s4999_s19 + $0x4f0] ss:$116 sps:$4 sm:$0xff]  }
 0x16d   : > { %3431 = vmatpush1.bf16.msra.mxu0 %v4759_v6  ;;  %3471 = vmatprep.subr.bf16.mxu1 %v4800_v15  ;;  %v4866_v6 = vld [vmem:[%s4999_s19 + $0x4f4] ss:$116 sps:$4 sm:$0xff]  }
 0x16e   : > { %3432 = vmatprep.subr.bf16.mxu0 %v4767_v7  ;;  %v4837_v7 = vld [vmem:[%s4999_s19 + $0x318] ss:$116 sps:$4 sm:$0xff]  }
 0x170   : > { %3472 = vmatpush1.bf16.msra.mxu1 %v4798_v18  ;;  %v4851_v18 = vld [vmem:[%s4999_s19 + $0x14c] ss:$116 sps:$4 sm:$0xff]  }
 0x171   : > { %3433 = vmatpush2.bf16.msra.mxu0 %v4765_v12  ;;  %3473 = vmatprep.subr.bf16.mxu1 %v4806_v19  ;;  %v4870_v19 = vld [vmem:[%s4999_s19 + $0x408] ss:$116 sps:$4 sm:$0xff]  }
 0x172   : > { %3434 = vmatprep.subr.bf16.mxu0 %v4773_v13 }
 0x174   : > { %3474 = vmatpush2.bf16.msra.mxu1 %v4804_v22  ;;  %v4857_v22 = vld [vmem:[%s4999_s19 + $0x64] ss:$116 sps:$4 sm:$0xff]  }
 0x175   : > { %3435 = vmatpush2.bf16.msra.mxu0 %v4771_v16  ;;  %3475 = vmatprep.subr.bf16.mxu1 %v4812_v23  ;;  %v4872_v16 = vld [vmem:[%s4999_s19 + $0x40c] ss:$116 sps:$4 sm:$0xff]  }
 0x176   : > { %3436 = vmatprep.subr.bf16.mxu0 %v4779_v17  ;;  %v4843_v17 = vld [vmem:[%s4999_s19 + $0x230] ss:$116 sps:$4 sm:$0xff]   ;;  %v4876_v23 = vld [vmem:[%s4999_s19 + $0x320] ss:$116 sps:$4 sm:$0xff]  }
 0x178   : > { %3476 = vmatpush2.bf16.msra.mxu1 %v4810_v25  ;;  %v4863_v25 = vld [vmem:[%s4999_s19 + $0xdfc] ss:$116 sps:$4 sm:$0xff]  }
 0x179   : > { %3437 = vmatpush2.bf16.msra.mxu0 %v4777_v20  ;;  %3477 = vmatprep.subr.bf16.mxu1 %v4818_v26  ;;  %v4878_v20 = vld [vmem:[%s4999_s19 + $0x324] ss:$116 sps:$4 sm:$0xff]  }
 0x17a   : > { %3438 = vmatprep.subr.bf16.mxu0 %v4785_v21  ;;  %v4849_v21 = vld [vmem:[%s4999_s19 + $0x148] ss:$116 sps:$4 sm:$0xff]   ;;  %v4882_v26 = vld [vmem:[%s4999_s19 + $0x238] ss:$116 sps:$4 sm:$0xff]  }
 0x17c   : > { %3478 = vmatpush2.bf16.msra.mxu1 %v4816_v29  ;;  %v4869_v29 = vld [vmem:[%s4999_s19 + $0xd14] ss:$116 sps:$4 sm:$0xff]  }
 0x17d   : > { %3439 = vmatpush2.bf16.msra.mxu0 %v4783_v24  ;;  %3479 = vmatprep.subr.bf16.mxu1 %v4824_v30  ;;  %v4884_v24 = vld [vmem:[%s4999_s19 + $0x23c] ss:$116 sps:$4 sm:$0xff]  }
 0x17e   : > { %3440 = vmatprep.subr.bf16.mxu0 %v4791_v0  ;;  %v4855_v0 = vld [vmem:[%s4999_s19 + $0x60] ss:$116 sps:$4 sm:$0xff]   ;;  %v4888_v30 = vld [vmem:[%s4999_s19 + $0x150] ss:$116 sps:$4 sm:$0xff]  }
 0x180   : > { %3480 = vmatpush2.bf16.msra.mxu1 %v4822_v33  ;;  %v4875_v33 = vld [vmem:[%s4999_s19 + $0xc2c] ss:$116 sps:$4 sm:$0xff]  }
 0x181   : > { %3441 = vmatpush2.bf16.msra.mxu0 %v4789_v27  ;;  %3481 = vmatprep.subr.bf16.mxu1 %v4830_v34  ;;  %v4890_v27 = vld [vmem:[%s4999_s19 + $0x154] ss:$116 sps:$4 sm:$0xff]  }
 0x182   : > { %3442 = vmatprep.subr.bf16.mxu0 %v4797_v28  ;;  %v4861_v28 = vld [vmem:[%s4999_s19 + $0xdf8] ss:$116 sps:$4 sm:$0xff]   ;;  %v4894_v34 = vld [vmem:[%s4999_s19 + $0x68] ss:$116 sps:$4 sm:$0xff]  }
 0x184   : > { %3482 = vmatpush2.bf16.msra.mxu1 %v4828_v37  ;;  %v4881_v37 = vld [vmem:[%s4999_s19 + $0xb44] ss:$116 sps:$4 sm:$0xff]  }
 0x185   : > { %3443 = vmatpush2.bf16.msra.mxu0 %v4795_v31  ;;  %3483 = vmatprep.subr.bf16.mxu1 %v4836_v38  ;;  %v4896_v31 = vld [vmem:[%s4999_s19 + $0x6c] ss:$116 sps:$4 sm:$0xff]  }
 0x186   : > { %3444 = vmatprep.subr.bf16.mxu0 %v4803_v32  ;;  %v4867_v32 = vld [vmem:[%s4999_s19 + $0xd10] ss:$116 sps:$4 sm:$0xff]   ;;  %v4900_v38 = vld [vmem:[%s4999_s19 + $0xe00] ss:$116 sps:$4 sm:$0xff]  }
 0x188   : > { %3484 = vmatpush2.bf16.msra.mxu1 %v4834_v41  ;;  %v4887_v41 = vld [vmem:[%s4999_s19 + $0xa5c] ss:$116 sps:$4 sm:$0xff]  }
 0x189   : > { %3445 = vmatpush2.bf16.msra.mxu0 %v4801_v35  ;;  %3485 = vmatprep.subr.bf16.mxu1 %v4842_v42  ;;  %v4902_v35 = vld [vmem:[%s4999_s19 + $0xe04] ss:$116 sps:$4 sm:$0xff]  }
 0x18a   : > { %3446 = vmatprep.subr.bf16.mxu0 %v4809_v36  ;;  %v4873_v36 = vld [vmem:[%s4999_s19 + $0xc28] ss:$116 sps:$4 sm:$0xff]   ;;  %v4906_v42 = vld [vmem:[%s4999_s19 + $0xd18] ss:$116 sps:$4 sm:$0xff]  }
 0x18c   : > { %3486 = vmatpush2.bf16.msra.mxu1 %v4840_v45  ;;  %v4893_v45 = vld [vmem:[%s4999_s19 + $0x974] ss:$116 sps:$4 sm:$0xff]  }
 0x18d   : > { %3447 = vmatpush2.bf16.msra.mxu0 %v4807_v39  ;;  %3487 = vmatprep.subr.bf16.mxu1 %v4848_v48  ;;  %v4908_v39 = vld [vmem:[%s4999_s19 + $0xd1c] ss:$116 sps:$4 sm:$0xff]   ;;  %v4918_v48 = vld [vmem:[%s4999_s19 + $0xb4c] ss:$116 sps:$4 sm:$0xff]  }
 0x18e   : > { %3498 = vmatprep.subr.bf16.mxu0 %v4815_v40  ;;  %v4879_v40 = vld [vmem:[%s4999_s19 + $0xb40] ss:$116 sps:$4 sm:$0xff]  }
 0x190   : > { %v3204_v46 = vpop.f32.mrf.mxu0  ;;  %3449 = vmatmul.mubr.bf16.vlgmr.msra.gmra.mxu0 %v5437_v47  ;;  %3488 = vmatpush2.bf16.msra.mxu1 %v4846_v54  ;;  %v4905_v54 = vld [vmem:[%s4999_s19 + $0x7a4] ss:$116 sps:$4 sm:$0xff]  }
 0x191   : > { %v3205_v49 = vadd.f32 %v3204_v46, %v5276_v11  ;;  %3499 = vmatpush1.bf16.msra.mxu0 %v4813_v43  ;;  %3530 = vmatprep.mubr.bf16.mxu0 %v4989_v1  ;;  %v4913_v43 = vld [vmem:[%s4999_s19 + $0xc34] ss:$116 sps:$4 sm:$0xff]   ;;  %v4911_v46 = vld [vmem:[%s4999_s19 + $0xc30] ss:$116 sps:$4 sm:$0xff]  }
 0x192   : > { %v3206_v51 = vpop.f32.mrf.mxu0  ;;  %3500 = vmatprep.subr.bf16.mxu0 %v4821_v44  ;;  %3539 = vmatprep.subr.bf16.mxu1 %v4854_v55  ;;  %v4885_v44 = vld [vmem:[%s4999_s19 + $0xa58] ss:$116 sps:$4 sm:$0xff]   ;;  %v4928_v55 = vld [vmem:[%s4999_s19 + $0x97c] ss:$116 sps:$4 sm:$0xff]  }
 0x193   : > { %v3207_v53 = vadd.f32 %v3206_v51, %v5276_v11  ;;  %v3245_v2 = vpop.f32.mrf.mxu1  ;;  %3490 = vmatmul.mubr.bf16.vlgmr.msra.gmra.mxu1 %v5437_v47  ;;  %v4916_v51 = vld [vmem:[%s4999_s19 + $0xb48] ss:$116 sps:$4 sm:$0xff]  }
 0x194   : > { %v3208_v10 = vpop.f32.mrf.mxu0  ;;  %v3246_v3 = vadd.f32 %v3245_v2, %v5276_v11  ;;  %3540 = vmatpush1.bf16.msra.mxu1 %v4852_v60  ;;  %3571 = vmatprep.mubr.bf16.mxu1 %v4989_v1  ;;  %v4910_v60 = vld [vmem:[%s4999_s19 + $0x6c8] ss:$116 sps:$4 sm:$0xff]   ;;  %v4938_v2 = vld [vmem:[%s4999_s19 + $0x7ac] ss:$116 sps:$4 sm:$0xff]  }
 0x195   : > { %v3652_v56 = vcombine.low %v3205_v49, %v3207_v53  ;;  %3501 = vmatpush1.bf16.msra.mxu0 %v4819_v50  ;;  %v3247_v5 = vpop.f32.mrf.mxu1  ;;  %3541 = vmatprep.subr.bf16.mxu1 %v4860_v61  ;;  %v4891_v49 = vld [vmem:[%s4999_s19 + $0x970] ss:$116 sps:$4 sm:$0xff]   ;;  %v4899_v50 = vld [vmem:[%s4999_s19 + $0x88c] ss:$116 sps:$4 sm:$0xff]   ;;  %v4897_v53 = vld [vmem:[%s4999_s19 + $0x888] ss:$116 sps:$4 sm:$0xff]  }
 0x196   : > { %v3209_v58 = vpop.f32.mrf.mxu0  ;;  %3502 = vmatprep.subr.bf16.mxu0 %v4827_v52  ;;  %v3248_v8 = vadd.f32 %v3247_v5, %v5276_v11  ;;  %v4923_v52 = vld [vmem:[%s4999_s19 + $0xa64] ss:$116 sps:$4 sm:$0xff]   ;;  %v4921_v10 = vld [vmem:[%s4999_s19 + $0xa60] ss:$116 sps:$4 sm:$0xff]  }
 0x197   : > { %3680 = vst [vmem:[%s5292_s27 + $0x20] sm:$0x77] %v3652_v56  ;;  %v3249_v12 = vpop.f32.mrf.mxu1  ;;  %v4903_v56 = vld [vmem:[%s4999_s19 + $0x7a0] ss:$116 sps:$4 sm:$0xff]   ;;  %v4926_v58 = vld [vmem:[%s4999_s19 + $0x978] ss:$116 sps:$4 sm:$0xff]  }
 0x198   : > { %v3653_v13 = vcombine.low %v3246_v3, %v3248_v8  ;;  %3542 = vmatpush1.bf16.msra.mxu1 %v4858_v4  ;;  %v4914_v61 = vld [vmem:[%s4999_s19 + $0xd20] ss:$116 sps:$4 sm:$0xff]   ;;  %v4936_v8 = vld [vmem:[%s4999_s19 + $0x7a8] ss:$116 sps:$4 sm:$0xff]  }
 0x199   : > { %3503 = vmatpush1.bf16.msra.mxu0 %v4825_v57  ;;  %v3250_v15 = vpop.f32.mrf.mxu1  ;;  %3543 = vmatprep.subr.bf16.mxu1 %v4866_v6  ;;  %v4909_v57 = vld [vmem:[%s4999_s19 + $0xe08] ss:$116 sps:$4 sm:$0xff]   ;;  %v4915_v4 = vld [vmem:[%s4999_s19 + $0x5e0] ss:$116 sps:$4 sm:$0xff]   ;;  %v4919_v6 = vld [vmem:[%s4999_s19 + $0xc38] ss:$116 sps:$4 sm:$0xff]  }
 0x19a   : > { %3504 = vmatprep.subr.bf16.mxu0 %v4833_v59  ;;  %3681 = vst [vmem:[%s5292_s27 + $0x28] sm:$0x77] %v3653_v13  ;;  %v4933_v59 = vld [vmem:[%s4999_s19 + $0x894] ss:$116 sps:$4 sm:$0xff]   ;;  %v4920_v13 = vld [vmem:[%s4999_s19 + $0x4f8] ss:$116 sps:$4 sm:$0xff]  }
 0x19b   : > { %v4924_v15 = vld [vmem:[%s4999_s19 + $0xb50] ss:$116 sps:$4 sm:$0xff]  }
 0x19c   : > { %3544 = vmatpush1.bf16.msra.mxu1 %v4864_v14 }
 0x19d   : > { %3505 = vmatpush1.bf16.msra.mxu0 %v4831_v62  ;;  %3545 = vmatprep.subr.bf16.mxu1 %v4872_v16  ;;  %v4931_v62 = vld [vmem:[%s4999_s19 + $0x890] ss:$116 sps:$4 sm:$0xff]   ;;  %v4929_v16 = vld [vmem:[%s4999_s19 + $0xa68] ss:$116 sps:$4 sm:$0xff]  }
 0x19e   : > { %3506 = vmatprep.subr.bf16.mxu0 %v4839_v63 }
 0x1a0   : > { %3546 = vmatpush1.bf16.msra.mxu1 %v4870_v19 }
 0x1a1   : > { %3507 = vmatpush1.bf16.msra.mxu0 %v4837_v7  ;;  %3547 = vmatprep.subr.bf16.mxu1 %v4878_v20  ;;  %v4930_v20 = vld [vmem:[%s4999_s19 + $0x328] ss:$116 sps:$4 sm:$0xff]  }
 0x1a2   : > { %3508 = vmatprep.subr.bf16.mxu0 %v4845_v9 }
 0x1a4   : > { %3548 = vmatpush1.bf16.msra.mxu1 %v4876_v23 }
 0x1a5   : > { %3509 = vmatpush1.bf16.msra.mxu0 %v4843_v17  ;;  %3549 = vmatprep.subr.bf16.mxu1 %v4884_v24 }
 0x1a6   : > { %3510 = vmatprep.subr.bf16.mxu0 %v4851_v18 }
 0x1a8   : > { %3550 = vmatpush1.bf16.msra.mxu1 %v4882_v26  ;;  %v4939_v26 = vld [vmem:[%s4999_s19 + $0x898] ss:$116 sps:$4 sm:$0xff]  }
 0x1a9   : > { %3511 = vmatpush1.bf16.msra.mxu0 %v4849_v21  ;;  %3551 = vmatprep.subr.bf16.mxu1 %v4890_v27  ;;  %v4940_v27 = vld [vmem:[%s4999_s19 + $0x158] ss:$116 sps:$4 sm:$0xff]  }
 0x1aa   : > { %3512 = vmatprep.subr.bf16.mxu0 %v4857_v22  ;;  %v4934_v22 = vld [vmem:[%s4999_s19 + $0x980] ss:$116 sps:$4 sm:$0xff]  }
 0x1ac   : > { %3552 = vmatpush1.bf16.msra.mxu1 %v4888_v30 }
 0x1ad   : > { %3513 = vmatpush1.bf16.msra.mxu0 %v4855_v0  ;;  %3553 = vmatprep.subr.bf16.mxu1 %v4896_v31 }
 0x1ae   : > { %3514 = vmatprep.subr.bf16.mxu0 %v4863_v25  ;;  %v4935_v25 = vld [vmem:[%s4999_s19 + $0x240] ss:$116 sps:$4 sm:$0xff]  }
 0x1b0   : > { %3554 = vmatpush1.bf16.msra.mxu1 %v4894_v34 }
 0x1b1   : > { %3515 = vmatpush2.bf16.msra.mxu0 %v4861_v28  ;;  %3555 = vmatprep.subr.bf16.mxu1 %v4902_v35  ;;  %v4941_v28 = vld [vmem:[%s4999_s19 + $0x7b0] ss:$116 sps:$4 sm:$0xff]  }
 0x1b2   : > { %3516 = vmatprep.subr.bf16.mxu0 %v4869_v29  ;;  %v4942_v29 = vld [vmem:[%s4999_s19 + $0x70] ss:$116 sps:$4 sm:$0xff]  }
 0x1b4   : > { %3556 = vmatpush2.bf16.msra.mxu1 %v4900_v38 }
 0x1b5   : > { %3517 = vmatpush2.bf16.msra.mxu0 %v4867_v32  ;;  %3557 = vmatprep.subr.bf16.mxu1 %v4908_v39 }
 0x1b6   : > { %3518 = vmatprep.subr.bf16.mxu0 %v4875_v33 }
 0x1b8   : > { %3558 = vmatpush2.bf16.msra.mxu1 %v4906_v42 }
 0x1b9   : > { %3519 = vmatpush2.bf16.msra.mxu0 %v4873_v36  ;;  %3559 = vmatprep.subr.bf16.mxu1 %v4913_v43 }
 0x1ba   : > { %3520 = vmatprep.subr.bf16.mxu0 %v4881_v37 }
 0x1bc   : > { %3560 = vmatpush2.bf16.msra.mxu1 %v4911_v46 }
 0x1bd   : > { %3521 = vmatpush2.bf16.msra.mxu0 %v4879_v40  ;;  %3561 = vmatprep.subr.bf16.mxu1 %v4918_v48 }
 0x1be   : > { %3522 = vmatprep.subr.bf16.mxu0 %v4887_v41 }
 0x1c0   : > { %3562 = vmatpush2.bf16.msra.mxu1 %v4916_v51 }
 0x1c1   : > { %3523 = vmatpush2.bf16.msra.mxu0 %v4885_v44  ;;  %3563 = vmatprep.subr.bf16.mxu1 %v4923_v52 }
 0x1c2   : > { %3524 = vmatprep.subr.bf16.mxu0 %v4893_v45 }
 0x1c4   : > { %3564 = vmatpush2.bf16.msra.mxu1 %v4921_v10 }
 0x1c5   : > { %3525 = vmatpush2.bf16.msra.mxu0 %v4891_v49  ;;  %3565 = vmatprep.subr.bf16.mxu1 %v4928_v55 }
 0x1c6   : > { %3526 = vmatprep.subr.bf16.mxu0 %v4899_v50 }
 0x1c8   : > { %3566 = vmatpush2.bf16.msra.mxu1 %v4926_v58 }
 0x1c9   : > { %3527 = vmatpush2.bf16.msra.mxu0 %v4897_v53  ;;  %3567 = vmatprep.subr.bf16.mxu1 %v4933_v59 }
 0x1ca   : > { %3528 = vmatprep.subr.bf16.mxu0 %v4905_v54 }
 0x1cc   : > { %3568 = vmatpush2.bf16.msra.mxu1 %v4931_v62 }
 0x1cd   : > { %3529 = vmatpush2.bf16.msra.mxu0 %v4903_v56  ;;  %3569 = vmatprep.subr.bf16.mxu1 %v4938_v2 }
 0x1ce   : > { %4221 = vmatprep.subr.bf16.mxu0 %v4909_v57 }
 0x1d0   : > { %v3286_v63 = vpop.f32.mrf.mxu0  ;;  %3531 = vmatmul.mubr.bf16.vlgmr.msra.gmra.mxu0 %v5437_v47  ;;  %3570 = vmatpush2.bf16.msra.mxu1 %v4936_v8 }
 0x1d1   : > { %v3287_v3 = vadd.f32 %v3286_v63, %v5276_v11  ;;  %4222 = vmatpush3.bf16.msra.mxu0 %v4910_v60  ;;  %3612 = vmatprep.mubr.bf16.mxu0 %v4989_v1  ;;  %v4925_v1 = vld [vmem:[%s4999_s19 + $0x410] ss:$116 sps:$4 sm:$0xff]  }
 0x1d2   : > { %v3288_v5 = vpop.f32.mrf.mxu0  ;;  %4223 = vmatprep.subr.bf16.mxu0 %v4914_v61 }
 0x1d3   : > { %v3289_v7 = vadd.f32 %v3288_v5, %v5276_v11  ;;  %3572 = vmatmul.mubr.bf16.vlgmr.msra.gmra.mxu1 %v5437_v47  ;;  %v3327_v17 = vpop.f32.mrf.mxu1 }
 0x1d4   : > { %v3290_v9 = vpop.f32.mrf.mxu0  ;;  %v3328_v18 = vadd.f32 %v3327_v17, %v5276_v11 }
 0x1d5   : > { %v3654_v12 = vcombine.low %v3287_v3, %v3289_v7  ;;  %4224 = vmatpush3.bf16.msra.mxu0 %v4915_v4  ;;  %v3329_v19 = vpop.f32.mrf.mxu1 }
 0x1d6   : > { %v3291_v14 = vpop.f32.mrf.mxu0  ;;  %4225 = vmatprep.subr.bf16.mxu0 %v4919_v6  ;;  %v3330_v21 = vadd.f32 %v3329_v19, %v5276_v11 }
 0x1d7   : > { %3682 = vst [vmem:[%s5292_s27 + $0x30] sm:$0x77] %v3654_v12  ;;  %v3331_v23 = vpop.f32.mrf.mxu1 }
 0x1d8   : > { %v3655_v24 = vcombine.low %v3328_v18, %v3330_v21 }
 0x1d9   : > { %4226 = vmatpush3.bf16.msra.mxu0 %v4920_v13  ;;  %v3332_v0 = vpop.f32.mrf.mxu1 }
 0x1da   : > { %4227 = vmatprep.subr.bf16.mxu0 %v4924_v15  ;;  %3683 = vst [vmem:[%s5292_s27 + $0x38] sm:$0x77] %v3655_v24 }
 0x1dd   : > { %4228 = vmatpush3.bf16.msra.mxu0 %v4925_v1 }
 0x1de   : > { %4229 = vmatprep.subr.bf16.mxu0 %v4929_v16 }
 0x1e1   : > { %4230 = vmatpush3.bf16.msra.mxu0 %v4930_v20 }
 0x1e2   : > { %4231 = vmatprep.subr.bf16.mxu0 %v4934_v22 }
 0x1e5   : > { %4232 = vmatpush3.bf16.msra.mxu0 %v4935_v25 }
 0x1e6   : > { %4233 = vmatprep.subr.bf16.mxu0 %v4939_v26 }
 0x1e9   : > { %4234 = vmatpush3.bf16.msra.mxu0 %v4940_v27 }
 0x1ea   : > { %4235 = vmatprep.subr.bf16.mxu0 %v4941_v28 }
 0x1ed   : > { %4236 = vmatpush3.bf16.msra.mxu0 %v4942_v29 }
 0x1f0   : > { %3613 = vmatmul.mubr.bf16.vlgmr.msra.gmra.mxu0 %v5437_v47 }
 0x210   : > { %v3368_v30 = vpop.f32.mrf.mxu0 }
 0x211   : > { %v3369_v31 = vadd.f32 %v3368_v30, %v5276_v11 }
 0x212   : > { %v3370_v32 = vpop.f32.mrf.mxu0 }
 0x213   : > { %v3371_v33 = vadd.f32 %v3370_v32, %v5276_v11  ;;  %v3409_v37 = vpop.f32.mrf.mxu1 }
 0x214   : > { %v3372_v34 = vpop.f32.mrf.mxu0  ;;  %v3410_v38 = vadd.f32 %v3409_v37, %v5276_v11 }
 0x215   : > { %v3656_v35 = vcombine.low %v3369_v31, %v3371_v33  ;;  %v3411_v39 = vpop.f32.mrf.mxu1 }
 0x216   : > { %v3373_v36 = vpop.f32.mrf.mxu0  ;;  %v3412_v40 = vadd.f32 %v3411_v39, %v5276_v11 }
 0x217   : > { %3684 = vst [vmem:[%s5292_s27 + $0x40] sm:$0x77] %v3656_v35  ;;  %v3413_v41 = vpop.f32.mrf.mxu1 }
 0x218   : > { %v3657_v47 = vcombine.low %v3410_v38, %v3412_v40 }
 0x219   : > { %v3414_v42 = vpop.f32.mrf.mxu1 }
 0x21a   : > { %3685 = vst [vmem:[%s5292_s27 + $0x48] sm:$0x77] %v3657_v47 }
 0x250   : > { %v3450_v43 = vpop.f32.mrf.mxu0 }
 0x251   : > { %v3451_v44 = vadd.f32 %v3450_v43, %v5276_v11 }
 0x252   : > { %v3452_v45 = vpop.f32.mrf.mxu0 }
 0x253   : > { %v3453_v46 = vadd.f32 %v3452_v45, %v5276_v11  ;;  %v3491_v51 = vpop.f32.mrf.mxu1 }
 0x254   : > { %v3454_v48 = vpop.f32.mrf.mxu0  ;;  %v3492_v52 = vadd.f32 %v3491_v51, %v5276_v11 }
 0x255   : > { %v3658_v49 = vcombine.low %v3451_v44, %v3453_v46  ;;  %v3493_v53 = vpop.f32.mrf.mxu1 }
 0x256   : > { %v3455_v50 = vpop.f32.mrf.mxu0  ;;  %v3494_v54 = vadd.f32 %v3493_v53, %v5276_v11 }
 0x257   : > { %3686 = vst [vmem:[%s5292_s27 + $0x50] sm:$0x77] %v3658_v49  ;;  %v3495_v10 = vpop.f32.mrf.mxu1 }
 0x258   : > { %v3659_v55 = vcombine.low %v3492_v52, %v3494_v54 }
 0x259   : > { %v3496_v56 = vpop.f32.mrf.mxu1 }
 0x25a   : > { %3687 = vst [vmem:[%s5292_s27 + $0x58] sm:$0x77] %v3659_v55 }
 0x290   : > { %v3532_v57 = vpop.f32.mrf.mxu0 }
 0x291   : > { %v3533_v58 = vadd.f32 %v3532_v57, %v5276_v11 }
 0x292   : > { %v3534_v59 = vpop.f32.mrf.mxu0 }
 0x293   : > { %v3535_v60 = vadd.f32 %v3534_v59, %v5276_v11  ;;  %v3573_v2 = vpop.f32.mrf.mxu1 }
 0x294   : > { %v3536_v61 = vpop.f32.mrf.mxu0  ;;  %v3574_v3 = vadd.f32 %v3573_v2, %v5276_v11 }
 0x295   : > { %v3660_v62 = vcombine.low %v3533_v58, %v3535_v60  ;;  %v3575_v4 = vpop.f32.mrf.mxu1 }
 0x296   : > { %v3537_v63 = vpop.f32.mrf.mxu0  ;;  %v3576_v5 = vadd.f32 %v3575_v4, %v5276_v11 }
 0x297   : > { %3688 = vst [vmem:[%s5292_s27 + $0x60] sm:$0x77] %v3660_v62  ;;  %v3577_v6 = vpop.f32.mrf.mxu1 }
 0x298   : > { %v3661_v7 = vcombine.low %v3574_v3, %v3576_v5 }
 0x299   : > { %v3578_v8 = vpop.f32.mrf.mxu1 }
 0x29a   : > { %3689 = vst [vmem:[%s5292_s27 + $0x68] sm:$0x77] %v3661_v7 }
 0x2b0   : > { %v4237_v9 = vpop.f32.mrf.mxu0 }
 0x2b2   : > { %v4238_v12 = vpop.f32.mrf.mxu0 }
 0x2b3   : > { %v4239_v13 = vadd.f32 %v4238_v12, %v4237_v9 }
 0x2b4   : > { %v4240_v14 = vpop.f32.mrf.mxu0 }
 0x2b5   : > { %v3615_v15 = vadd.f32 %v4239_v13, %v5276_v11 }
 0x2b6   : > { %v4241_v1 = vpop.f32.mrf.mxu0 }
 0x2b7   : > { %3691 = vst.msk [vmem:[%s5292_s27 + $0x70] sm:$0x7] %vm3690_vm0, %v3615_v15 }
 0x2b8 PF: > { %s13_s12 = sadd.s32 1, %s4951_s12  }
 0x2b9   : > { %p10_p4 = scmp.ge.s32.totalorder %s13_s12, 4  }
 0x2bb   :  { %12 = sbr.rel (!%p10_p4) target bundleno = 1 (0x1), region = 62 }

</bundles_post_ra>
